<compile_context>
chip_gen: v7x
topology: tpu7x:2x2x1
jax: 0.10.0
libtpu: 0.0.40
codegen_flags: <defaults>
</compile_context>

<pallas_src>
import jax
import jax.numpy as jnp
from jax.experimental import pallas as pl
from jax.experimental.pallas import tpu as pltpu


O_PAD = 128  # lane-dense kernel output width; logits live in the first O columns


def lstm2_bidir_kernel(x_ref, w1_ref, b1_ref, whh1_ref,
                       w2f_ref, w2b_ref, b2_ref, whh2_ref,
                       wlin_bwd_ref, wlin_fwd_ref, blin_ref,
                       out_ref, l1_ref):
    """2-layer bidirectional LSTM + linear head, fully VMEM-resident.

    x_ref:        (T*B, E)     bf16  embedded tokens (time-major, flattened)
    w1_ref:       (E, 8H)      bf16  layer-1 input weights [fwd i,f,g,o | bwd i,f,g,o]
    b1_ref:       (1, 8H)      f32   layer-1 folded biases (b_ih + b_hh)
    whh1_ref:     (2, 4, H, H) bf16  layer-1 recurrent weights [dir, gate]
    w2f_ref:      (H, 8H)      bf16  layer-2 input weights acting on the fwd half of its input
    w2b_ref:      (H, 8H)      bf16  ... acting on the bwd half
    b2_ref:       (1, 8H)      f32   layer-2 folded biases
    whh2_ref:     (2, 4, H, H) bf16  layer-2 recurrent weights
    wlin_bwd_ref: (H, O_PAD)   bf16  linear block applied to h_n[-1] (layer-2 backward)
    wlin_fwd_ref: (H, O_PAD)   bf16  linear block applied to h_n[-2] (layer-2 forward)
    blin_ref:     (1, O_PAD)   f32
    out_ref:      (B, O_PAD)   f32   logits in [:, :O]
    l1_ref:       (2, T*B, H)  f32   scratch: layer-1 per-timestep outputs [dir, time*B, H]
    """
    TB = x_ref.shape[0]
    B = out_ref.shape[0]
    H = whh1_ref.shape[-1]
    T = TB // B
    f32, bf16 = jnp.float32, jnp.bfloat16

    def dot32(a, b):
        return jnp.dot(a, b, preferred_element_type=f32)

    def split_gates(gi_all):
        # (T*B, 8H) -> [dir][gate] of (T*B, H); one-time lane split, outside the loops.
        return [[gi_all[:, (4 * d + g) * H:(4 * d + g + 1) * H] for g in range(4)]
                for d in range(2)]

    def load_whh(whh_ref):
        # [dir][gate] -> (H, H) bf16 values, loaded once (static indices).
        return [[whh_ref[d, g] for g in range(4)] for d in range(2)]

    def lstm_step(gi_d, t, h, c, whh_d):
        # One LSTM cell update; gi_d already holds x @ W_ih + b_ih + b_hh.
        hb = h.astype(bf16)
        r0 = t * B
        i = jax.nn.sigmoid(gi_d[0][r0:r0 + B] + dot32(hb, whh_d[0]))
        f = jax.nn.sigmoid(gi_d[1][r0:r0 + B] + dot32(hb, whh_d[1]))
        g = jnp.tanh(      gi_d[2][r0:r0 + B] + dot32(hb, whh_d[2]))
        o = jax.nn.sigmoid(gi_d[3][r0:r0 + B] + dot32(hb, whh_d[3]))
        c_new = f * c + i * g
        h_new = o * jnp.tanh(c_new)
        return h_new, c_new

    zero = jnp.zeros((B, H), f32)

    # ---------------- Layer 1: hoisted input projection + fused fwd/bwd recurrence
    gi1 = split_gates(dot32(x_ref[...], w1_ref[...]) + b1_ref[...])
    whh1 = load_whh(whh1_ref)

    h1f, c1f, h1b, c1b = zero, zero, zero, zero
    for t in range(T):                      # fully unrolled: T is small & static
        tb = T - 1 - t
        h1f, c1f = lstm_step(gi1[0], t, h1f, c1f, whh1[0])
        h1b, c1b = lstm_step(gi1[1], tb, h1b, c1b, whh1[1])
        l1_ref[0, t * B:(t + 1) * B, :] = h1f
        l1_ref[1, tb * B:(tb + 1) * B, :] = h1b

    # ---------------- Layer 2: input is [l1_fwd ; l1_bwd] per timestep.
    # Keep the halves separate (two matmuls + add) instead of a lane concat.
    x2f = l1_ref[0].astype(bf16)            # (T*B, H)
    x2b = l1_ref[1].astype(bf16)            # (T*B, H)
    gi2 = split_gates(dot32(x2f, w2f_ref[...]) + dot32(x2b, w2b_ref[...]) + b2_ref[...])
    whh2 = load_whh(whh2_ref)

    h2f, c2f, h2b, c2b = zero, zero, zero, zero
    for t in range(T):
        tb = T - 1 - t
        h2f, c2f = lstm_step(gi2[0], t, h2f, c2f, whh2[0])
        h2b, c2b = lstm_step(gi2[1], tb, h2b, c2b, whh2[1])

    # ---------------- Final linear: hidden = cat([h_n[-1], h_n[-2]]) = [l2 bwd, l2 fwd]
    out_ref[...] = (dot32(h2b.astype(bf16), wlin_bwd_ref[...])
                    + dot32(h2f.astype(bf16), wlin_fwd_ref[...])
                    + blin_ref[...])


def rnn_forward(text, params, kparams):
    """text: (T, B) int32 token ids -> logits (B, O). Gather + dropout(=id) stay in JAX."""
    emb = params["embedding"][text]                         # (T, B, E) f32
    T, B, E = emb.shape
    H = kparams["whh1"].shape[-1]
    O = params["w_lin"].shape[0]
    x2d = emb.reshape(T * B, E).astype(jnp.bfloat16)

    inputs = [x2d, kparams["w1"], kparams["b1"], kparams["whh1"],
              kparams["w2f"], kparams["w2b"], kparams["b2"], kparams["whh2"],
              kparams["wlin_bwd"], kparams["wlin_fwd"], kparams["blin"]]
    vmem = lambda: pl.BlockSpec(memory_space=pltpu.MemorySpace.VMEM)
    out = pl.pallas_call(
        lstm2_bidir_kernel,
        out_shape=jax.ShapeDtypeStruct((B, O_PAD), jnp.float32),
        in_specs=[vmem() for _ in inputs],
        out_specs=vmem(),
        scratch_shapes=[pltpu.VMEM((2, T * B, H), jnp.float32)],
    )(*inputs)
    return out[:, :O]


def init_params(key, vocab_size, E, H, O, pad_idx):
    """PyTorch-layout parameters (same shapes / init distributions as the nn.Module)."""
    keys = iter(jax.random.split(key, 20))
    k = 1.0 / (H ** 0.5)

    def u(shape, bound):
        return jax.random.uniform(next(keys), shape, jnp.float32, -bound, bound)

    emb = jax.random.normal(next(keys), (vocab_size, E), jnp.float32)
    emb = emb.at[pad_idx].set(0.0)                          # padding_idx row is zero
    p = {"embedding": emb}
    for layer, in_size in ((0, E), (1, 2 * H)):
        for sfx in ("", "_rev"):
            p[f"w_ih_l{layer}{sfx}"] = u((4 * H, in_size), k)   # gate order i, f, g, o
            p[f"w_hh_l{layer}{sfx}"] = u((4 * H, H), k)
            p[f"b_ih_l{layer}{sfx}"] = u((4 * H,), k)
            p[f"b_hh_l{layer}{sfx}"] = u((4 * H,), k)
    klin = 1.0 / ((2 * H) ** 0.5)
    p["w_lin"] = u((O, 2 * H), klin)
    p["b_lin"] = u((O,), klin)
    return p


def pack_kernel_params(p, H, O):
    """Repack PyTorch-layout params into the kernel's MXU-friendly layout."""
    bf16 = jnp.bfloat16

    # Layer 1: columns = [fwd i,f,g,o | bwd i,f,g,o]; biases folded (b_ih + b_hh).
    w1 = jnp.concatenate([p["w_ih_l0"].T, p["w_ih_l0_rev"].T], axis=1)          # (E, 8H)
    b1 = jnp.concatenate([p["b_ih_l0"] + p["b_hh_l0"],
                          p["b_ih_l0_rev"] + p["b_hh_l0_rev"]]).reshape(1, 8 * H)

    # Layer 2 input is cat(l1_fwd, l1_bwd); split its input weight by input half.
    w2f = jnp.concatenate([p["w_ih_l1"][:, :H].T, p["w_ih_l1_rev"][:, :H].T], axis=1)
    w2b = jnp.concatenate([p["w_ih_l1"][:, H:].T, p["w_ih_l1_rev"][:, H:].T], axis=1)
    b2 = jnp.concatenate([p["b_ih_l1"] + p["b_hh_l1"],
                          p["b_ih_l1_rev"] + p["b_hh_l1_rev"]]).reshape(1, 8 * H)

    def whh_stack(layer):
        per_dir = []
        for sfx in ("", "_rev"):
            w = p[f"w_hh_l{layer}{sfx}"]                                        # (4H, H)
            per_dir.append(jnp.stack([w[g * H:(g + 1) * H, :].T for g in range(4)]))
        return jnp.stack(per_dir)                                               # (2,4,H,H)

    # Final linear: input order is cat([h_n[-1] (l2 bwd), h_n[-2] (l2 fwd)]).
    wlin_T = p["w_lin"].T                                                       # (2H, O)
    pad_cols = lambda m: jnp.pad(m, ((0, 0), (0, O_PAD - m.shape[1])))
    return {
        "w1": w1.astype(bf16), "b1": b1, "whh1": whh_stack(0).astype(bf16),
        "w2f": w2f.astype(bf16), "w2b": w2b.astype(bf16), "b2": b2,
        "whh2": whh_stack(1).astype(bf16),
        "wlin_bwd": pad_cols(wlin_T[:H]).astype(bf16),
        "wlin_fwd": pad_cols(wlin_T[H:]).astype(bf16),
        "blin": jnp.pad(p["b_lin"], (0, O_PAD - O)).reshape(1, O_PAD),
    }


def reference_forward(text, p, H):
    """Pure-JAX f32 reference mirroring PyTorch LSTM semantics (eval mode)."""
    emb = p["embedding"][text]                              # (T, B, E)
    T, B, _ = emb.shape

    def cell(x_t, h, c, w_ih, w_hh, b_ih, b_hh):
        gates = x_t @ w_ih.T + b_ih + h @ w_hh.T + b_hh
        i = jax.nn.sigmoid(gates[:, 0 * H:1 * H])
        f = jax.nn.sigmoid(gates[:, 1 * H:2 * H])
        g = jnp.tanh(gates[:, 2 * H:3 * H])
        o = jax.nn.sigmoid(gates[:, 3 * H:4 * H])
        c = f * c + i * g
        return o * jnp.tanh(c), c

    def run_layer(x_seq, layer):
        hf = cf = hb = cb = jnp.zeros((B, H), jnp.float32)
        outs_f, outs_b = [], []
        for t in range(T):
            hf, cf = cell(x_seq[t], hf, cf, p[f"w_ih_l{layer}"], p[f"w_hh_l{layer}"],
                          p[f"b_ih_l{layer}"], p[f"b_hh_l{layer}"])
            outs_f.append(hf)
        for t in range(T - 1, -1, -1):
            hb, cb = cell(x_seq[t], hb, cb, p[f"w_ih_l{layer}_rev"], p[f"w_hh_l{layer}_rev"],
                          p[f"b_ih_l{layer}_rev"], p[f"b_hh_l{layer}_rev"])
            outs_b.append(hb)
        outs_b = outs_b[::-1]
        out_seq = jnp.stack([jnp.concatenate([outs_f[t], outs_b[t]], axis=1)
                             for t in range(T)])
        return out_seq, hf, hb

    seq1, _, _ = run_layer(emb, 0)
    _, h2f, h2b = run_layer(seq1, 1)
    hidden = jnp.concatenate([h2b, h2f], axis=1)            # cat([h_n[-1], h_n[-2]])
    return hidden @ p["w_lin"].T + p["b_lin"]


if __name__ == "__main__":
    vocab_size, embedding_size, output_size = 50, 32, 4
    pad_idx, hidden_size, dropout = 0, 32, 0.5              # dropout is identity (eval)
    T, B = 8, 2

    key = jax.random.PRNGKey(0)
    k_params, k_text = jax.random.split(key)
    params = init_params(k_params, vocab_size, embedding_size, hidden_size,
                         output_size, pad_idx)
    kparams = pack_kernel_params(params, hidden_size, output_size)
    text = jax.random.randint(k_text, (T, B), 0, vocab_size, dtype=jnp.int32)

    logits = jax.block_until_ready(rnn_forward(text, params, kparams))
    ref = reference_forward(text, params, hidden_size)

    assert logits.shape == (B, output_size)
    assert jnp.allclose(logits, ref, atol=3e-2, rtol=3e-2), (logits, ref)
    print("KERNEL_OK")
</pallas_src>

<mosaic_0001>
module attributes {stable_mosaic.version = 11 : i64} {
  func.func @lstm2_bidir_kernel(%arg0: memref<16x32xbf16, #tpu.memory_space<vmem>>, %arg1: memref<32x256xbf16, #tpu.memory_space<vmem>>, %arg2: memref<1x256xf32, #tpu.memory_space<vmem>>, %arg3: memref<2x4x32x32xbf16, #tpu.memory_space<vmem>>, %arg4: memref<32x256xbf16, #tpu.memory_space<vmem>>, %arg5: memref<32x256xbf16, #tpu.memory_space<vmem>>, %arg6: memref<1x256xf32, #tpu.memory_space<vmem>>, %arg7: memref<2x4x32x32xbf16, #tpu.memory_space<vmem>>, %arg8: memref<32x128xbf16, #tpu.memory_space<vmem>>, %arg9: memref<32x128xbf16, #tpu.memory_space<vmem>>, %arg10: memref<1x128xf32, #tpu.memory_space<vmem>>, %arg11: memref<2x128xf32, #tpu.memory_space<vmem>>, %arg12: memref<2x16x32xf32, #tpu.memory_space<vmem>>) attributes {dimension_semantics = [], scalar_prefetch = 0 : i64, scratch_operands = 1 : i64, tpu.core_type = #tpu.core_type<tc>} {
    %cst = arith.constant 0.000000e+00 : f32
    %0 = vector.broadcast %cst : f32 to vector<2x32xf32>
    %c0 = arith.constant 0 : index
    %c0_0 = arith.constant 0 : index
    %1 = vector.load %arg0[%c0, %c0_0] : memref<16x32xbf16, #tpu.memory_space<vmem>>, vector<16x32xbf16>
    %c0_1 = arith.constant 0 : index
    %c0_2 = arith.constant 0 : index
    %2 = vector.load %arg1[%c0_1, %c0_2] : memref<32x256xbf16, #tpu.memory_space<vmem>>, vector<32x256xbf16>
    %cst_3 = arith.constant dense<0.000000e+00> : vector<16x256xf32>
    %3 = tpu.matmul %1, %2, %cst_3 {dimension_numbers = #tpu.dot_dimension_numbers<[1], [0], [0], [1], [0, 0, 1, 1], [], []>} : vector<16x32xbf16>, vector<32x256xbf16>, vector<16x256xf32> -> vector<16x256xf32>
    %c0_4 = arith.constant 0 : index
    %c0_5 = arith.constant 0 : index
    %4 = vector.load %arg2[%c0_4, %c0_5] : memref<1x256xf32, #tpu.memory_space<vmem>>, vector<1x256xf32>
    %5 = vector.broadcast %4 : vector<1x256xf32> to vector<16x256xf32>
    %6 = arith.addf %3, %5 : vector<16x256xf32>
    %7 = vector.extract_strided_slice %6 {offsets = [0, 0], sizes = [16, 32], strides = [1, 1]} : vector<16x256xf32> to vector<16x32xf32>
    %8 = vector.extract_strided_slice %6 {offsets = [0, 32], sizes = [16, 32], strides = [1, 1]} : vector<16x256xf32> to vector<16x32xf32>
    %9 = vector.extract_strided_slice %6 {offsets = [0, 64], sizes = [16, 32], strides = [1, 1]} : vector<16x256xf32> to vector<16x32xf32>
    %10 = vector.extract_strided_slice %6 {offsets = [0, 96], sizes = [16, 32], strides = [1, 1]} : vector<16x256xf32> to vector<16x32xf32>
    %11 = vector.extract_strided_slice %6 {offsets = [0, 128], sizes = [16, 32], strides = [1, 1]} : vector<16x256xf32> to vector<16x32xf32>
    %12 = vector.extract_strided_slice %6 {offsets = [0, 160], sizes = [16, 32], strides = [1, 1]} : vector<16x256xf32> to vector<16x32xf32>
    %13 = vector.extract_strided_slice %6 {offsets = [0, 192], sizes = [16, 32], strides = [1, 1]} : vector<16x256xf32> to vector<16x32xf32>
    %14 = vector.extract_strided_slice %6 {offsets = [0, 224], sizes = [16, 32], strides = [1, 1]} : vector<16x256xf32> to vector<16x32xf32>
    %c0_6 = arith.constant 0 : index
    %c0_7 = arith.constant 0 : index
    %c0_8 = arith.constant 0 : index
    %c0_9 = arith.constant 0 : index
    %15 = vector.load %arg3[%c0_6, %c0_7, %c0_8, %c0_9] : memref<2x4x32x32xbf16, #tpu.memory_space<vmem>>, vector<1x1x32x32xbf16>
    %16 = vector.shape_cast %15 : vector<1x1x32x32xbf16> to vector<32x32xbf16>
    %c0_10 = arith.constant 0 : index
    %c1 = arith.constant 1 : index
    %c0_11 = arith.constant 0 : index
    %c0_12 = arith.constant 0 : index
    %17 = vector.load %arg3[%c0_10, %c1, %c0_11, %c0_12] : memref<2x4x32x32xbf16, #tpu.memory_space<vmem>>, vector<1x1x32x32xbf16>
    %18 = vector.shape_cast %17 : vector<1x1x32x32xbf16> to vector<32x32xbf16>
    %c0_13 = arith.constant 0 : index
    %c2 = arith.constant 2 : index
    %c0_14 = arith.constant 0 : index
    %c0_15 = arith.constant 0 : index
    %19 = vector.load %arg3[%c0_13, %c2, %c0_14, %c0_15] : memref<2x4x32x32xbf16, #tpu.memory_space<vmem>>, vector<1x1x32x32xbf16>
    %20 = vector.shape_cast %19 : vector<1x1x32x32xbf16> to vector<32x32xbf16>
    %c0_16 = arith.constant 0 : index
    %c3 = arith.constant 3 : index
    %c0_17 = arith.constant 0 : index
    %c0_18 = arith.constant 0 : index
    %21 = vector.load %arg3[%c0_16, %c3, %c0_17, %c0_18] : memref<2x4x32x32xbf16, #tpu.memory_space<vmem>>, vector<1x1x32x32xbf16>
    %22 = vector.shape_cast %21 : vector<1x1x32x32xbf16> to vector<32x32xbf16>
    %c1_19 = arith.constant 1 : index
    %c0_20 = arith.constant 0 : index
    %c0_21 = arith.constant 0 : index
    %c0_22 = arith.constant 0 : index
    %23 = vector.load %arg3[%c1_19, %c0_20, %c0_21, %c0_22] : memref<2x4x32x32xbf16, #tpu.memory_space<vmem>>, vector<1x1x32x32xbf16>
    %24 = vector.shape_cast %23 : vector<1x1x32x32xbf16> to vector<32x32xbf16>
    %c1_23 = arith.constant 1 : index
    %c1_24 = arith.constant 1 : index
    %c0_25 = arith.constant 0 : index
    %c0_26 = arith.constant 0 : index
    %25 = vector.load %arg3[%c1_23, %c1_24, %c0_25, %c0_26] : memref<2x4x32x32xbf16, #tpu.memory_space<vmem>>, vector<1x1x32x32xbf16>
    %26 = vector.shape_cast %25 : vector<1x1x32x32xbf16> to vector<32x32xbf16>
    %c1_27 = arith.constant 1 : index
    %c2_28 = arith.constant 2 : index
    %c0_29 = arith.constant 0 : index
    %c0_30 = arith.constant 0 : index
    %27 = vector.load %arg3[%c1_27, %c2_28, %c0_29, %c0_30] : memref<2x4x32x32xbf16, #tpu.memory_space<vmem>>, vector<1x1x32x32xbf16>
    %28 = vector.shape_cast %27 : vector<1x1x32x32xbf16> to vector<32x32xbf16>
    %c1_31 = arith.constant 1 : index
    %c3_32 = arith.constant 3 : index
    %c0_33 = arith.constant 0 : index
    %c0_34 = arith.constant 0 : index
    %29 = vector.load %arg3[%c1_31, %c3_32, %c0_33, %c0_34] : memref<2x4x32x32xbf16, #tpu.memory_space<vmem>>, vector<1x1x32x32xbf16>
    %30 = vector.shape_cast %29 : vector<1x1x32x32xbf16> to vector<32x32xbf16>
    %31 = arith.truncf %0 : vector<2x32xf32> to vector<2x32xbf16>
    %32 = vector.extract_strided_slice %7 {offsets = [0, 0], sizes = [2, 32], strides = [1, 1]} : vector<16x32xf32> to vector<2x32xf32>
    %cst_35 = arith.constant dense<0.000000e+00> : vector<2x32xf32>
    %33 = tpu.matmul %31, %16, %cst_35 {dimension_numbers = #tpu.dot_dimension_numbers<[1], [0], [0], [1], [0, 0, 1, 1], [], []>} : vector<2x32xbf16>, vector<32x32xbf16>, vector<2x32xf32> -> vector<2x32xf32>
    %34 = arith.addf %32, %33 : vector<2x32xf32>
    %35 = arith.negf %34 : vector<2x32xf32>
    %36 = math.exp %35 : vector<2x32xf32>
    %cst_36 = arith.constant 1.000000e+00 : f32
    %37 = vector.broadcast %cst_36 : f32 to vector<2x32xf32>
    %38 = arith.addf %37, %36 : vector<2x32xf32>
    %39 = arith.divf %37, %38 : vector<2x32xf32>
    %40 = vector.extract_strided_slice %8 {offsets = [0, 0], sizes = [2, 32], strides = [1, 1]} : vector<16x32xf32> to vector<2x32xf32>
    %cst_37 = arith.constant dense<0.000000e+00> : vector<2x32xf32>
    %41 = tpu.matmul %31, %18, %cst_37 {dimension_numbers = #tpu.dot_dimension_numbers<[1], [0], [0], [1], [0, 0, 1, 1], [], []>} : vector<2x32xbf16>, vector<32x32xbf16>, vector<2x32xf32> -> vector<2x32xf32>
    %42 = arith.addf %40, %41 : vector<2x32xf32>
    %43 = arith.negf %42 : vector<2x32xf32>
    %44 = math.exp %43 : vector<2x32xf32>
    %cst_38 = arith.constant 1.000000e+00 : f32
    %45 = vector.broadcast %cst_38 : f32 to vector<2x32xf32>
    %46 = arith.addf %45, %44 : vector<2x32xf32>
    %47 = arith.divf %45, %46 : vector<2x32xf32>
    %48 = vector.extract_strided_slice %9 {offsets = [0, 0], sizes = [2, 32], strides = [1, 1]} : vector<16x32xf32> to vector<2x32xf32>
    %cst_39 = arith.constant dense<0.000000e+00> : vector<2x32xf32>
    %49 = tpu.matmul %31, %20, %cst_39 {dimension_numbers = #tpu.dot_dimension_numbers<[1], [0], [0], [1], [0, 0, 1, 1], [], []>} : vector<2x32xbf16>, vector<32x32xbf16>, vector<2x32xf32> -> vector<2x32xf32>
    %50 = arith.addf %48, %49 : vector<2x32xf32>
    %51 = math.tanh %50 : vector<2x32xf32>
    %52 = vector.extract_strided_slice %10 {offsets = [0, 0], sizes = [2, 32], strides = [1, 1]} : vector<16x32xf32> to vector<2x32xf32>
    %cst_40 = arith.constant dense<0.000000e+00> : vector<2x32xf32>
    %53 = tpu.matmul %31, %22, %cst_40 {dimension_numbers = #tpu.dot_dimension_numbers<[1], [0], [0], [1], [0, 0, 1, 1], [], []>} : vector<2x32xbf16>, vector<32x32xbf16>, vector<2x32xf32> -> vector<2x32xf32>
    %54 = arith.addf %52, %53 : vector<2x32xf32>
    %55 = arith.negf %54 : vector<2x32xf32>
    %56 = math.exp %55 : vector<2x32xf32>
    %cst_41 = arith.constant 1.000000e+00 : f32
    %57 = vector.broadcast %cst_41 : f32 to vector<2x32xf32>
    %58 = arith.addf %57, %56 : vector<2x32xf32>
    %59 = arith.divf %57, %58 : vector<2x32xf32>
    %60 = arith.mulf %47, %0 : vector<2x32xf32>
    %61 = arith.mulf %39, %51 : vector<2x32xf32>
    %62 = arith.addf %60, %61 : vector<2x32xf32>
    %63 = math.tanh %62 : vector<2x32xf32>
    %64 = arith.mulf %59, %63 : vector<2x32xf32>
    %65 = arith.truncf %0 : vector<2x32xf32> to vector<2x32xbf16>
    %66 = vector.extract_strided_slice %11 {offsets = [14, 0], sizes = [2, 32], strides = [1, 1]} : vector<16x32xf32> to vector<2x32xf32>
    %cst_42 = arith.constant dense<0.000000e+00> : vector<2x32xf32>
    %67 = tpu.matmul %65, %24, %cst_42 {dimension_numbers = #tpu.dot_dimension_numbers<[1], [0], [0], [1], [0, 0, 1, 1], [], []>} : vector<2x32xbf16>, vector<32x32xbf16>, vector<2x32xf32> -> vector<2x32xf32>
    %68 = arith.addf %66, %67 : vector<2x32xf32>
    %69 = arith.negf %68 : vector<2x32xf32>
    %70 = math.exp %69 : vector<2x32xf32>
    %cst_43 = arith.constant 1.000000e+00 : f32
    %71 = vector.broadcast %cst_43 : f32 to vector<2x32xf32>
    %72 = arith.addf %71, %70 : vector<2x32xf32>
    %73 = arith.divf %71, %72 : vector<2x32xf32>
    %74 = vector.extract_strided_slice %12 {offsets = [14, 0], sizes = [2, 32], strides = [1, 1]} : vector<16x32xf32> to vector<2x32xf32>
    %cst_44 = arith.constant dense<0.000000e+00> : vector<2x32xf32>
    %75 = tpu.matmul %65, %26, %cst_44 {dimension_numbers = #tpu.dot_dimension_numbers<[1], [0], [0], [1], [0, 0, 1, 1], [], []>} : vector<2x32xbf16>, vector<32x32xbf16>, vector<2x32xf32> -> vector<2x32xf32>
    %76 = arith.addf %74, %75 : vector<2x32xf32>
    %77 = arith.negf %76 : vector<2x32xf32>
    %78 = math.exp %77 : vector<2x32xf32>
    %cst_45 = arith.constant 1.000000e+00 : f32
    %79 = vector.broadcast %cst_45 : f32 to vector<2x32xf32>
    %80 = arith.addf %79, %78 : vector<2x32xf32>
    %81 = arith.divf %79, %80 : vector<2x32xf32>
    %82 = vector.extract_strided_slice %13 {offsets = [14, 0], sizes = [2, 32], strides = [1, 1]} : vector<16x32xf32> to vector<2x32xf32>
    %cst_46 = arith.constant dense<0.000000e+00> : vector<2x32xf32>
    %83 = tpu.matmul %65, %28, %cst_46 {dimension_numbers = #tpu.dot_dimension_numbers<[1], [0], [0], [1], [0, 0, 1, 1], [], []>} : vector<2x32xbf16>, vector<32x32xbf16>, vector<2x32xf32> -> vector<2x32xf32>
    %84 = arith.addf %82, %83 : vector<2x32xf32>
    %85 = math.tanh %84 : vector<2x32xf32>
    %86 = vector.extract_strided_slice %14 {offsets = [14, 0], sizes = [2, 32], strides = [1, 1]} : vector<16x32xf32> to vector<2x32xf32>
    %cst_47 = arith.constant dense<0.000000e+00> : vector<2x32xf32>
    %87 = tpu.matmul %65, %30, %cst_47 {dimension_numbers = #tpu.dot_dimension_numbers<[1], [0], [0], [1], [0, 0, 1, 1], [], []>} : vector<2x32xbf16>, vector<32x32xbf16>, vector<2x32xf32> -> vector<2x32xf32>
    %88 = arith.addf %86, %87 : vector<2x32xf32>
    %89 = arith.negf %88 : vector<2x32xf32>
    %90 = math.exp %89 : vector<2x32xf32>
    %cst_48 = arith.constant 1.000000e+00 : f32
    %91 = vector.broadcast %cst_48 : f32 to vector<2x32xf32>
    %92 = arith.addf %91, %90 : vector<2x32xf32>
    %93 = arith.divf %91, %92 : vector<2x32xf32>
    %94 = arith.mulf %81, %0 : vector<2x32xf32>
    %95 = arith.mulf %73, %85 : vector<2x32xf32>
    %96 = arith.addf %94, %95 : vector<2x32xf32>
    %97 = math.tanh %96 : vector<2x32xf32>
    %98 = arith.mulf %93, %97 : vector<2x32xf32>
    %c0_49 = arith.constant 0 : index
    %c0_50 = arith.constant 0 : index
    %c0_51 = arith.constant 0 : index
    %99 = vector.load %arg12[%c0_49, %c0_50, %c0_51] : memref<2x16x32xf32, #tpu.memory_space<vmem>>, vector<1x2x32xf32>
    %100 = vector.shape_cast %99 : vector<1x2x32xf32> to vector<2x32xf32>
    %101 = vector.shape_cast %64 : vector<2x32xf32> to vector<1x2x32xf32>
    tpu.vector_store %arg12[%c0_49, %c0_50, %c0_51], %101 {strides = array<i32>} : memref<2x16x32xf32, #tpu.memory_space<vmem>>, vector<1x2x32xf32>,
    %c1_52 = arith.constant 1 : index
    %c14 = arith.constant 14 : index
    %c0_53 = arith.constant 0 : index
    %102 = vector.load %arg12[%c1_52, %c14, %c0_53] : memref<2x16x32xf32, #tpu.memory_space<vmem>>, vector<1x2x32xf32>
    %103 = vector.shape_cast %102 : vector<1x2x32xf32> to vector<2x32xf32>
    %104 = vector.shape_cast %98 : vector<2x32xf32> to vector<1x2x32xf32>
    tpu.vector_store %arg12[%c1_52, %c14, %c0_53], %104 {strides = array<i32>} : memref<2x16x32xf32, #tpu.memory_space<vmem>>, vector<1x2x32xf32>,
    %105 = arith.truncf %64 : vector<2x32xf32> to vector<2x32xbf16>
    %106 = vector.extract_strided_slice %7 {offsets = [2, 0], sizes = [2, 32], strides = [1, 1]} : vector<16x32xf32> to vector<2x32xf32>
    %cst_54 = arith.constant dense<0.000000e+00> : vector<2x32xf32>
    %107 = tpu.matmul %105, %16, %cst_54 {dimension_numbers = #tpu.dot_dimension_numbers<[1], [0], [0], [1], [0, 0, 1, 1], [], []>} : vector<2x32xbf16>, vector<32x32xbf16>, vector<2x32xf32> -> vector<2x32xf32>
    %108 = arith.addf %106, %107 : vector<2x32xf32>
    %109 = arith.negf %108 : vector<2x32xf32>
    %110 = math.exp %109 : vector<2x32xf32>
    %cst_55 = arith.constant 1.000000e+00 : f32
    %111 = vector.broadcast %cst_55 : f32 to vector<2x32xf32>
    %112 = arith.addf %111, %110 : vector<2x32xf32>
    %113 = arith.divf %111, %112 : vector<2x32xf32>
    %114 = vector.extract_strided_slice %8 {offsets = [2, 0], sizes = [2, 32], strides = [1, 1]} : vector<16x32xf32> to vector<2x32xf32>
    %cst_56 = arith.constant dense<0.000000e+00> : vector<2x32xf32>
    %115 = tpu.matmul %105, %18, %cst_56 {dimension_numbers = #tpu.dot_dimension_numbers<[1], [0], [0], [1], [0, 0, 1, 1], [], []>} : vector<2x32xbf16>, vector<32x32xbf16>, vector<2x32xf32> -> vector<2x32xf32>
    %116 = arith.addf %114, %115 : vector<2x32xf32>
    %117 = arith.negf %116 : vector<2x32xf32>
    %118 = math.exp %117 : vector<2x32xf32>
    %cst_57 = arith.constant 1.000000e+00 : f32
    %119 = vector.broadcast %cst_57 : f32 to vector<2x32xf32>
    %120 = arith.addf %119, %118 : vector<2x32xf32>
    %121 = arith.divf %119, %120 : vector<2x32xf32>
    %122 = vector.extract_strided_slice %9 {offsets = [2, 0], sizes = [2, 32], strides = [1, 1]} : vector<16x32xf32> to vector<2x32xf32>
    %cst_58 = arith.constant dense<0.000000e+00> : vector<2x32xf32>
    %123 = tpu.matmul %105, %20, %cst_58 {dimension_numbers = #tpu.dot_dimension_numbers<[1], [0], [0], [1], [0, 0, 1, 1], [], []>} : vector<2x32xbf16>, vector<32x32xbf16>, vector<2x32xf32> -> vector<2x32xf32>
    %124 = arith.addf %122, %123 : vector<2x32xf32>
    %125 = math.tanh %124 : vector<2x32xf32>
    %126 = vector.extract_strided_slice %10 {offsets = [2, 0], sizes = [2, 32], strides = [1, 1]} : vector<16x32xf32> to vector<2x32xf32>
    %cst_59 = arith.constant dense<0.000000e+00> : vector<2x32xf32>
    %127 = tpu.matmul %105, %22, %cst_59 {dimension_numbers = #tpu.dot_dimension_numbers<[1], [0], [0], [1], [0, 0, 1, 1], [], []>} : vector<2x32xbf16>, vector<32x32xbf16>, vector<2x32xf32> -> vector<2x32xf32>
    %128 = arith.addf %126, %127 : vector<2x32xf32>
    %129 = arith.negf %128 : vector<2x32xf32>
    %130 = math.exp %129 : vector<2x32xf32>
    %cst_60 = arith.constant 1.000000e+00 : f32
    %131 = vector.broadcast %cst_60 : f32 to vector<2x32xf32>
    %132 = arith.addf %131, %130 : vector<2x32xf32>
    %133 = arith.divf %131, %132 : vector<2x32xf32>
    %134 = arith.mulf %121, %62 : vector<2x32xf32>
    %135 = arith.mulf %113, %125 : vector<2x32xf32>
    %136 = arith.addf %134, %135 : vector<2x32xf32>
    %137 = math.tanh %136 : vector<2x32xf32>
    %138 = arith.mulf %133, %137 : vector<2x32xf32>
    %139 = arith.truncf %98 : vector<2x32xf32> to vector<2x32xbf16>
    %140 = vector.extract_strided_slice %11 {offsets = [12, 0], sizes = [2, 32], strides = [1, 1]} : vector<16x32xf32> to vector<2x32xf32>
    %cst_61 = arith.constant dense<0.000000e+00> : vector<2x32xf32>
    %141 = tpu.matmul %139, %24, %cst_61 {dimension_numbers = #tpu.dot_dimension_numbers<[1], [0], [0], [1], [0, 0, 1, 1], [], []>} : vector<2x32xbf16>, vector<32x32xbf16>, vector<2x32xf32> -> vector<2x32xf32>
    %142 = arith.addf %140, %141 : vector<2x32xf32>
    %143 = arith.negf %142 : vector<2x32xf32>
    %144 = math.exp %143 : vector<2x32xf32>
    %cst_62 = arith.constant 1.000000e+00 : f32
    %145 = vector.broadcast %cst_62 : f32 to vector<2x32xf32>
    %146 = arith.addf %145, %144 : vector<2x32xf32>
    %147 = arith.divf %145, %146 : vector<2x32xf32>
    %148 = vector.extract_strided_slice %12 {offsets = [12, 0], sizes = [2, 32], strides = [1, 1]} : vector<16x32xf32> to vector<2x32xf32>
    %cst_63 = arith.constant dense<0.000000e+00> : vector<2x32xf32>
    %149 = tpu.matmul %139, %26, %cst_63 {dimension_numbers = #tpu.dot_dimension_numbers<[1], [0], [0], [1], [0, 0, 1, 1], [], []>} : vector<2x32xbf16>, vector<32x32xbf16>, vector<2x32xf32> -> vector<2x32xf32>
    %150 = arith.addf %148, %149 : vector<2x32xf32>
    %151 = arith.negf %150 : vector<2x32xf32>
    %152 = math.exp %151 : vector<2x32xf32>
    %cst_64 = arith.constant 1.000000e+00 : f32
    %153 = vector.broadcast %cst_64 : f32 to vector<2x32xf32>
    %154 = arith.addf %153, %152 : vector<2x32xf32>
    %155 = arith.divf %153, %154 : vector<2x32xf32>
    %156 = vector.extract_strided_slice %13 {offsets = [12, 0], sizes = [2, 32], strides = [1, 1]} : vector<16x32xf32> to vector<2x32xf32>
    %cst_65 = arith.constant dense<0.000000e+00> : vector<2x32xf32>
    %157 = tpu.matmul %139, %28, %cst_65 {dimension_numbers = #tpu.dot_dimension_numbers<[1], [0], [0], [1], [0, 0, 1, 1], [], []>} : vector<2x32xbf16>, vector<32x32xbf16>, vector<2x32xf32> -> vector<2x32xf32>
    %158 = arith.addf %156, %157 : vector<2x32xf32>
    %159 = math.tanh %158 : vector<2x32xf32>
    %160 = vector.extract_strided_slice %14 {offsets = [12, 0], sizes = [2, 32], strides = [1, 1]} : vector<16x32xf32> to vector<2x32xf32>
    %cst_66 = arith.constant dense<0.000000e+00> : vector<2x32xf32>
    %161 = tpu.matmul %139, %30, %cst_66 {dimension_numbers = #tpu.dot_dimension_numbers<[1], [0], [0], [1], [0, 0, 1, 1], [], []>} : vector<2x32xbf16>, vector<32x32xbf16>, vector<2x32xf32> -> vector<2x32xf32>
    %162 = arith.addf %160, %161 : vector<2x32xf32>
    %163 = arith.negf %162 : vector<2x32xf32>
    %164 = math.exp %163 : vector<2x32xf32>
    %cst_67 = arith.constant 1.000000e+00 : f32
    %165 = vector.broadcast %cst_67 : f32 to vector<2x32xf32>
    %166 = arith.addf %165, %164 : vector<2x32xf32>
    %167 = arith.divf %165, %166 : vector<2x32xf32>
    %168 = arith.mulf %155, %96 : vector<2x32xf32>
    %169 = arith.mulf %147, %159 : vector<2x32xf32>
    %170 = arith.addf %168, %169 : vector<2x32xf32>
    %171 = math.tanh %170 : vector<2x32xf32>
    %172 = arith.mulf %167, %171 : vector<2x32xf32>
    %c0_68 = arith.constant 0 : index
    %c2_69 = arith.constant 2 : index
    %c0_70 = arith.constant 0 : index
    %173 = vector.load %arg12[%c0_68, %c2_69, %c0_70] : memref<2x16x32xf32, #tpu.memory_space<vmem>>, vector<1x2x32xf32>
    %174 = vector.shape_cast %173 : vector<1x2x32xf32> to vector<2x32xf32>
    %175 = vector.shape_cast %138 : vector<2x32xf32> to vector<1x2x32xf32>
    tpu.vector_store %arg12[%c0_68, %c2_69, %c0_70], %175 {strides = array<i32>} : memref<2x16x32xf32, #tpu.memory_space<vmem>>, vector<1x2x32xf32>,
    %c1_71 = arith.constant 1 : index
    %c12 = arith.constant 12 : index
    %c0_72 = arith.constant 0 : index
    %176 = vector.load %arg12[%c1_71, %c12, %c0_72] : memref<2x16x32xf32, #tpu.memory_space<vmem>>, vector<1x2x32xf32>
    %177 = vector.shape_cast %176 : vector<1x2x32xf32> to vector<2x32xf32>
    %178 = vector.shape_cast %172 : vector<2x32xf32> to vector<1x2x32xf32>
    tpu.vector_store %arg12[%c1_71, %c12, %c0_72], %178 {strides = array<i32>} : memref<2x16x32xf32, #tpu.memory_space<vmem>>, vector<1x2x32xf32>,
    %179 = arith.truncf %138 : vector<2x32xf32> to vector<2x32xbf16>
    %180 = vector.extract_strided_slice %7 {offsets = [4, 0], sizes = [2, 32], strides = [1, 1]} : vector<16x32xf32> to vector<2x32xf32>
    %cst_73 = arith.constant dense<0.000000e+00> : vector<2x32xf32>
    %181 = tpu.matmul %179, %16, %cst_73 {dimension_numbers = #tpu.dot_dimension_numbers<[1], [0], [0], [1], [0, 0, 1, 1], [], []>} : vector<2x32xbf16>, vector<32x32xbf16>, vector<2x32xf32> -> vector<2x32xf32>
    %182 = arith.addf %180, %181 : vector<2x32xf32>
    %183 = arith.negf %182 : vector<2x32xf32>
    %184 = math.exp %183 : vector<2x32xf32>
    %cst_74 = arith.constant 1.000000e+00 : f32
    %185 = vector.broadcast %cst_74 : f32 to vector<2x32xf32>
    %186 = arith.addf %185, %184 : vector<2x32xf32>
    %187 = arith.divf %185, %186 : vector<2x32xf32>
    %188 = vector.extract_strided_slice %8 {offsets = [4, 0], sizes = [2, 32], strides = [1, 1]} : vector<16x32xf32> to vector<2x32xf32>
    %cst_75 = arith.constant dense<0.000000e+00> : vector<2x32xf32>
    %189 = tpu.matmul %179, %18, %cst_75 {dimension_numbers = #tpu.dot_dimension_numbers<[1], [0], [0], [1], [0, 0, 1, 1], [], []>} : vector<2x32xbf16>, vector<32x32xbf16>, vector<2x32xf32> -> vector<2x32xf32>
    %190 = arith.addf %188, %189 : vector<2x32xf32>
    %191 = arith.negf %190 : vector<2x32xf32>
    %192 = math.exp %191 : vector<2x32xf32>
    %cst_76 = arith.constant 1.000000e+00 : f32
    %193 = vector.broadcast %cst_76 : f32 to vector<2x32xf32>
    %194 = arith.addf %193, %192 : vector<2x32xf32>
    %195 = arith.divf %193, %194 : vector<2x32xf32>
    %196 = vector.extract_strided_slice %9 {offsets = [4, 0], sizes = [2, 32], strides = [1, 1]} : vector<16x32xf32> to vector<2x32xf32>
    %cst_77 = arith.constant dense<0.000000e+00> : vector<2x32xf32>
    %197 = tpu.matmul %179, %20, %cst_77 {dimension_numbers = #tpu.dot_dimension_numbers<[1], [0], [0], [1], [0, 0, 1, 1], [], []>} : vector<2x32xbf16>, vector<32x32xbf16>, vector<2x32xf32> -> vector<2x32xf32>
    %198 = arith.addf %196, %197 : vector<2x32xf32>
    %199 = math.tanh %198 : vector<2x32xf32>
    %200 = vector.extract_strided_slice %10 {offsets = [4, 0], sizes = [2, 32], strides = [1, 1]} : vector<16x32xf32> to vector<2x32xf32>
    %cst_78 = arith.constant dense<0.000000e+00> : vector<2x32xf32>
    %201 = tpu.matmul %179, %22, %cst_78 {dimension_numbers = #tpu.dot_dimension_numbers<[1], [0], [0], [1], [0, 0, 1, 1], [], []>} : vector<2x32xbf16>, vector<32x32xbf16>, vector<2x32xf32> -> vector<2x32xf32>
    %202 = arith.addf %200, %201 : vector<2x32xf32>
    %203 = arith.negf %202 : vector<2x32xf32>
    %204 = math.exp %203 : vector<2x32xf32>
    %cst_79 = arith.constant 1.000000e+00 : f32
    %205 = vector.broadcast %cst_79 : f32 to vector<2x32xf32>
    %206 = arith.addf %205, %204 : vector<2x32xf32>
    %207 = arith.divf %205, %206 : vector<2x32xf32>
    %208 = arith.mulf %195, %136 : vector<2x32xf32>
    %209 = arith.mulf %187, %199 : vector<2x32xf32>
    %210 = arith.addf %208, %209 : vector<2x32xf32>
    %211 = math.tanh %210 : vector<2x32xf32>
    %212 = arith.mulf %207, %211 : vector<2x32xf32>
    %213 = arith.truncf %172 : vector<2x32xf32> to vector<2x32xbf16>
    %214 = vector.extract_strided_slice %11 {offsets = [10, 0], sizes = [2, 32], strides = [1, 1]} : vector<16x32xf32> to vector<2x32xf32>
    %cst_80 = arith.constant dense<0.000000e+00> : vector<2x32xf32>
    %215 = tpu.matmul %213, %24, %cst_80 {dimension_numbers = #tpu.dot_dimension_numbers<[1], [0], [0], [1], [0, 0, 1, 1], [], []>} : vector<2x32xbf16>, vector<32x32xbf16>, vector<2x32xf32> -> vector<2x32xf32>
    %216 = arith.addf %214, %215 : vector<2x32xf32>
    %217 = arith.negf %216 : vector<2x32xf32>
    %218 = math.exp %217 : vector<2x32xf32>
    %cst_81 = arith.constant 1.000000e+00 : f32
    %219 = vector.broadcast %cst_81 : f32 to vector<2x32xf32>
    %220 = arith.addf %219, %218 : vector<2x32xf32>
    %221 = arith.divf %219, %220 : vector<2x32xf32>
    %222 = vector.extract_strided_slice %12 {offsets = [10, 0], sizes = [2, 32], strides = [1, 1]} : vector<16x32xf32> to vector<2x32xf32>
    %cst_82 = arith.constant dense<0.000000e+00> : vector<2x32xf32>
    %223 = tpu.matmul %213, %26, %cst_82 {dimension_numbers = #tpu.dot_dimension_numbers<[1], [0], [0], [1], [0, 0, 1, 1], [], []>} : vector<2x32xbf16>, vector<32x32xbf16>, vector<2x32xf32> -> vector<2x32xf32>
    %224 = arith.addf %222, %223 : vector<2x32xf32>
    %225 = arith.negf %224 : vector<2x32xf32>
    %226 = math.exp %225 : vector<2x32xf32>
    %cst_83 = arith.constant 1.000000e+00 : f32
    %227 = vector.broadcast %cst_83 : f32 to vector<2x32xf32>
    %228 = arith.addf %227, %226 : vector<2x32xf32>
    %229 = arith.divf %227, %228 : vector<2x32xf32>
    %230 = vector.extract_strided_slice %13 {offsets = [10, 0], sizes = [2, 32], strides = [1, 1]} : vector<16x32xf32> to vector<2x32xf32>
    %cst_84 = arith.constant dense<0.000000e+00> : vector<2x32xf32>
    %231 = tpu.matmul %213, %28, %cst_84 {dimension_numbers = #tpu.dot_dimension_numbers<[1], [0], [0], [1], [0, 0, 1, 1], [], []>} : vector<2x32xbf16>, vector<32x32xbf16>, vector<2x32xf32> -> vector<2x32xf32>
    %232 = arith.addf %230, %231 : vector<2x32xf32>
    %233 = math.tanh %232 : vector<2x32xf32>
    %234 = vector.extract_strided_slice %14 {offsets = [10, 0], sizes = [2, 32], strides = [1, 1]} : vector<16x32xf32> to vector<2x32xf32>
    %cst_85 = arith.constant dense<0.000000e+00> : vector<2x32xf32>
    %235 = tpu.matmul %213, %30, %cst_85 {dimension_numbers = #tpu.dot_dimension_numbers<[1], [0], [0], [1], [0, 0, 1, 1], [], []>} : vector<2x32xbf16>, vector<32x32xbf16>, vector<2x32xf32> -> vector<2x32xf32>
    %236 = arith.addf %234, %235 : vector<2x32xf32>
    %237 = arith.negf %236 : vector<2x32xf32>
    %238 = math.exp %237 : vector<2x32xf32>
    %cst_86 = arith.constant 1.000000e+00 : f32
    %239 = vector.broadcast %cst_86 : f32 to vector<2x32xf32>
    %240 = arith.addf %239, %238 : vector<2x32xf32>
    %241 = arith.divf %239, %240 : vector<2x32xf32>
    %242 = arith.mulf %229, %170 : vector<2x32xf32>
    %243 = arith.mulf %221, %233 : vector<2x32xf32>
    %244 = arith.addf %242, %243 : vector<2x32xf32>
    %245 = math.tanh %244 : vector<2x32xf32>
    %246 = arith.mulf %241, %245 : vector<2x32xf32>
    %c0_87 = arith.constant 0 : index
    %c4 = arith.constant 4 : index
    %c0_88 = arith.constant 0 : index
    %247 = vector.load %arg12[%c0_87, %c4, %c0_88] : memref<2x16x32xf32, #tpu.memory_space<vmem>>, vector<1x2x32xf32>
    %248 = vector.shape_cast %247 : vector<1x2x32xf32> to vector<2x32xf32>
    %249 = vector.shape_cast %212 : vector<2x32xf32> to vector<1x2x32xf32>
    tpu.vector_store %arg12[%c0_87, %c4, %c0_88], %249 {strides = array<i32>} : memref<2x16x32xf32, #tpu.memory_space<vmem>>, vector<1x2x32xf32>,
    %c1_89 = arith.constant 1 : index
    %c10 = arith.constant 10 : index
    %c0_90 = arith.constant 0 : index
    %250 = vector.load %arg12[%c1_89, %c10, %c0_90] : memref<2x16x32xf32, #tpu.memory_space<vmem>>, vector<1x2x32xf32>
    %251 = vector.shape_cast %250 : vector<1x2x32xf32> to vector<2x32xf32>
    %252 = vector.shape_cast %246 : vector<2x32xf32> to vector<1x2x32xf32>
    tpu.vector_store %arg12[%c1_89, %c10, %c0_90], %252 {strides = array<i32>} : memref<2x16x32xf32, #tpu.memory_space<vmem>>, vector<1x2x32xf32>,
    %253 = arith.truncf %212 : vector<2x32xf32> to vector<2x32xbf16>
    %254 = vector.extract_strided_slice %7 {offsets = [6, 0], sizes = [2, 32], strides = [1, 1]} : vector<16x32xf32> to vector<2x32xf32>
    %cst_91 = arith.constant dense<0.000000e+00> : vector<2x32xf32>
    %255 = tpu.matmul %253, %16, %cst_91 {dimension_numbers = #tpu.dot_dimension_numbers<[1], [0], [0], [1], [0, 0, 1, 1], [], []>} : vector<2x32xbf16>, vector<32x32xbf16>, vector<2x32xf32> -> vector<2x32xf32>
    %256 = arith.addf %254, %255 : vector<2x32xf32>
    %257 = arith.negf %256 : vector<2x32xf32>
    %258 = math.exp %257 : vector<2x32xf32>
    %cst_92 = arith.constant 1.000000e+00 : f32
    %259 = vector.broadcast %cst_92 : f32 to vector<2x32xf32>
    %260 = arith.addf %259, %258 : vector<2x32xf32>
    %261 = arith.divf %259, %260 : vector<2x32xf32>
    %262 = vector.extract_strided_slice %8 {offsets = [6, 0], sizes = [2, 32], strides = [1, 1]} : vector<16x32xf32> to vector<2x32xf32>
    %cst_93 = arith.constant dense<0.000000e+00> : vector<2x32xf32>
    %263 = tpu.matmul %253, %18, %cst_93 {dimension_numbers = #tpu.dot_dimension_numbers<[1], [0], [0], [1], [0, 0, 1, 1], [], []>} : vector<2x32xbf16>, vector<32x32xbf16>, vector<2x32xf32> -> vector<2x32xf32>
    %264 = arith.addf %262, %263 : vector<2x32xf32>
    %265 = arith.negf %264 : vector<2x32xf32>
    %266 = math.exp %265 : vector<2x32xf32>
    %cst_94 = arith.constant 1.000000e+00 : f32
    %267 = vector.broadcast %cst_94 : f32 to vector<2x32xf32>
    %268 = arith.addf %267, %266 : vector<2x32xf32>
    %269 = arith.divf %267, %268 : vector<2x32xf32>
    %270 = vector.extract_strided_slice %9 {offsets = [6, 0], sizes = [2, 32], strides = [1, 1]} : vector<16x32xf32> to vector<2x32xf32>
    %cst_95 = arith.constant dense<0.000000e+00> : vector<2x32xf32>
    %271 = tpu.matmul %253, %20, %cst_95 {dimension_numbers = #tpu.dot_dimension_numbers<[1], [0], [0], [1], [0, 0, 1, 1], [], []>} : vector<2x32xbf16>, vector<32x32xbf16>, vector<2x32xf32> -> vector<2x32xf32>
    %272 = arith.addf %270, %271 : vector<2x32xf32>
    %273 = math.tanh %272 : vector<2x32xf32>
    %274 = vector.extract_strided_slice %10 {offsets = [6, 0], sizes = [2, 32], strides = [1, 1]} : vector<16x32xf32> to vector<2x32xf32>
    %cst_96 = arith.constant dense<0.000000e+00> : vector<2x32xf32>
    %275 = tpu.matmul %253, %22, %cst_96 {dimension_numbers = #tpu.dot_dimension_numbers<[1], [0], [0], [1], [0, 0, 1, 1], [], []>} : vector<2x32xbf16>, vector<32x32xbf16>, vector<2x32xf32> -> vector<2x32xf32>
    %276 = arith.addf %274, %275 : vector<2x32xf32>
    %277 = arith.negf %276 : vector<2x32xf32>
    %278 = math.exp %277 : vector<2x32xf32>
    %cst_97 = arith.constant 1.000000e+00 : f32
    %279 = vector.broadcast %cst_97 : f32 to vector<2x32xf32>
    %280 = arith.addf %279, %278 : vector<2x32xf32>
    %281 = arith.divf %279, %280 : vector<2x32xf32>
    %282 = arith.mulf %269, %210 : vector<2x32xf32>
    %283 = arith.mulf %261, %273 : vector<2x32xf32>
    %284 = arith.addf %282, %283 : vector<2x32xf32>
    %285 = math.tanh %284 : vector<2x32xf32>
    %286 = arith.mulf %281, %285 : vector<2x32xf32>
    %287 = arith.truncf %246 : vector<2x32xf32> to vector<2x32xbf16>
    %288 = vector.extract_strided_slice %11 {offsets = [8, 0], sizes = [2, 32], strides = [1, 1]} : vector<16x32xf32> to vector<2x32xf32>
    %cst_98 = arith.constant dense<0.000000e+00> : vector<2x32xf32>
    %289 = tpu.matmul %287, %24, %cst_98 {dimension_numbers = #tpu.dot_dimension_numbers<[1], [0], [0], [1], [0, 0, 1, 1], [], []>} : vector<2x32xbf16>, vector<32x32xbf16>, vector<2x32xf32> -> vector<2x32xf32>
    %290 = arith.addf %288, %289 : vector<2x32xf32>
    %291 = arith.negf %290 : vector<2x32xf32>
    %292 = math.exp %291 : vector<2x32xf32>
    %cst_99 = arith.constant 1.000000e+00 : f32
    %293 = vector.broadcast %cst_99 : f32 to vector<2x32xf32>
    %294 = arith.addf %293, %292 : vector<2x32xf32>
    %295 = arith.divf %293, %294 : vector<2x32xf32>
    %296 = vector.extract_strided_slice %12 {offsets = [8, 0], sizes = [2, 32], strides = [1, 1]} : vector<16x32xf32> to vector<2x32xf32>
    %cst_100 = arith.constant dense<0.000000e+00> : vector<2x32xf32>
    %297 = tpu.matmul %287, %26, %cst_100 {dimension_numbers = #tpu.dot_dimension_numbers<[1], [0], [0], [1], [0, 0, 1, 1], [], []>} : vector<2x32xbf16>, vector<32x32xbf16>, vector<2x32xf32> -> vector<2x32xf32>
    %298 = arith.addf %296, %297 : vector<2x32xf32>
    %299 = arith.negf %298 : vector<2x32xf32>
    %300 = math.exp %299 : vector<2x32xf32>
    %cst_101 = arith.constant 1.000000e+00 : f32
    %301 = vector.broadcast %cst_101 : f32 to vector<2x32xf32>
    %302 = arith.addf %301, %300 : vector<2x32xf32>
    %303 = arith.divf %301, %302 : vector<2x32xf32>
    %304 = vector.extract_strided_slice %13 {offsets = [8, 0], sizes = [2, 32], strides = [1, 1]} : vector<16x32xf32> to vector<2x32xf32>
    %cst_102 = arith.constant dense<0.000000e+00> : vector<2x32xf32>
    %305 = tpu.matmul %287, %28, %cst_102 {dimension_numbers = #tpu.dot_dimension_numbers<[1], [0], [0], [1], [0, 0, 1, 1], [], []>} : vector<2x32xbf16>, vector<32x32xbf16>, vector<2x32xf32> -> vector<2x32xf32>
    %306 = arith.addf %304, %305 : vector<2x32xf32>
    %307 = math.tanh %306 : vector<2x32xf32>
    %308 = vector.extract_strided_slice %14 {offsets = [8, 0], sizes = [2, 32], strides = [1, 1]} : vector<16x32xf32> to vector<2x32xf32>
    %cst_103 = arith.constant dense<0.000000e+00> : vector<2x32xf32>
    %309 = tpu.matmul %287, %30, %cst_103 {dimension_numbers = #tpu.dot_dimension_numbers<[1], [0], [0], [1], [0, 0, 1, 1], [], []>} : vector<2x32xbf16>, vector<32x32xbf16>, vector<2x32xf32> -> vector<2x32xf32>
    %310 = arith.addf %308, %309 : vector<2x32xf32>
    %311 = arith.negf %310 : vector<2x32xf32>
    %312 = math.exp %311 : vector<2x32xf32>
    %cst_104 = arith.constant 1.000000e+00 : f32
    %313 = vector.broadcast %cst_104 : f32 to vector<2x32xf32>
    %314 = arith.addf %313, %312 : vector<2x32xf32>
    %315 = arith.divf %313, %314 : vector<2x32xf32>
    %316 = arith.mulf %303, %244 : vector<2x32xf32>
    %317 = arith.mulf %295, %307 : vector<2x32xf32>
    %318 = arith.addf %316, %317 : vector<2x32xf32>
    %319 = math.tanh %318 : vector<2x32xf32>
    %320 = arith.mulf %315, %319 : vector<2x32xf32>
    %c0_105 = arith.constant 0 : index
    %c6 = arith.constant 6 : index
    %c0_106 = arith.constant 0 : index
    %321 = vector.load %arg12[%c0_105, %c6, %c0_106] : memref<2x16x32xf32, #tpu.memory_space<vmem>>, vector<1x2x32xf32>
    %322 = vector.shape_cast %321 : vector<1x2x32xf32> to vector<2x32xf32>
    %323 = vector.shape_cast %286 : vector<2x32xf32> to vector<1x2x32xf32>
    tpu.vector_store %arg12[%c0_105, %c6, %c0_106], %323 {strides = array<i32>} : memref<2x16x32xf32, #tpu.memory_space<vmem>>, vector<1x2x32xf32>,
    %c1_107 = arith.constant 1 : index
    %c8 = arith.constant 8 : index
    %c0_108 = arith.constant 0 : index
    %324 = vector.load %arg12[%c1_107, %c8, %c0_108] : memref<2x16x32xf32, #tpu.memory_space<vmem>>, vector<1x2x32xf32>
    %325 = vector.shape_cast %324 : vector<1x2x32xf32> to vector<2x32xf32>
    %326 = vector.shape_cast %320 : vector<2x32xf32> to vector<1x2x32xf32>
    tpu.vector_store %arg12[%c1_107, %c8, %c0_108], %326 {strides = array<i32>} : memref<2x16x32xf32, #tpu.memory_space<vmem>>, vector<1x2x32xf32>,
    %327 = arith.truncf %286 : vector<2x32xf32> to vector<2x32xbf16>
    %328 = vector.extract_strided_slice %7 {offsets = [8, 0], sizes = [2, 32], strides = [1, 1]} : vector<16x32xf32> to vector<2x32xf32>
    %cst_109 = arith.constant dense<0.000000e+00> : vector<2x32xf32>
    %329 = tpu.matmul %327, %16, %cst_109 {dimension_numbers = #tpu.dot_dimension_numbers<[1], [0], [0], [1], [0, 0, 1, 1], [], []>} : vector<2x32xbf16>, vector<32x32xbf16>, vector<2x32xf32> -> vector<2x32xf32>
    %330 = arith.addf %328, %329 : vector<2x32xf32>
    %331 = arith.negf %330 : vector<2x32xf32>
    %332 = math.exp %331 : vector<2x32xf32>
    %cst_110 = arith.constant 1.000000e+00 : f32
    %333 = vector.broadcast %cst_110 : f32 to vector<2x32xf32>
    %334 = arith.addf %333, %332 : vector<2x32xf32>
    %335 = arith.divf %333, %334 : vector<2x32xf32>
    %336 = vector.extract_strided_slice %8 {offsets = [8, 0], sizes = [2, 32], strides = [1, 1]} : vector<16x32xf32> to vector<2x32xf32>
    %cst_111 = arith.constant dense<0.000000e+00> : vector<2x32xf32>
    %337 = tpu.matmul %327, %18, %cst_111 {dimension_numbers = #tpu.dot_dimension_numbers<[1], [0], [0], [1], [0, 0, 1, 1], [], []>} : vector<2x32xbf16>, vector<32x32xbf16>, vector<2x32xf32> -> vector<2x32xf32>
    %338 = arith.addf %336, %337 : vector<2x32xf32>
    %339 = arith.negf %338 : vector<2x32xf32>
    %340 = math.exp %339 : vector<2x32xf32>
    %cst_112 = arith.constant 1.000000e+00 : f32
    %341 = vector.broadcast %cst_112 : f32 to vector<2x32xf32>
    %342 = arith.addf %341, %340 : vector<2x32xf32>
    %343 = arith.divf %341, %342 : vector<2x32xf32>
    %344 = vector.extract_strided_slice %9 {offsets = [8, 0], sizes = [2, 32], strides = [1, 1]} : vector<16x32xf32> to vector<2x32xf32>
    %cst_113 = arith.constant dense<0.000000e+00> : vector<2x32xf32>
    %345 = tpu.matmul %327, %20, %cst_113 {dimension_numbers = #tpu.dot_dimension_numbers<[1], [0], [0], [1], [0, 0, 1, 1], [], []>} : vector<2x32xbf16>, vector<32x32xbf16>, vector<2x32xf32> -> vector<2x32xf32>
    %346 = arith.addf %344, %345 : vector<2x32xf32>
    %347 = math.tanh %346 : vector<2x32xf32>
    %348 = vector.extract_strided_slice %10 {offsets = [8, 0], sizes = [2, 32], strides = [1, 1]} : vector<16x32xf32> to vector<2x32xf32>
    %cst_114 = arith.constant dense<0.000000e+00> : vector<2x32xf32>
    %349 = tpu.matmul %327, %22, %cst_114 {dimension_numbers = #tpu.dot_dimension_numbers<[1], [0], [0], [1], [0, 0, 1, 1], [], []>} : vector<2x32xbf16>, vector<32x32xbf16>, vector<2x32xf32> -> vector<2x32xf32>
    %350 = arith.addf %348, %349 : vector<2x32xf32>
    %351 = arith.negf %350 : vector<2x32xf32>
    %352 = math.exp %351 : vector<2x32xf32>
    %cst_115 = arith.constant 1.000000e+00 : f32
    %353 = vector.broadcast %cst_115 : f32 to vector<2x32xf32>
    %354 = arith.addf %353, %352 : vector<2x32xf32>
    %355 = arith.divf %353, %354 : vector<2x32xf32>
    %356 = arith.mulf %343, %284 : vector<2x32xf32>
    %357 = arith.mulf %335, %347 : vector<2x32xf32>
    %358 = arith.addf %356, %357 : vector<2x32xf32>
    %359 = math.tanh %358 : vector<2x32xf32>
    %360 = arith.mulf %355, %359 : vector<2x32xf32>
    %361 = arith.truncf %320 : vector<2x32xf32> to vector<2x32xbf16>
    %362 = vector.extract_strided_slice %11 {offsets = [6, 0], sizes = [2, 32], strides = [1, 1]} : vector<16x32xf32> to vector<2x32xf32>
    %cst_116 = arith.constant dense<0.000000e+00> : vector<2x32xf32>
    %363 = tpu.matmul %361, %24, %cst_116 {dimension_numbers = #tpu.dot_dimension_numbers<[1], [0], [0], [1], [0, 0, 1, 1], [], []>} : vector<2x32xbf16>, vector<32x32xbf16>, vector<2x32xf32> -> vector<2x32xf32>
    %364 = arith.addf %362, %363 : vector<2x32xf32>
    %365 = arith.negf %364 : vector<2x32xf32>
    %366 = math.exp %365 : vector<2x32xf32>
    %cst_117 = arith.constant 1.000000e+00 : f32
    %367 = vector.broadcast %cst_117 : f32 to vector<2x32xf32>
    %368 = arith.addf %367, %366 : vector<2x32xf32>
    %369 = arith.divf %367, %368 : vector<2x32xf32>
    %370 = vector.extract_strided_slice %12 {offsets = [6, 0], sizes = [2, 32], strides = [1, 1]} : vector<16x32xf32> to vector<2x32xf32>
    %cst_118 = arith.constant dense<0.000000e+00> : vector<2x32xf32>
    %371 = tpu.matmul %361, %26, %cst_118 {dimension_numbers = #tpu.dot_dimension_numbers<[1], [0], [0], [1], [0, 0, 1, 1], [], []>} : vector<2x32xbf16>, vector<32x32xbf16>, vector<2x32xf32> -> vector<2x32xf32>
    %372 = arith.addf %370, %371 : vector<2x32xf32>
    %373 = arith.negf %372 : vector<2x32xf32>
    %374 = math.exp %373 : vector<2x32xf32>
    %cst_119 = arith.constant 1.000000e+00 : f32
    %375 = vector.broadcast %cst_119 : f32 to vector<2x32xf32>
    %376 = arith.addf %375, %374 : vector<2x32xf32>
    %377 = arith.divf %375, %376 : vector<2x32xf32>
    %378 = vector.extract_strided_slice %13 {offsets = [6, 0], sizes = [2, 32], strides = [1, 1]} : vector<16x32xf32> to vector<2x32xf32>
    %cst_120 = arith.constant dense<0.000000e+00> : vector<2x32xf32>
    %379 = tpu.matmul %361, %28, %cst_120 {dimension_numbers = #tpu.dot_dimension_numbers<[1], [0], [0], [1], [0, 0, 1, 1], [], []>} : vector<2x32xbf16>, vector<32x32xbf16>, vector<2x32xf32> -> vector<2x32xf32>
    %380 = arith.addf %378, %379 : vector<2x32xf32>
    %381 = math.tanh %380 : vector<2x32xf32>
    %382 = vector.extract_strided_slice %14 {offsets = [6, 0], sizes = [2, 32], strides = [1, 1]} : vector<16x32xf32> to vector<2x32xf32>
    %cst_121 = arith.constant dense<0.000000e+00> : vector<2x32xf32>
    %383 = tpu.matmul %361, %30, %cst_121 {dimension_numbers = #tpu.dot_dimension_numbers<[1], [0], [0], [1], [0, 0, 1, 1], [], []>} : vector<2x32xbf16>, vector<32x32xbf16>, vector<2x32xf32> -> vector<2x32xf32>
    %384 = arith.addf %382, %383 : vector<2x32xf32>
    %385 = arith.negf %384 : vector<2x32xf32>
    %386 = math.exp %385 : vector<2x32xf32>
    %cst_122 = arith.constant 1.000000e+00 : f32
    %387 = vector.broadcast %cst_122 : f32 to vector<2x32xf32>
    %388 = arith.addf %387, %386 : vector<2x32xf32>
    %389 = arith.divf %387, %388 : vector<2x32xf32>
    %390 = arith.mulf %377, %318 : vector<2x32xf32>
    %391 = arith.mulf %369, %381 : vector<2x32xf32>
    %392 = arith.addf %390, %391 : vector<2x32xf32>
    %393 = math.tanh %392 : vector<2x32xf32>
    %394 = arith.mulf %389, %393 : vector<2x32xf32>
    %c0_123 = arith.constant 0 : index
    %c8_124 = arith.constant 8 : index
    %c0_125 = arith.constant 0 : index
    %395 = vector.load %arg12[%c0_123, %c8_124, %c0_125] : memref<2x16x32xf32, #tpu.memory_space<vmem>>, vector<1x2x32xf32>
    %396 = vector.shape_cast %395 : vector<1x2x32xf32> to vector<2x32xf32>
    %397 = vector.shape_cast %360 : vector<2x32xf32> to vector<1x2x32xf32>
    tpu.vector_store %arg12[%c0_123, %c8_124, %c0_125], %397 {strides = array<i32>} : memref<2x16x32xf32, #tpu.memory_space<vmem>>, vector<1x2x32xf32>,
    %c1_126 = arith.constant 1 : index
    %c6_127 = arith.constant 6 : index
    %c0_128 = arith.constant 0 : index
    %398 = vector.load %arg12[%c1_126, %c6_127, %c0_128] : memref<2x16x32xf32, #tpu.memory_space<vmem>>, vector<1x2x32xf32>
    %399 = vector.shape_cast %398 : vector<1x2x32xf32> to vector<2x32xf32>
    %400 = vector.shape_cast %394 : vector<2x32xf32> to vector<1x2x32xf32>
    tpu.vector_store %arg12[%c1_126, %c6_127, %c0_128], %400 {strides = array<i32>} : memref<2x16x32xf32, #tpu.memory_space<vmem>>, vector<1x2x32xf32>,
    %401 = arith.truncf %360 : vector<2x32xf32> to vector<2x32xbf16>
    %402 = vector.extract_strided_slice %7 {offsets = [10, 0], sizes = [2, 32], strides = [1, 1]} : vector<16x32xf32> to vector<2x32xf32>
    %cst_129 = arith.constant dense<0.000000e+00> : vector<2x32xf32>
    %403 = tpu.matmul %401, %16, %cst_129 {dimension_numbers = #tpu.dot_dimension_numbers<[1], [0], [0], [1], [0, 0, 1, 1], [], []>} : vector<2x32xbf16>, vector<32x32xbf16>, vector<2x32xf32> -> vector<2x32xf32>
    %404 = arith.addf %402, %403 : vector<2x32xf32>
    %405 = arith.negf %404 : vector<2x32xf32>
    %406 = math.exp %405 : vector<2x32xf32>
    %cst_130 = arith.constant 1.000000e+00 : f32
    %407 = vector.broadcast %cst_130 : f32 to vector<2x32xf32>
    %408 = arith.addf %407, %406 : vector<2x32xf32>
    %409 = arith.divf %407, %408 : vector<2x32xf32>
    %410 = vector.extract_strided_slice %8 {offsets = [10, 0], sizes = [2, 32], strides = [1, 1]} : vector<16x32xf32> to vector<2x32xf32>
    %cst_131 = arith.constant dense<0.000000e+00> : vector<2x32xf32>
    %411 = tpu.matmul %401, %18, %cst_131 {dimension_numbers = #tpu.dot_dimension_numbers<[1], [0], [0], [1], [0, 0, 1, 1], [], []>} : vector<2x32xbf16>, vector<32x32xbf16>, vector<2x32xf32> -> vector<2x32xf32>
    %412 = arith.addf %410, %411 : vector<2x32xf32>
    %413 = arith.negf %412 : vector<2x32xf32>
    %414 = math.exp %413 : vector<2x32xf32>
    %cst_132 = arith.constant 1.000000e+00 : f32
    %415 = vector.broadcast %cst_132 : f32 to vector<2x32xf32>
    %416 = arith.addf %415, %414 : vector<2x32xf32>
    %417 = arith.divf %415, %416 : vector<2x32xf32>
    %418 = vector.extract_strided_slice %9 {offsets = [10, 0], sizes = [2, 32], strides = [1, 1]} : vector<16x32xf32> to vector<2x32xf32>
    %cst_133 = arith.constant dense<0.000000e+00> : vector<2x32xf32>
    %419 = tpu.matmul %401, %20, %cst_133 {dimension_numbers = #tpu.dot_dimension_numbers<[1], [0], [0], [1], [0, 0, 1, 1], [], []>} : vector<2x32xbf16>, vector<32x32xbf16>, vector<2x32xf32> -> vector<2x32xf32>
    %420 = arith.addf %418, %419 : vector<2x32xf32>
    %421 = math.tanh %420 : vector<2x32xf32>
    %422 = vector.extract_strided_slice %10 {offsets = [10, 0], sizes = [2, 32], strides = [1, 1]} : vector<16x32xf32> to vector<2x32xf32>
    %cst_134 = arith.constant dense<0.000000e+00> : vector<2x32xf32>
    %423 = tpu.matmul %401, %22, %cst_134 {dimension_numbers = #tpu.dot_dimension_numbers<[1], [0], [0], [1], [0, 0, 1, 1], [], []>} : vector<2x32xbf16>, vector<32x32xbf16>, vector<2x32xf32> -> vector<2x32xf32>
    %424 = arith.addf %422, %423 : vector<2x32xf32>
    %425 = arith.negf %424 : vector<2x32xf32>
    %426 = math.exp %425 : vector<2x32xf32>
    %cst_135 = arith.constant 1.000000e+00 : f32
    %427 = vector.broadcast %cst_135 : f32 to vector<2x32xf32>
    %428 = arith.addf %427, %426 : vector<2x32xf32>
    %429 = arith.divf %427, %428 : vector<2x32xf32>
    %430 = arith.mulf %417, %358 : vector<2x32xf32>
    %431 = arith.mulf %409, %421 : vector<2x32xf32>
    %432 = arith.addf %430, %431 : vector<2x32xf32>
    %433 = math.tanh %432 : vector<2x32xf32>
    %434 = arith.mulf %429, %433 : vector<2x32xf32>
    %435 = arith.truncf %394 : vector<2x32xf32> to vector<2x32xbf16>
    %436 = vector.extract_strided_slice %11 {offsets = [4, 0], sizes = [2, 32], strides = [1, 1]} : vector<16x32xf32> to vector<2x32xf32>
    %cst_136 = arith.constant dense<0.000000e+00> : vector<2x32xf32>
    %437 = tpu.matmul %435, %24, %cst_136 {dimension_numbers = #tpu.dot_dimension_numbers<[1], [0], [0], [1], [0, 0, 1, 1], [], []>} : vector<2x32xbf16>, vector<32x32xbf16>, vector<2x32xf32> -> vector<2x32xf32>
    %438 = arith.addf %436, %437 : vector<2x32xf32>
    %439 = arith.negf %438 : vector<2x32xf32>
    %440 = math.exp %439 : vector<2x32xf32>
    %cst_137 = arith.constant 1.000000e+00 : f32
    %441 = vector.broadcast %cst_137 : f32 to vector<2x32xf32>
    %442 = arith.addf %441, %440 : vector<2x32xf32>
    %443 = arith.divf %441, %442 : vector<2x32xf32>
    %444 = vector.extract_strided_slice %12 {offsets = [4, 0], sizes = [2, 32], strides = [1, 1]} : vector<16x32xf32> to vector<2x32xf32>
    %cst_138 = arith.constant dense<0.000000e+00> : vector<2x32xf32>
    %445 = tpu.matmul %435, %26, %cst_138 {dimension_numbers = #tpu.dot_dimension_numbers<[1], [0], [0], [1], [0, 0, 1, 1], [], []>} : vector<2x32xbf16>, vector<32x32xbf16>, vector<2x32xf32> -> vector<2x32xf32>
    %446 = arith.addf %444, %445 : vector<2x32xf32>
    %447 = arith.negf %446 : vector<2x32xf32>
    %448 = math.exp %447 : vector<2x32xf32>
    %cst_139 = arith.constant 1.000000e+00 : f32
    %449 = vector.broadcast %cst_139 : f32 to vector<2x32xf32>
    %450 = arith.addf %449, %448 : vector<2x32xf32>
    %451 = arith.divf %449, %450 : vector<2x32xf32>
    %452 = vector.extract_strided_slice %13 {offsets = [4, 0], sizes = [2, 32], strides = [1, 1]} : vector<16x32xf32> to vector<2x32xf32>
    %cst_140 = arith.constant dense<0.000000e+00> : vector<2x32xf32>
    %453 = tpu.matmul %435, %28, %cst_140 {dimension_numbers = #tpu.dot_dimension_numbers<[1], [0], [0], [1], [0, 0, 1, 1], [], []>} : vector<2x32xbf16>, vector<32x32xbf16>, vector<2x32xf32> -> vector<2x32xf32>
    %454 = arith.addf %452, %453 : vector<2x32xf32>
    %455 = math.tanh %454 : vector<2x32xf32>
    %456 = vector.extract_strided_slice %14 {offsets = [4, 0], sizes = [2, 32], strides = [1, 1]} : vector<16x32xf32> to vector<2x32xf32>
    %cst_141 = arith.constant dense<0.000000e+00> : vector<2x32xf32>
    %457 = tpu.matmul %435, %30, %cst_141 {dimension_numbers = #tpu.dot_dimension_numbers<[1], [0], [0], [1], [0, 0, 1, 1], [], []>} : vector<2x32xbf16>, vector<32x32xbf16>, vector<2x32xf32> -> vector<2x32xf32>
    %458 = arith.addf %456, %457 : vector<2x32xf32>
    %459 = arith.negf %458 : vector<2x32xf32>
    %460 = math.exp %459 : vector<2x32xf32>
    %cst_142 = arith.constant 1.000000e+00 : f32
    %461 = vector.broadcast %cst_142 : f32 to vector<2x32xf32>
    %462 = arith.addf %461, %460 : vector<2x32xf32>
    %463 = arith.divf %461, %462 : vector<2x32xf32>
    %464 = arith.mulf %451, %392 : vector<2x32xf32>
    %465 = arith.mulf %443, %455 : vector<2x32xf32>
    %466 = arith.addf %464, %465 : vector<2x32xf32>
    %467 = math.tanh %466 : vector<2x32xf32>
    %468 = arith.mulf %463, %467 : vector<2x32xf32>
    %c0_143 = arith.constant 0 : index
    %c10_144 = arith.constant 10 : index
    %c0_145 = arith.constant 0 : index
    %469 = vector.load %arg12[%c0_143, %c10_144, %c0_145] : memref<2x16x32xf32, #tpu.memory_space<vmem>>, vector<1x2x32xf32>
    %470 = vector.shape_cast %469 : vector<1x2x32xf32> to vector<2x32xf32>
    %471 = vector.shape_cast %434 : vector<2x32xf32> to vector<1x2x32xf32>
    tpu.vector_store %arg12[%c0_143, %c10_144, %c0_145], %471 {strides = array<i32>} : memref<2x16x32xf32, #tpu.memory_space<vmem>>, vector<1x2x32xf32>,
    %c1_146 = arith.constant 1 : index
    %c4_147 = arith.constant 4 : index
    %c0_148 = arith.constant 0 : index
    %472 = vector.load %arg12[%c1_146, %c4_147, %c0_148] : memref<2x16x32xf32, #tpu.memory_space<vmem>>, vector<1x2x32xf32>
    %473 = vector.shape_cast %472 : vector<1x2x32xf32> to vector<2x32xf32>
    %474 = vector.shape_cast %468 : vector<2x32xf32> to vector<1x2x32xf32>
    tpu.vector_store %arg12[%c1_146, %c4_147, %c0_148], %474 {strides = array<i32>} : memref<2x16x32xf32, #tpu.memory_space<vmem>>, vector<1x2x32xf32>,
    %475 = arith.truncf %434 : vector<2x32xf32> to vector<2x32xbf16>
    %476 = vector.extract_strided_slice %7 {offsets = [12, 0], sizes = [2, 32], strides = [1, 1]} : vector<16x32xf32> to vector<2x32xf32>
    %cst_149 = arith.constant dense<0.000000e+00> : vector<2x32xf32>
    %477 = tpu.matmul %475, %16, %cst_149 {dimension_numbers = #tpu.dot_dimension_numbers<[1], [0], [0], [1], [0, 0, 1, 1], [], []>} : vector<2x32xbf16>, vector<32x32xbf16>, vector<2x32xf32> -> vector<2x32xf32>
    %478 = arith.addf %476, %477 : vector<2x32xf32>
    %479 = arith.negf %478 : vector<2x32xf32>
    %480 = math.exp %479 : vector<2x32xf32>
    %cst_150 = arith.constant 1.000000e+00 : f32
    %481 = vector.broadcast %cst_150 : f32 to vector<2x32xf32>
    %482 = arith.addf %481, %480 : vector<2x32xf32>
    %483 = arith.divf %481, %482 : vector<2x32xf32>
    %484 = vector.extract_strided_slice %8 {offsets = [12, 0], sizes = [2, 32], strides = [1, 1]} : vector<16x32xf32> to vector<2x32xf32>
    %cst_151 = arith.constant dense<0.000000e+00> : vector<2x32xf32>
    %485 = tpu.matmul %475, %18, %cst_151 {dimension_numbers = #tpu.dot_dimension_numbers<[1], [0], [0], [1], [0, 0, 1, 1], [], []>} : vector<2x32xbf16>, vector<32x32xbf16>, vector<2x32xf32> -> vector<2x32xf32>
    %486 = arith.addf %484, %485 : vector<2x32xf32>
    %487 = arith.negf %486 : vector<2x32xf32>
    %488 = math.exp %487 : vector<2x32xf32>
    %cst_152 = arith.constant 1.000000e+00 : f32
    %489 = vector.broadcast %cst_152 : f32 to vector<2x32xf32>
    %490 = arith.addf %489, %488 : vector<2x32xf32>
    %491 = arith.divf %489, %490 : vector<2x32xf32>
    %492 = vector.extract_strided_slice %9 {offsets = [12, 0], sizes = [2, 32], strides = [1, 1]} : vector<16x32xf32> to vector<2x32xf32>
    %cst_153 = arith.constant dense<0.000000e+00> : vector<2x32xf32>
    %493 = tpu.matmul %475, %20, %cst_153 {dimension_numbers = #tpu.dot_dimension_numbers<[1], [0], [0], [1], [0, 0, 1, 1], [], []>} : vector<2x32xbf16>, vector<32x32xbf16>, vector<2x32xf32> -> vector<2x32xf32>
    %494 = arith.addf %492, %493 : vector<2x32xf32>
    %495 = math.tanh %494 : vector<2x32xf32>
    %496 = vector.extract_strided_slice %10 {offsets = [12, 0], sizes = [2, 32], strides = [1, 1]} : vector<16x32xf32> to vector<2x32xf32>
    %cst_154 = arith.constant dense<0.000000e+00> : vector<2x32xf32>
    %497 = tpu.matmul %475, %22, %cst_154 {dimension_numbers = #tpu.dot_dimension_numbers<[1], [0], [0], [1], [0, 0, 1, 1], [], []>} : vector<2x32xbf16>, vector<32x32xbf16>, vector<2x32xf32> -> vector<2x32xf32>
    %498 = arith.addf %496, %497 : vector<2x32xf32>
    %499 = arith.negf %498 : vector<2x32xf32>
    %500 = math.exp %499 : vector<2x32xf32>
    %cst_155 = arith.constant 1.000000e+00 : f32
    %501 = vector.broadcast %cst_155 : f32 to vector<2x32xf32>
    %502 = arith.addf %501, %500 : vector<2x32xf32>
    %503 = arith.divf %501, %502 : vector<2x32xf32>
    %504 = arith.mulf %491, %432 : vector<2x32xf32>
    %505 = arith.mulf %483, %495 : vector<2x32xf32>
    %506 = arith.addf %504, %505 : vector<2x32xf32>
    %507 = math.tanh %506 : vector<2x32xf32>
    %508 = arith.mulf %503, %507 : vector<2x32xf32>
    %509 = arith.truncf %468 : vector<2x32xf32> to vector<2x32xbf16>
    %510 = vector.extract_strided_slice %11 {offsets = [2, 0], sizes = [2, 32], strides = [1, 1]} : vector<16x32xf32> to vector<2x32xf32>
    %cst_156 = arith.constant dense<0.000000e+00> : vector<2x32xf32>
    %511 = tpu.matmul %509, %24, %cst_156 {dimension_numbers = #tpu.dot_dimension_numbers<[1], [0], [0], [1], [0, 0, 1, 1], [], []>} : vector<2x32xbf16>, vector<32x32xbf16>, vector<2x32xf32> -> vector<2x32xf32>
    %512 = arith.addf %510, %511 : vector<2x32xf32>
    %513 = arith.negf %512 : vector<2x32xf32>
    %514 = math.exp %513 : vector<2x32xf32>
    %cst_157 = arith.constant 1.000000e+00 : f32
    %515 = vector.broadcast %cst_157 : f32 to vector<2x32xf32>
    %516 = arith.addf %515, %514 : vector<2x32xf32>
    %517 = arith.divf %515, %516 : vector<2x32xf32>
    %518 = vector.extract_strided_slice %12 {offsets = [2, 0], sizes = [2, 32], strides = [1, 1]} : vector<16x32xf32> to vector<2x32xf32>
    %cst_158 = arith.constant dense<0.000000e+00> : vector<2x32xf32>
    %519 = tpu.matmul %509, %26, %cst_158 {dimension_numbers = #tpu.dot_dimension_numbers<[1], [0], [0], [1], [0, 0, 1, 1], [], []>} : vector<2x32xbf16>, vector<32x32xbf16>, vector<2x32xf32> -> vector<2x32xf32>
    %520 = arith.addf %518, %519 : vector<2x32xf32>
    %521 = arith.negf %520 : vector<2x32xf32>
    %522 = math.exp %521 : vector<2x32xf32>
    %cst_159 = arith.constant 1.000000e+00 : f32
    %523 = vector.broadcast %cst_159 : f32 to vector<2x32xf32>
    %524 = arith.addf %523, %522 : vector<2x32xf32>
    %525 = arith.divf %523, %524 : vector<2x32xf32>
    %526 = vector.extract_strided_slice %13 {offsets = [2, 0], sizes = [2, 32], strides = [1, 1]} : vector<16x32xf32> to vector<2x32xf32>
    %cst_160 = arith.constant dense<0.000000e+00> : vector<2x32xf32>
    %527 = tpu.matmul %509, %28, %cst_160 {dimension_numbers = #tpu.dot_dimension_numbers<[1], [0], [0], [1], [0, 0, 1, 1], [], []>} : vector<2x32xbf16>, vector<32x32xbf16>, vector<2x32xf32> -> vector<2x32xf32>
    %528 = arith.addf %526, %527 : vector<2x32xf32>
    %529 = math.tanh %528 : vector<2x32xf32>
    %530 = vector.extract_strided_slice %14 {offsets = [2, 0], sizes = [2, 32], strides = [1, 1]} : vector<16x32xf32> to vector<2x32xf32>
    %cst_161 = arith.constant dense<0.000000e+00> : vector<2x32xf32>
    %531 = tpu.matmul %509, %30, %cst_161 {dimension_numbers = #tpu.dot_dimension_numbers<[1], [0], [0], [1], [0, 0, 1, 1], [], []>} : vector<2x32xbf16>, vector<32x32xbf16>, vector<2x32xf32> -> vector<2x32xf32>
    %532 = arith.addf %530, %531 : vector<2x32xf32>
    %533 = arith.negf %532 : vector<2x32xf32>
    %534 = math.exp %533 : vector<2x32xf32>
    %cst_162 = arith.constant 1.000000e+00 : f32
    %535 = vector.broadcast %cst_162 : f32 to vector<2x32xf32>
    %536 = arith.addf %535, %534 : vector<2x32xf32>
    %537 = arith.divf %535, %536 : vector<2x32xf32>
    %538 = arith.mulf %525, %466 : vector<2x32xf32>
    %539 = arith.mulf %517, %529 : vector<2x32xf32>
    %540 = arith.addf %538, %539 : vector<2x32xf32>
    %541 = math.tanh %540 : vector<2x32xf32>
    %542 = arith.mulf %537, %541 : vector<2x32xf32>
    %c0_163 = arith.constant 0 : index
    %c12_164 = arith.constant 12 : index
    %c0_165 = arith.constant 0 : index
    %543 = vector.load %arg12[%c0_163, %c12_164, %c0_165] : memref<2x16x32xf32, #tpu.memory_space<vmem>>, vector<1x2x32xf32>
    %544 = vector.shape_cast %543 : vector<1x2x32xf32> to vector<2x32xf32>
    %545 = vector.shape_cast %508 : vector<2x32xf32> to vector<1x2x32xf32>
    tpu.vector_store %arg12[%c0_163, %c12_164, %c0_165], %545 {strides = array<i32>} : memref<2x16x32xf32, #tpu.memory_space<vmem>>, vector<1x2x32xf32>,
    %c1_166 = arith.constant 1 : index
    %c2_167 = arith.constant 2 : index
    %c0_168 = arith.constant 0 : index
    %546 = vector.load %arg12[%c1_166, %c2_167, %c0_168] : memref<2x16x32xf32, #tpu.memory_space<vmem>>, vector<1x2x32xf32>
    %547 = vector.shape_cast %546 : vector<1x2x32xf32> to vector<2x32xf32>
    %548 = vector.shape_cast %542 : vector<2x32xf32> to vector<1x2x32xf32>
    tpu.vector_store %arg12[%c1_166, %c2_167, %c0_168], %548 {strides = array<i32>} : memref<2x16x32xf32, #tpu.memory_space<vmem>>, vector<1x2x32xf32>,
    %549 = arith.truncf %508 : vector<2x32xf32> to vector<2x32xbf16>
    %550 = vector.extract_strided_slice %7 {offsets = [14, 0], sizes = [2, 32], strides = [1, 1]} : vector<16x32xf32> to vector<2x32xf32>
    %cst_169 = arith.constant dense<0.000000e+00> : vector<2x32xf32>
    %551 = tpu.matmul %549, %16, %cst_169 {dimension_numbers = #tpu.dot_dimension_numbers<[1], [0], [0], [1], [0, 0, 1, 1], [], []>} : vector<2x32xbf16>, vector<32x32xbf16>, vector<2x32xf32> -> vector<2x32xf32>
    %552 = arith.addf %550, %551 : vector<2x32xf32>
    %553 = arith.negf %552 : vector<2x32xf32>
    %554 = math.exp %553 : vector<2x32xf32>
    %cst_170 = arith.constant 1.000000e+00 : f32
    %555 = vector.broadcast %cst_170 : f32 to vector<2x32xf32>
    %556 = arith.addf %555, %554 : vector<2x32xf32>
    %557 = arith.divf %555, %556 : vector<2x32xf32>
    %558 = vector.extract_strided_slice %8 {offsets = [14, 0], sizes = [2, 32], strides = [1, 1]} : vector<16x32xf32> to vector<2x32xf32>
    %cst_171 = arith.constant dense<0.000000e+00> : vector<2x32xf32>
    %559 = tpu.matmul %549, %18, %cst_171 {dimension_numbers = #tpu.dot_dimension_numbers<[1], [0], [0], [1], [0, 0, 1, 1], [], []>} : vector<2x32xbf16>, vector<32x32xbf16>, vector<2x32xf32> -> vector<2x32xf32>
    %560 = arith.addf %558, %559 : vector<2x32xf32>
    %561 = arith.negf %560 : vector<2x32xf32>
    %562 = math.exp %561 : vector<2x32xf32>
    %cst_172 = arith.constant 1.000000e+00 : f32
    %563 = vector.broadcast %cst_172 : f32 to vector<2x32xf32>
    %564 = arith.addf %563, %562 : vector<2x32xf32>
    %565 = arith.divf %563, %564 : vector<2x32xf32>
    %566 = vector.extract_strided_slice %9 {offsets = [14, 0], sizes = [2, 32], strides = [1, 1]} : vector<16x32xf32> to vector<2x32xf32>
    %cst_173 = arith.constant dense<0.000000e+00> : vector<2x32xf32>
    %567 = tpu.matmul %549, %20, %cst_173 {dimension_numbers = #tpu.dot_dimension_numbers<[1], [0], [0], [1], [0, 0, 1, 1], [], []>} : vector<2x32xbf16>, vector<32x32xbf16>, vector<2x32xf32> -> vector<2x32xf32>
    %568 = arith.addf %566, %567 : vector<2x32xf32>
    %569 = math.tanh %568 : vector<2x32xf32>
    %570 = vector.extract_strided_slice %10 {offsets = [14, 0], sizes = [2, 32], strides = [1, 1]} : vector<16x32xf32> to vector<2x32xf32>
    %cst_174 = arith.constant dense<0.000000e+00> : vector<2x32xf32>
    %571 = tpu.matmul %549, %22, %cst_174 {dimension_numbers = #tpu.dot_dimension_numbers<[1], [0], [0], [1], [0, 0, 1, 1], [], []>} : vector<2x32xbf16>, vector<32x32xbf16>, vector<2x32xf32> -> vector<2x32xf32>
    %572 = arith.addf %570, %571 : vector<2x32xf32>
    %573 = arith.negf %572 : vector<2x32xf32>
    %574 = math.exp %573 : vector<2x32xf32>
    %cst_175 = arith.constant 1.000000e+00 : f32
    %575 = vector.broadcast %cst_175 : f32 to vector<2x32xf32>
    %576 = arith.addf %575, %574 : vector<2x32xf32>
    %577 = arith.divf %575, %576 : vector<2x32xf32>
    %578 = arith.mulf %565, %506 : vector<2x32xf32>
    %579 = arith.mulf %557, %569 : vector<2x32xf32>
    %580 = arith.addf %578, %579 : vector<2x32xf32>
    %581 = math.tanh %580 : vector<2x32xf32>
    %582 = arith.mulf %577, %581 : vector<2x32xf32>
    %583 = arith.truncf %542 : vector<2x32xf32> to vector<2x32xbf16>
    %584 = vector.extract_strided_slice %11 {offsets = [0, 0], sizes = [2, 32], strides = [1, 1]} : vector<16x32xf32> to vector<2x32xf32>
    %cst_176 = arith.constant dense<0.000000e+00> : vector<2x32xf32>
    %585 = tpu.matmul %583, %24, %cst_176 {dimension_numbers = #tpu.dot_dimension_numbers<[1], [0], [0], [1], [0, 0, 1, 1], [], []>} : vector<2x32xbf16>, vector<32x32xbf16>, vector<2x32xf32> -> vector<2x32xf32>
    %586 = arith.addf %584, %585 : vector<2x32xf32>
    %587 = arith.negf %586 : vector<2x32xf32>
    %588 = math.exp %587 : vector<2x32xf32>
    %cst_177 = arith.constant 1.000000e+00 : f32
    %589 = vector.broadcast %cst_177 : f32 to vector<2x32xf32>
    %590 = arith.addf %589, %588 : vector<2x32xf32>
    %591 = arith.divf %589, %590 : vector<2x32xf32>
    %592 = vector.extract_strided_slice %12 {offsets = [0, 0], sizes = [2, 32], strides = [1, 1]} : vector<16x32xf32> to vector<2x32xf32>
    %cst_178 = arith.constant dense<0.000000e+00> : vector<2x32xf32>
    %593 = tpu.matmul %583, %26, %cst_178 {dimension_numbers = #tpu.dot_dimension_numbers<[1], [0], [0], [1], [0, 0, 1, 1], [], []>} : vector<2x32xbf16>, vector<32x32xbf16>, vector<2x32xf32> -> vector<2x32xf32>
    %594 = arith.addf %592, %593 : vector<2x32xf32>
    %595 = arith.negf %594 : vector<2x32xf32>
    %596 = math.exp %595 : vector<2x32xf32>
    %cst_179 = arith.constant 1.000000e+00 : f32
    %597 = vector.broadcast %cst_179 : f32 to vector<2x32xf32>
    %598 = arith.addf %597, %596 : vector<2x32xf32>
    %599 = arith.divf %597, %598 : vector<2x32xf32>
    %600 = vector.extract_strided_slice %13 {offsets = [0, 0], sizes = [2, 32], strides = [1, 1]} : vector<16x32xf32> to vector<2x32xf32>
    %cst_180 = arith.constant dense<0.000000e+00> : vector<2x32xf32>
    %601 = tpu.matmul %583, %28, %cst_180 {dimension_numbers = #tpu.dot_dimension_numbers<[1], [0], [0], [1], [0, 0, 1, 1], [], []>} : vector<2x32xbf16>, vector<32x32xbf16>, vector<2x32xf32> -> vector<2x32xf32>
    %602 = arith.addf %600, %601 : vector<2x32xf32>
    %603 = math.tanh %602 : vector<2x32xf32>
    %604 = vector.extract_strided_slice %14 {offsets = [0, 0], sizes = [2, 32], strides = [1, 1]} : vector<16x32xf32> to vector<2x32xf32>
    %cst_181 = arith.constant dense<0.000000e+00> : vector<2x32xf32>
    %605 = tpu.matmul %583, %30, %cst_181 {dimension_numbers = #tpu.dot_dimension_numbers<[1], [0], [0], [1], [0, 0, 1, 1], [], []>} : vector<2x32xbf16>, vector<32x32xbf16>, vector<2x32xf32> -> vector<2x32xf32>
    %606 = arith.addf %604, %605 : vector<2x32xf32>
    %607 = arith.negf %606 : vector<2x32xf32>
    %608 = math.exp %607 : vector<2x32xf32>
    %cst_182 = arith.constant 1.000000e+00 : f32
    %609 = vector.broadcast %cst_182 : f32 to vector<2x32xf32>
    %610 = arith.addf %609, %608 : vector<2x32xf32>
    %611 = arith.divf %609, %610 : vector<2x32xf32>
    %612 = arith.mulf %599, %540 : vector<2x32xf32>
    %613 = arith.mulf %591, %603 : vector<2x32xf32>
    %614 = arith.addf %612, %613 : vector<2x32xf32>
    %615 = math.tanh %614 : vector<2x32xf32>
    %616 = arith.mulf %611, %615 : vector<2x32xf32>
    %c0_183 = arith.constant 0 : index
    %c14_184 = arith.constant 14 : index
    %c0_185 = arith.constant 0 : index
    %617 = vector.load %arg12[%c0_183, %c14_184, %c0_185] : memref<2x16x32xf32, #tpu.memory_space<vmem>>, vector<1x2x32xf32>
    %618 = vector.shape_cast %617 : vector<1x2x32xf32> to vector<2x32xf32>
    %619 = vector.shape_cast %582 : vector<2x32xf32> to vector<1x2x32xf32>
    tpu.vector_store %arg12[%c0_183, %c14_184, %c0_185], %619 {strides = array<i32>} : memref<2x16x32xf32, #tpu.memory_space<vmem>>, vector<1x2x32xf32>,
    %c1_186 = arith.constant 1 : index
    %c0_187 = arith.constant 0 : index
    %c0_188 = arith.constant 0 : index
    %620 = vector.load %arg12[%c1_186, %c0_187, %c0_188] : memref<2x16x32xf32, #tpu.memory_space<vmem>>, vector<1x2x32xf32>
    %621 = vector.shape_cast %620 : vector<1x2x32xf32> to vector<2x32xf32>
    %622 = vector.shape_cast %616 : vector<2x32xf32> to vector<1x2x32xf32>
    tpu.vector_store %arg12[%c1_186, %c0_187, %c0_188], %622 {strides = array<i32>} : memref<2x16x32xf32, #tpu.memory_space<vmem>>, vector<1x2x32xf32>,
    %c0_189 = arith.constant 0 : index
    %c0_190 = arith.constant 0 : index
    %c0_191 = arith.constant 0 : index
    %623 = vector.load %arg12[%c0_189, %c0_190, %c0_191] : memref<2x16x32xf32, #tpu.memory_space<vmem>>, vector<1x16x32xf32>
    %624 = vector.shape_cast %623 : vector<1x16x32xf32> to vector<16x32xf32>
    %625 = arith.truncf %624 : vector<16x32xf32> to vector<16x32xbf16>
    %c1_192 = arith.constant 1 : index
    %c0_193 = arith.constant 0 : index
    %c0_194 = arith.constant 0 : index
    %626 = vector.load %arg12[%c1_192, %c0_193, %c0_194] : memref<2x16x32xf32, #tpu.memory_space<vmem>>, vector<1x16x32xf32>
    %627 = vector.shape_cast %626 : vector<1x16x32xf32> to vector<16x32xf32>
    %628 = arith.truncf %627 : vector<16x32xf32> to vector<16x32xbf16>
    %c0_195 = arith.constant 0 : index
    %c0_196 = arith.constant 0 : index
    %629 = vector.load %arg4[%c0_195, %c0_196] : memref<32x256xbf16, #tpu.memory_space<vmem>>, vector<32x256xbf16>
    %cst_197 = arith.constant dense<0.000000e+00> : vector<16x256xf32>
    %630 = tpu.matmul %625, %629, %cst_197 {dimension_numbers = #tpu.dot_dimension_numbers<[1], [0], [0], [1], [0, 0, 1, 1], [], []>} : vector<16x32xbf16>, vector<32x256xbf16>, vector<16x256xf32> -> vector<16x256xf32>
    %c0_198 = arith.constant 0 : index
    %c0_199 = arith.constant 0 : index
    %631 = vector.load %arg5[%c0_198, %c0_199] : memref<32x256xbf16, #tpu.memory_space<vmem>>, vector<32x256xbf16>
    %cst_200 = arith.constant dense<0.000000e+00> : vector<16x256xf32>
    %632 = tpu.matmul %628, %631, %cst_200 {dimension_numbers = #tpu.dot_dimension_numbers<[1], [0], [0], [1], [0, 0, 1, 1], [], []>} : vector<16x32xbf16>, vector<32x256xbf16>, vector<16x256xf32> -> vector<16x256xf32>
    %633 = arith.addf %630, %632 : vector<16x256xf32>
    %c0_201 = arith.constant 0 : index
    %c0_202 = arith.constant 0 : index
    %634 = vector.load %arg6[%c0_201, %c0_202] : memref<1x256xf32, #tpu.memory_space<vmem>>, vector<1x256xf32>
    %635 = vector.broadcast %634 : vector<1x256xf32> to vector<16x256xf32>
    %636 = arith.addf %633, %635 : vector<16x256xf32>
    %637 = vector.extract_strided_slice %636 {offsets = [0, 0], sizes = [16, 32], strides = [1, 1]} : vector<16x256xf32> to vector<16x32xf32>
    %638 = vector.extract_strided_slice %636 {offsets = [0, 32], sizes = [16, 32], strides = [1, 1]} : vector<16x256xf32> to vector<16x32xf32>
    %639 = vector.extract_strided_slice %636 {offsets = [0, 64], sizes = [16, 32], strides = [1, 1]} : vector<16x256xf32> to vector<16x32xf32>
    %640 = vector.extract_strided_slice %636 {offsets = [0, 96], sizes = [16, 32], strides = [1, 1]} : vector<16x256xf32> to vector<16x32xf32>
    %641 = vector.extract_strided_slice %636 {offsets = [0, 128], sizes = [16, 32], strides = [1, 1]} : vector<16x256xf32> to vector<16x32xf32>
    %642 = vector.extract_strided_slice %636 {offsets = [0, 160], sizes = [16, 32], strides = [1, 1]} : vector<16x256xf32> to vector<16x32xf32>
    %643 = vector.extract_strided_slice %636 {offsets = [0, 192], sizes = [16, 32], strides = [1, 1]} : vector<16x256xf32> to vector<16x32xf32>
    %644 = vector.extract_strided_slice %636 {offsets = [0, 224], sizes = [16, 32], strides = [1, 1]} : vector<16x256xf32> to vector<16x32xf32>
    %c0_203 = arith.constant 0 : index
    %c0_204 = arith.constant 0 : index
    %c0_205 = arith.constant 0 : index
    %c0_206 = arith.constant 0 : index
    %645 = vector.load %arg7[%c0_203, %c0_204, %c0_205, %c0_206] : memref<2x4x32x32xbf16, #tpu.memory_space<vmem>>, vector<1x1x32x32xbf16>
    %646 = vector.shape_cast %645 : vector<1x1x32x32xbf16> to vector<32x32xbf16>
    %c0_207 = arith.constant 0 : index
    %c1_208 = arith.constant 1 : index
    %c0_209 = arith.constant 0 : index
    %c0_210 = arith.constant 0 : index
    %647 = vector.load %arg7[%c0_207, %c1_208, %c0_209, %c0_210] : memref<2x4x32x32xbf16, #tpu.memory_space<vmem>>, vector<1x1x32x32xbf16>
    %648 = vector.shape_cast %647 : vector<1x1x32x32xbf16> to vector<32x32xbf16>
    %c0_211 = arith.constant 0 : index
    %c2_212 = arith.constant 2 : index
    %c0_213 = arith.constant 0 : index
    %c0_214 = arith.constant 0 : index
    %649 = vector.load %arg7[%c0_211, %c2_212, %c0_213, %c0_214] : memref<2x4x32x32xbf16, #tpu.memory_space<vmem>>, vector<1x1x32x32xbf16>
    %650 = vector.shape_cast %649 : vector<1x1x32x32xbf16> to vector<32x32xbf16>
    %c0_215 = arith.constant 0 : index
    %c3_216 = arith.constant 3 : index
    %c0_217 = arith.constant 0 : index
    %c0_218 = arith.constant 0 : index
    %651 = vector.load %arg7[%c0_215, %c3_216, %c0_217, %c0_218] : memref<2x4x32x32xbf16, #tpu.memory_space<vmem>>, vector<1x1x32x32xbf16>
    %652 = vector.shape_cast %651 : vector<1x1x32x32xbf16> to vector<32x32xbf16>
    %c1_219 = arith.constant 1 : index
    %c0_220 = arith.constant 0 : index
    %c0_221 = arith.constant 0 : index
    %c0_222 = arith.constant 0 : index
    %653 = vector.load %arg7[%c1_219, %c0_220, %c0_221, %c0_222] : memref<2x4x32x32xbf16, #tpu.memory_space<vmem>>, vector<1x1x32x32xbf16>
    %654 = vector.shape_cast %653 : vector<1x1x32x32xbf16> to vector<32x32xbf16>
    %c1_223 = arith.constant 1 : index
    %c1_224 = arith.constant 1 : index
    %c0_225 = arith.constant 0 : index
    %c0_226 = arith.constant 0 : index
    %655 = vector.load %arg7[%c1_223, %c1_224, %c0_225, %c0_226] : memref<2x4x32x32xbf16, #tpu.memory_space<vmem>>, vector<1x1x32x32xbf16>
    %656 = vector.shape_cast %655 : vector<1x1x32x32xbf16> to vector<32x32xbf16>
    %c1_227 = arith.constant 1 : index
    %c2_228 = arith.constant 2 : index
    %c0_229 = arith.constant 0 : index
    %c0_230 = arith.constant 0 : index
    %657 = vector.load %arg7[%c1_227, %c2_228, %c0_229, %c0_230] : memref<2x4x32x32xbf16, #tpu.memory_space<vmem>>, vector<1x1x32x32xbf16>
    %658 = vector.shape_cast %657 : vector<1x1x32x32xbf16> to vector<32x32xbf16>
    %c1_231 = arith.constant 1 : index
    %c3_232 = arith.constant 3 : index
    %c0_233 = arith.constant 0 : index
    %c0_234 = arith.constant 0 : index
    %659 = vector.load %arg7[%c1_231, %c3_232, %c0_233, %c0_234] : memref<2x4x32x32xbf16, #tpu.memory_space<vmem>>, vector<1x1x32x32xbf16>
    %660 = vector.shape_cast %659 : vector<1x1x32x32xbf16> to vector<32x32xbf16>
    %661 = arith.truncf %0 : vector<2x32xf32> to vector<2x32xbf16>
    %662 = vector.extract_strided_slice %637 {offsets = [0, 0], sizes = [2, 32], strides = [1, 1]} : vector<16x32xf32> to vector<2x32xf32>
    %cst_235 = arith.constant dense<0.000000e+00> : vector<2x32xf32>
    %663 = tpu.matmul %661, %646, %cst_235 {dimension_numbers = #tpu.dot_dimension_numbers<[1], [0], [0], [1], [0, 0, 1, 1], [], []>} : vector<2x32xbf16>, vector<32x32xbf16>, vector<2x32xf32> -> vector<2x32xf32>
    %664 = arith.addf %662, %663 : vector<2x32xf32>
    %665 = arith.negf %664 : vector<2x32xf32>
    %666 = math.exp %665 : vector<2x32xf32>
    %cst_236 = arith.constant 1.000000e+00 : f32
    %667 = vector.broadcast %cst_236 : f32 to vector<2x32xf32>
    %668 = arith.addf %667, %666 : vector<2x32xf32>
    %669 = arith.divf %667, %668 : vector<2x32xf32>
    %670 = vector.extract_strided_slice %638 {offsets = [0, 0], sizes = [2, 32], strides = [1, 1]} : vector<16x32xf32> to vector<2x32xf32>
    %cst_237 = arith.constant dense<0.000000e+00> : vector<2x32xf32>
    %671 = tpu.matmul %661, %648, %cst_237 {dimension_numbers = #tpu.dot_dimension_numbers<[1], [0], [0], [1], [0, 0, 1, 1], [], []>} : vector<2x32xbf16>, vector<32x32xbf16>, vector<2x32xf32> -> vector<2x32xf32>
    %672 = arith.addf %670, %671 : vector<2x32xf32>
    %673 = arith.negf %672 : vector<2x32xf32>
    %674 = math.exp %673 : vector<2x32xf32>
    %cst_238 = arith.constant 1.000000e+00 : f32
    %675 = vector.broadcast %cst_238 : f32 to vector<2x32xf32>
    %676 = arith.addf %675, %674 : vector<2x32xf32>
    %677 = arith.divf %675, %676 : vector<2x32xf32>
    %678 = vector.extract_strided_slice %639 {offsets = [0, 0], sizes = [2, 32], strides = [1, 1]} : vector<16x32xf32> to vector<2x32xf32>
    %cst_239 = arith.constant dense<0.000000e+00> : vector<2x32xf32>
    %679 = tpu.matmul %661, %650, %cst_239 {dimension_numbers = #tpu.dot_dimension_numbers<[1], [0], [0], [1], [0, 0, 1, 1], [], []>} : vector<2x32xbf16>, vector<32x32xbf16>, vector<2x32xf32> -> vector<2x32xf32>
    %680 = arith.addf %678, %679 : vector<2x32xf32>
    %681 = math.tanh %680 : vector<2x32xf32>
    %682 = vector.extract_strided_slice %640 {offsets = [0, 0], sizes = [2, 32], strides = [1, 1]} : vector<16x32xf32> to vector<2x32xf32>
    %cst_240 = arith.constant dense<0.000000e+00> : vector<2x32xf32>
    %683 = tpu.matmul %661, %652, %cst_240 {dimension_numbers = #tpu.dot_dimension_numbers<[1], [0], [0], [1], [0, 0, 1, 1], [], []>} : vector<2x32xbf16>, vector<32x32xbf16>, vector<2x32xf32> -> vector<2x32xf32>
    %684 = arith.addf %682, %683 : vector<2x32xf32>
    %685 = arith.negf %684 : vector<2x32xf32>
    %686 = math.exp %685 : vector<2x32xf32>
    %cst_241 = arith.constant 1.000000e+00 : f32
    %687 = vector.broadcast %cst_241 : f32 to vector<2x32xf32>
    %688 = arith.addf %687, %686 : vector<2x32xf32>
    %689 = arith.divf %687, %688 : vector<2x32xf32>
    %690 = arith.mulf %677, %0 : vector<2x32xf32>
    %691 = arith.mulf %669, %681 : vector<2x32xf32>
    %692 = arith.addf %690, %691 : vector<2x32xf32>
    %693 = math.tanh %692 : vector<2x32xf32>
    %694 = arith.mulf %689, %693 : vector<2x32xf32>
    %695 = arith.truncf %0 : vector<2x32xf32> to vector<2x32xbf16>
    %696 = vector.extract_strided_slice %641 {offsets = [14, 0], sizes = [2, 32], strides = [1, 1]} : vector<16x32xf32> to vector<2x32xf32>
    %cst_242 = arith.constant dense<0.000000e+00> : vector<2x32xf32>
    %697 = tpu.matmul %695, %654, %cst_242 {dimension_numbers = #tpu.dot_dimension_numbers<[1], [0], [0], [1], [0, 0, 1, 1], [], []>} : vector<2x32xbf16>, vector<32x32xbf16>, vector<2x32xf32> -> vector<2x32xf32>
    %698 = arith.addf %696, %697 : vector<2x32xf32>
    %699 = arith.negf %698 : vector<2x32xf32>
    %700 = math.exp %699 : vector<2x32xf32>
    %cst_243 = arith.constant 1.000000e+00 : f32
    %701 = vector.broadcast %cst_243 : f32 to vector<2x32xf32>
    %702 = arith.addf %701, %700 : vector<2x32xf32>
    %703 = arith.divf %701, %702 : vector<2x32xf32>
    %704 = vector.extract_strided_slice %642 {offsets = [14, 0], sizes = [2, 32], strides = [1, 1]} : vector<16x32xf32> to vector<2x32xf32>
    %cst_244 = arith.constant dense<0.000000e+00> : vector<2x32xf32>
    %705 = tpu.matmul %695, %656, %cst_244 {dimension_numbers = #tpu.dot_dimension_numbers<[1], [0], [0], [1], [0, 0, 1, 1], [], []>} : vector<2x32xbf16>, vector<32x32xbf16>, vector<2x32xf32> -> vector<2x32xf32>
    %706 = arith.addf %704, %705 : vector<2x32xf32>
    %707 = arith.negf %706 : vector<2x32xf32>
    %708 = math.exp %707 : vector<2x32xf32>
    %cst_245 = arith.constant 1.000000e+00 : f32
    %709 = vector.broadcast %cst_245 : f32 to vector<2x32xf32>
    %710 = arith.addf %709, %708 : vector<2x32xf32>
    %711 = arith.divf %709, %710 : vector<2x32xf32>
    %712 = vector.extract_strided_slice %643 {offsets = [14, 0], sizes = [2, 32], strides = [1, 1]} : vector<16x32xf32> to vector<2x32xf32>
    %cst_246 = arith.constant dense<0.000000e+00> : vector<2x32xf32>
    %713 = tpu.matmul %695, %658, %cst_246 {dimension_numbers = #tpu.dot_dimension_numbers<[1], [0], [0], [1], [0, 0, 1, 1], [], []>} : vector<2x32xbf16>, vector<32x32xbf16>, vector<2x32xf32> -> vector<2x32xf32>
    %714 = arith.addf %712, %713 : vector<2x32xf32>
    %715 = math.tanh %714 : vector<2x32xf32>
    %716 = vector.extract_strided_slice %644 {offsets = [14, 0], sizes = [2, 32], strides = [1, 1]} : vector<16x32xf32> to vector<2x32xf32>
    %cst_247 = arith.constant dense<0.000000e+00> : vector<2x32xf32>
    %717 = tpu.matmul %695, %660, %cst_247 {dimension_numbers = #tpu.dot_dimension_numbers<[1], [0], [0], [1], [0, 0, 1, 1], [], []>} : vector<2x32xbf16>, vector<32x32xbf16>, vector<2x32xf32> -> vector<2x32xf32>
    %718 = arith.addf %716, %717 : vector<2x32xf32>
    %719 = arith.negf %718 : vector<2x32xf32>
    %720 = math.exp %719 : vector<2x32xf32>
    %cst_248 = arith.constant 1.000000e+00 : f32
    %721 = vector.broadcast %cst_248 : f32 to vector<2x32xf32>
    %722 = arith.addf %721, %720 : vector<2x32xf32>
    %723 = arith.divf %721, %722 : vector<2x32xf32>
    %724 = arith.mulf %711, %0 : vector<2x32xf32>
    %725 = arith.mulf %703, %715 : vector<2x32xf32>
    %726 = arith.addf %724, %725 : vector<2x32xf32>
    %727 = math.tanh %726 : vector<2x32xf32>
    %728 = arith.mulf %723, %727 : vector<2x32xf32>
    %729 = arith.truncf %694 : vector<2x32xf32> to vector<2x32xbf16>
    %730 = vector.extract_strided_slice %637 {offsets = [2, 0], sizes = [2, 32], strides = [1, 1]} : vector<16x32xf32> to vector<2x32xf32>
    %cst_249 = arith.constant dense<0.000000e+00> : vector<2x32xf32>
    %731 = tpu.matmul %729, %646, %cst_249 {dimension_numbers = #tpu.dot_dimension_numbers<[1], [0], [0], [1], [0, 0, 1, 1], [], []>} : vector<2x32xbf16>, vector<32x32xbf16>, vector<2x32xf32> -> vector<2x32xf32>
    %732 = arith.addf %730, %731 : vector<2x32xf32>
    %733 = arith.negf %732 : vector<2x32xf32>
    %734 = math.exp %733 : vector<2x32xf32>
    %cst_250 = arith.constant 1.000000e+00 : f32
    %735 = vector.broadcast %cst_250 : f32 to vector<2x32xf32>
    %736 = arith.addf %735, %734 : vector<2x32xf32>
    %737 = arith.divf %735, %736 : vector<2x32xf32>
    %738 = vector.extract_strided_slice %638 {offsets = [2, 0], sizes = [2, 32], strides = [1, 1]} : vector<16x32xf32> to vector<2x32xf32>
    %cst_251 = arith.constant dense<0.000000e+00> : vector<2x32xf32>
    %739 = tpu.matmul %729, %648, %cst_251 {dimension_numbers = #tpu.dot_dimension_numbers<[1], [0], [0], [1], [0, 0, 1, 1], [], []>} : vector<2x32xbf16>, vector<32x32xbf16>, vector<2x32xf32> -> vector<2x32xf32>
    %740 = arith.addf %738, %739 : vector<2x32xf32>
    %741 = arith.negf %740 : vector<2x32xf32>
    %742 = math.exp %741 : vector<2x32xf32>
    %cst_252 = arith.constant 1.000000e+00 : f32
    %743 = vector.broadcast %cst_252 : f32 to vector<2x32xf32>
    %744 = arith.addf %743, %742 : vector<2x32xf32>
    %745 = arith.divf %743, %744 : vector<2x32xf32>
    %746 = vector.extract_strided_slice %639 {offsets = [2, 0], sizes = [2, 32], strides = [1, 1]} : vector<16x32xf32> to vector<2x32xf32>
    %cst_253 = arith.constant dense<0.000000e+00> : vector<2x32xf32>
    %747 = tpu.matmul %729, %650, %cst_253 {dimension_numbers = #tpu.dot_dimension_numbers<[1], [0], [0], [1], [0, 0, 1, 1], [], []>} : vector<2x32xbf16>, vector<32x32xbf16>, vector<2x32xf32> -> vector<2x32xf32>
    %748 = arith.addf %746, %747 : vector<2x32xf32>
    %749 = math.tanh %748 : vector<2x32xf32>
    %750 = vector.extract_strided_slice %640 {offsets = [2, 0], sizes = [2, 32], strides = [1, 1]} : vector<16x32xf32> to vector<2x32xf32>
    %cst_254 = arith.constant dense<0.000000e+00> : vector<2x32xf32>
    %751 = tpu.matmul %729, %652, %cst_254 {dimension_numbers = #tpu.dot_dimension_numbers<[1], [0], [0], [1], [0, 0, 1, 1], [], []>} : vector<2x32xbf16>, vector<32x32xbf16>, vector<2x32xf32> -> vector<2x32xf32>
    %752 = arith.addf %750, %751 : vector<2x32xf32>
    %753 = arith.negf %752 : vector<2x32xf32>
    %754 = math.exp %753 : vector<2x32xf32>
    %cst_255 = arith.constant 1.000000e+00 : f32
    %755 = vector.broadcast %cst_255 : f32 to vector<2x32xf32>
    %756 = arith.addf %755, %754 : vector<2x32xf32>
    %757 = arith.divf %755, %756 : vector<2x32xf32>
    %758 = arith.mulf %745, %692 : vector<2x32xf32>
    %759 = arith.mulf %737, %749 : vector<2x32xf32>
    %760 = arith.addf %758, %759 : vector<2x32xf32>
    %761 = math.tanh %760 : vector<2x32xf32>
    %762 = arith.mulf %757, %761 : vector<2x32xf32>
    %763 = arith.truncf %728 : vector<2x32xf32> to vector<2x32xbf16>
    %764 = vector.extract_strided_slice %641 {offsets = [12, 0], sizes = [2, 32], strides = [1, 1]} : vector<16x32xf32> to vector<2x32xf32>
    %cst_256 = arith.constant dense<0.000000e+00> : vector<2x32xf32>
    %765 = tpu.matmul %763, %654, %cst_256 {dimension_numbers = #tpu.dot_dimension_numbers<[1], [0], [0], [1], [0, 0, 1, 1], [], []>} : vector<2x32xbf16>, vector<32x32xbf16>, vector<2x32xf32> -> vector<2x32xf32>
    %766 = arith.addf %764, %765 : vector<2x32xf32>
    %767 = arith.negf %766 : vector<2x32xf32>
    %768 = math.exp %767 : vector<2x32xf32>
    %cst_257 = arith.constant 1.000000e+00 : f32
    %769 = vector.broadcast %cst_257 : f32 to vector<2x32xf32>
    %770 = arith.addf %769, %768 : vector<2x32xf32>
    %771 = arith.divf %769, %770 : vector<2x32xf32>
    %772 = vector.extract_strided_slice %642 {offsets = [12, 0], sizes = [2, 32], strides = [1, 1]} : vector<16x32xf32> to vector<2x32xf32>
    %cst_258 = arith.constant dense<0.000000e+00> : vector<2x32xf32>
    %773 = tpu.matmul %763, %656, %cst_258 {dimension_numbers = #tpu.dot_dimension_numbers<[1], [0], [0], [1], [0, 0, 1, 1], [], []>} : vector<2x32xbf16>, vector<32x32xbf16>, vector<2x32xf32> -> vector<2x32xf32>
    %774 = arith.addf %772, %773 : vector<2x32xf32>
    %775 = arith.negf %774 : vector<2x32xf32>
    %776 = math.exp %775 : vector<2x32xf32>
    %cst_259 = arith.constant 1.000000e+00 : f32
    %777 = vector.broadcast %cst_259 : f32 to vector<2x32xf32>
    %778 = arith.addf %777, %776 : vector<2x32xf32>
    %779 = arith.divf %777, %778 : vector<2x32xf32>
    %780 = vector.extract_strided_slice %643 {offsets = [12, 0], sizes = [2, 32], strides = [1, 1]} : vector<16x32xf32> to vector<2x32xf32>
    %cst_260 = arith.constant dense<0.000000e+00> : vector<2x32xf32>
    %781 = tpu.matmul %763, %658, %cst_260 {dimension_numbers = #tpu.dot_dimension_numbers<[1], [0], [0], [1], [0, 0, 1, 1], [], []>} : vector<2x32xbf16>, vector<32x32xbf16>, vector<2x32xf32> -> vector<2x32xf32>
    %782 = arith.addf %780, %781 : vector<2x32xf32>
    %783 = math.tanh %782 : vector<2x32xf32>
    %784 = vector.extract_strided_slice %644 {offsets = [12, 0], sizes = [2, 32], strides = [1, 1]} : vector<16x32xf32> to vector<2x32xf32>
    %cst_261 = arith.constant dense<0.000000e+00> : vector<2x32xf32>
    %785 = tpu.matmul %763, %660, %cst_261 {dimension_numbers = #tpu.dot_dimension_numbers<[1], [0], [0], [1], [0, 0, 1, 1], [], []>} : vector<2x32xbf16>, vector<32x32xbf16>, vector<2x32xf32> -> vector<2x32xf32>
    %786 = arith.addf %784, %785 : vector<2x32xf32>
    %787 = arith.negf %786 : vector<2x32xf32>
    %788 = math.exp %787 : vector<2x32xf32>
    %cst_262 = arith.constant 1.000000e+00 : f32
    %789 = vector.broadcast %cst_262 : f32 to vector<2x32xf32>
    %790 = arith.addf %789, %788 : vector<2x32xf32>
    %791 = arith.divf %789, %790 : vector<2x32xf32>
    %792 = arith.mulf %779, %726 : vector<2x32xf32>
    %793 = arith.mulf %771, %783 : vector<2x32xf32>
    %794 = arith.addf %792, %793 : vector<2x32xf32>
    %795 = math.tanh %794 : vector<2x32xf32>
    %796 = arith.mulf %791, %795 : vector<2x32xf32>
    %797 = arith.truncf %762 : vector<2x32xf32> to vector<2x32xbf16>
    %798 = vector.extract_strided_slice %637 {offsets = [4, 0], sizes = [2, 32], strides = [1, 1]} : vector<16x32xf32> to vector<2x32xf32>
    %cst_263 = arith.constant dense<0.000000e+00> : vector<2x32xf32>
    %799 = tpu.matmul %797, %646, %cst_263 {dimension_numbers = #tpu.dot_dimension_numbers<[1], [0], [0], [1], [0, 0, 1, 1], [], []>} : vector<2x32xbf16>, vector<32x32xbf16>, vector<2x32xf32> -> vector<2x32xf32>
    %800 = arith.addf %798, %799 : vector<2x32xf32>
    %801 = arith.negf %800 : vector<2x32xf32>
    %802 = math.exp %801 : vector<2x32xf32>
    %cst_264 = arith.constant 1.000000e+00 : f32
    %803 = vector.broadcast %cst_264 : f32 to vector<2x32xf32>
    %804 = arith.addf %803, %802 : vector<2x32xf32>
    %805 = arith.divf %803, %804 : vector<2x32xf32>
    %806 = vector.extract_strided_slice %638 {offsets = [4, 0], sizes = [2, 32], strides = [1, 1]} : vector<16x32xf32> to vector<2x32xf32>
    %cst_265 = arith.constant dense<0.000000e+00> : vector<2x32xf32>
    %807 = tpu.matmul %797, %648, %cst_265 {dimension_numbers = #tpu.dot_dimension_numbers<[1], [0], [0], [1], [0, 0, 1, 1], [], []>} : vector<2x32xbf16>, vector<32x32xbf16>, vector<2x32xf32> -> vector<2x32xf32>
    %808 = arith.addf %806, %807 : vector<2x32xf32>
    %809 = arith.negf %808 : vector<2x32xf32>
    %810 = math.exp %809 : vector<2x32xf32>
    %cst_266 = arith.constant 1.000000e+00 : f32
    %811 = vector.broadcast %cst_266 : f32 to vector<2x32xf32>
    %812 = arith.addf %811, %810 : vector<2x32xf32>
    %813 = arith.divf %811, %812 : vector<2x32xf32>
    %814 = vector.extract_strided_slice %639 {offsets = [4, 0], sizes = [2, 32], strides = [1, 1]} : vector<16x32xf32> to vector<2x32xf32>
    %cst_267 = arith.constant dense<0.000000e+00> : vector<2x32xf32>
    %815 = tpu.matmul %797, %650, %cst_267 {dimension_numbers = #tpu.dot_dimension_numbers<[1], [0], [0], [1], [0, 0, 1, 1], [], []>} : vector<2x32xbf16>, vector<32x32xbf16>, vector<2x32xf32> -> vector<2x32xf32>
    %816 = arith.addf %814, %815 : vector<2x32xf32>
    %817 = math.tanh %816 : vector<2x32xf32>
    %818 = vector.extract_strided_slice %640 {offsets = [4, 0], sizes = [2, 32], strides = [1, 1]} : vector<16x32xf32> to vector<2x32xf32>
    %cst_268 = arith.constant dense<0.000000e+00> : vector<2x32xf32>
    %819 = tpu.matmul %797, %652, %cst_268 {dimension_numbers = #tpu.dot_dimension_numbers<[1], [0], [0], [1], [0, 0, 1, 1], [], []>} : vector<2x32xbf16>, vector<32x32xbf16>, vector<2x32xf32> -> vector<2x32xf32>
    %820 = arith.addf %818, %819 : vector<2x32xf32>
    %821 = arith.negf %820 : vector<2x32xf32>
    %822 = math.exp %821 : vector<2x32xf32>
    %cst_269 = arith.constant 1.000000e+00 : f32
    %823 = vector.broadcast %cst_269 : f32 to vector<2x32xf32>
    %824 = arith.addf %823, %822 : vector<2x32xf32>
    %825 = arith.divf %823, %824 : vector<2x32xf32>
    %826 = arith.mulf %813, %760 : vector<2x32xf32>
    %827 = arith.mulf %805, %817 : vector<2x32xf32>
    %828 = arith.addf %826, %827 : vector<2x32xf32>
    %829 = math.tanh %828 : vector<2x32xf32>
    %830 = arith.mulf %825, %829 : vector<2x32xf32>
    %831 = arith.truncf %796 : vector<2x32xf32> to vector<2x32xbf16>
    %832 = vector.extract_strided_slice %641 {offsets = [10, 0], sizes = [2, 32], strides = [1, 1]} : vector<16x32xf32> to vector<2x32xf32>
    %cst_270 = arith.constant dense<0.000000e+00> : vector<2x32xf32>
    %833 = tpu.matmul %831, %654, %cst_270 {dimension_numbers = #tpu.dot_dimension_numbers<[1], [0], [0], [1], [0, 0, 1, 1], [], []>} : vector<2x32xbf16>, vector<32x32xbf16>, vector<2x32xf32> -> vector<2x32xf32>
    %834 = arith.addf %832, %833 : vector<2x32xf32>
    %835 = arith.negf %834 : vector<2x32xf32>
    %836 = math.exp %835 : vector<2x32xf32>
    %cst_271 = arith.constant 1.000000e+00 : f32
    %837 = vector.broadcast %cst_271 : f32 to vector<2x32xf32>
    %838 = arith.addf %837, %836 : vector<2x32xf32>
    %839 = arith.divf %837, %838 : vector<2x32xf32>
    %840 = vector.extract_strided_slice %642 {offsets = [10, 0], sizes = [2, 32], strides = [1, 1]} : vector<16x32xf32> to vector<2x32xf32>
    %cst_272 = arith.constant dense<0.000000e+00> : vector<2x32xf32>
    %841 = tpu.matmul %831, %656, %cst_272 {dimension_numbers = #tpu.dot_dimension_numbers<[1], [0], [0], [1], [0, 0, 1, 1], [], []>} : vector<2x32xbf16>, vector<32x32xbf16>, vector<2x32xf32> -> vector<2x32xf32>
    %842 = arith.addf %840, %841 : vector<2x32xf32>
    %843 = arith.negf %842 : vector<2x32xf32>
    %844 = math.exp %843 : vector<2x32xf32>
    %cst_273 = arith.constant 1.000000e+00 : f32
    %845 = vector.broadcast %cst_273 : f32 to vector<2x32xf32>
    %846 = arith.addf %845, %844 : vector<2x32xf32>
    %847 = arith.divf %845, %846 : vector<2x32xf32>
    %848 = vector.extract_strided_slice %643 {offsets = [10, 0], sizes = [2, 32], strides = [1, 1]} : vector<16x32xf32> to vector<2x32xf32>
    %cst_274 = arith.constant dense<0.000000e+00> : vector<2x32xf32>
    %849 = tpu.matmul %831, %658, %cst_274 {dimension_numbers = #tpu.dot_dimension_numbers<[1], [0], [0], [1], [0, 0, 1, 1], [], []>} : vector<2x32xbf16>, vector<32x32xbf16>, vector<2x32xf32> -> vector<2x32xf32>
    %850 = arith.addf %848, %849 : vector<2x32xf32>
    %851 = math.tanh %850 : vector<2x32xf32>
    %852 = vector.extract_strided_slice %644 {offsets = [10, 0], sizes = [2, 32], strides = [1, 1]} : vector<16x32xf32> to vector<2x32xf32>
    %cst_275 = arith.constant dense<0.000000e+00> : vector<2x32xf32>
    %853 = tpu.matmul %831, %660, %cst_275 {dimension_numbers = #tpu.dot_dimension_numbers<[1], [0], [0], [1], [0, 0, 1, 1], [], []>} : vector<2x32xbf16>, vector<32x32xbf16>, vector<2x32xf32> -> vector<2x32xf32>
    %854 = arith.addf %852, %853 : vector<2x32xf32>
    %855 = arith.negf %854 : vector<2x32xf32>
    %856 = math.exp %855 : vector<2x32xf32>
    %cst_276 = arith.constant 1.000000e+00 : f32
    %857 = vector.broadcast %cst_276 : f32 to vector<2x32xf32>
    %858 = arith.addf %857, %856 : vector<2x32xf32>
    %859 = arith.divf %857, %858 : vector<2x32xf32>
    %860 = arith.mulf %847, %794 : vector<2x32xf32>
    %861 = arith.mulf %839, %851 : vector<2x32xf32>
    %862 = arith.addf %860, %861 : vector<2x32xf32>
    %863 = math.tanh %862 : vector<2x32xf32>
    %864 = arith.mulf %859, %863 : vector<2x32xf32>
    %865 = arith.truncf %830 : vector<2x32xf32> to vector<2x32xbf16>
    %866 = vector.extract_strided_slice %637 {offsets = [6, 0], sizes = [2, 32], strides = [1, 1]} : vector<16x32xf32> to vector<2x32xf32>
    %cst_277 = arith.constant dense<0.000000e+00> : vector<2x32xf32>
    %867 = tpu.matmul %865, %646, %cst_277 {dimension_numbers = #tpu.dot_dimension_numbers<[1], [0], [0], [1], [0, 0, 1, 1], [], []>} : vector<2x32xbf16>, vector<32x32xbf16>, vector<2x32xf32> -> vector<2x32xf32>
    %868 = arith.addf %866, %867 : vector<2x32xf32>
    %869 = arith.negf %868 : vector<2x32xf32>
    %870 = math.exp %869 : vector<2x32xf32>
    %cst_278 = arith.constant 1.000000e+00 : f32
    %871 = vector.broadcast %cst_278 : f32 to vector<2x32xf32>
    %872 = arith.addf %871, %870 : vector<2x32xf32>
    %873 = arith.divf %871, %872 : vector<2x32xf32>
    %874 = vector.extract_strided_slice %638 {offsets = [6, 0], sizes = [2, 32], strides = [1, 1]} : vector<16x32xf32> to vector<2x32xf32>
    %cst_279 = arith.constant dense<0.000000e+00> : vector<2x32xf32>
    %875 = tpu.matmul %865, %648, %cst_279 {dimension_numbers = #tpu.dot_dimension_numbers<[1], [0], [0], [1], [0, 0, 1, 1], [], []>} : vector<2x32xbf16>, vector<32x32xbf16>, vector<2x32xf32> -> vector<2x32xf32>
    %876 = arith.addf %874, %875 : vector<2x32xf32>
    %877 = arith.negf %876 : vector<2x32xf32>
    %878 = math.exp %877 : vector<2x32xf32>
    %cst_280 = arith.constant 1.000000e+00 : f32
    %879 = vector.broadcast %cst_280 : f32 to vector<2x32xf32>
    %880 = arith.addf %879, %878 : vector<2x32xf32>
    %881 = arith.divf %879, %880 : vector<2x32xf32>
    %882 = vector.extract_strided_slice %639 {offsets = [6, 0], sizes = [2, 32], strides = [1, 1]} : vector<16x32xf32> to vector<2x32xf32>
    %cst_281 = arith.constant dense<0.000000e+00> : vector<2x32xf32>
    %883 = tpu.matmul %865, %650, %cst_281 {dimension_numbers = #tpu.dot_dimension_numbers<[1], [0], [0], [1], [0, 0, 1, 1], [], []>} : vector<2x32xbf16>, vector<32x32xbf16>, vector<2x32xf32> -> vector<2x32xf32>
    %884 = arith.addf %882, %883 : vector<2x32xf32>
    %885 = math.tanh %884 : vector<2x32xf32>
    %886 = vector.extract_strided_slice %640 {offsets = [6, 0], sizes = [2, 32], strides = [1, 1]} : vector<16x32xf32> to vector<2x32xf32>
    %cst_282 = arith.constant dense<0.000000e+00> : vector<2x32xf32>
    %887 = tpu.matmul %865, %652, %cst_282 {dimension_numbers = #tpu.dot_dimension_numbers<[1], [0], [0], [1], [0, 0, 1, 1], [], []>} : vector<2x32xbf16>, vector<32x32xbf16>, vector<2x32xf32> -> vector<2x32xf32>
    %888 = arith.addf %886, %887 : vector<2x32xf32>
    %889 = arith.negf %888 : vector<2x32xf32>
    %890 = math.exp %889 : vector<2x32xf32>
    %cst_283 = arith.constant 1.000000e+00 : f32
    %891 = vector.broadcast %cst_283 : f32 to vector<2x32xf32>
    %892 = arith.addf %891, %890 : vector<2x32xf32>
    %893 = arith.divf %891, %892 : vector<2x32xf32>
    %894 = arith.mulf %881, %828 : vector<2x32xf32>
    %895 = arith.mulf %873, %885 : vector<2x32xf32>
    %896 = arith.addf %894, %895 : vector<2x32xf32>
    %897 = math.tanh %896 : vector<2x32xf32>
    %898 = arith.mulf %893, %897 : vector<2x32xf32>
    %899 = arith.truncf %864 : vector<2x32xf32> to vector<2x32xbf16>
    %900 = vector.extract_strided_slice %641 {offsets = [8, 0], sizes = [2, 32], strides = [1, 1]} : vector<16x32xf32> to vector<2x32xf32>
    %cst_284 = arith.constant dense<0.000000e+00> : vector<2x32xf32>
    %901 = tpu.matmul %899, %654, %cst_284 {dimension_numbers = #tpu.dot_dimension_numbers<[1], [0], [0], [1], [0, 0, 1, 1], [], []>} : vector<2x32xbf16>, vector<32x32xbf16>, vector<2x32xf32> -> vector<2x32xf32>
    %902 = arith.addf %900, %901 : vector<2x32xf32>
    %903 = arith.negf %902 : vector<2x32xf32>
    %904 = math.exp %903 : vector<2x32xf32>
    %cst_285 = arith.constant 1.000000e+00 : f32
    %905 = vector.broadcast %cst_285 : f32 to vector<2x32xf32>
    %906 = arith.addf %905, %904 : vector<2x32xf32>
    %907 = arith.divf %905, %906 : vector<2x32xf32>
    %908 = vector.extract_strided_slice %642 {offsets = [8, 0], sizes = [2, 32], strides = [1, 1]} : vector<16x32xf32> to vector<2x32xf32>
    %cst_286 = arith.constant dense<0.000000e+00> : vector<2x32xf32>
    %909 = tpu.matmul %899, %656, %cst_286 {dimension_numbers = #tpu.dot_dimension_numbers<[1], [0], [0], [1], [0, 0, 1, 1], [], []>} : vector<2x32xbf16>, vector<32x32xbf16>, vector<2x32xf32> -> vector<2x32xf32>
    %910 = arith.addf %908, %909 : vector<2x32xf32>
    %911 = arith.negf %910 : vector<2x32xf32>
    %912 = math.exp %911 : vector<2x32xf32>
    %cst_287 = arith.constant 1.000000e+00 : f32
    %913 = vector.broadcast %cst_287 : f32 to vector<2x32xf32>
    %914 = arith.addf %913, %912 : vector<2x32xf32>
    %915 = arith.divf %913, %914 : vector<2x32xf32>
    %916 = vector.extract_strided_slice %643 {offsets = [8, 0], sizes = [2, 32], strides = [1, 1]} : vector<16x32xf32> to vector<2x32xf32>
    %cst_288 = arith.constant dense<0.000000e+00> : vector<2x32xf32>
    %917 = tpu.matmul %899, %658, %cst_288 {dimension_numbers = #tpu.dot_dimension_numbers<[1], [0], [0], [1], [0, 0, 1, 1], [], []>} : vector<2x32xbf16>, vector<32x32xbf16>, vector<2x32xf32> -> vector<2x32xf32>
    %918 = arith.addf %916, %917 : vector<2x32xf32>
    %919 = math.tanh %918 : vector<2x32xf32>
    %920 = vector.extract_strided_slice %644 {offsets = [8, 0], sizes = [2, 32], strides = [1, 1]} : vector<16x32xf32> to vector<2x32xf32>
    %cst_289 = arith.constant dense<0.000000e+00> : vector<2x32xf32>
    %921 = tpu.matmul %899, %660, %cst_289 {dimension_numbers = #tpu.dot_dimension_numbers<[1], [0], [0], [1], [0, 0, 1, 1], [], []>} : vector<2x32xbf16>, vector<32x32xbf16>, vector<2x32xf32> -> vector<2x32xf32>
    %922 = arith.addf %920, %921 : vector<2x32xf32>
    %923 = arith.negf %922 : vector<2x32xf32>
    %924 = math.exp %923 : vector<2x32xf32>
    %cst_290 = arith.constant 1.000000e+00 : f32
    %925 = vector.broadcast %cst_290 : f32 to vector<2x32xf32>
    %926 = arith.addf %925, %924 : vector<2x32xf32>
    %927 = arith.divf %925, %926 : vector<2x32xf32>
    %928 = arith.mulf %915, %862 : vector<2x32xf32>
    %929 = arith.mulf %907, %919 : vector<2x32xf32>
    %930 = arith.addf %928, %929 : vector<2x32xf32>
    %931 = math.tanh %930 : vector<2x32xf32>
    %932 = arith.mulf %927, %931 : vector<2x32xf32>
    %933 = arith.truncf %898 : vector<2x32xf32> to vector<2x32xbf16>
    %934 = vector.extract_strided_slice %637 {offsets = [8, 0], sizes = [2, 32], strides = [1, 1]} : vector<16x32xf32> to vector<2x32xf32>
    %cst_291 = arith.constant dense<0.000000e+00> : vector<2x32xf32>
    %935 = tpu.matmul %933, %646, %cst_291 {dimension_numbers = #tpu.dot_dimension_numbers<[1], [0], [0], [1], [0, 0, 1, 1], [], []>} : vector<2x32xbf16>, vector<32x32xbf16>, vector<2x32xf32> -> vector<2x32xf32>
    %936 = arith.addf %934, %935 : vector<2x32xf32>
    %937 = arith.negf %936 : vector<2x32xf32>
    %938 = math.exp %937 : vector<2x32xf32>
    %cst_292 = arith.constant 1.000000e+00 : f32
    %939 = vector.broadcast %cst_292 : f32 to vector<2x32xf32>
    %940 = arith.addf %939, %938 : vector<2x32xf32>
    %941 = arith.divf %939, %940 : vector<2x32xf32>
    %942 = vector.extract_strided_slice %638 {offsets = [8, 0], sizes = [2, 32], strides = [1, 1]} : vector<16x32xf32> to vector<2x32xf32>
    %cst_293 = arith.constant dense<0.000000e+00> : vector<2x32xf32>
    %943 = tpu.matmul %933, %648, %cst_293 {dimension_numbers = #tpu.dot_dimension_numbers<[1], [0], [0], [1], [0, 0, 1, 1], [], []>} : vector<2x32xbf16>, vector<32x32xbf16>, vector<2x32xf32> -> vector<2x32xf32>
    %944 = arith.addf %942, %943 : vector<2x32xf32>
    %945 = arith.negf %944 : vector<2x32xf32>
    %946 = math.exp %945 : vector<2x32xf32>
    %cst_294 = arith.constant 1.000000e+00 : f32
    %947 = vector.broadcast %cst_294 : f32 to vector<2x32xf32>
    %948 = arith.addf %947, %946 : vector<2x32xf32>
    %949 = arith.divf %947, %948 : vector<2x32xf32>
    %950 = vector.extract_strided_slice %639 {offsets = [8, 0], sizes = [2, 32], strides = [1, 1]} : vector<16x32xf32> to vector<2x32xf32>
    %cst_295 = arith.constant dense<0.000000e+00> : vector<2x32xf32>
    %951 = tpu.matmul %933, %650, %cst_295 {dimension_numbers = #tpu.dot_dimension_numbers<[1], [0], [0], [1], [0, 0, 1, 1], [], []>} : vector<2x32xbf16>, vector<32x32xbf16>, vector<2x32xf32> -> vector<2x32xf32>
    %952 = arith.addf %950, %951 : vector<2x32xf32>
    %953 = math.tanh %952 : vector<2x32xf32>
    %954 = vector.extract_strided_slice %640 {offsets = [8, 0], sizes = [2, 32], strides = [1, 1]} : vector<16x32xf32> to vector<2x32xf32>
    %cst_296 = arith.constant dense<0.000000e+00> : vector<2x32xf32>
    %955 = tpu.matmul %933, %652, %cst_296 {dimension_numbers = #tpu.dot_dimension_numbers<[1], [0], [0], [1], [0, 0, 1, 1], [], []>} : vector<2x32xbf16>, vector<32x32xbf16>, vector<2x32xf32> -> vector<2x32xf32>
    %956 = arith.addf %954, %955 : vector<2x32xf32>
    %957 = arith.negf %956 : vector<2x32xf32>
    %958 = math.exp %957 : vector<2x32xf32>
    %cst_297 = arith.constant 1.000000e+00 : f32
    %959 = vector.broadcast %cst_297 : f32 to vector<2x32xf32>
    %960 = arith.addf %959, %958 : vector<2x32xf32>
    %961 = arith.divf %959, %960 : vector<2x32xf32>
    %962 = arith.mulf %949, %896 : vector<2x32xf32>
    %963 = arith.mulf %941, %953 : vector<2x32xf32>
    %964 = arith.addf %962, %963 : vector<2x32xf32>
    %965 = math.tanh %964 : vector<2x32xf32>
    %966 = arith.mulf %961, %965 : vector<2x32xf32>
    %967 = arith.truncf %932 : vector<2x32xf32> to vector<2x32xbf16>
    %968 = vector.extract_strided_slice %641 {offsets = [6, 0], sizes = [2, 32], strides = [1, 1]} : vector<16x32xf32> to vector<2x32xf32>
    %cst_298 = arith.constant dense<0.000000e+00> : vector<2x32xf32>
    %969 = tpu.matmul %967, %654, %cst_298 {dimension_numbers = #tpu.dot_dimension_numbers<[1], [0], [0], [1], [0, 0, 1, 1], [], []>} : vector<2x32xbf16>, vector<32x32xbf16>, vector<2x32xf32> -> vector<2x32xf32>
    %970 = arith.addf %968, %969 : vector<2x32xf32>
    %971 = arith.negf %970 : vector<2x32xf32>
    %972 = math.exp %971 : vector<2x32xf32>
    %cst_299 = arith.constant 1.000000e+00 : f32
    %973 = vector.broadcast %cst_299 : f32 to vector<2x32xf32>
    %974 = arith.addf %973, %972 : vector<2x32xf32>
    %975 = arith.divf %973, %974 : vector<2x32xf32>
    %976 = vector.extract_strided_slice %642 {offsets = [6, 0], sizes = [2, 32], strides = [1, 1]} : vector<16x32xf32> to vector<2x32xf32>
    %cst_300 = arith.constant dense<0.000000e+00> : vector<2x32xf32>
    %977 = tpu.matmul %967, %656, %cst_300 {dimension_numbers = #tpu.dot_dimension_numbers<[1], [0], [0], [1], [0, 0, 1, 1], [], []>} : vector<2x32xbf16>, vector<32x32xbf16>, vector<2x32xf32> -> vector<2x32xf32>
    %978 = arith.addf %976, %977 : vector<2x32xf32>
    %979 = arith.negf %978 : vector<2x32xf32>
    %980 = math.exp %979 : vector<2x32xf32>
    %cst_301 = arith.constant 1.000000e+00 : f32
    %981 = vector.broadcast %cst_301 : f32 to vector<2x32xf32>
    %982 = arith.addf %981, %980 : vector<2x32xf32>
    %983 = arith.divf %981, %982 : vector<2x32xf32>
    %984 = vector.extract_strided_slice %643 {offsets = [6, 0], sizes = [2, 32], strides = [1, 1]} : vector<16x32xf32> to vector<2x32xf32>
    %cst_302 = arith.constant dense<0.000000e+00> : vector<2x32xf32>
    %985 = tpu.matmul %967, %658, %cst_302 {dimension_numbers = #tpu.dot_dimension_numbers<[1], [0], [0], [1], [0, 0, 1, 1], [], []>} : vector<2x32xbf16>, vector<32x32xbf16>, vector<2x32xf32> -> vector<2x32xf32>
    %986 = arith.addf %984, %985 : vector<2x32xf32>
    %987 = math.tanh %986 : vector<2x32xf32>
    %988 = vector.extract_strided_slice %644 {offsets = [6, 0], sizes = [2, 32], strides = [1, 1]} : vector<16x32xf32> to vector<2x32xf32>
    %cst_303 = arith.constant dense<0.000000e+00> : vector<2x32xf32>
    %989 = tpu.matmul %967, %660, %cst_303 {dimension_numbers = #tpu.dot_dimension_numbers<[1], [0], [0], [1], [0, 0, 1, 1], [], []>} : vector<2x32xbf16>, vector<32x32xbf16>, vector<2x32xf32> -> vector<2x32xf32>
    %990 = arith.addf %988, %989 : vector<2x32xf32>
    %991 = arith.negf %990 : vector<2x32xf32>
    %992 = math.exp %991 : vector<2x32xf32>
    %cst_304 = arith.constant 1.000000e+00 : f32
    %993 = vector.broadcast %cst_304 : f32 to vector<2x32xf32>
    %994 = arith.addf %993, %992 : vector<2x32xf32>
    %995 = arith.divf %993, %994 : vector<2x32xf32>
    %996 = arith.mulf %983, %930 : vector<2x32xf32>
    %997 = arith.mulf %975, %987 : vector<2x32xf32>
    %998 = arith.addf %996, %997 : vector<2x32xf32>
    %999 = math.tanh %998 : vector<2x32xf32>
    %1000 = arith.mulf %995, %999 : vector<2x32xf32>
    %1001 = arith.truncf %966 : vector<2x32xf32> to vector<2x32xbf16>
    %1002 = vector.extract_strided_slice %637 {offsets = [10, 0], sizes = [2, 32], strides = [1, 1]} : vector<16x32xf32> to vector<2x32xf32>
    %cst_305 = arith.constant dense<0.000000e+00> : vector<2x32xf32>
    %1003 = tpu.matmul %1001, %646, %cst_305 {dimension_numbers = #tpu.dot_dimension_numbers<[1], [0], [0], [1], [0, 0, 1, 1], [], []>} : vector<2x32xbf16>, vector<32x32xbf16>, vector<2x32xf32> -> vector<2x32xf32>
    %1004 = arith.addf %1002, %1003 : vector<2x32xf32>
    %1005 = arith.negf %1004 : vector<2x32xf32>
    %1006 = math.exp %1005 : vector<2x32xf32>
    %cst_306 = arith.constant 1.000000e+00 : f32
    %1007 = vector.broadcast %cst_306 : f32 to vector<2x32xf32>
    %1008 = arith.addf %1007, %1006 : vector<2x32xf32>
    %1009 = arith.divf %1007, %1008 : vector<2x32xf32>
    %1010 = vector.extract_strided_slice %638 {offsets = [10, 0], sizes = [2, 32], strides = [1, 1]} : vector<16x32xf32> to vector<2x32xf32>
    %cst_307 = arith.constant dense<0.000000e+00> : vector<2x32xf32>
    %1011 = tpu.matmul %1001, %648, %cst_307 {dimension_numbers = #tpu.dot_dimension_numbers<[1], [0], [0], [1], [0, 0, 1, 1], [], []>} : vector<2x32xbf16>, vector<32x32xbf16>, vector<2x32xf32> -> vector<2x32xf32>
    %1012 = arith.addf %1010, %1011 : vector<2x32xf32>
    %1013 = arith.negf %1012 : vector<2x32xf32>
    %1014 = math.exp %1013 : vector<2x32xf32>
    %cst_308 = arith.constant 1.000000e+00 : f32
    %1015 = vector.broadcast %cst_308 : f32 to vector<2x32xf32>
    %1016 = arith.addf %1015, %1014 : vector<2x32xf32>
    %1017 = arith.divf %1015, %1016 : vector<2x32xf32>
    %1018 = vector.extract_strided_slice %639 {offsets = [10, 0], sizes = [2, 32], strides = [1, 1]} : vector<16x32xf32> to vector<2x32xf32>
    %cst_309 = arith.constant dense<0.000000e+00> : vector<2x32xf32>
    %1019 = tpu.matmul %1001, %650, %cst_309 {dimension_numbers = #tpu.dot_dimension_numbers<[1], [0], [0], [1], [0, 0, 1, 1], [], []>} : vector<2x32xbf16>, vector<32x32xbf16>, vector<2x32xf32> -> vector<2x32xf32>
    %1020 = arith.addf %1018, %1019 : vector<2x32xf32>
    %1021 = math.tanh %1020 : vector<2x32xf32>
    %1022 = vector.extract_strided_slice %640 {offsets = [10, 0], sizes = [2, 32], strides = [1, 1]} : vector<16x32xf32> to vector<2x32xf32>
    %cst_310 = arith.constant dense<0.000000e+00> : vector<2x32xf32>
    %1023 = tpu.matmul %1001, %652, %cst_310 {dimension_numbers = #tpu.dot_dimension_numbers<[1], [0], [0], [1], [0, 0, 1, 1], [], []>} : vector<2x32xbf16>, vector<32x32xbf16>, vector<2x32xf32> -> vector<2x32xf32>
    %1024 = arith.addf %1022, %1023 : vector<2x32xf32>
    %1025 = arith.negf %1024 : vector<2x32xf32>
    %1026 = math.exp %1025 : vector<2x32xf32>
    %cst_311 = arith.constant 1.000000e+00 : f32
    %1027 = vector.broadcast %cst_311 : f32 to vector<2x32xf32>
    %1028 = arith.addf %1027, %1026 : vector<2x32xf32>
    %1029 = arith.divf %1027, %1028 : vector<2x32xf32>
    %1030 = arith.mulf %1017, %964 : vector<2x32xf32>
    %1031 = arith.mulf %1009, %1021 : vector<2x32xf32>
    %1032 = arith.addf %1030, %1031 : vector<2x32xf32>
    %1033 = math.tanh %1032 : vector<2x32xf32>
    %1034 = arith.mulf %1029, %1033 : vector<2x32xf32>
    %1035 = arith.truncf %1000 : vector<2x32xf32> to vector<2x32xbf16>
    %1036 = vector.extract_strided_slice %641 {offsets = [4, 0], sizes = [2, 32], strides = [1, 1]} : vector<16x32xf32> to vector<2x32xf32>
    %cst_312 = arith.constant dense<0.000000e+00> : vector<2x32xf32>
    %1037 = tpu.matmul %1035, %654, %cst_312 {dimension_numbers = #tpu.dot_dimension_numbers<[1], [0], [0], [1], [0, 0, 1, 1], [], []>} : vector<2x32xbf16>, vector<32x32xbf16>, vector<2x32xf32> -> vector<2x32xf32>
    %1038 = arith.addf %1036, %1037 : vector<2x32xf32>
    %1039 = arith.negf %1038 : vector<2x32xf32>
    %1040 = math.exp %1039 : vector<2x32xf32>
    %cst_313 = arith.constant 1.000000e+00 : f32
    %1041 = vector.broadcast %cst_313 : f32 to vector<2x32xf32>
    %1042 = arith.addf %1041, %1040 : vector<2x32xf32>
    %1043 = arith.divf %1041, %1042 : vector<2x32xf32>
    %1044 = vector.extract_strided_slice %642 {offsets = [4, 0], sizes = [2, 32], strides = [1, 1]} : vector<16x32xf32> to vector<2x32xf32>
    %cst_314 = arith.constant dense<0.000000e+00> : vector<2x32xf32>
    %1045 = tpu.matmul %1035, %656, %cst_314 {dimension_numbers = #tpu.dot_dimension_numbers<[1], [0], [0], [1], [0, 0, 1, 1], [], []>} : vector<2x32xbf16>, vector<32x32xbf16>, vector<2x32xf32> -> vector<2x32xf32>
    %1046 = arith.addf %1044, %1045 : vector<2x32xf32>
    %1047 = arith.negf %1046 : vector<2x32xf32>
    %1048 = math.exp %1047 : vector<2x32xf32>
    %cst_315 = arith.constant 1.000000e+00 : f32
    %1049 = vector.broadcast %cst_315 : f32 to vector<2x32xf32>
    %1050 = arith.addf %1049, %1048 : vector<2x32xf32>
    %1051 = arith.divf %1049, %1050 : vector<2x32xf32>
    %1052 = vector.extract_strided_slice %643 {offsets = [4, 0], sizes = [2, 32], strides = [1, 1]} : vector<16x32xf32> to vector<2x32xf32>
    %cst_316 = arith.constant dense<0.000000e+00> : vector<2x32xf32>
    %1053 = tpu.matmul %1035, %658, %cst_316 {dimension_numbers = #tpu.dot_dimension_numbers<[1], [0], [0], [1], [0, 0, 1, 1], [], []>} : vector<2x32xbf16>, vector<32x32xbf16>, vector<2x32xf32> -> vector<2x32xf32>
    %1054 = arith.addf %1052, %1053 : vector<2x32xf32>
    %1055 = math.tanh %1054 : vector<2x32xf32>
    %1056 = vector.extract_strided_slice %644 {offsets = [4, 0], sizes = [2, 32], strides = [1, 1]} : vector<16x32xf32> to vector<2x32xf32>
    %cst_317 = arith.constant dense<0.000000e+00> : vector<2x32xf32>
    %1057 = tpu.matmul %1035, %660, %cst_317 {dimension_numbers = #tpu.dot_dimension_numbers<[1], [0], [0], [1], [0, 0, 1, 1], [], []>} : vector<2x32xbf16>, vector<32x32xbf16>, vector<2x32xf32> -> vector<2x32xf32>
    %1058 = arith.addf %1056, %1057 : vector<2x32xf32>
    %1059 = arith.negf %1058 : vector<2x32xf32>
    %1060 = math.exp %1059 : vector<2x32xf32>
    %cst_318 = arith.constant 1.000000e+00 : f32
    %1061 = vector.broadcast %cst_318 : f32 to vector<2x32xf32>
    %1062 = arith.addf %1061, %1060 : vector<2x32xf32>
    %1063 = arith.divf %1061, %1062 : vector<2x32xf32>
    %1064 = arith.mulf %1051, %998 : vector<2x32xf32>
    %1065 = arith.mulf %1043, %1055 : vector<2x32xf32>
    %1066 = arith.addf %1064, %1065 : vector<2x32xf32>
    %1067 = math.tanh %1066 : vector<2x32xf32>
    %1068 = arith.mulf %1063, %1067 : vector<2x32xf32>
    %1069 = arith.truncf %1034 : vector<2x32xf32> to vector<2x32xbf16>
    %1070 = vector.extract_strided_slice %637 {offsets = [12, 0], sizes = [2, 32], strides = [1, 1]} : vector<16x32xf32> to vector<2x32xf32>
    %cst_319 = arith.constant dense<0.000000e+00> : vector<2x32xf32>
    %1071 = tpu.matmul %1069, %646, %cst_319 {dimension_numbers = #tpu.dot_dimension_numbers<[1], [0], [0], [1], [0, 0, 1, 1], [], []>} : vector<2x32xbf16>, vector<32x32xbf16>, vector<2x32xf32> -> vector<2x32xf32>
    %1072 = arith.addf %1070, %1071 : vector<2x32xf32>
    %1073 = arith.negf %1072 : vector<2x32xf32>
    %1074 = math.exp %1073 : vector<2x32xf32>
    %cst_320 = arith.constant 1.000000e+00 : f32
    %1075 = vector.broadcast %cst_320 : f32 to vector<2x32xf32>
    %1076 = arith.addf %1075, %1074 : vector<2x32xf32>
    %1077 = arith.divf %1075, %1076 : vector<2x32xf32>
    %1078 = vector.extract_strided_slice %638 {offsets = [12, 0], sizes = [2, 32], strides = [1, 1]} : vector<16x32xf32> to vector<2x32xf32>
    %cst_321 = arith.constant dense<0.000000e+00> : vector<2x32xf32>
    %1079 = tpu.matmul %1069, %648, %cst_321 {dimension_numbers = #tpu.dot_dimension_numbers<[1], [0], [0], [1], [0, 0, 1, 1], [], []>} : vector<2x32xbf16>, vector<32x32xbf16>, vector<2x32xf32> -> vector<2x32xf32>
    %1080 = arith.addf %1078, %1079 : vector<2x32xf32>
    %1081 = arith.negf %1080 : vector<2x32xf32>
    %1082 = math.exp %1081 : vector<2x32xf32>
    %cst_322 = arith.constant 1.000000e+00 : f32
    %1083 = vector.broadcast %cst_322 : f32 to vector<2x32xf32>
    %1084 = arith.addf %1083, %1082 : vector<2x32xf32>
    %1085 = arith.divf %1083, %1084 : vector<2x32xf32>
    %1086 = vector.extract_strided_slice %639 {offsets = [12, 0], sizes = [2, 32], strides = [1, 1]} : vector<16x32xf32> to vector<2x32xf32>
    %cst_323 = arith.constant dense<0.000000e+00> : vector<2x32xf32>
    %1087 = tpu.matmul %1069, %650, %cst_323 {dimension_numbers = #tpu.dot_dimension_numbers<[1], [0], [0], [1], [0, 0, 1, 1], [], []>} : vector<2x32xbf16>, vector<32x32xbf16>, vector<2x32xf32> -> vector<2x32xf32>
    %1088 = arith.addf %1086, %1087 : vector<2x32xf32>
    %1089 = math.tanh %1088 : vector<2x32xf32>
    %1090 = vector.extract_strided_slice %640 {offsets = [12, 0], sizes = [2, 32], strides = [1, 1]} : vector<16x32xf32> to vector<2x32xf32>
    %cst_324 = arith.constant dense<0.000000e+00> : vector<2x32xf32>
    %1091 = tpu.matmul %1069, %652, %cst_324 {dimension_numbers = #tpu.dot_dimension_numbers<[1], [0], [0], [1], [0, 0, 1, 1], [], []>} : vector<2x32xbf16>, vector<32x32xbf16>, vector<2x32xf32> -> vector<2x32xf32>
    %1092 = arith.addf %1090, %1091 : vector<2x32xf32>
    %1093 = arith.negf %1092 : vector<2x32xf32>
    %1094 = math.exp %1093 : vector<2x32xf32>
    %cst_325 = arith.constant 1.000000e+00 : f32
    %1095 = vector.broadcast %cst_325 : f32 to vector<2x32xf32>
    %1096 = arith.addf %1095, %1094 : vector<2x32xf32>
    %1097 = arith.divf %1095, %1096 : vector<2x32xf32>
    %1098 = arith.mulf %1085, %1032 : vector<2x32xf32>
    %1099 = arith.mulf %1077, %1089 : vector<2x32xf32>
    %1100 = arith.addf %1098, %1099 : vector<2x32xf32>
    %1101 = math.tanh %1100 : vector<2x32xf32>
    %1102 = arith.mulf %1097, %1101 : vector<2x32xf32>
    %1103 = arith.truncf %1068 : vector<2x32xf32> to vector<2x32xbf16>
    %1104 = vector.extract_strided_slice %641 {offsets = [2, 0], sizes = [2, 32], strides = [1, 1]} : vector<16x32xf32> to vector<2x32xf32>
    %cst_326 = arith.constant dense<0.000000e+00> : vector<2x32xf32>
    %1105 = tpu.matmul %1103, %654, %cst_326 {dimension_numbers = #tpu.dot_dimension_numbers<[1], [0], [0], [1], [0, 0, 1, 1], [], []>} : vector<2x32xbf16>, vector<32x32xbf16>, vector<2x32xf32> -> vector<2x32xf32>
    %1106 = arith.addf %1104, %1105 : vector<2x32xf32>
    %1107 = arith.negf %1106 : vector<2x32xf32>
    %1108 = math.exp %1107 : vector<2x32xf32>
    %cst_327 = arith.constant 1.000000e+00 : f32
    %1109 = vector.broadcast %cst_327 : f32 to vector<2x32xf32>
    %1110 = arith.addf %1109, %1108 : vector<2x32xf32>
    %1111 = arith.divf %1109, %1110 : vector<2x32xf32>
    %1112 = vector.extract_strided_slice %642 {offsets = [2, 0], sizes = [2, 32], strides = [1, 1]} : vector<16x32xf32> to vector<2x32xf32>
    %cst_328 = arith.constant dense<0.000000e+00> : vector<2x32xf32>
    %1113 = tpu.matmul %1103, %656, %cst_328 {dimension_numbers = #tpu.dot_dimension_numbers<[1], [0], [0], [1], [0, 0, 1, 1], [], []>} : vector<2x32xbf16>, vector<32x32xbf16>, vector<2x32xf32> -> vector<2x32xf32>
    %1114 = arith.addf %1112, %1113 : vector<2x32xf32>
    %1115 = arith.negf %1114 : vector<2x32xf32>
    %1116 = math.exp %1115 : vector<2x32xf32>
    %cst_329 = arith.constant 1.000000e+00 : f32
    %1117 = vector.broadcast %cst_329 : f32 to vector<2x32xf32>
    %1118 = arith.addf %1117, %1116 : vector<2x32xf32>
    %1119 = arith.divf %1117, %1118 : vector<2x32xf32>
    %1120 = vector.extract_strided_slice %643 {offsets = [2, 0], sizes = [2, 32], strides = [1, 1]} : vector<16x32xf32> to vector<2x32xf32>
    %cst_330 = arith.constant dense<0.000000e+00> : vector<2x32xf32>
    %1121 = tpu.matmul %1103, %658, %cst_330 {dimension_numbers = #tpu.dot_dimension_numbers<[1], [0], [0], [1], [0, 0, 1, 1], [], []>} : vector<2x32xbf16>, vector<32x32xbf16>, vector<2x32xf32> -> vector<2x32xf32>
    %1122 = arith.addf %1120, %1121 : vector<2x32xf32>
    %1123 = math.tanh %1122 : vector<2x32xf32>
    %1124 = vector.extract_strided_slice %644 {offsets = [2, 0], sizes = [2, 32], strides = [1, 1]} : vector<16x32xf32> to vector<2x32xf32>
    %cst_331 = arith.constant dense<0.000000e+00> : vector<2x32xf32>
    %1125 = tpu.matmul %1103, %660, %cst_331 {dimension_numbers = #tpu.dot_dimension_numbers<[1], [0], [0], [1], [0, 0, 1, 1], [], []>} : vector<2x32xbf16>, vector<32x32xbf16>, vector<2x32xf32> -> vector<2x32xf32>
    %1126 = arith.addf %1124, %1125 : vector<2x32xf32>
    %1127 = arith.negf %1126 : vector<2x32xf32>
    %1128 = math.exp %1127 : vector<2x32xf32>
    %cst_332 = arith.constant 1.000000e+00 : f32
    %1129 = vector.broadcast %cst_332 : f32 to vector<2x32xf32>
    %1130 = arith.addf %1129, %1128 : vector<2x32xf32>
    %1131 = arith.divf %1129, %1130 : vector<2x32xf32>
    %1132 = arith.mulf %1119, %1066 : vector<2x32xf32>
    %1133 = arith.mulf %1111, %1123 : vector<2x32xf32>
    %1134 = arith.addf %1132, %1133 : vector<2x32xf32>
    %1135 = math.tanh %1134 : vector<2x32xf32>
    %1136 = arith.mulf %1131, %1135 : vector<2x32xf32>
    %1137 = arith.truncf %1102 : vector<2x32xf32> to vector<2x32xbf16>
    %1138 = vector.extract_strided_slice %637 {offsets = [14, 0], sizes = [2, 32], strides = [1, 1]} : vector<16x32xf32> to vector<2x32xf32>
    %cst_333 = arith.constant dense<0.000000e+00> : vector<2x32xf32>
    %1139 = tpu.matmul %1137, %646, %cst_333 {dimension_numbers = #tpu.dot_dimension_numbers<[1], [0], [0], [1], [0, 0, 1, 1], [], []>} : vector<2x32xbf16>, vector<32x32xbf16>, vector<2x32xf32> -> vector<2x32xf32>
    %1140 = arith.addf %1138, %1139 : vector<2x32xf32>
    %1141 = arith.negf %1140 : vector<2x32xf32>
    %1142 = math.exp %1141 : vector<2x32xf32>
    %cst_334 = arith.constant 1.000000e+00 : f32
    %1143 = vector.broadcast %cst_334 : f32 to vector<2x32xf32>
    %1144 = arith.addf %1143, %1142 : vector<2x32xf32>
    %1145 = arith.divf %1143, %1144 : vector<2x32xf32>
    %1146 = vector.extract_strided_slice %638 {offsets = [14, 0], sizes = [2, 32], strides = [1, 1]} : vector<16x32xf32> to vector<2x32xf32>
    %cst_335 = arith.constant dense<0.000000e+00> : vector<2x32xf32>
    %1147 = tpu.matmul %1137, %648, %cst_335 {dimension_numbers = #tpu.dot_dimension_numbers<[1], [0], [0], [1], [0, 0, 1, 1], [], []>} : vector<2x32xbf16>, vector<32x32xbf16>, vector<2x32xf32> -> vector<2x32xf32>
    %1148 = arith.addf %1146, %1147 : vector<2x32xf32>
    %1149 = arith.negf %1148 : vector<2x32xf32>
    %1150 = math.exp %1149 : vector<2x32xf32>
    %cst_336 = arith.constant 1.000000e+00 : f32
    %1151 = vector.broadcast %cst_336 : f32 to vector<2x32xf32>
    %1152 = arith.addf %1151, %1150 : vector<2x32xf32>
    %1153 = arith.divf %1151, %1152 : vector<2x32xf32>
    %1154 = vector.extract_strided_slice %639 {offsets = [14, 0], sizes = [2, 32], strides = [1, 1]} : vector<16x32xf32> to vector<2x32xf32>
    %cst_337 = arith.constant dense<0.000000e+00> : vector<2x32xf32>
    %1155 = tpu.matmul %1137, %650, %cst_337 {dimension_numbers = #tpu.dot_dimension_numbers<[1], [0], [0], [1], [0, 0, 1, 1], [], []>} : vector<2x32xbf16>, vector<32x32xbf16>, vector<2x32xf32> -> vector<2x32xf32>
    %1156 = arith.addf %1154, %1155 : vector<2x32xf32>
    %1157 = math.tanh %1156 : vector<2x32xf32>
    %1158 = vector.extract_strided_slice %640 {offsets = [14, 0], sizes = [2, 32], strides = [1, 1]} : vector<16x32xf32> to vector<2x32xf32>
    %cst_338 = arith.constant dense<0.000000e+00> : vector<2x32xf32>
    %1159 = tpu.matmul %1137, %652, %cst_338 {dimension_numbers = #tpu.dot_dimension_numbers<[1], [0], [0], [1], [0, 0, 1, 1], [], []>} : vector<2x32xbf16>, vector<32x32xbf16>, vector<2x32xf32> -> vector<2x32xf32>
    %1160 = arith.addf %1158, %1159 : vector<2x32xf32>
    %1161 = arith.negf %1160 : vector<2x32xf32>
    %1162 = math.exp %1161 : vector<2x32xf32>
    %cst_339 = arith.constant 1.000000e+00 : f32
    %1163 = vector.broadcast %cst_339 : f32 to vector<2x32xf32>
    %1164 = arith.addf %1163, %1162 : vector<2x32xf32>
    %1165 = arith.divf %1163, %1164 : vector<2x32xf32>
    %1166 = arith.mulf %1153, %1100 : vector<2x32xf32>
    %1167 = arith.mulf %1145, %1157 : vector<2x32xf32>
    %1168 = arith.addf %1166, %1167 : vector<2x32xf32>
    %1169 = math.tanh %1168 : vector<2x32xf32>
    %1170 = arith.mulf %1165, %1169 : vector<2x32xf32>
    %1171 = arith.truncf %1136 : vector<2x32xf32> to vector<2x32xbf16>
    %1172 = vector.extract_strided_slice %641 {offsets = [0, 0], sizes = [2, 32], strides = [1, 1]} : vector<16x32xf32> to vector<2x32xf32>
    %cst_340 = arith.constant dense<0.000000e+00> : vector<2x32xf32>
    %1173 = tpu.matmul %1171, %654, %cst_340 {dimension_numbers = #tpu.dot_dimension_numbers<[1], [0], [0], [1], [0, 0, 1, 1], [], []>} : vector<2x32xbf16>, vector<32x32xbf16>, vector<2x32xf32> -> vector<2x32xf32>
    %1174 = arith.addf %1172, %1173 : vector<2x32xf32>
    %1175 = arith.negf %1174 : vector<2x32xf32>
    %1176 = math.exp %1175 : vector<2x32xf32>
    %cst_341 = arith.constant 1.000000e+00 : f32
    %1177 = vector.broadcast %cst_341 : f32 to vector<2x32xf32>
    %1178 = arith.addf %1177, %1176 : vector<2x32xf32>
    %1179 = arith.divf %1177, %1178 : vector<2x32xf32>
    %1180 = vector.extract_strided_slice %642 {offsets = [0, 0], sizes = [2, 32], strides = [1, 1]} : vector<16x32xf32> to vector<2x32xf32>
    %cst_342 = arith.constant dense<0.000000e+00> : vector<2x32xf32>
    %1181 = tpu.matmul %1171, %656, %cst_342 {dimension_numbers = #tpu.dot_dimension_numbers<[1], [0], [0], [1], [0, 0, 1, 1], [], []>} : vector<2x32xbf16>, vector<32x32xbf16>, vector<2x32xf32> -> vector<2x32xf32>
    %1182 = arith.addf %1180, %1181 : vector<2x32xf32>
    %1183 = arith.negf %1182 : vector<2x32xf32>
    %1184 = math.exp %1183 : vector<2x32xf32>
    %cst_343 = arith.constant 1.000000e+00 : f32
    %1185 = vector.broadcast %cst_343 : f32 to vector<2x32xf32>
    %1186 = arith.addf %1185, %1184 : vector<2x32xf32>
    %1187 = arith.divf %1185, %1186 : vector<2x32xf32>
    %1188 = vector.extract_strided_slice %643 {offsets = [0, 0], sizes = [2, 32], strides = [1, 1]} : vector<16x32xf32> to vector<2x32xf32>
    %cst_344 = arith.constant dense<0.000000e+00> : vector<2x32xf32>
    %1189 = tpu.matmul %1171, %658, %cst_344 {dimension_numbers = #tpu.dot_dimension_numbers<[1], [0], [0], [1], [0, 0, 1, 1], [], []>} : vector<2x32xbf16>, vector<32x32xbf16>, vector<2x32xf32> -> vector<2x32xf32>
    %1190 = arith.addf %1188, %1189 : vector<2x32xf32>
    %1191 = math.tanh %1190 : vector<2x32xf32>
    %1192 = vector.extract_strided_slice %644 {offsets = [0, 0], sizes = [2, 32], strides = [1, 1]} : vector<16x32xf32> to vector<2x32xf32>
    %cst_345 = arith.constant dense<0.000000e+00> : vector<2x32xf32>
    %1193 = tpu.matmul %1171, %660, %cst_345 {dimension_numbers = #tpu.dot_dimension_numbers<[1], [0], [0], [1], [0, 0, 1, 1], [], []>} : vector<2x32xbf16>, vector<32x32xbf16>, vector<2x32xf32> -> vector<2x32xf32>
    %1194 = arith.addf %1192, %1193 : vector<2x32xf32>
    %1195 = arith.negf %1194 : vector<2x32xf32>
    %1196 = math.exp %1195 : vector<2x32xf32>
    %cst_346 = arith.constant 1.000000e+00 : f32
    %1197 = vector.broadcast %cst_346 : f32 to vector<2x32xf32>
    %1198 = arith.addf %1197, %1196 : vector<2x32xf32>
    %1199 = arith.divf %1197, %1198 : vector<2x32xf32>
    %1200 = arith.mulf %1187, %1134 : vector<2x32xf32>
    %1201 = arith.mulf %1179, %1191 : vector<2x32xf32>
    %1202 = arith.addf %1200, %1201 : vector<2x32xf32>
    %1203 = math.tanh %1202 : vector<2x32xf32>
    %1204 = arith.mulf %1199, %1203 : vector<2x32xf32>
    %1205 = arith.truncf %1204 : vector<2x32xf32> to vector<2x32xbf16>
    %c0_347 = arith.constant 0 : index
    %c0_348 = arith.constant 0 : index
    %1206 = vector.load %arg8[%c0_347, %c0_348] : memref<32x128xbf16, #tpu.memory_space<vmem>>, vector<32x128xbf16>
    %cst_349 = arith.constant dense<0.000000e+00> : vector<2x128xf32>
    %1207 = tpu.matmul %1205, %1206, %cst_349 {dimension_numbers = #tpu.dot_dimension_numbers<[1], [0], [0], [1], [0, 0, 1, 1], [], []>} : vector<2x32xbf16>, vector<32x128xbf16>, vector<2x128xf32> -> vector<2x128xf32>
    %1208 = arith.truncf %1170 : vector<2x32xf32> to vector<2x32xbf16>
    %c0_350 = arith.constant 0 : index
    %c0_351 = arith.constant 0 : index
    %1209 = vector.load %arg9[%c0_350, %c0_351] : memref<32x128xbf16, #tpu.memory_space<vmem>>, vector<32x128xbf16>
    %cst_352 = arith.constant dense<0.000000e+00> : vector<2x128xf32>
    %1210 = tpu.matmul %1208, %1209, %cst_352 {dimension_numbers = #tpu.dot_dimension_numbers<[1], [0], [0], [1], [0, 0, 1, 1], [], []>} : vector<2x32xbf16>, vector<32x128xbf16>, vector<2x128xf32> -> vector<2x128xf32>
    %1211 = arith.addf %1207, %1210 : vector<2x128xf32>
    %c0_353 = arith.constant 0 : index
    %c0_354 = arith.constant 0 : index
    %1212 = vector.load %arg10[%c0_353, %c0_354] : memref<1x128xf32, #tpu.memory_space<vmem>>, vector<1x128xf32>
    %1213 = vector.broadcast %1212 : vector<1x128xf32> to vector<2x128xf32>
    %1214 = arith.addf %1211, %1213 : vector<2x128xf32>
    %c0_355 = arith.constant 0 : index
    %c0_356 = arith.constant 0 : index
    %1215 = vector.load %arg11[%c0_355, %c0_356] : memref<2x128xf32, #tpu.memory_space<vmem>>, vector<2x128xf32>
    tpu.vector_store %arg11[%c0_355, %c0_356], %1214 {strides = array<i32>} : memref<2x128xf32, #tpu.memory_space<vmem>>, vector<2x128xf32>,
    return
  }
}

</mosaic_0001>

<bundles_post_ra>
// kernel: tpu_custom_call.1
= control target key start
LH: loop header
LB: loop body
LE: loop exit
PB: predicated region body
PF: predicated region fallthrough
CT: control target
= control target key end

     0   :  { %16 = vsyncpa [#allocation4], 0  ;;  %s12555_s0 = inlined_call_operand.hbm [shape: bf16[16,32], index: 0, kind: input, shape index: {}]   ;;  %s12556_s1 = inlined_call_operand.hbm [shape: bf16[32,256], index: 1, kind: input, shape index: {}]   ;;  %s12557_s2 = inlined_call_operand.vmem [shape: f32[1,256], index: 2, kind: input, shape index: {}]   ;;  %s12558_s3 = inlined_call_operand.hbm [shape: bf16[2,4,32,32], index: 3, kind: input, shape index: {}]   ;;  %s12559_s4 = inlined_call_operand.hbm [shape: bf16[32,256], index: 4, kind: input, shape index: {}]   ;;  %s12560_s5 = inlined_call_operand.hbm [shape: bf16[32,256], index: 5, kind: input, shape index: {}]   ;;  %s12561_s6 = inlined_call_operand.hbm [shape: f32[1,256], index: 6, kind: input, shape index: {}]   ;;  %s12562_s7 = inlined_call_operand.hbm [shape: bf16[2,4,32,32], index: 7, kind: input, shape index: {}]   ;;  %s12563_s8 = inlined_call_operand.vmem [shape: bf16[32,128], index: 8, kind: input, shape index: {}]   ;;  %s12564_s9 = inlined_call_operand.vmem [shape: bf16[32,128], index: 9, kind: input, shape index: {}]   ;;  %s12565_s10 = inlined_call_operand.vmem [shape: f32[1,128], index: 10, kind: input, shape index: {}]   ;;  %s12566_s11 = inlined_call_operand.hbm [shape: f32[2,128], index: 11, kind: output, shape index: {}]  }
   0x1   :  { %17 = vsyncpa [#allocation7], 0 }
   0x2   :  { %18 = vsyncpa [#allocation10], 0 }
   0x3   :  { %19 = vsyncpa [#allocation13], 0 }
   0x4   :  { %20 = vsyncpa [#allocation5], 0  ;;  %s10658_s17 = smov [#allocation6]   ;;  %s10472_s21 = scalar_lea.hbm %s12556_s1, 512 }
   0x5   :  { %s38_s18 = sshll.u32 %s10658_s17, 4  ;;  %p10473_p0 = scmp.ne.s32.totalorder %s12556_s1, %s10472_s21  ;;  %s39_s18 = int_to_ptr.vmem [resolvable:$true] %s38_s18 }
   0x6   :  { %p10476_p1 = scmp.lt.u32.totalorder %s10472_s21, %s12556_s1 }
   0x8   :  { %p10478_p2 = pnand %p10476_p1, %p10473_p0 }
   0xa   :  { %10481 = shalt.err (!%p10478_p2)
}
   0xb   :  { %s10482_s26 = scalar_lea.vmem %s39_s18, 512  ;;  %p10487_p4 = scmp.lt.s32.totalorder %s39_s18, %s39_s18 }
   0xc   :  { %p10483_p3 = scmp.ne.s32.totalorder %s39_s18, %s10482_s26  ;;  %p10488_p5 = scmp.lt.s32.totalorder %s10482_s26, %s10482_s26 }
   0xe   :  { %p10489_p6 = por %p10488_p5, %p10487_p4 }
  0x10   :  { %p10490_p7 = pnand %p10489_p6, %p10483_p3 }
  0x12   :  { %10493 = shalt.err (!%p10490_p7)
}
  0x13   :  { %s10659_s27 = smov 128   ;;  %s10660_s28 = smov 8  }
  0x14   :  { %44 = dma.hbm_to_vmem [thread:$0]  %s12556_s1, 512, %s39_s18, [#allocation7], %s10659_s27, %s10659_s27, %s10660_s28  }
  0x15   :  { %s10661_s12 = smov [#allocation9]   ;;  %s10662_s14 = smov [#allocation12]  }
  0x16   :  { %s64_s13 = sshll.u32 %s10661_s12, 4  ;;  %s89_s15 = sshll.u32 %s10662_s14, 4  ;;  %s65_s13 = int_to_ptr.vmem [resolvable:$true] %s64_s13  ;;  %s90_s15 = int_to_ptr.vmem [resolvable:$true] %s89_s15 }
  0x17   :  { %s10494_s19 = scalar_lea.hbm %s12559_s4, 512 }
  0x18   :  { %p10495_p8 = scmp.ne.s32.totalorder %s12559_s4, %s10494_s19  ;;  %p10498_p9 = scmp.lt.u32.totalorder %s10494_s19, %s12559_s4 }
  0x1a   :  { %p10500_p10 = pnand %p10498_p9, %p10495_p8 }
  0x1c   :  { %10503 = shalt.err (!%p10500_p10)
}
  0x1d   :  { %s10504_s1 = scalar_lea.vmem %s65_s13, 512  ;;  %p10509_p12 = scmp.lt.s32.totalorder %s65_s13, %s65_s13 }
  0x1e   :  { %p10505_p11 = scmp.ne.s32.totalorder %s65_s13, %s10504_s1  ;;  %p10510_p13 = scmp.lt.s32.totalorder %s10504_s1, %s10504_s1 }
  0x20   :  { %p10511_p0 = por %p10510_p13, %p10509_p12 }
  0x22   :  { %p10512_p1 = pnand %p10511_p0, %p10505_p11 }
  0x24   :  { %10515 = shalt.err (!%p10512_p1)
}
  0x25   :  { %70 = dma.hbm_to_vmem [thread:$0]  %s12559_s4, 512, %s65_s13, [#allocation10], %s10659_s27, %s10659_s27, %s10660_s28  }
  0x26   :  { %s10516_s29 = scalar_lea.hbm %s12561_s6, 32 }
  0x27   :  { %p10517_p2 = scmp.ne.s32.totalorder %s12561_s6, %s10516_s29  ;;  %p10520_p3 = scmp.lt.u32.totalorder %s10516_s29, %s12561_s6 }
  0x29   :  { %p10522_p4 = pnand %p10520_p3, %p10517_p2 }
  0x2b   :  { %10525 = shalt.err (!%p10522_p4)
}
  0x2c   :  { %s10526_s17 = scalar_lea.vmem %s90_s15, 32  ;;  %p10531_p6 = scmp.lt.s32.totalorder %s90_s15, %s90_s15 }
  0x2d   :  { %p10527_p5 = scmp.ne.s32.totalorder %s90_s15, %s10526_s17  ;;  %p10532_p7 = scmp.lt.s32.totalorder %s10526_s17, %s10526_s17 }
  0x2f   :  { %p10533_p8 = por %p10532_p7, %p10531_p6 }
  0x31   :  { %p10534_p9 = pnand %p10533_p8, %p10527_p5 }
  0x33   :  { %10537 = shalt.err (!%p10534_p9)
}
  0x34   :  { %92 = dma.hbm_to_vmem [thread:$0]  %s12561_s6, 32, %s90_s15, [#allocation13]  }
  0x35   :  { %s10663_s19 = smov [#allocation3]   ;;  %s10538_s23 = scalar_lea.hbm %s12555_s0, 128 }
  0x36   :  { %s26_s20 = sshll.u32 %s10663_s19, 4  ;;  %p10539_p10 = scmp.ne.s32.totalorder %s12555_s0, %s10538_s23  ;;  %s27_s20 = int_to_ptr.vmem [resolvable:$true] %s26_s20 }
  0x37   :  { %p10542_p11 = scmp.lt.u32.totalorder %s10538_s23, %s12555_s0 }
  0x39   :  { %p10544_p12 = pnand %p10542_p11, %p10539_p10 }
  0x3b   :  { %10547 = shalt.err (!%p10544_p12)
}
  0x3c   :  { %s10548_s26 = scalar_lea.vmem %s27_s20, 128  ;;  %p10553_p0 = scmp.lt.s32.totalorder %s27_s20, %s27_s20 }
  0x3d   :  { %p10549_p13 = scmp.ne.s32.totalorder %s27_s20, %s10548_s26  ;;  %p10554_p1 = scmp.lt.s32.totalorder %s10548_s26, %s10548_s26 }
  0x3f   :  { %p10555_p2 = por %p10554_p1, %p10553_p0 }
  0x41   :  { %p10556_p3 = pnand %p10555_p2, %p10549_p13 }
  0x43   :  { %10559 = shalt.err (!%p10556_p3)
}
  0x44   :  { %s10664_s6 = smov 64   ;;  %s10665_s15 = smov 4  }
  0x45   :  { %32 = dma.hbm_to_vmem [thread:$0]  %s12555_s0, 128, %s27_s20, [#allocation4], %s10664_s6, %s10664_s6, %s10665_s15  }
  0x46   :  { %s10666_s12 = smov [#allocation8]   ;;  %s10667_s16 = smov [#allocation11]  }
  0x47   :  { %s52_s14 = sshll.u32 %s10666_s12, 4  ;;  %s76_s17 = sshll.u32 %s10667_s16, 4  ;;  %s53_s14 = int_to_ptr.vmem [resolvable:$true] %s52_s14  ;;  %s10792_s17 = int_to_ptr.vmem [resolvable:$true] %s76_s17 }
  0x48   :  { %s10560_s19 = scalar_lea.hbm %s12558_s3, 2048 }
  0x49   :  { %p10561_p4 = scmp.ne.s32.totalorder %s12558_s3, %s10560_s19  ;;  %p10564_p5 = scmp.lt.u32.totalorder %s10560_s19, %s12558_s3 }
  0x4b   :  { %p10566_p6 = pnand %p10564_p5, %p10561_p4 }
  0x4d   :  { %10569 = shalt.err (!%p10566_p6)
}
  0x4e   :  { %s10570_s0 = scalar_lea.vmem %s53_s14, 2048  ;;  %p10575_p8 = scmp.lt.s32.totalorder %s53_s14, %s53_s14 }
  0x4f   :  { %p10571_p7 = scmp.ne.s32.totalorder %s53_s14, %s10570_s0  ;;  %p10576_p9 = scmp.lt.s32.totalorder %s10570_s0, %s10570_s0 }
  0x51   :  { %p10577_p10 = por %p10576_p9, %p10575_p8 }
  0x53   :  { %p10578_p11 = pnand %p10577_p10, %p10571_p7 }
  0x55   :  { %10581 = shalt.err (!%p10578_p11)
}
  0x56   :  { %58 = dma.hbm_to_vmem [thread:$0]  %s12558_s3, 2048, %s53_s14, [#allocation7], %s10664_s6, %s10664_s6, %s10665_s15  }
  0x57   :  { %s10582_s26 = scalar_lea.hbm %s12560_s5, 512 }
  0x58   :  { %p10583_p12 = scmp.ne.s32.totalorder %s12560_s5, %s10582_s26  ;;  %p10586_p13 = scmp.lt.u32.totalorder %s10582_s26, %s12560_s5 }
  0x5a   :  { %p10588_p0 = pnand %p10586_p13, %p10583_p12 }
  0x5c   :  { %10591 = shalt.err (!%p10588_p0)
}
  0x5d   :  { %s10592_s4 = scalar_lea.vmem %s10792_s17, 512  ;;  %p10597_p2 = scmp.lt.s32.totalorder %s10792_s17, %s10792_s17 }
  0x5e   :  { %p10593_p1 = scmp.ne.s32.totalorder %s10792_s17, %s10592_s4  ;;  %p10598_p3 = scmp.lt.s32.totalorder %s10592_s4, %s10592_s4 }
  0x60   :  { %p10599_p4 = por %p10598_p3, %p10597_p2 }
  0x62   :  { %p10600_p5 = pnand %p10599_p4, %p10593_p1 }
  0x64   :  { %10603 = shalt.err (!%p10600_p5)
}
  0x65   :  { %82 = dma.hbm_to_vmem [thread:$0]  %s12560_s5, 512, %s10792_s17, [#allocation10], %s10659_s27, %s10659_s27, %s10660_s28  }
  0x66   :  { %s10668_s13 = smov [#allocation14]   ;;  %s10604_s23 = scalar_lea.hbm %s12562_s7, 2048 }
  0x67   :  { %s98_s19 = sshll.u32 %s10668_s13, 4  ;;  %p10605_p6 = scmp.ne.s32.totalorder %s12562_s7, %s10604_s23  ;;  %s99_s19 = int_to_ptr.vmem [resolvable:$true] %s98_s19 }
  0x68   :  { %p10608_p7 = scmp.lt.u32.totalorder %s10604_s23, %s12562_s7 }
  0x6a   :  { %p10610_p8 = pnand %p10608_p7, %p10605_p6 }
  0x6c   :  { %10613 = shalt.err (!%p10610_p8)
}
  0x6d   :  { %s10614_s24 = scalar_lea.vmem %s99_s19, 2048  ;;  %p10619_p10 = scmp.lt.s32.totalorder %s99_s19, %s99_s19 }
  0x6e   :  { %p10615_p9 = scmp.ne.s32.totalorder %s99_s19, %s10614_s24  ;;  %p10620_p11 = scmp.lt.s32.totalorder %s10614_s24, %s10614_s24 }
  0x70   :  { %p10621_p12 = por %p10620_p11, %p10619_p10 }
  0x72   :  { %p10622_p13 = pnand %p10621_p12, %p10615_p9 }
  0x74   :  { %10625 = shalt.err (!%p10622_p13)
}
  0x75   :  { %104 = dma.hbm_to_vmem [thread:$0]  %s12562_s7, 2048, %s99_s19, [#allocation13], %s10664_s6, %s10664_s6, %s10665_s15  }
  0x76   :  { %10648 = dma.done.wait [#allocation4], 128  }
  0x77   :  { %10649 = vsyncadd [#allocation4], 4294967168 }
  0x78   :  { %10650 = dma.done.wait [#allocation7], 2560  }
  0x79   :  { %10651 = vsyncadd [#allocation7], 4294964736 }
  0x7a   :  { %10652 = dma.done.wait [#allocation10], 1024  }
  0x7b   :  { %10653 = vsyncadd [#allocation10], 4294966272 }
  0x7c   :  { %10654 = dma.done.wait [#allocation13], 2080  }
  0x7d   :  { %10655 = vsyncadd [#allocation13], 4294965216  ;;  %v10669_v0 = vmov 0.0   ;;  %vm10670_vm0 = vmmov 0   ;;  %v10671_v1 = vmov 0   ;;  %v10848_v3 = vld [vmem:[#allocation8] sm:$0xff]   ;;  %v141_v23 = vlaneseq }
  0x7e   :  { %8780 = vmatprep.subr.bf16.mxu1 %v10669_v0  ;;  %8784 = vmatprep.mubr.msk.bf16.mxu1 %vm10670_vm0, %v10669_v0  ;;  %v9841_v2 = vld [vmem:[#allocation6 + $0x4] ss:$8 sps:$4 sm:$0xff]   ;;  %v9844_v4 = vld [vmem:[#allocation6] ss:$8 sps:$4 sm:$0xff]   ;;  %v9845_v5 = vld [vmem:[#allocation6 + $0x14] ss:$8 sps:$4 sm:$0xff]  }
  0x7f   :  { %212 = vmatprep.mubr.bf16.mxu0 %v10671_v1  ;;  %180 = vmatprep.subr.bf16.mxu0 %v9841_v2  ;;  %v10852_v6 = vld [vmem:[#allocation8 + $0x8] sm:$0xff]   ;;  %v9848_v7 = vld [vmem:[#allocation6 + $0x10] ss:$8 sps:$4 sm:$0xff]   ;;  %v10855_v9 = vld [vmem:[#allocation8 + $0x20] sm:$0xff]   ;;  %vm176_vm1 = vcmask 261120   ;;  %v10948_v24 = vshrl.u32 %v141_v23, 7 }
  0x80   :  { %8781 = vmatpush3.bf16.msra.mxu1 %v10848_v3  ;;  %181 = vmatpush1.bf16.msra.mxu0 %v9844_v4  ;;  %v9849_v8 = vld [vmem:[#allocation3] sm:$0xff]   ;;  %v10862_v10 = vld [vmem:[#allocation8 + $0x28] sm:$0xff]   ;;  %v10867_v11 = vld [vmem:[#allocation8 + $0x10] sm:$0xff]   ;;  %s10673_s15 = smov 96   ;;  %vm1271_vm2 = vcmask 259076   ;;  %vm795_vm3 = vcmask 254976  }
  0x81   :  { %8782 = vmatprep.subr.bf16.mxu1 %v10669_v0  ;;  %182 = vmatprep.subr.bf16.mxu0 %v9845_v5  ;;  %v10872_v12 = vld [vmem:[#allocation8 + $0x18] sm:$0xff]   ;;  %v10875_v13 = vld [vmem:[#allocation8 + $0x40] sm:$0xff]   ;;  %v10879_v14 = vld [vmem:[#allocation8 + $0x48] sm:$0xff]   ;;  %v147_v25 = vsub.s32 1, %v10948_v24  ;;  %v143_v26 = vsub.s32 0, %v10948_v24  ;;  %vm1265_vm4 = vcmask 257026  }
  0x82   :  { %v10881_v15 = vld [vmem:[#allocation8 + $0x30] sm:$0xff]   ;;  %v10890_v16 = vld [vmem:[#allocation8 + $0x38] sm:$0xff]   ;;  %v10892_v17 = vld [vmem:[#allocation8 + $0x60] sm:$0xff]   ;;  %vm802_vm5 = vcmask 261126   ;;  %s10674_s4 = smov [#allocation15]  }
  0x83   :  { %v10901_v18 = vld [vmem:[#allocation8 + $0x50] sm:$0xff]   ;;  %v10903_v19 = vld [vmem:[#allocation8 + $0x68] sm:$0xff]   ;;  %v10912_v20 = vld [vmem:[#allocation8 + $0x58] sm:$0xff]   ;;  %s8115_s3 = sshll.u32 %s10674_s4, 4  ;;  %s8116_s3 = int_to_ptr.vmem [resolvable:$true] %s8115_s3 }
  0x84   :  { %8783 = vmatpush3.bf16.msra.mxu1 %v10852_v6  ;;  %183 = vmatpush1.bf16.msra.mxu0 %v9848_v7  ;;  %v10933_v21 = vld [vmem:[#allocation8 + $0x70] sm:$0xff]   ;;  %v10936_v22 = vld [vmem:[#allocation8 + $0x78] sm:$0xff]   ;;  %s10626_s14 = scalar_lea.vmem %s8116_s3, 32  ;;  %p10631_p1 = scmp.lt.s32.totalorder %s8116_s3, %s8116_s3 }
  0x85   :  { %8796 = vmatprep.subr.bf16.mxu1 %v10669_v0  ;;  %8788 = vmatprep.subr.bf16.mxu0 %v10669_v0  ;;  %v139_v27 = vld [vmem:[%s12557_s2] sm:$0x3]  ;;  %s10672_s2 = smov 32   ;;  %p10627_p0 = scmp.ne.s32.totalorder %s8116_s3, %s10626_s14 }
  0x86   :  { %v148_v31 = vrot.slane %v139_v27, %v147_v25  ;;  %v144_v32 = vrot.slane %v139_v27, %v143_v26  ;;  %p10632_p2 = scmp.lt.s32.totalorder %s10626_s14, %s10626_s14 }
  0x87   :  { %8785 = vmatmul.mubr.bf16.vlgmr.msra.gmra.mrb[0].mxu1 %v10671_v1  ;;  %8132 = vmatmul.mubr.msk.bf16.vlgmr.msra.gmra.mrb[0].mxu0 %vm176_vm1, %v9849_v8 }
  0x88   :  { %8797 = vmatpush3.bf16.msra.mxu1 %v10855_v9  ;;  %8800 = vmatprep.mubr.msk.bf16.mxu1 %vm10670_vm0, %v10669_v0  ;;  %p10633_p3 = por %p10632_p2, %p10631_p1 }
  0x89   :  { %8798 = vmatprep.subr.bf16.mxu1 %v10669_v0  ;;  %8792 = vmatprep.mubr.msk.bf16.mxu0 %vm10670_vm0, %v10669_v0 }
  0x8a   :  { %8789 = vmatpush3.bf16.msra.mxu0 %v10867_v11  ;;  %p10634_p4 = pnand %p10633_p3, %p10627_p0 }
  0x8b   :  { %8790 = vmatprep.subr.bf16.mxu0 %v10669_v0 }
  0x8c   :  { %8799 = vmatpush3.bf16.msra.mxu1 %v10862_v10 }
  0x8d   :  { %8812 = vmatprep.subr.bf16.mxu1 %v10669_v0 }
  0x8e   :  { %8791 = vmatpush3.bf16.msra.mxu0 %v10872_v12 }
  0x8f   :  { %8801 = vmatmul.mubr.bf16.vlgmr.msra.gmra.mrb[4].mxu1 %v10671_v1  ;;  %8804 = vmatprep.subr.bf16.mxu0 %v10669_v0 }
  0x90   :  { %8813 = vmatpush3.bf16.msra.mxu1 %v10875_v13  ;;  %8816 = vmatprep.mubr.msk.bf16.mxu1 %vm10670_vm0, %v10669_v0 }
  0x91   :  { %8814 = vmatprep.subr.bf16.mxu1 %v10669_v0  ;;  %8793 = vmatmul.mubr.bf16.vlgmr.msra.gmra.mrb[4].mxu0 %v10671_v1 }
  0x92   :  { %8805 = vmatpush3.bf16.msra.mxu0 %v10881_v15  ;;  %8808 = vmatprep.mubr.msk.bf16.mxu0 %vm10670_vm0, %v10669_v0 }
  0x93   :  { %8806 = vmatprep.subr.bf16.mxu0 %v10669_v0 }
  0x94   :  { %8815 = vmatpush3.bf16.msra.mxu1 %v10879_v14 }
  0x95   :  { %8828 = vmatprep.subr.bf16.mxu1 %v10669_v0 }
  0x96   :  { %8807 = vmatpush3.bf16.msra.mxu0 %v10890_v16 }
  0x97   :  { %8817 = vmatmul.mubr.bf16.vlgmr.msra.gmra.mrb[8].mxu1 %v10671_v1  ;;  %8820 = vmatprep.subr.bf16.mxu0 %v10669_v0 }
  0x98   :  { %8829 = vmatpush3.bf16.msra.mxu1 %v10892_v17  ;;  %8832 = vmatprep.mubr.msk.bf16.mxu1 %vm10670_vm0, %v10669_v0 }
  0x99   :  { %8830 = vmatprep.subr.bf16.mxu1 %v10669_v0  ;;  %8809 = vmatmul.mubr.bf16.vlgmr.msra.gmra.mrb[8].mxu0 %v10671_v1 }
  0x9a   :  { %8821 = vmatpush3.bf16.msra.mxu0 %v10901_v18  ;;  %8824 = vmatprep.mubr.msk.bf16.mxu0 %vm10670_vm0, %v10669_v0 }
  0x9b   :  { %8822 = vmatprep.subr.bf16.mxu0 %v10669_v0 }
  0x9c   :  { %8831 = vmatpush3.bf16.msra.mxu1 %v10903_v19 }
  0x9d   :  { %8844 = vmatprep.subr.bf16.mxu1 %v10669_v0 }
  0x9e   :  { %8823 = vmatpush3.bf16.msra.mxu0 %v10912_v20 }
  0x9f   :  { %8833 = vmatmul.mubr.bf16.vlgmr.msra.gmra.mrb[12].mxu1 %v10671_v1  ;;  %8836 = vmatprep.subr.bf16.mxu0 %v10669_v0 }
  0xa0   :  { %8845 = vmatpush3.bf16.msra.mxu1 %v10848_v3  ;;  %8848 = vmatprep.mubr.msk.bf16.mxu1 %vm10670_vm0, %v10669_v0 }
  0xa1   :  { %8846 = vmatprep.subr.bf16.mxu1 %v10669_v0  ;;  %8825 = vmatmul.mubr.bf16.vlgmr.msra.gmra.mrb[12].mxu0 %v10671_v1 }
  0xa2   :  { %8840 = vmatprep.mubr.msk.bf16.mxu0 %vm10670_vm0, %v10669_v0  ;;  %8837 = vmatpush3.bf16.msra.mxu0 %v10933_v21 }
  0xa3   :  { %8838 = vmatprep.subr.bf16.mxu0 %v10669_v0 }
  0xa4   :  { %8847 = vmatpush3.bf16.msra.mxu1 %v10852_v6 }
  0xa5   :  { %8860 = vmatprep.subr.bf16.mxu1 %v10669_v0 }
  0xa6   :  { %8839 = vmatpush3.bf16.msra.mxu0 %v10936_v22 }
  0xa7   :  { %8852 = vmatprep.subr.bf16.mxu0 %v10669_v0 }
  0xa9   :  { %8841 = vmatmul.mubr.bf16.vlgmr.msra.gmra.mrb[16].mxu0 %v10671_v1 }
  0xaa   :  { %8853 = vmatpush3.bf16.msra.mxu0 %v10867_v11  ;;  %8856 = vmatprep.mubr.msk.bf16.mxu0 %vm10670_vm0, %v10669_v0 }
  0xab   :  { %8854 = vmatprep.subr.bf16.mxu0 %v10669_v0 }
  0xae   :  { %8855 = vmatpush3.bf16.msra.mxu0 %v10872_v12 }
  0xaf   :  { %8868 = vmatprep.subr.bf16.mxu0 %v10669_v0 }
 0x15a   :  { %v311_v28 = vpop.f32.mrb[0].mxu1  ;;  %v214_v29 = vpop.f32.mrb[0].mxu0 }
 0x15b   :  { %v8786_v30 = vpop.f32.mrb[1].mxu1  ;;  %v216_v34 = vpop.f32.mrb[1].mxu0  ;;  %v10966_v4 = vadd.f32 %v214_v29, %v144_v32 }
 0x15c   :  { %v314_v33 = vpop.f32.mrb[2].mxu1  ;;  %v10959_v36 = vadd.f32 %v216_v34, %v148_v31  ;;  %v218_v37 = vpop.f32.mrb[2].mxu0 }
 0x15d   :  { %v8787_v35 = vpop.f32.mrb[3].mxu1  ;;  %v10961_v38 = vadd.f32 %v218_v37, %v144_v32  ;;  %v220_v39 = vpop.f32.mrb[3].mxu0  ;;  %v317_v32 = vadd.f32 %v311_v28, %v10966_v4 }
 0x15e   :  { %v10970_v23 = vadd.f32 %v220_v39, %v148_v31 }
 0x162   :  { %v433_v40 = vpop.f32.mrb[4].mxu1 }
 0x163   :  { %440 = vrot.lane.b32.xlu0 %v433_v40, %s10664_s6  ;;  %v8802_v41 = vpop.f32.mrb[5].mxu1 }
 0x164   :  { %v436_v42 = vpop.f32.mrb[6].mxu1  ;;  %v370_v44 = vpop.f32.mrb[4].mxu0  ;;  %v8135_v41 = vmul.f32 -1.442695, %v317_v32 }
 0x165   :  { %v8803_v43 = vpop.f32.mrb[7].mxu1  ;;  %v8794_v45 = vpop.f32.mrb[5].mxu0 }
 0x166   :  { %v373_v46 = vpop.f32.mrb[6].mxu0 }
 0x167   :  { %v8795_v47 = vpop.f32.mrb[7].mxu0 }
 0x16a   :  { %v571_v48 = vpop.f32.mrb[8].mxu1 }
 0x16b   :  { %v8818_v49 = vpop.f32.mrb[9].mxu1  ;;  %v578_v31 = vrot.slane %v571_v48, 2 }
 0x16c   :  { %v574_v50 = vpop.f32.mrb[10].mxu1  ;;  %v491_v53 = vpop.f32.mrb[8].mxu0 }
 0x16d   :  { %v8819_v51 = vpop.f32.mrb[11].mxu1  ;;  %v8810_v56 = vpop.f32.mrb[9].mxu0  ;;  %v580_v42 = vadd.f32 %v578_v31, %v10970_v23 }
 0x16e   :  { %v494_v58 = vpop.f32.mrb[10].mxu0 }
 0x16f   :  { %v8811_v60 = vpop.f32.mrb[11].mxu0 }
 0x172   :  { %v697_v52 = vpop.f32.mrb[12].mxu1 }
 0x173   :  { %v704_v54 = vrot.slane %v697_v52, 2  ;;  %v8834_v55 = vpop.f32.mrb[13].mxu1 }
 0x174   :  { %v700_v57 = vpop.f32.mrb[14].mxu1  ;;  %v633_v61 = vpop.f32.mrb[12].mxu0 }
 0x175   :  { %705 = vrot.lane.b32.xlu0 %v704_v54, %s10664_s6  ;;  %v8835_v59 = vpop.f32.mrb[15].mxu1  ;;  %v8826_v62 = vpop.f32.mrb[13].mxu0  ;;  %v640_v29 = vrot.slane %v633_v61, 2 }
 0x176   :  { %v636_v63 = vpop.f32.mrb[14].mxu0 }
 0x177   :  { %v8827_v2 = vpop.f32.mrb[15].mxu0 }
 0x179   :  { %377 = vrot.lane.b32.xlu0 %v370_v44, %s10672_s2  ;;  %v8146_v44 = vmul.f32 -1.442695, %v580_v42 }
 0x17c   :  { %v756_v33 = vpop.f32.mrb[16].mxu0 }
 0x17d   :  { %v8842_v34 = vpop.f32.mrb[17].mxu0  ;;  %v763_v52 = vrot.slane %v756_v33, 2 }
 0x17e   :  { %v759_v35 = vpop.f32.mrb[18].mxu0 }
 0x17f   :  { %v8843_v37 = vpop.f32.mrb[19].mxu0 }
 0x1d5   :  { %v441_v5 = vpop.permute.xlu0 %440 }
 0x1d6   :  { %v443_v7 = vadd.f32 %v441_v5, %v10966_v4 }
 0x1d8   :  { %9896 = vtanh.f32 %v443_v7 }
 0x1e2   :  { %v9897_v8 = vpop.eup %9896 }
 0x1e3   :  { %510 = vrot.lane.b32.xlu1 %v9897_v8, %s10664_s6 }
 0x1e7   :  { %v706_v27 = vpop.permute.xlu0 %705 }
 0x1e8   :  { %v708_v30 = vadd.f32 %v706_v27, %v10970_v23 }
 0x1ea   :  { %9898 = vtanh.f32 %v708_v30 }
 0x1eb   :  { %9900 = vpow2.f32 %v8135_v41  ;;  %v378_v54 = vpop.permute.xlu0 %377 }
 0x1ec   :  { %v380_v55 = vadd.f32 %v378_v54, %v10966_v4 }
 0x1ee   :  { %v8138_v56 = vmul.f32 -1.442695, %v380_v55 }
 0x1f4   :  { %v9899_v40 = vpop.eup %9898 }
 0x1f5   :  { %776 = vrot.lane.b32.xlu1 %v9899_v40, %s10664_s6  ;;  %v9901_v39 = vpop.eup %9900 }
 0x1f6   :  { %v321_v43 = vadd.f32 1.0, %v9901_v39 }
 0x1f8   :  { %9902 = vrcp.f32 %v321_v43 }
 0x1f9   :  { %641 = vrot.lane.b32.xlu1 %v640_v29, %s10672_s2  ;;  %9904 = vpow2.f32 %v8146_v44 }
 0x202   :  { %v9903_v45 = vpop.eup %9902 }
 0x203   :  { %v9905_v47 = vpop.eup %9904 }
 0x204   :  { %v584_v50 = vadd.f32 1.0, %v9905_v47 }
 0x206   :  { %9906 = vrcp.f32 %v584_v50 }
 0x207   :  { %9908 = vpow2.f32 %v8138_v56 }
 0x210   :  { %v9907_v28 = vpop.eup %9906 }
 0x211   :  { %v9909_v58 = vpop.eup %9908 }
 0x212   :  { %v384_v60 = vadd.f32 1.0, %v9909_v58 }
 0x214   :  { %9910 = vrcp.f32 %v384_v60 }
 0x21e   :  { %v9911_v61 = vpop.eup %9910 }
 0x21f   :  { %v508_v63 = vmul.f32 0.0, %v9911_v61 }
 0x255   :  { %v511_v46 = vpop.permute.xlu1 %510 }
 0x256   :  { %v513_v49 = vmul.f32 %v9903_v45, %v511_v46 }
 0x258   :  { %515 = vrot.lane.b32.xlu0 %v513_v49, %s10672_s2 }
 0x25c   :  { %498 = vrot.lane.b32.xlu0 %v491_v53, %s10673_s15 }
 0x267   :  { %v777_v48 = vpop.permute.xlu1 %776 }
 0x268   :  { %v779_v51 = vmul.f32 %v9907_v28, %v777_v48 }
 0x26a   :  { %781 = vrot.lane.b32.xlu1 %v779_v51, %s10672_s2 }
 0x26b   :  { %v642_v57 = vpop.permute.xlu1 %641 }
 0x26c   :  { %v644_v59 = vadd.f32 %v642_v57, %v10970_v23 }
 0x26e   :  { %764 = vrot.lane.b32.xlu1 %v763_v52, %s10673_s15  ;;  %v8149_v53 = vmul.f32 -1.442695, %v644_v59 }
 0x270   :  { %9912 = vpow2.f32 %v8149_v53 }
 0x27a   :  { %v9913_v62 = vpop.eup %9912 }
 0x27b   :  { %v648_v2 = vadd.f32 1.0, %v9913_v62 }
 0x2ca   :  { %v516_v5 = vpop.permute.xlu0 %515 }
 0x2cb   :  { %v10983_v7 = vadd.f32 %v516_v5, %v508_v63 }
 0x2cd   :  { %9914 = vtanh.f32 %v10983_v7 }
 0x2ce   :  { %9916 = vrcp.f32 %v648_v2  ;;  %v499_v37 = vpop.permute.xlu0 %498 }
 0x2cf   :  { %v501_v40 = vadd.f32 %v499_v37, %v10966_v4 }
 0x2d1   :  { %v8143_v29 = vmul.f32 -1.442695, %v501_v40 }
 0x2d7   :  { %v9915_v8 = vpop.eup %9914 }
 0x2d8   :  { %v9917_v27 = vpop.eup %9916  ;;  %521 = vrot.lane.b32.xlu0 %v9915_v8, %s10664_s6 }
 0x2d9   :  { %v774_v30 = vmul.f32 0.0, %v9917_v27 }
 0x2dc   :  { %v782_v33 = vpop.permute.xlu1 %781 }
 0x2dd   :  { %v10987_v34 = vadd.f32 %v782_v33, %v774_v30 }
 0x2df   :  { %9918 = vtanh.f32 %v10987_v34 }
 0x2e0   :  { %9920 = vpow2.f32 %v8143_v29  ;;  %v765_v32 = vpop.permute.xlu1 %764 }
 0x2e1   :  { %v767_v31 = vadd.f32 %v765_v32, %v10970_v23 }
 0x2e3   :  { %v8154_v42 = vmul.f32 -1.442695, %v767_v31 }
 0x2e9   :  { %v9919_v35 = vpop.eup %9918 }
 0x2ea   :  { %787 = vrot.lane.b32.xlu1 %v9919_v35, %s10664_s6  ;;  %v9921_v41 = vpop.eup %9920 }
 0x2eb   :  { %v505_v39 = vadd.f32 1.0, %v9921_v41 }
 0x2ed   :  { %9922 = vrcp.f32 %v505_v39 }
 0x2ee   :  { %9924 = vpow2.f32 %v8154_v42 }
 0x2f7   :  { %v9923_v43 = vpop.eup %9922 }
 0x2f8   :  { %v9925_v45 = vpop.eup %9924 }
 0x2f9   :  { %v771_v49 = vadd.f32 1.0, %v9925_v45 }
 0x2fb   :  { %9926 = vrcp.f32 %v771_v49 }
 0x305   :  { %v9927_v50 = vpop.eup %9926 }
 0x34a   :  { %v522_v44 = vpop.permute.xlu0 %521 }
 0x34b   :  { %v10993_v46 = vmul.f32 %v9923_v43, %v522_v44 }
 0x34d   :  { %v804_v47 = vpack.c.bf16 %v10993_v46, %v10993_v46 }
 0x34f   :  { %806 = vrot.lane.b32.xlu0 %v804_v47, %s10672_s2 }
 0x35c   :  { %v788_v28 = vpop.permute.xlu1 %787 }
 0x35d   :  { %v10998_v48 = vmul.f32 %v9927_v50, %v788_v28 }
 0x35f   :  { %v1032_v51 = vpack.c.bf16 %v10998_v48, %v10998_v48 }
 0x361   :  { %v1034_v52 = vrot.slane %v1032_v51, 3 }
 0x363   :  { %1035 = vrot.lane.b32.xlu1 %v1034_v52, %s10672_s2 }
 0x3c1   :  { %v807_v54 = vpop.permute.xlu0 %806 }
 0x3c2   :  { %8849 = vmatmul.mubr.msk.bf16.vlgmr.msra.gmra.mrb[16].mxu1 %vm176_vm1, %v807_v54  ;;  %8857 = vmatmul.mubr.msk.bf16.vlgmr.msra.gmra.mrb[20].mxu0 %vm176_vm1, %v807_v54 }
 0x3c3   :  { %8861 = vmatpush3.bf16.msra.mxu1 %v10855_v9  ;;  %8869 = vmatpush3.bf16.msra.mxu0 %v10881_v15 }
 0x3c4   :  { %8862 = vmatprep.subr.bf16.mxu1 %v10669_v0  ;;  %8870 = vmatprep.subr.bf16.mxu0 %v10669_v0 }
 0x3c5   :  { %8864 = vmatprep.mubr.msk.bf16.mxu1 %vm10670_vm0, %v10669_v0  ;;  %8872 = vmatprep.mubr.msk.bf16.mxu0 %vm10670_vm0, %v10669_v0 }
 0x3c7   :  { %8863 = vmatpush3.bf16.msra.mxu1 %v10862_v10  ;;  %8871 = vmatpush3.bf16.msra.mxu0 %v10890_v16 }
 0x3c8   :  { %8876 = vmatprep.subr.bf16.mxu1 %v10669_v0  ;;  %8884 = vmatprep.subr.bf16.mxu0 %v10669_v0 }
 0x3ca   :  { %8865 = vmatmul.mubr.msk.bf16.vlgmr.msra.gmra.mrb[20].mxu1 %vm176_vm1, %v807_v54  ;;  %8873 = vmatmul.mubr.msk.bf16.vlgmr.msra.gmra.mrb[24].mxu0 %vm176_vm1, %v807_v54 }
 0x3cb   :  { %8877 = vmatpush3.bf16.msra.mxu1 %v10875_v13  ;;  %8885 = vmatpush3.bf16.msra.mxu0 %v10901_v18 }
 0x3cc   :  { %8878 = vmatprep.subr.bf16.mxu1 %v10669_v0  ;;  %8886 = vmatprep.subr.bf16.mxu0 %v10669_v0 }
 0x3cd   :  { %8880 = vmatprep.mubr.msk.bf16.mxu1 %vm10670_vm0, %v10669_v0  ;;  %8888 = vmatprep.mubr.msk.bf16.mxu0 %vm10670_vm0, %v10669_v0 }
 0x3cf   :  { %8879 = vmatpush3.bf16.msra.mxu1 %v10879_v14  ;;  %8887 = vmatpush3.bf16.msra.mxu0 %v10912_v20 }
 0x3d0   :  { %8892 = vmatprep.subr.bf16.mxu1 %v10669_v0  ;;  %8900 = vmatprep.subr.bf16.mxu0 %v10669_v0 }
 0x3d5   :  { %v1036_v55 = vpop.permute.xlu1 %1035 }
 0x3d6   :  { %8881 = vmatmul.mubr.msk.bf16.vlgmr.msra.gmra.mrb[24].mxu1 %vm176_vm1, %v1036_v55  ;;  %8889 = vmatmul.mubr.msk.bf16.vlgmr.msra.gmra.mrb[28].mxu0 %vm176_vm1, %v1036_v55 }
 0x3d7   :  { %8893 = vmatpush3.bf16.msra.mxu1 %v10892_v17  ;;  %8901 = vmatpush3.bf16.msra.mxu0 %v10933_v21 }
 0x3d8   :  { %8894 = vmatprep.subr.bf16.mxu1 %v10669_v0  ;;  %8902 = vmatprep.subr.bf16.mxu0 %v10669_v0 }
 0x3d9   :  { %8896 = vmatprep.mubr.msk.bf16.mxu1 %vm10670_vm0, %v10669_v0  ;;  %8904 = vmatprep.mubr.msk.bf16.mxu0 %vm10670_vm0, %v10669_v0 }
 0x3db   :  { %8895 = vmatpush3.bf16.msra.mxu1 %v10903_v19  ;;  %8903 = vmatpush3.bf16.msra.mxu0 %v10936_v22 }
 0x3dc   :  { %8908 = vmatprep.subr.bf16.mxu1 %v10669_v0  ;;  %8916 = vmatprep.subr.bf16.mxu0 %v10669_v0 }
 0x3de   :  { %8897 = vmatmul.mubr.msk.bf16.vlgmr.msra.gmra.mrb[28].mxu1 %vm176_vm1, %v1036_v55  ;;  %8905 = vmatmul.mubr.msk.bf16.vlgmr.msra.gmra.mrb[32].mxu0 %vm176_vm1, %v1036_v55 }
 0x3df   :  { %8909 = vmatpush3.bf16.msra.mxu1 %v10848_v3  ;;  %8917 = vmatpush3.bf16.msra.mxu0 %v10867_v11 }
 0x3e0   :  { %8910 = vmatprep.subr.bf16.mxu1 %v10669_v0  ;;  %8918 = vmatprep.subr.bf16.mxu0 %v10669_v0 }
 0x3e1   :  { %8912 = vmatprep.mubr.msk.bf16.mxu1 %vm10670_vm0, %v10669_v0  ;;  %8920 = vmatprep.mubr.msk.bf16.mxu0 %vm10670_vm0, %v10669_v0 }
 0x3e3   :  { %8911 = vmatpush3.bf16.msra.mxu1 %v10852_v6  ;;  %8919 = vmatpush3.bf16.msra.mxu0 %v10872_v12 }
 0x3e4   :  { %8924 = vmatprep.subr.bf16.mxu1 %v10669_v0  ;;  %8932 = vmatprep.subr.bf16.mxu0 %v10669_v0 }
 0x495   :  { %v845_v3 = vpop.f32.mrb[16].mxu1  ;;  %v895_v56 = vpop.f32.mrb[20].mxu0 }
 0x496   :  { %v8850_v57 = vpop.f32.mrb[17].mxu1  ;;  %v8858_v58 = vpop.f32.mrb[21].mxu0 }
 0x497   :  { %v848_v59 = vpop.f32.mrb[18].mxu1  ;;  %v898_v60 = vpop.f32.mrb[22].mxu0  ;;  %v902_v57 = vrot.slane %v895_v56, 6 }
 0x498   :  { %v8851_v53 = vpop.f32.mrb[19].mxu1  ;;  %v8859_v61 = vpop.f32.mrb[23].mxu0 }
 0x499   :  { %v852_v61 = vrot.slane %v845_v3, 6 }
 0x49d   :  { %v947_v62 = vpop.f32.mrb[20].mxu1  ;;  %v994_v63 = vpop.f32.mrb[24].mxu0 }
 0x49e   :  { %v954_v2 = vrot.slane %v947_v62, 6  ;;  %v8866_v5 = vpop.f32.mrb[21].mxu1  ;;  %v8874_v8 = vpop.f32.mrb[25].mxu0  ;;  %v854_v62 = vadd.f32 %v852_v61, %v10966_v4 }
 0x49f   :  { %v950_v6 = vpop.f32.mrb[22].mxu1  ;;  %v997_v27 = vpop.f32.mrb[26].mxu0 }
 0x4a0   :  { %v8875_v30 = vpop.f32.mrb[27].mxu0  ;;  %955 = vrot.lane.b32.xlu0 %v954_v2, %s10664_s6  ;;  %v8867_v33 = vpop.f32.mrb[23].mxu1  ;;  %v8156_v2 = vmul.f32 -1.442695, %v854_v62 }
 0x4a9   :  { %v1074_v35 = vpop.f32.mrb[24].mxu1  ;;  %v1124_v37 = vpop.f32.mrb[28].mxu0 }
 0x4aa   :  { %v8882_v40 = vpop.f32.mrb[25].mxu1  ;;  %v8890_v29 = vpop.f32.mrb[29].mxu0  ;;  %v1131_v53 = vrot.slane %v1124_v37, 4  ;;  %v1081_v5 = vrot.slane %v1074_v35, 4  ;;  %v1001_v37 = vrot.slane %v994_v63, 6 }
 0x4ab   :  { %v1077_v32 = vpop.f32.mrb[26].mxu1  ;;  %v1127_v41 = vpop.f32.mrb[30].mxu0 }
 0x4ac   :  { %v8883_v31 = vpop.f32.mrb[27].mxu1  ;;  %v8891_v39 = vpop.f32.mrb[31].mxu0  ;;  %v1083_v56 = vadd.f32 %v1081_v5, %v10970_v23 }
 0x4ae   :  { %v8163_v27 = vmul.f32 -1.442695, %v1083_v56 }
 0x4b1   :  { %v1176_v42 = vpop.f32.mrb[28].mxu1  ;;  %v1223_v43 = vpop.f32.mrb[32].mxu0 }
 0x4b2   :  { %v1183_v44 = vrot.slane %v1176_v42, 4  ;;  %v8898_v45 = vpop.f32.mrb[29].mxu1  ;;  %v8906_v47 = vpop.f32.mrb[33].mxu0  ;;  %v1230_v31 = vrot.slane %v1223_v43, 4 }
 0x4b3   :  { %v1179_v49 = vpop.f32.mrb[30].mxu1  ;;  %v1226_v50 = vpop.f32.mrb[34].mxu0 }
 0x4b4   :  { %v8907_v28 = vpop.f32.mrb[35].mxu0  ;;  %1184 = vrot.lane.b32.xlu1 %v1183_v44, %s10664_s6  ;;  %v8899_v51 = vpop.f32.mrb[31].mxu1 }
 0x4b5   :  { %v1013_v51 = vrot.slane %v10983_v7, 6 }
 0x512   :  { %v956_v52 = vpop.permute.xlu0 %955 }
 0x513   :  { %v958_v54 = vadd.f32 %v956_v52, %v10966_v4 }
 0x515   :  { %9928 = vtanh.f32 %v958_v54 }
 0x51f   :  { %v9929_v55 = vpop.eup %9928 }
 0x520   :  { %1017 = vrot.lane.b32.xlu0 %v9929_v55, %s10664_s6 }
 0x524   :  { %903 = vrot.lane.b32.xlu0 %v902_v57, %s10672_s2 }
 0x526   :  { %v1185_v58 = vpop.permute.xlu1 %1184 }
 0x527   :  { %v1187_v59 = vadd.f32 %v1185_v58, %v10970_v23 }
 0x529   :  { %9930 = vtanh.f32 %v1187_v59 }
 0x52a   :  { %9932 = vpow2.f32 %v8156_v2 }
 0x533   :  { %v9931_v60 = vpop.eup %9930 }
 0x534   :  { %1246 = vrot.lane.b32.xlu1 %v9931_v60, %s10664_s6  ;;  %v9933_v8 = vpop.eup %9932  ;;  %v1242_v60 = vrot.slane %v10987_v34, 2 }
 0x535   :  { %v858_v6 = vadd.f32 1.0, %v9933_v8 }
 0x537   :  { %9934 = vrcp.f32 %v858_v6 }
 0x538   :  { %1132 = vrot.lane.b32.xlu1 %v1131_v53, %s10672_s2  ;;  %9936 = vpow2.f32 %v8163_v27 }
 0x541   :  { %v9935_v30 = vpop.eup %9934 }
 0x542   :  { %v9937_v29 = vpop.eup %9936 }
 0x543   :  { %v1087_v3 = vadd.f32 1.0, %v9937_v29 }
 0x545   :  { %9938 = vrcp.f32 %v1087_v3 }
 0x54f   :  { %v9939_v32 = vpop.eup %9938 }
 0x592   :  { %v1018_v33 = vpop.permute.xlu0 %1017 }
 0x593   :  { %v1020_v40 = vmul.f32 %v9935_v30, %v1018_v33 }
 0x595   :  { %1022 = vrot.lane.b32.xlu0 %v1020_v40, %s10672_s2 }
 0x596   :  { %v904_v39 = vpop.permute.xlu0 %903 }
 0x597   :  { %v906_v42 = vadd.f32 %v904_v39, %v10966_v4 }
 0x599   :  { %1002 = vrot.lane.b32.xlu0 %v1001_v37, %s10673_s15  ;;  %v8158_v44 = vmul.f32 -1.442695, %v906_v42 }
 0x59b   :  { %9940 = vpow2.f32 %v8158_v44 }
 0x5a5   :  { %v9941_v47 = vpop.eup %9940 }
 0x5a6   :  { %v1247_v35 = vpop.permute.xlu1 %1246  ;;  %v910_v49 = vadd.f32 1.0, %v9941_v47 }
 0x5a7   :  { %v1249_v41 = vmul.f32 %v9939_v32, %v1247_v35 }
 0x5a8   :  { %9942 = vrcp.f32 %v910_v49 }
 0x5a9   :  { %1251 = vrot.lane.b32.xlu1 %v1249_v41, %s10672_s2 }
 0x5aa   :  { %v1133_v45 = vpop.permute.xlu1 %1132 }
 0x5ab   :  { %v1135_v63 = vadd.f32 %v1133_v45, %v10970_v23 }
 0x5ad   :  { %1231 = vrot.lane.b32.xlu1 %v1230_v31, %s10673_s15  ;;  %v8165_v50 = vmul.f32 -1.442695, %v1135_v63 }
 0x5af   :  { %9944 = vpow2.f32 %v8165_v50 }
 0x5b2   :  { %v9943_v28 = vpop.eup %9942 }
 0x5b3   :  { %v1015_v43 = vmul.f32 %v9943_v28, %v1013_v51 }
 0x5b9   :  { %v9945_v52 = vpop.eup %9944 }
 0x5ba   :  { %v1139_v57 = vadd.f32 1.0, %v9945_v52 }
 0x607   :  { %v1023_v54 = vpop.permute.xlu0 %1022 }
 0x608   :  { %v11076_v55 = vadd.f32 %v1023_v54, %v1015_v43 }
 0x60a   :  { %9946 = vtanh.f32 %v11076_v55 }
 0x60b   :  { %9948 = vrcp.f32 %v1139_v57  ;;  %v1003_v2 = vpop.permute.xlu0 %1002 }
 0x60c   :  { %v1005_v5 = vadd.f32 %v1003_v2, %v10966_v4 }
 0x60e   :  { %v8161_v8 = vmul.f32 -1.442695, %v1005_v5 }
 0x614   :  { %v9947_v58 = vpop.eup %9946 }
 0x615   :  { %1028 = vrot.lane.b32.xlu0 %v9947_v58, %s10664_s6  ;;  %v9949_v59 = vpop.eup %9948 }
 0x616   :  { %v1244_v53 = vmul.f32 %v9949_v59, %v1242_v60 }
 0x61b   :  { %v1252_v61 = vpop.permute.xlu1 %1251 }
 0x61c   :  { %v11081_v62 = vadd.f32 %v1252_v61, %v1244_v53 }
 0x61e   :  { %9950 = vtanh.f32 %v11081_v62 }
 0x61f   :  { %9952 = vpow2.f32 %v8161_v8  ;;  %v1232_v56 = vpop.permute.xlu1 %1231 }
 0x620   :  { %v1234_v27 = vadd.f32 %v1232_v56, %v10970_v23 }
 0x622   :  { %v8168_v34 = vmul.f32 -1.442695, %v1234_v27 }
 0x628   :  { %v9951_v7 = vpop.eup %9950 }
 0x629   :  { %1257 = vrot.lane.b32.xlu1 %v9951_v7, %s10664_s6  ;;  %v9953_v6 = vpop.eup %9952 }
 0x62a   :  { %v1009_v30 = vadd.f32 1.0, %v9953_v6 }
 0x62c   :  { %9954 = vrcp.f32 %v1009_v30 }
 0x62d   :  { %9956 = vpow2.f32 %v8168_v34 }
 0x636   :  { %v9955_v33 = vpop.eup %9954 }
 0x637   :  { %v9957_v37 = vpop.eup %9956 }
 0x638   :  { %v1238_v35 = vadd.f32 1.0, %v9957_v37 }
 0x63a   :  { %9958 = vrcp.f32 %v1238_v35 }
 0x644   :  { %v9959_v41 = vpop.eup %9958 }
 0x687   :  { %v1029_v40 = vpop.permute.xlu0 %1028 }
 0x688   :  { %v11087_v29 = vmul.f32 %v9955_v33, %v1029_v40 }
 0x68a   :  { %v1273_v3 = vpack.c.bf16 %v11087_v29, %v11087_v29 }
 0x68c   :  { %v1275_v32 = vrot.slane %v1273_v3, 1 }
 0x68e   :  { %1276 = vrot.lane.b32.xlu0 %v1275_v32, %s10672_s2 }
 0x69b   :  { %v1258_v31 = vpop.permute.xlu1 %1257 }
 0x69c   :  { %v11092_v39 = vmul.f32 %v9959_v41, %v1258_v31 }
 0x69e   :  { %v1502_v42 = vpack.c.bf16 %v11092_v39, %v11092_v39 }
 0x6a0   :  { %v1504_v44 = vrot.slane %v1502_v42, 2 }
 0x6a2   :  { %1505 = vrot.lane.b32.xlu1 %v1504_v44, %s10672_s2 }
 0x700   :  { %v1277_v45 = vpop.permute.xlu0 %1276 }
 0x701   :  { %8913 = vmatmul.mubr.msk.bf16.vlgmr.msra.gmra.mrb[32].mxu1 %vm176_vm1, %v1277_v45  ;;  %8921 = vmatmul.mubr.msk.bf16.vlgmr.msra.gmra.mrb[36].mxu0 %vm176_vm1, %v1277_v45 }
 0x702   :  { %8925 = vmatpush3.bf16.msra.mxu1 %v10855_v9  ;;  %8933 = vmatpush3.bf16.msra.mxu0 %v10881_v15 }
 0x703   :  { %8926 = vmatprep.subr.bf16.mxu1 %v10669_v0  ;;  %8934 = vmatprep.subr.bf16.mxu0 %v10669_v0 }
 0x704   :  { %8928 = vmatprep.mubr.msk.bf16.mxu1 %vm10670_vm0, %v10669_v0  ;;  %8936 = vmatprep.mubr.msk.bf16.mxu0 %vm10670_vm0, %v10669_v0 }
 0x706   :  { %8927 = vmatpush3.bf16.msra.mxu1 %v10862_v10  ;;  %8935 = vmatpush3.bf16.msra.mxu0 %v10890_v16  ;;  %v11141_v10 = vld [vmem:[#allocation8] sm:$0xff]  }
 0x707   :  { %8940 = vmatprep.subr.bf16.mxu1 %v10669_v0  ;;  %8948 = vmatprep.subr.bf16.mxu0 %v10669_v0 }
 0x709   :  { %8929 = vmatmul.mubr.msk.bf16.vlgmr.msra.gmra.mrb[36].mxu1 %vm176_vm1, %v1277_v45  ;;  %8937 = vmatmul.mubr.msk.bf16.vlgmr.msra.gmra.mrb[40].mxu0 %vm176_vm1, %v1277_v45 }
 0x70a   :  { %8941 = vmatpush3.bf16.msra.mxu1 %v10875_v13  ;;  %8949 = vmatpush3.bf16.msra.mxu0 %v10901_v18  ;;  %v11151_v13 = vld [vmem:[#allocation8 + $0x8] sm:$0xff]  }
 0x70b   :  { %8942 = vmatprep.subr.bf16.mxu1 %v10669_v0  ;;  %8950 = vmatprep.subr.bf16.mxu0 %v10669_v0 }
 0x70c   :  { %8944 = vmatprep.mubr.msk.bf16.mxu1 %vm10670_vm0, %v10669_v0  ;;  %8952 = vmatprep.mubr.msk.bf16.mxu0 %vm10670_vm0, %v10669_v0 }
 0x70e   :  { %8943 = vmatpush3.bf16.msra.mxu1 %v10879_v14  ;;  %8951 = vmatpush3.bf16.msra.mxu0 %v10912_v20 }
 0x70f   :  { %8956 = vmatprep.subr.bf16.mxu1 %v10669_v0  ;;  %8964 = vmatprep.subr.bf16.mxu0 %v10669_v0 }
 0x714   :  { %v1506_v9 = vpop.permute.xlu1 %1505 }
 0x715   :  { %8945 = vmatmul.mubr.msk.bf16.vlgmr.msra.gmra.mrb[40].mxu1 %vm176_vm1, %v1506_v9  ;;  %8953 = vmatmul.mubr.msk.bf16.vlgmr.msra.gmra.mrb[44].mxu0 %vm176_vm1, %v1506_v9 }
 0x716   :  { %8957 = vmatpush3.bf16.msra.mxu1 %v10892_v17  ;;  %8965 = vmatpush3.bf16.msra.mxu0 %v10933_v21 }
 0x717   :  { %8958 = vmatprep.subr.bf16.mxu1 %v10669_v0  ;;  %8966 = vmatprep.subr.bf16.mxu0 %v10669_v0 }
 0x718   :  { %8960 = vmatprep.mubr.msk.bf16.mxu1 %vm10670_vm0, %v10669_v0  ;;  %8968 = vmatprep.mubr.msk.bf16.mxu0 %vm10670_vm0, %v10669_v0 }
 0x71a   :  { %8959 = vmatpush3.bf16.msra.mxu1 %v10903_v19  ;;  %8967 = vmatpush3.bf16.msra.mxu0 %v10936_v22 }
 0x71b   :  { %8972 = vmatprep.subr.bf16.mxu1 %v10669_v0  ;;  %8980 = vmatprep.subr.bf16.mxu0 %v10669_v0 }
 0x71d   :  { %8961 = vmatmul.mubr.msk.bf16.vlgmr.msra.gmra.mrb[44].mxu1 %vm176_vm1, %v1506_v9  ;;  %8969 = vmatmul.mubr.msk.bf16.vlgmr.msra.gmra.mrb[48].mxu0 %vm176_vm1, %v1506_v9 }
 0x71e   :  { %8973 = vmatpush3.bf16.msra.mxu1 %v11141_v10  ;;  %8981 = vmatpush3.bf16.msra.mxu0 %v10867_v11 }
 0x71f   :  { %8974 = vmatprep.subr.bf16.mxu1 %v10669_v0  ;;  %8982 = vmatprep.subr.bf16.mxu0 %v10669_v0 }
 0x720   :  { %8976 = vmatprep.mubr.msk.bf16.mxu1 %vm10670_vm0, %v10669_v0  ;;  %8984 = vmatprep.mubr.msk.bf16.mxu0 %vm10670_vm0, %v10669_v0 }
 0x722   :  { %8975 = vmatpush3.bf16.msra.mxu1 %v11151_v13  ;;  %8983 = vmatpush3.bf16.msra.mxu0 %v10872_v12 }
 0x723   :  { %8988 = vmatprep.subr.bf16.mxu1 %v10669_v0  ;;  %8996 = vmatprep.subr.bf16.mxu0 %v10669_v0 }
 0x7d4   :  { %v1315_v11 = vpop.f32.mrb[32].mxu1  ;;  %v1365_v14 = vpop.f32.mrb[36].mxu0 }
 0x7d5   :  { %v8914_v15 = vpop.f32.mrb[33].mxu1  ;;  %v8922_v16 = vpop.f32.mrb[37].mxu0  ;;  %v1372_v37 = vrot.slane %v1365_v14, 4  ;;  %v1322_v31 = vrot.slane %v1315_v11, 4 }
 0x7d6   :  { %v1318_v17 = vpop.f32.mrb[34].mxu1  ;;  %v1368_v18 = vpop.f32.mrb[38].mxu0 }
 0x7d7   :  { %v8915_v19 = vpop.f32.mrb[35].mxu1  ;;  %v8923_v20 = vpop.f32.mrb[39].mxu0  ;;  %v1324_v42 = vadd.f32 %v1322_v31, %v10966_v4 }
 0x7d9   :  { %v8170_v44 = vmul.f32 -1.442695, %v1324_v42 }
 0x7dc   :  { %v1417_v21 = vpop.f32.mrb[36].mxu1  ;;  %v1464_v22 = vpop.f32.mrb[40].mxu0 }
 0x7dd   :  { %v1424_v47 = vrot.slane %v1417_v21, 4  ;;  %v8930_v63 = vpop.f32.mrb[37].mxu1  ;;  %v8938_v49 = vpop.f32.mrb[41].mxu0  ;;  %v1471_v21 = vrot.slane %v1464_v22, 4 }
 0x7de   :  { %v1420_v50 = vpop.f32.mrb[38].mxu1  ;;  %v1467_v28 = vpop.f32.mrb[42].mxu0 }
 0x7df   :  { %v8939_v12 = vpop.f32.mrb[43].mxu0  ;;  %1425 = vrot.lane.b32.xlu0 %v1424_v47, %s10664_s6  ;;  %v8931_v51 = vpop.f32.mrb[39].mxu1 }
 0x7e8   :  { %v1544_v52 = vpop.f32.mrb[40].mxu1  ;;  %v1594_v43 = vpop.f32.mrb[44].mxu0 }
 0x7e9   :  { %v8946_v54 = vpop.f32.mrb[41].mxu1  ;;  %v8954_v57 = vpop.f32.mrb[45].mxu0  ;;  %v1601_v41 = vrot.slane %v1594_v43, 6  ;;  %v1551_v45 = vrot.slane %v1544_v52, 6 }
 0x7ea   :  { %v1547_v58 = vpop.f32.mrb[42].mxu1  ;;  %v1597_v59 = vpop.f32.mrb[46].mxu0 }
 0x7eb   :  { %v8947_v60 = vpop.f32.mrb[43].mxu1  ;;  %v8955_v53 = vpop.f32.mrb[47].mxu0  ;;  %v1553_v14 = vadd.f32 %v1551_v45, %v10970_v23  ;;  %v1483_v59 = vrot.slane %v11076_v55, 6 }
 0x7ed   :  { %v8177_v16 = vmul.f32 -1.442695, %v1553_v14 }
 0x7f0   :  { %v1646_v61 = vpop.f32.mrb[44].mxu1  ;;  %v1693_v7 = vpop.f32.mrb[48].mxu0 }
 0x7f1   :  { %v1653_v2 = vrot.slane %v1646_v61, 6  ;;  %v8962_v5 = vpop.f32.mrb[45].mxu1  ;;  %v8970_v8 = vpop.f32.mrb[49].mxu0  ;;  %v1700_v50 = vrot.slane %v1693_v7, 6 }
 0x7f2   :  { %v1649_v56 = vpop.f32.mrb[46].mxu1  ;;  %v1696_v6 = vpop.f32.mrb[50].mxu0 }
 0x7f3   :  { %v8971_v27 = vpop.f32.mrb[51].mxu0  ;;  %1654 = vrot.lane.b32.xlu1 %v1653_v2, %s10664_s6  ;;  %v8963_v30 = vpop.f32.mrb[47].mxu1  ;;  %v1712_v56 = vrot.slane %v11081_v62, 2 }
 0x851   :  { %v1426_v34 = vpop.permute.xlu0 %1425 }
 0x852   :  { %v1428_v33 = vadd.f32 %v1426_v34, %v10966_v4 }
 0x854   :  { %9960 = vtanh.f32 %v1428_v33 }
 0x85e   :  { %v9961_v40 = vpop.eup %9960 }
 0x85f   :  { %1487 = vrot.lane.b32.xlu0 %v9961_v40, %s10664_s6 }
 0x863   :  { %1373 = vrot.lane.b32.xlu0 %v1372_v37, %s10672_s2 }
 0x865   :  { %v1655_v3 = vpop.permute.xlu1 %1654 }
 0x866   :  { %v1657_v32 = vadd.f32 %v1655_v3, %v10970_v23 }
 0x868   :  { %9962 = vtanh.f32 %v1657_v32 }
 0x869   :  { %9964 = vpow2.f32 %v8170_v44 }
 0x872   :  { %v9963_v35 = vpop.eup %9962 }
 0x873   :  { %1716 = vrot.lane.b32.xlu1 %v9963_v35, %s10664_s6  ;;  %v9965_v9 = vpop.eup %9964 }
 0x874   :  { %v1328_v15 = vadd.f32 1.0, %v9965_v9 }
 0x876   :  { %9966 = vrcp.f32 %v1328_v15 }
 0x877   :  { %1602 = vrot.lane.b32.xlu1 %v1601_v41, %s10672_s2  ;;  %9968 = vpow2.f32 %v8177_v16 }
 0x880   :  { %v9967_v17 = vpop.eup %9966 }
 0x881   :  { %v9969_v20 = vpop.eup %9968 }
 0x882   :  { %v1557_v11 = vadd.f32 1.0, %v9969_v20 }
 0x884   :  { %9970 = vrcp.f32 %v1557_v11  ;;  %v11200_v11 = vld [vmem:[#allocation8 + $0x30] sm:$0xff]  }
 0x88e   :  { %v9971_v47 = vpop.eup %9970 }
 0x8d1   :  { %v1488_v18 = vpop.permute.xlu0 %1487 }
 0x8d2   :  { %v1490_v19 = vmul.f32 %v9967_v17, %v1488_v18 }
 0x8d4   :  { %1492 = vrot.lane.b32.xlu0 %v1490_v19, %s10672_s2 }
 0x8d5   :  { %v1374_v28 = vpop.permute.xlu0 %1373 }
 0x8d6   :  { %v1376_v12 = vadd.f32 %v1374_v28, %v10966_v4  ;;  %v11231_v28 = vld [vmem:[#allocation8 + $0x48] sm:$0xff]  }
 0x8d8   :  { %1472 = vrot.lane.b32.xlu0 %v1471_v21, %s10673_s15  ;;  %v8172_v51 = vmul.f32 -1.442695, %v1376_v12  ;;  %v11197_v21 = vld [vmem:[#allocation8 + $0x20] sm:$0xff]   ;;  %v11234_v12 = vld [vmem:[#allocation8 + $0x58] sm:$0xff]  }
 0x8da   :  { %9972 = vpow2.f32 %v8172_v51 }
 0x8e4   :  { %v9973_v43 = vpop.eup %9972 }
 0x8e5   :  { %v1717_v63 = vpop.permute.xlu1 %1716  ;;  %v1380_v54 = vadd.f32 1.0, %v9973_v43  ;;  %v11244_v43 = vld [vmem:[#allocation8 + $0x70] sm:$0xff]  }
 0x8e6   :  { %v1719_v49 = vmul.f32 %v9971_v47, %v1717_v63  ;;  %v11209_v47 = vld [vmem:[#allocation8 + $0x28] sm:$0xff]   ;;  %v11212_v63 = vld [vmem:[#allocation8 + $0x38] sm:$0xff]  }
 0x8e7   :  { %9974 = vrcp.f32 %v1380_v54  ;;  %v11256_v54 = vld [vmem:[#allocation8 + $0x78] sm:$0xff]  }
 0x8e8   :  { %1721 = vrot.lane.b32.xlu1 %v1719_v49, %s10672_s2  ;;  %v11219_v49 = vld [vmem:[#allocation8 + $0x40] sm:$0xff]  }
 0x8e9   :  { %v1603_v52 = vpop.permute.xlu1 %1602 }
 0x8ea   :  { %v1605_v22 = vadd.f32 %v1603_v52, %v10970_v23  ;;  %v11241_v52 = vld [vmem:[#allocation8 + $0x60] sm:$0xff]  }
 0x8ec   :  { %1701 = vrot.lane.b32.xlu1 %v1700_v50, %s10673_s15  ;;  %v8179_v57 = vmul.f32 -1.442695, %v1605_v22  ;;  %v11222_v50 = vld [vmem:[#allocation8 + $0x50] sm:$0xff]   ;;  %v11253_v22 = vld [vmem:[#allocation8 + $0x68] sm:$0xff]  }
 0x8ee   :  { %9976 = vpow2.f32 %v8179_v57  ;;  %v11264_v57 = vld [vmem:[#allocation8 + $0x10] sm:$0xff]  }
 0x8f1   :  { %v9975_v58 = vpop.eup %9974 }
 0x8f2   :  { %v1485_v53 = vmul.f32 %v9975_v58, %v1483_v59  ;;  %v11274_v58 = vld [vmem:[#allocation8 + $0x18] sm:$0xff]  }
 0x8f8   :  { %v9977_v60 = vpop.eup %9976 }
 0x8f9   :  { %v1609_v2 = vadd.f32 1.0, %v9977_v60 }
 0x946   :  { %v1493_v61 = vpop.permute.xlu0 %1492 }
 0x947   :  { %v11174_v7 = vadd.f32 %v1493_v61, %v1485_v53 }
 0x949   :  { %9978 = vtanh.f32 %v11174_v7 }
 0x94a   :  { %9980 = vrcp.f32 %v1609_v2  ;;  %v1473_v34 = vpop.permute.xlu0 %1472 }
 0x94b   :  { %v1475_v33 = vadd.f32 %v1473_v34, %v10966_v4 }
 0x94d   :  { %v8175_v40 = vmul.f32 -1.442695, %v1475_v33 }
 0x953   :  { %v9979_v5 = vpop.eup %9978 }
 0x954   :  { %1498 = vrot.lane.b32.xlu0 %v9979_v5, %s10664_s6  ;;  %v9981_v8 = vpop.eup %9980 }
 0x955   :  { %v1714_v6 = vmul.f32 %v9981_v8, %v1712_v56 }
 0x95a   :  { %v1722_v27 = vpop.permute.xlu1 %1721 }
 0x95b   :  { %v11179_v30 = vadd.f32 %v1722_v27, %v1714_v6 }
 0x95d   :  { %9982 = vtanh.f32 %v11179_v30 }
 0x95e   :  { %9984 = vpow2.f32 %v8175_v40  ;;  %v1702_v37 = vpop.permute.xlu1 %1701 }
 0x95f   :  { %v1704_v32 = vadd.f32 %v1702_v37, %v10970_v23 }
 0x961   :  { %v8182_v62 = vmul.f32 -1.442695, %v1704_v32 }
 0x967   :  { %v9983_v55 = vpop.eup %9982 }
 0x968   :  { %1727 = vrot.lane.b32.xlu1 %v9983_v55, %s10664_s6  ;;  %v9985_v3 = vpop.eup %9984 }
 0x969   :  { %v1479_v35 = vadd.f32 1.0, %v9985_v3 }
 0x96b   :  { %9986 = vrcp.f32 %v1479_v35 }
 0x96c   :  { %9988 = vpow2.f32 %v8182_v62 }
 0x975   :  { %v9987_v41 = vpop.eup %9986 }
 0x976   :  { %v9989_v44 = vpop.eup %9988 }
 0x977   :  { %v1708_v14 = vadd.f32 1.0, %v9989_v44 }
 0x979   :  { %9990 = vrcp.f32 %v1708_v14 }
 0x983   :  { %v9991_v15 = vpop.eup %9990 }
 0x9c6   :  { %v1499_v31 = vpop.permute.xlu0 %1498 }
 0x9c7   :  { %v11185_v42 = vmul.f32 %v9987_v41, %v1499_v31 }
 0x9c9   :  { %v1741_v45 = vpack.c.bf16 %v11185_v42, %v11185_v42 }
 0x9cb   :  { %v1743_v9 = vrot.slane %v1741_v45, 2 }
 0x9cd   :  { %1744 = vrot.lane.b32.xlu0 %v1743_v9, %s10672_s2 }
 0x9da   :  { %v1728_v16 = vpop.permute.xlu1 %1727 }
 0x9db   :  { %v11190_v17 = vmul.f32 %v9991_v15, %v1728_v16 }
 0x9dd   :  { %v1970_v18 = vpack.c.bf16 %v11190_v17, %v11190_v17 }
 0x9df   :  { %v1972_v19 = vrot.slane %v1970_v18, 1 }
 0x9e1   :  { %1973 = vrot.lane.b32.xlu1 %v1972_v19, %s10672_s2 }
 0xa3f   :  { %v1745_v20 = vpop.permute.xlu0 %1744 }
 0xa40   :  { %8977 = vmatmul.mubr.msk.bf16.vlgmr.msra.gmra.mrb[48].mxu1 %vm176_vm1, %v1745_v20  ;;  %8985 = vmatmul.mubr.msk.bf16.vlgmr.msra.gmra.mrb[52].mxu0 %vm176_vm1, %v1745_v20 }
 0xa41   :  { %8989 = vmatpush3.bf16.msra.mxu1 %v11197_v21  ;;  %8997 = vmatpush3.bf16.msra.mxu0 %v11200_v11 }
 0xa42   :  { %8990 = vmatprep.subr.bf16.mxu1 %v10669_v0  ;;  %8998 = vmatprep.subr.bf16.mxu0 %v10669_v0 }
 0xa43   :  { %8992 = vmatprep.mubr.msk.bf16.mxu1 %vm10670_vm0, %v10669_v0  ;;  %9000 = vmatprep.mubr.msk.bf16.mxu0 %vm10670_vm0, %v10669_v0 }
 0xa45   :  { %8991 = vmatpush3.bf16.msra.mxu1 %v11209_v47  ;;  %8999 = vmatpush3.bf16.msra.mxu0 %v11212_v63 }
 0xa46   :  { %9004 = vmatprep.subr.bf16.mxu1 %v10669_v0  ;;  %9012 = vmatprep.subr.bf16.mxu0 %v10669_v0 }
 0xa48   :  { %8993 = vmatmul.mubr.msk.bf16.vlgmr.msra.gmra.mrb[52].mxu1 %vm176_vm1, %v1745_v20  ;;  %9001 = vmatmul.mubr.msk.bf16.vlgmr.msra.gmra.mrb[56].mxu0 %vm176_vm1, %v1745_v20 }
 0xa49   :  { %9005 = vmatpush3.bf16.msra.mxu1 %v11219_v49  ;;  %9013 = vmatpush3.bf16.msra.mxu0 %v11222_v50 }
 0xa4a   :  { %9006 = vmatprep.subr.bf16.mxu1 %v10669_v0  ;;  %9014 = vmatprep.subr.bf16.mxu0 %v10669_v0 }
 0xa4b   :  { %9008 = vmatprep.mubr.msk.bf16.mxu1 %vm10670_vm0, %v10669_v0  ;;  %9016 = vmatprep.mubr.msk.bf16.mxu0 %vm10670_vm0, %v10669_v0 }
 0xa4d   :  { %9007 = vmatpush3.bf16.msra.mxu1 %v11231_v28  ;;  %9015 = vmatpush3.bf16.msra.mxu0 %v11234_v12 }
 0xa4e   :  { %9020 = vmatprep.subr.bf16.mxu1 %v10669_v0  ;;  %9028 = vmatprep.subr.bf16.mxu0 %v10669_v0 }
 0xa53   :  { %v1974_v51 = vpop.permute.xlu1 %1973 }
 0xa54   :  { %9009 = vmatmul.mubr.msk.bf16.vlgmr.msra.gmra.mrb[56].mxu1 %vm176_vm1, %v1974_v51  ;;  %9017 = vmatmul.mubr.msk.bf16.vlgmr.msra.gmra.mrb[60].mxu0 %vm176_vm1, %v1974_v51 }
 0xa55   :  { %9021 = vmatpush3.bf16.msra.mxu1 %v11241_v52  ;;  %9029 = vmatpush3.bf16.msra.mxu0 %v11244_v43 }
 0xa56   :  { %9022 = vmatprep.subr.bf16.mxu1 %v10669_v0  ;;  %9030 = vmatprep.subr.bf16.mxu0 %v10669_v0 }
 0xa57   :  { %9024 = vmatprep.mubr.msk.bf16.mxu1 %vm10670_vm0, %v10669_v0  ;;  %9032 = vmatprep.mubr.msk.bf16.mxu0 %vm10670_vm0, %v10669_v0 }
 0xa59   :  { %9023 = vmatpush3.bf16.msra.mxu1 %v11253_v22  ;;  %9031 = vmatpush3.bf16.msra.mxu0 %v11256_v54 }
 0xa5a   :  { %9036 = vmatprep.subr.bf16.mxu1 %v10669_v0  ;;  %9044 = vmatprep.subr.bf16.mxu0 %v10669_v0 }
 0xa5c   :  { %9025 = vmatmul.mubr.msk.bf16.vlgmr.msra.gmra.mrb[60].mxu1 %vm176_vm1, %v1974_v51  ;;  %9033 = vmatmul.mubr.msk.bf16.vlgmr.msra.gmra.mrb[64].mxu0 %vm176_vm1, %v1974_v51 }
 0xa5d   :  { %9037 = vmatpush3.bf16.msra.mxu1 %v11141_v10  ;;  %9045 = vmatpush3.bf16.msra.mxu0 %v11264_v57 }
 0xa5e   :  { %9038 = vmatprep.subr.bf16.mxu1 %v10669_v0  ;;  %9046 = vmatprep.subr.bf16.mxu0 %v10669_v0 }
 0xa5f   :  { %9040 = vmatprep.mubr.msk.bf16.mxu1 %vm10670_vm0, %v10669_v0  ;;  %9048 = vmatprep.mubr.msk.bf16.mxu0 %vm10670_vm0, %v10669_v0 }
 0xa61   :  { %9039 = vmatpush3.bf16.msra.mxu1 %v11151_v13  ;;  %9047 = vmatpush3.bf16.msra.mxu0 %v11274_v58 }
 0xa62   :  { %9052 = vmatprep.subr.bf16.mxu1 %v10669_v0  ;;  %9060 = vmatprep.subr.bf16.mxu0 %v10669_v0 }
 0xb13   :  { %v1783_v59 = vpop.f32.mrb[48].mxu1  ;;  %v1833_v60 = vpop.f32.mrb[52].mxu0 }
 0xb14   :  { %v8978_v53 = vpop.f32.mrb[49].mxu1  ;;  %v8986_v61 = vpop.f32.mrb[53].mxu0 }
 0xb15   :  { %v1786_v2 = vpop.f32.mrb[50].mxu1  ;;  %v1836_v5 = vpop.f32.mrb[54].mxu0 }
 0xb16   :  { %v8979_v8 = vpop.f32.mrb[51].mxu1  ;;  %v8987_v56 = vpop.f32.mrb[55].mxu0 }
 0xb17   :  { %v1840_v56 = vrot.slane %v1833_v60, 2 }
 0xb1b   :  { %v1885_v6 = vpop.f32.mrb[52].mxu1  ;;  %v1932_v27 = vpop.f32.mrb[56].mxu0 }
 0xb1c   :  { %v1892_v55 = vrot.slane %v1885_v6, 2  ;;  %v8994_v34 = vpop.f32.mrb[53].mxu1  ;;  %v9002_v33 = vpop.f32.mrb[57].mxu0 }
 0xb1d   :  { %v1888_v40 = vpop.f32.mrb[54].mxu1  ;;  %v1935_v37 = vpop.f32.mrb[58].mxu0  ;;  %v1790_v33 = vrot.slane %v1783_v59, 2 }
 0xb1e   :  { %v9003_v3 = vpop.f32.mrb[59].mxu0  ;;  %1893 = vrot.lane.b32.xlu0 %v1892_v55, %s10664_s6  ;;  %v8995_v32 = vpop.f32.mrb[55].mxu1 }
 0xb1f   :  { %v1792_v40 = vadd.f32 %v1790_v33, %v10966_v4 }
 0xb21   :  { %v8184_v37 = vmul.f32 -1.442695, %v1792_v40 }
 0xb27   :  { %v2012_v35 = vpop.f32.mrb[56].mxu1  ;;  %v2059_v62 = vpop.f32.mrb[60].mxu0 }
 0xb28   :  { %v9010_v41 = vpop.f32.mrb[57].mxu1  ;;  %v9018_v31 = vpop.f32.mrb[61].mxu0  ;;  %v2018_v32 = vadd.f32 %v2012_v35, %v10970_v23 }
 0xb29   :  { %v2015_v44 = vpop.f32.mrb[58].mxu1  ;;  %v2062_v45 = vpop.f32.mrb[62].mxu0 }
 0xb2a   :  { %v9011_v9 = vpop.f32.mrb[59].mxu1  ;;  %v9019_v14 = vpop.f32.mrb[63].mxu0  ;;  %v8191_v41 = vmul.f32 -1.442695, %v2018_v32 }
 0xb2f   :  { %v2110_v15 = vpop.f32.mrb[60].mxu1  ;;  %v2156_v16 = vpop.f32.mrb[64].mxu0 }
 0xb30   :  { %v9034_v18 = vpop.f32.mrb[65].mxu0  ;;  %2117 = vrot.lane.b32.xlu1 %v2110_v15, %s10664_s6  ;;  %v9026_v19 = vpop.f32.mrb[61].mxu1 }
 0xb31   :  { %v2113_v20 = vpop.f32.mrb[62].mxu1  ;;  %v2159_v51 = vpop.f32.mrb[66].mxu0 }
 0xb32   :  { %v9027_v53 = vpop.f32.mrb[63].mxu1  ;;  %v9035_v61 = vpop.f32.mrb[67].mxu0 }
 0xb90   :  { %v1894_v2 = vpop.permute.xlu0 %1893 }
 0xb91   :  { %v1896_v5 = vadd.f32 %v1894_v2, %v10966_v4 }
 0xb93   :  { %9992 = vtanh.f32 %v1896_v5 }
 0xb9d   :  { %v9993_v8 = vpop.eup %9992 }
 0xb9e   :  { %1955 = vrot.lane.b32.xlu0 %v9993_v8, %s10664_s6 }
 0xba2   :  { %1841 = vrot.lane.b32.xlu0 %v1840_v56, %s10672_s2  ;;  %v2118_v6 = vpop.permute.xlu1 %2117  ;;  %v1951_v56 = vrot.slane %v11174_v7, 6 }
 0xba3   :  { %v2120_v55 = vadd.f32 %v2118_v6, %v10970_v23 }
 0xba5   :  { %9994 = vtanh.f32 %v2120_v55 }
 0xba6   :  { %9996 = vpow2.f32 %v8184_v37  ;;  %v2174_v37 = vrot.slane %v11179_v30, 2 }
 0xbaf   :  { %v9995_v34 = vpop.eup %9994 }
 0xbb0   :  { %2178 = vrot.lane.b32.xlu1 %v9995_v34, %s10664_s6  ;;  %v9997_v3 = vpop.eup %9996 }
 0xbb1   :  { %v1796_v60 = vadd.f32 1.0, %v9997_v3 }
 0xbb3   :  { %9998 = vrcp.f32 %v1796_v60 }
 0xbb4   :  { %2066 = vrot.lane.b32.xlu1 %v2059_v62, %s10672_s2  ;;  %10000 = vpow2.f32 %v8191_v41  ;;  %v1939_v62 = vrot.slane %v1932_v27, 2 }
 0xbbd   :  { %v9999_v31 = vpop.eup %9998 }
 0xbbe   :  { %v10001_v45 = vpop.eup %10000 }
 0xbbf   :  { %v2022_v14 = vadd.f32 1.0, %v10001_v45 }
 0xbc1   :  { %10002 = vrcp.f32 %v2022_v14 }
 0xbcb   :  { %v10003_v59 = vpop.eup %10002 }
 0xc10   :  { %v1956_v44 = vpop.permute.xlu0 %1955 }
 0xc11   :  { %v1958_v9 = vmul.f32 %v9999_v31, %v1956_v44 }
 0xc13   :  { %1960 = vrot.lane.b32.xlu0 %v1958_v9, %s10672_s2 }
 0xc14   :  { %v1842_v35 = vpop.permute.xlu0 %1841 }
 0xc15   :  { %v1844_v19 = vadd.f32 %v1842_v35, %v10966_v4 }
 0xc17   :  { %1940 = vrot.lane.b32.xlu0 %v1939_v62, %s10673_s15  ;;  %v8186_v20 = vmul.f32 -1.442695, %v1844_v19 }
 0xc19   :  { %10004 = vpow2.f32 %v8186_v20 }
 0xc22   :  { %v2179_v15 = vpop.permute.xlu1 %2178 }
 0xc23   :  { %v2181_v18 = vmul.f32 %v10003_v59, %v2179_v15  ;;  %v10005_v53 = vpop.eup %10004 }
 0xc24   :  { %v1848_v27 = vadd.f32 1.0, %v10005_v53 }
 0xc25   :  { %2183 = vrot.lane.b32.xlu1 %v2181_v18, %s10672_s2 }
 0xc26   :  { %v2067_v51 = vpop.permute.xlu1 %2066  ;;  %10006 = vrcp.f32 %v1848_v27 }
 0xc27   :  { %v2069_v61 = vadd.f32 %v2067_v51, %v10970_v23 }
 0xc29   :  { %2163 = vrot.lane.b32.xlu1 %v2156_v16, %s10673_s15  ;;  %v8193_v2 = vmul.f32 -1.442695, %v2069_v61 }
 0xc2b   :  { %10008 = vpow2.f32 %v8193_v2 }
 0xc30   :  { %v10007_v5 = vpop.eup %10006 }
 0xc31   :  { %v1953_v6 = vmul.f32 %v10007_v5, %v1951_v56 }
 0xc35   :  { %v10009_v8 = vpop.eup %10008 }
 0xc36   :  { %v2073_v55 = vadd.f32 1.0, %v10009_v8 }
 0xc85   :  { %v1961_v16 = vpop.permute.xlu0 %1960 }
 0xc86   :  { %v11296_v34 = vadd.f32 %v1961_v16, %v1953_v6 }
 0xc88   :  { %10010 = vtanh.f32 %v11296_v34 }
 0xc89   :  { %10012 = vrcp.f32 %v2073_v55  ;;  %v1941_v41 = vpop.permute.xlu0 %1940 }
 0xc8a   :  { %v1943_v31 = vadd.f32 %v1941_v41, %v10966_v4 }
 0xc8c   :  { %v8189_v44 = vmul.f32 -1.442695, %v1943_v31 }
 0xc92   :  { %v10011_v33 = vpop.eup %10010 }
 0xc93   :  { %v10013_v40 = vpop.eup %10012  ;;  %1966 = vrot.lane.b32.xlu0 %v10011_v33, %s10664_s6 }
 0xc94   :  { %v2176_v3 = vmul.f32 %v10013_v40, %v2174_v37 }
 0xc97   :  { %v2184_v32 = vpop.permute.xlu1 %2183 }
 0xc98   :  { %v11301_v60 = vadd.f32 %v2184_v32, %v2176_v3 }
 0xc9a   :  { %10014 = vtanh.f32 %v11301_v60 }
 0xc9b   :  { %10016 = vpow2.f32 %v8189_v44  ;;  %v2164_v45 = vpop.permute.xlu1 %2163 }
 0xc9c   :  { %v2166_v14 = vadd.f32 %v2164_v45, %v10970_v23 }
 0xc9e   :  { %v8196_v30 = vmul.f32 -1.442695, %v2166_v14 }
 0xca4   :  { %v10015_v7 = vpop.eup %10014 }
 0xca5   :  { %2189 = vrot.lane.b32.xlu1 %v10015_v7, %s10664_s6  ;;  %v10017_v9 = vpop.eup %10016 }
 0xca6   :  { %v1947_v62 = vadd.f32 1.0, %v10017_v9 }
 0xca8   :  { %10018 = vrcp.f32 %v1947_v62 }
 0xca9   :  { %10020 = vpow2.f32 %v8196_v30 }
 0xcb2   :  { %v10019_v59 = vpop.eup %10018 }
 0xcb3   :  { %v10021_v18 = vpop.eup %10020 }
 0xcb4   :  { %v2170_v20 = vadd.f32 1.0, %v10021_v18 }
 0xcb6   :  { %10022 = vrcp.f32 %v2170_v20 }
 0xcc0   :  { %v10023_v51 = vpop.eup %10022 }
 0xd05   :  { %v1967_v15 = vpop.permute.xlu0 %1966 }
 0xd06   :  { %v11307_v35 = vmul.f32 %v10019_v59, %v1967_v15 }
 0xd08   :  { %v2203_v19 = vpack.c.bf16 %v11307_v35, %v11307_v35 }
 0xd0a   :  { %v2205_v4 = vrot.slane %v2203_v19, 3 }
 0xd0c   :  { %2206 = vrot.lane.b32.xlu0 %v2205_v4, %s10672_s2 }
 0xd17   :  { %v2190_v53 = vpop.permute.xlu1 %2189 }
 0xd18   :  { %v11312_v23 = vmul.f32 %v10023_v51, %v2190_v53 }
 0xd1a   :  { %v2426_v61 = vpack.c.bf16 %v11312_v23, %v11312_v23 }
 0xd1c   :  { %2428 = vrot.lane.b32.xlu1 %v2426_v61, %s10672_s2 }
 0xd7e   :  { %v2207_v27 = vpop.permute.xlu0 %2206 }
 0xd7f   :  { %9041 = vmatmul.mubr.msk.bf16.vlgmr.msra.gmra.mrb[64].mxu1 %vm176_vm1, %v2207_v27  ;;  %9049 = vmatmul.mubr.msk.bf16.vlgmr.msra.gmra.mrb[68].mxu0 %vm176_vm1, %v2207_v27 }
 0xd80   :  { %9053 = vmatpush3.bf16.msra.mxu1 %v11197_v21  ;;  %9061 = vmatpush3.bf16.msra.mxu0 %v11200_v11 }
 0xd81   :  { %9054 = vmatprep.subr.bf16.mxu1 %v10669_v0  ;;  %9062 = vmatprep.subr.bf16.mxu0 %v10669_v0 }
 0xd82   :  { %9056 = vmatprep.mubr.msk.bf16.mxu1 %vm10670_vm0, %v10669_v0  ;;  %9064 = vmatprep.mubr.msk.bf16.mxu0 %vm10670_vm0, %v10669_v0 }
 0xd84   :  { %9055 = vmatpush3.bf16.msra.mxu1 %v11209_v47  ;;  %9063 = vmatpush3.bf16.msra.mxu0 %v11212_v63 }
 0xd85   :  { %9068 = vmatprep.subr.bf16.mxu1 %v10669_v0  ;;  %9076 = vmatprep.subr.bf16.mxu0 %v10669_v0 }
 0xd87   :  { %9057 = vmatmul.mubr.msk.bf16.vlgmr.msra.gmra.mrb[68].mxu1 %vm176_vm1, %v2207_v27  ;;  %9065 = vmatmul.mubr.msk.bf16.vlgmr.msra.gmra.mrb[72].mxu0 %vm176_vm1, %v2207_v27 }
 0xd88   :  { %9069 = vmatpush3.bf16.msra.mxu1 %v11219_v49  ;;  %9077 = vmatpush3.bf16.msra.mxu0 %v11222_v50 }
 0xd89   :  { %9070 = vmatprep.subr.bf16.mxu1 %v10669_v0  ;;  %9078 = vmatprep.subr.bf16.mxu0 %v10669_v0 }
 0xd8a   :  { %9072 = vmatprep.mubr.msk.bf16.mxu1 %vm10670_vm0, %v10669_v0  ;;  %9080 = vmatprep.mubr.msk.bf16.mxu0 %vm10670_vm0, %v10669_v0 }
 0xd8c   :  { %9071 = vmatpush3.bf16.msra.mxu1 %v11231_v28  ;;  %9079 = vmatpush3.bf16.msra.mxu0 %v11234_v12 }
 0xd8d   :  { %9084 = vmatprep.subr.bf16.mxu1 %v10669_v0  ;;  %9092 = vmatprep.subr.bf16.mxu0 %v10669_v0 }
 0xd8e   :  { %v2429_v2 = vpop.permute.xlu1 %2428 }
 0xd8f   :  { %9073 = vmatmul.mubr.msk.bf16.vlgmr.msra.gmra.mrb[72].mxu1 %vm176_vm1, %v2429_v2  ;;  %9081 = vmatmul.mubr.msk.bf16.vlgmr.msra.gmra.mrb[76].mxu0 %vm176_vm1, %v2429_v2 }
 0xd90   :  { %9085 = vmatpush3.bf16.msra.mxu1 %v11241_v52  ;;  %9093 = vmatpush3.bf16.msra.mxu0 %v11244_v43 }
 0xd91   :  { %9086 = vmatprep.subr.bf16.mxu1 %v10669_v0  ;;  %9094 = vmatprep.subr.bf16.mxu0 %v10669_v0 }
 0xd92   :  { %9088 = vmatprep.mubr.msk.bf16.mxu1 %vm10670_vm0, %v10669_v0  ;;  %9096 = vmatprep.mubr.msk.bf16.mxu0 %vm10670_vm0, %v10669_v0 }
 0xd94   :  { %9087 = vmatpush3.bf16.msra.mxu1 %v11253_v22  ;;  %9095 = vmatpush3.bf16.msra.mxu0 %v11256_v54 }
 0xd95   :  { %9100 = vmatprep.subr.bf16.mxu1 %v10669_v0  ;;  %9108 = vmatprep.subr.bf16.mxu0 %v10669_v0 }
 0xd97   :  { %9089 = vmatmul.mubr.msk.bf16.vlgmr.msra.gmra.mrb[76].mxu1 %vm176_vm1, %v2429_v2  ;;  %9097 = vmatmul.mubr.msk.bf16.vlgmr.msra.gmra.mrb[80].mxu0 %vm176_vm1, %v2429_v2 }
 0xd98   :  { %9101 = vmatpush3.bf16.msra.mxu1 %v11141_v10  ;;  %9109 = vmatpush3.bf16.msra.mxu0 %v11264_v57 }
 0xd99   :  { %9102 = vmatprep.subr.bf16.mxu1 %v10669_v0  ;;  %9110 = vmatprep.subr.bf16.mxu0 %v10669_v0 }
 0xd9a   :  { %9104 = vmatprep.mubr.msk.bf16.mxu1 %vm10670_vm0, %v10669_v0  ;;  %9112 = vmatprep.mubr.msk.bf16.mxu0 %vm10670_vm0, %v10669_v0 }
 0xd9c   :  { %9103 = vmatpush3.bf16.msra.mxu1 %v11151_v13  ;;  %9111 = vmatpush3.bf16.msra.mxu0 %v11274_v58 }
 0xd9d   :  { %9116 = vmatprep.subr.bf16.mxu1 %v10669_v0  ;;  %9124 = vmatprep.subr.bf16.mxu0 %v10669_v0 }
 0xe52   :  { %v2245_v10 = vpop.f32.mrb[64].mxu1  ;;  %v2292_v5 = vpop.f32.mrb[68].mxu0 }
 0xe53   :  { %v9042_v8 = vpop.f32.mrb[65].mxu1  ;;  %v9050_v56 = vpop.f32.mrb[69].mxu0 }
 0xe54   :  { %v2248_v6 = vpop.f32.mrb[66].mxu1  ;;  %v2295_v55 = vpop.f32.mrb[70].mxu0 }
 0xe55   :  { %v9043_v16 = vpop.f32.mrb[67].mxu1  ;;  %v9051_v33 = vpop.f32.mrb[71].mxu0 }
 0xe5a   :  { %v2343_v40 = vpop.f32.mrb[68].mxu1  ;;  %v2389_v37 = vpop.f32.mrb[72].mxu0 }
 0xe5b   :  { %v9066_v3 = vpop.f32.mrb[73].mxu0  ;;  %2350 = vrot.lane.b32.xlu0 %v2343_v40, %s10664_s6  ;;  %v9058_v13 = vpop.f32.mrb[69].mxu1 }
 0xe5c   :  { %v2346_v32 = vpop.f32.mrb[70].mxu1  ;;  %v2392_v7 = vpop.f32.mrb[74].mxu0  ;;  %v2251_v3 = vadd.f32 %v2245_v10, %v10961_v38 }
 0xe5d   :  { %v9059_v41 = vpop.f32.mrb[71].mxu1  ;;  %v9067_v31 = vpop.f32.mrb[75].mxu0 }
 0xe5e   :  { %v8198_v13 = vmul.f32 -1.442695, %v2251_v3  ;;  %v2635_v3 = vrot.slane %v11301_v60, 2 }
 0xe62   :  { %v2467_v44 = vpop.f32.mrb[72].mxu1  ;;  %v2517_v45 = vpop.f32.mrb[76].mxu0 }
 0xe63   :  { %v9074_v9 = vpop.f32.mrb[73].mxu1  ;;  %v9082_v14 = vpop.f32.mrb[77].mxu0  ;;  %v2524_v40 = vrot.slane %v2517_v45, 2  ;;  %v2474_v32 = vrot.slane %v2467_v44, 2 }
 0xe64   :  { %v2470_v62 = vpop.f32.mrb[74].mxu1  ;;  %v2520_v30 = vpop.f32.mrb[78].mxu0 }
 0xe65   :  { %v9075_v59 = vpop.f32.mrb[75].mxu1  ;;  %v9083_v15 = vpop.f32.mrb[79].mxu0  ;;  %v2476_v41 = vadd.f32 %v2474_v32, %v10959_v36 }
 0xe6a   :  { %v2569_v18 = vpop.f32.mrb[76].mxu1  ;;  %v2616_v19 = vpop.f32.mrb[80].mxu0 }
 0xe6b   :  { %v2576_v20 = vrot.slane %v2569_v18, 2  ;;  %v9090_v4 = vpop.f32.mrb[77].mxu1  ;;  %v9098_v51 = vpop.f32.mrb[81].mxu0  ;;  %v2623_v15 = vrot.slane %v2616_v19, 2 }
 0xe6c   :  { %v2572_v53 = vpop.f32.mrb[78].mxu1  ;;  %v2619_v61 = vpop.f32.mrb[82].mxu0 }
 0xe6d   :  { %v9099_v27 = vpop.f32.mrb[83].mxu0  ;;  %2577 = vrot.lane.b32.xlu1 %v2576_v20, %s10664_s6  ;;  %v9091_v2 = vpop.f32.mrb[79].mxu1 }
 0xecd   :  { %v2351_v8 = vpop.permute.xlu0 %2350 }
 0xece   :  { %v2353_v56 = vadd.f32 %v2351_v8, %v10961_v38 }
 0xed0   :  { %10024 = vtanh.f32 %v2353_v56  ;;  %v2407_v56 = vrot.slane %v11296_v34, 6 }
 0xeda   :  { %v10025_v6 = vpop.eup %10024 }
 0xedb   :  { %2411 = vrot.lane.b32.xlu0 %v10025_v6, %s10664_s6 }
 0xedf   :  { %2299 = vrot.lane.b32.xlu0 %v2292_v5, %s10672_s2  ;;  %v2578_v55 = vpop.permute.xlu1 %2577  ;;  %v8205_v5 = vmul.f32 -1.442695, %v2476_v41 }
 0xee0   :  { %v2580_v16 = vadd.f32 %v2578_v55, %v10959_v36 }
 0xee2   :  { %10026 = vtanh.f32 %v2580_v16 }
 0xee3   :  { %10028 = vpow2.f32 %v8198_v13 }
 0xeec   :  { %v10027_v33 = vpop.eup %10026 }
 0xeed   :  { %2639 = vrot.lane.b32.xlu1 %v10027_v33, %s10664_s6  ;;  %v10029_v7 = vpop.eup %10028 }
 0xeee   :  { %v2255_v31 = vadd.f32 1.0, %v10029_v7 }
 0xef0   :  { %10030 = vrcp.f32 %v2255_v31 }
 0xef1   :  { %2525 = vrot.lane.b32.xlu1 %v2524_v40, %s10672_s2  ;;  %10032 = vpow2.f32 %v8205_v5 }
 0xefa   :  { %v10031_v9 = vpop.eup %10030 }
 0xefb   :  { %v10033_v62 = vpop.eup %10032 }
 0xefc   :  { %v2480_v45 = vadd.f32 1.0, %v10033_v62 }
 0xefe   :  { %10034 = vrcp.f32 %v2480_v45 }
 0xf08   :  { %v10035_v10 = vpop.eup %10034 }
 0xf4d   :  { %v2412_v14 = vpop.permute.xlu0 %2411 }
 0xf4e   :  { %v2414_v30 = vmul.f32 %v10031_v9, %v2412_v14 }
 0xf50   :  { %2416 = vrot.lane.b32.xlu0 %v2414_v30, %s10672_s2 }
 0xf51   :  { %v2300_v18 = vpop.permute.xlu0 %2299 }
 0xf52   :  { %v2302_v20 = vadd.f32 %v2300_v18, %v10961_v38 }
 0xf54   :  { %2396 = vrot.lane.b32.xlu0 %v2389_v37, %s10673_s15  ;;  %v8200_v4 = vmul.f32 -1.442695, %v2302_v20 }
 0xf56   :  { %10036 = vpow2.f32 %v8200_v4 }
 0xf5f   :  { %v2640_v59 = vpop.permute.xlu1 %2639 }
 0xf60   :  { %v2642_v44 = vmul.f32 %v10035_v10, %v2640_v59  ;;  %v10037_v53 = vpop.eup %10036 }
 0xf61   :  { %v2306_v27 = vadd.f32 1.0, %v10037_v53 }
 0xf62   :  { %2644 = vrot.lane.b32.xlu1 %v2642_v44, %s10672_s2 }
 0xf63   :  { %v2526_v51 = vpop.permute.xlu1 %2525  ;;  %10038 = vrcp.f32 %v2306_v27 }
 0xf64   :  { %v2528_v61 = vadd.f32 %v2526_v51, %v10959_v36 }
 0xf66   :  { %2624 = vrot.lane.b32.xlu1 %v2623_v15, %s10673_s15  ;;  %v8207_v37 = vmul.f32 -1.442695, %v2528_v61 }
 0xf68   :  { %10040 = vpow2.f32 %v8207_v37 }
 0xf6d   :  { %v10039_v2 = vpop.eup %10038 }
 0xf6e   :  { %v2409_v19 = vmul.f32 %v10039_v2, %v2407_v56 }
 0xf72   :  { %v10041_v8 = vpop.eup %10040 }
 0xf73   :  { %v2532_v6 = vadd.f32 1.0, %v10041_v8 }
 0xfc2   :  { %v2417_v55 = vpop.permute.xlu0 %2416 }
 0xfc3   :  { %v11390_v16 = vadd.f32 %v2417_v55, %v2409_v19 }
 0xfc5   :  { %10042 = vtanh.f32 %v11390_v16 }
 0xfc6   :  { %10044 = vrcp.f32 %v2532_v6  ;;  %v2397_v41 = vpop.permute.xlu0 %2396 }
 0xfc7   :  { %v2399_v31 = vadd.f32 %v2397_v41, %v10961_v38 }
 0xfc9   :  { %v8203_v5 = vmul.f32 -1.442695, %v2399_v31 }
 0xfcf   :  { %v10043_v33 = vpop.eup %10042 }
 0xfd0   :  { %v10045_v40 = vpop.eup %10044  ;;  %2422 = vrot.lane.b32.xlu0 %v10043_v33, %s10664_s6 }
 0xfd1   :  { %v2637_v13 = vmul.f32 %v10045_v40, %v2635_v3 }
 0xfd4   :  { %v2645_v32 = vpop.permute.xlu1 %2644 }
 0xfd5   :  { %v11395_v7 = vadd.f32 %v2645_v32, %v2637_v13 }
 0xfd7   :  { %10046 = vtanh.f32 %v11395_v7 }
 0xfd8   :  { %10048 = vpow2.f32 %v8203_v5  ;;  %v2625_v9 = vpop.permute.xlu1 %2624 }
 0xfd9   :  { %v2627_v62 = vadd.f32 %v2625_v9, %v10959_v36 }
 0xfdb   :  { %v8210_v60 = vmul.f32 -1.442695, %v2627_v62 }
 0xfe1   :  { %v10047_v34 = vpop.eup %10046 }
 0xfe2   :  { %2650 = vrot.lane.b32.xlu1 %v10047_v34, %s10664_s6  ;;  %v10049_v14 = vpop.eup %10048 }
 0xfe3   :  { %v2403_v30 = vadd.f32 1.0, %v10049_v14 }
 0xfe5   :  { %10050 = vrcp.f32 %v2403_v30 }
 0xfe6   :  { %10052 = vpow2.f32 %v8210_v60 }
 0xfef   :  { %v10051_v45 = vpop.eup %10050 }
 0xff0   :  { %v10053_v59 = vpop.eup %10052 }
 0xff1   :  { %v2631_v18 = vadd.f32 1.0, %v10053_v59 }
 0xff3   :  { %10054 = vrcp.f32 %v2631_v18 }
 0xffd   :  { %v10055_v20 = vpop.eup %10054 }
0x1042   :  { %v2423_v10 = vpop.permute.xlu0 %2422 }
0x1043   :  { %v11401_v44 = vmul.f32 %v10051_v45, %v2423_v10 }
0x1045   :  { %v2664_v15 = vpack.c.bf16 %v11401_v44, %v11401_v44 }
0x1047   :  { %2666 = vrot.lane.b32.xlu0 %v2664_v15, %s10672_s2 }
0x1054   :  { %v2651_v4 = vpop.permute.xlu1 %2650 }
0x1055   :  { %v11406_v51 = vmul.f32 %v10055_v20, %v2651_v4 }
0x1057   :  { %v2892_v53 = vpack.c.bf16 %v11406_v51, %v11406_v51 }
0x1059   :  { %v2894_v61 = vrot.slane %v2892_v53, 3 }
0x105b   :  { %2895 = vrot.lane.b32.xlu1 %v2894_v61, %s10672_s2 }
0x10b9   :  { %v2667_v27 = vpop.permute.xlu0 %2666 }
0x10ba   :  { %9105 = vmatmul.mubr.msk.bf16.vlgmr.msra.gmra.mrb[80].mxu1 %vm176_vm1, %v2667_v27  ;;  %9113 = vmatmul.mubr.msk.bf16.vlgmr.msra.gmra.mrb[84].mxu0 %vm176_vm1, %v2667_v27 }
0x10bb   :  { %9117 = vmatpush3.bf16.msra.mxu1 %v11197_v21  ;;  %9125 = vmatpush3.bf16.msra.mxu0 %v11200_v11  ;;  %v11455_v11 = vld [vmem:[#allocation8] sm:$0xff]  }
0x10bc   :  { %9118 = vmatprep.subr.bf16.mxu1 %v10669_v0  ;;  %9126 = vmatprep.subr.bf16.mxu0 %v10669_v0 }
0x10bd   :  { %9120 = vmatprep.mubr.msk.bf16.mxu1 %vm10670_vm0, %v10669_v0  ;;  %9128 = vmatprep.mubr.msk.bf16.mxu0 %vm10670_vm0, %v10669_v0 }
0x10bf   :  { %9119 = vmatpush3.bf16.msra.mxu1 %v11209_v47  ;;  %9127 = vmatpush3.bf16.msra.mxu0 %v11212_v63  ;;  %v11465_v47 = vld [vmem:[#allocation8 + $0x8] sm:$0xff]  }
0x10c0   :  { %9132 = vmatprep.subr.bf16.mxu1 %v10669_v0  ;;  %9140 = vmatprep.subr.bf16.mxu0 %v10669_v0 }
0x10c2   :  { %9121 = vmatmul.mubr.msk.bf16.vlgmr.msra.gmra.mrb[84].mxu1 %vm176_vm1, %v2667_v27  ;;  %9129 = vmatmul.mubr.msk.bf16.vlgmr.msra.gmra.mrb[88].mxu0 %vm176_vm1, %v2667_v27 }
0x10c3   :  { %9133 = vmatpush3.bf16.msra.mxu1 %v11219_v49  ;;  %9141 = vmatpush3.bf16.msra.mxu0 %v11222_v50 }
0x10c4   :  { %9134 = vmatprep.subr.bf16.mxu1 %v10669_v0  ;;  %9142 = vmatprep.subr.bf16.mxu0 %v10669_v0 }
0x10c5   :  { %9136 = vmatprep.mubr.msk.bf16.mxu1 %vm10670_vm0, %v10669_v0  ;;  %9144 = vmatprep.mubr.msk.bf16.mxu0 %vm10670_vm0, %v10669_v0 }
0x10c7   :  { %9135 = vmatpush3.bf16.msra.mxu1 %v11231_v28  ;;  %9143 = vmatpush3.bf16.msra.mxu0 %v11234_v12 }
0x10c8   :  { %9148 = vmatprep.subr.bf16.mxu1 %v10669_v0  ;;  %9156 = vmatprep.subr.bf16.mxu0 %v10669_v0 }
0x10cd   :  { %v2896_v21 = vpop.permute.xlu1 %2895 }
0x10ce   :  { %9137 = vmatmul.mubr.msk.bf16.vlgmr.msra.gmra.mrb[88].mxu1 %vm176_vm1, %v2896_v21  ;;  %9145 = vmatmul.mubr.msk.bf16.vlgmr.msra.gmra.mrb[92].mxu0 %vm176_vm1, %v2896_v21 }
0x10cf   :  { %9149 = vmatpush3.bf16.msra.mxu1 %v11241_v52  ;;  %9157 = vmatpush3.bf16.msra.mxu0 %v11244_v43 }
0x10d0   :  { %9150 = vmatprep.subr.bf16.mxu1 %v10669_v0  ;;  %9158 = vmatprep.subr.bf16.mxu0 %v10669_v0 }
0x10d1   :  { %9152 = vmatprep.mubr.msk.bf16.mxu1 %vm10670_vm0, %v10669_v0  ;;  %9160 = vmatprep.mubr.msk.bf16.mxu0 %vm10670_vm0, %v10669_v0 }
0x10d3   :  { %9151 = vmatpush3.bf16.msra.mxu1 %v11253_v22  ;;  %9159 = vmatpush3.bf16.msra.mxu0 %v11256_v54 }
0x10d4   :  { %9164 = vmatprep.subr.bf16.mxu1 %v10669_v0  ;;  %9172 = vmatprep.subr.bf16.mxu0 %v10669_v0 }
0x10d6   :  { %9153 = vmatmul.mubr.msk.bf16.vlgmr.msra.gmra.mrb[92].mxu1 %vm176_vm1, %v2896_v21  ;;  %9161 = vmatmul.mubr.msk.bf16.vlgmr.msra.gmra.mrb[96].mxu0 %vm176_vm1, %v2896_v21 }
0x10d7   :  { %9165 = vmatpush3.bf16.msra.mxu1 %v11455_v11  ;;  %9173 = vmatpush3.bf16.msra.mxu0 %v11264_v57 }
0x10d8   :  { %9166 = vmatprep.subr.bf16.mxu1 %v10669_v0  ;;  %9174 = vmatprep.subr.bf16.mxu0 %v10669_v0 }
0x10d9   :  { %9168 = vmatprep.mubr.msk.bf16.mxu1 %vm10670_vm0, %v10669_v0  ;;  %9176 = vmatprep.mubr.msk.bf16.mxu0 %vm10670_vm0, %v10669_v0 }
0x10db   :  { %9167 = vmatpush3.bf16.msra.mxu1 %v11465_v47  ;;  %9175 = vmatpush3.bf16.msra.mxu0 %v11274_v58 }
0x10dc   :  { %9180 = vmatprep.subr.bf16.mxu1 %v10669_v0  ;;  %9188 = vmatprep.subr.bf16.mxu0 %v10669_v0 }
0x118d   :  { %v2705_v63 = vpop.f32.mrb[80].mxu1  ;;  %v2755_v49 = vpop.f32.mrb[84].mxu0 }
0x118e   :  { %v9106_v50 = vpop.f32.mrb[81].mxu1  ;;  %v9114_v28 = vpop.f32.mrb[85].mxu0  ;;  %v2762_v20 = vrot.slane %v2755_v49, 6  ;;  %v2712_v21 = vrot.slane %v2705_v63, 6 }
0x118f   :  { %v2708_v12 = vpop.f32.mrb[82].mxu1  ;;  %v2758_v52 = vpop.f32.mrb[86].mxu0 }
0x1190   :  { %v9107_v43 = vpop.f32.mrb[83].mxu1  ;;  %v9115_v22 = vpop.f32.mrb[87].mxu0  ;;  %v2714_v50 = vadd.f32 %v2712_v21, %v10961_v38 }
0x1192   :  { %v8212_v28 = vmul.f32 -1.442695, %v2714_v50 }
0x1195   :  { %v2807_v54 = vpop.f32.mrb[84].mxu1  ;;  %v2854_v57 = vpop.f32.mrb[88].mxu0 }
0x1196   :  { %v2814_v37 = vrot.slane %v2807_v54, 6  ;;  %v9122_v2 = vpop.f32.mrb[85].mxu1  ;;  %v9130_v8 = vpop.f32.mrb[89].mxu0 }
0x1197   :  { %v2810_v56 = vpop.f32.mrb[86].mxu1  ;;  %v2857_v19 = vpop.f32.mrb[90].mxu0 }
0x1198   :  { %v9131_v58 = vpop.f32.mrb[91].mxu0  ;;  %2815 = vrot.lane.b32.xlu0 %v2814_v37, %s10664_s6  ;;  %v9123_v6 = vpop.f32.mrb[87].mxu1  ;;  %v2861_v56 = vrot.slane %v2854_v57, 6 }
0x11a1   :  { %v2934_v55 = vpop.f32.mrb[88].mxu1  ;;  %v2984_v33 = vpop.f32.mrb[92].mxu0 }
0x11a2   :  { %v9138_v40 = vpop.f32.mrb[89].mxu1  ;;  %v9146_v3 = vpop.f32.mrb[93].mxu0  ;;  %v2991_v27 = vrot.slane %v2984_v33, 4  ;;  %v2941_v12 = vrot.slane %v2934_v55, 4 }
0x11a3   :  { %v2937_v13 = vpop.f32.mrb[90].mxu1  ;;  %v2987_v32 = vpop.f32.mrb[94].mxu0 }
0x11a4   :  { %v9139_v34 = vpop.f32.mrb[91].mxu1  ;;  %v9147_v41 = vpop.f32.mrb[95].mxu0  ;;  %v2943_v49 = vadd.f32 %v2941_v12, %v10959_v36 }
0x11a6   :  { %v8219_v22 = vmul.f32 -1.442695, %v2943_v49 }
0x11a9   :  { %v3036_v31 = vpop.f32.mrb[92].mxu1  ;;  %v3083_v5 = vpop.f32.mrb[96].mxu0 }
0x11aa   :  { %v3043_v9 = vrot.slane %v3036_v31, 4  ;;  %v9154_v14 = vpop.f32.mrb[93].mxu1  ;;  %v9162_v62 = vpop.f32.mrb[97].mxu0  ;;  %v3090_v55 = vrot.slane %v3083_v5, 4 }
0x11ab   :  { %v3039_v30 = vpop.f32.mrb[94].mxu1  ;;  %v3086_v60 = vpop.f32.mrb[98].mxu0 }
0x11ac   :  { %v9163_v45 = vpop.f32.mrb[99].mxu0  ;;  %3044 = vrot.lane.b32.xlu1 %v3043_v9, %s10664_s6  ;;  %v9155_v10 = vpop.f32.mrb[95].mxu1  ;;  %v2873_v9 = vrot.slane %v11390_v16, 6 }
0x120a   :  { %v2816_v59 = vpop.permute.xlu0 %2815 }
0x120b   :  { %v2818_v15 = vadd.f32 %v2816_v59, %v10961_v38  ;;  %v3102_v59 = vrot.slane %v11395_v7, 2 }
0x120d   :  { %10056 = vtanh.f32 %v2818_v15 }
0x1217   :  { %v10057_v18 = vpop.eup %10056 }
0x1218   :  { %2877 = vrot.lane.b32.xlu0 %v10057_v18, %s10664_s6 }
0x121c   :  { %2763 = vrot.lane.b32.xlu0 %v2762_v20, %s10672_s2 }
0x121e   :  { %v3045_v4 = vpop.permute.xlu1 %3044 }
0x121f   :  { %v3047_v53 = vadd.f32 %v3045_v4, %v10959_v36 }
0x1221   :  { %10058 = vtanh.f32 %v3047_v53 }
0x1222   :  { %10060 = vpow2.f32 %v8212_v28 }
0x122b   :  { %v10059_v61 = vpop.eup %10058 }
0x122c   :  { %3106 = vrot.lane.b32.xlu1 %v10059_v61, %s10664_s6  ;;  %v10061_v52 = vpop.eup %10060 }
0x122d   :  { %v2718_v43 = vadd.f32 1.0, %v10061_v52 }
0x122f   :  { %10062 = vrcp.f32 %v2718_v43 }
0x1230   :  { %2992 = vrot.lane.b32.xlu1 %v2991_v27, %s10672_s2  ;;  %10064 = vpow2.f32 %v8219_v22 }
0x1239   :  { %v10063_v54 = vpop.eup %10062 }
0x123a   :  { %v10065_v8 = vpop.eup %10064 }
0x123b   :  { %v2947_v63 = vadd.f32 1.0, %v10065_v8 }
0x123d   :  { %10066 = vrcp.f32 %v2947_v63 }
0x1247   :  { %v10067_v19 = vpop.eup %10066 }
0x128a   :  { %v2878_v37 = vpop.permute.xlu0 %2877 }
0x128b   :  { %v2880_v2 = vmul.f32 %v10063_v54, %v2878_v37 }
0x128d   :  { %2882 = vrot.lane.b32.xlu0 %v2880_v2, %s10672_s2 }
0x128e   :  { %v2764_v33 = vpop.permute.xlu0 %2763 }
0x128f   :  { %v2766_v40 = vadd.f32 %v2764_v33, %v10961_v38  ;;  %v11523_v33 = vld [vmem:[#allocation8 + $0x28] sm:$0xff]  }
0x1291   :  { %2862 = vrot.lane.b32.xlu0 %v2861_v56, %s10673_s15  ;;  %v8214_v3 = vmul.f32 -1.442695, %v2766_v40  ;;  %v11526_v40 = vld [vmem:[#allocation8 + $0x38] sm:$0xff]  }
0x1293   :  { %10068 = vpow2.f32 %v8214_v3  ;;  %v11533_v3 = vld [vmem:[#allocation8 + $0x40] sm:$0xff]  }
0x129d   :  { %v10069_v32 = vpop.eup %10068 }
0x129e   :  { %v3107_v58 = vpop.permute.xlu1 %3106  ;;  %v2770_v34 = vadd.f32 1.0, %v10069_v32  ;;  %v11545_v32 = vld [vmem:[#allocation8 + $0x48] sm:$0xff]  }
0x129f   :  { %v3109_v6 = vmul.f32 %v10067_v19, %v3107_v58 }
0x12a0   :  { %10070 = vrcp.f32 %v2770_v34 }
0x12a1   :  { %3111 = vrot.lane.b32.xlu1 %v3109_v6, %s10672_s2  ;;  %v11511_v6 = vld [vmem:[#allocation8 + $0x20] sm:$0xff]  }
0x12a2   :  { %v2993_v13 = vpop.permute.xlu1 %2992 }
0x12a3   :  { %v2995_v57 = vadd.f32 %v2993_v13, %v10959_v36  ;;  %v11536_v13 = vld [vmem:[#allocation8 + $0x50] sm:$0xff]  }
0x12a5   :  { %3091 = vrot.lane.b32.xlu1 %v3090_v55, %s10673_s15  ;;  %v8221_v41 = vmul.f32 -1.442695, %v2995_v57  ;;  %v11514_v55 = vld [vmem:[#allocation8 + $0x30] sm:$0xff]   ;;  %v11548_v57 = vld [vmem:[#allocation8 + $0x58] sm:$0xff]  }
0x12a7   :  { %10072 = vpow2.f32 %v8221_v41  ;;  %v11555_v41 = vld [vmem:[#allocation8 + $0x60] sm:$0xff]  }
0x12aa   :  { %v10071_v31 = vpop.eup %10070 }
0x12ab   :  { %v2875_v5 = vmul.f32 %v10071_v31, %v2873_v9  ;;  %v11558_v31 = vld [vmem:[#allocation8 + $0x70] sm:$0xff]   ;;  %v11567_v9 = vld [vmem:[#allocation8 + $0x68] sm:$0xff]  }
0x12b1   :  { %v10073_v14 = vpop.eup %10072 }
0x12b2   :  { %v2999_v60 = vadd.f32 1.0, %v10073_v14  ;;  %v11570_v14 = vld [vmem:[#allocation8 + $0x78] sm:$0xff]  }
0x12ff   :  { %v2883_v62 = vpop.permute.xlu0 %2882 }
0x1300   :  { %v11488_v30 = vadd.f32 %v2883_v62, %v2875_v5  ;;  %v10438_v5 = vld [vmem:[#allocation8 + $0x10] sm:$0xff]   ;;  %v10439_v62 = vld [vmem:[#allocation8 + $0x18] sm:$0xff]  }
0x1302   :  { %10074 = vtanh.f32 %v11488_v30 }
0x1303   :  { %10076 = vrcp.f32 %v2999_v60  ;;  %v2863_v4 = vpop.permute.xlu0 %2862 }
0x1304   :  { %v2865_v53 = vadd.f32 %v2863_v4, %v10961_v38 }
0x1306   :  { %v8217_v61 = vmul.f32 -1.442695, %v2865_v53 }
0x130c   :  { %v10075_v45 = vpop.eup %10074 }
0x130d   :  { %2888 = vrot.lane.b32.xlu0 %v10075_v45, %s10664_s6  ;;  %v10077_v10 = vpop.eup %10076 }
0x130e   :  { %v3104_v15 = vmul.f32 %v10077_v10, %v3102_v59 }
0x1313   :  { %v3112_v18 = vpop.permute.xlu1 %3111 }
0x1314   :  { %v11493_v20 = vadd.f32 %v3112_v18, %v3104_v15 }
0x1316   :  { %10078 = vtanh.f32 %v11493_v20 }
0x1317   :  { %10080 = vpow2.f32 %v8217_v61  ;;  %v3092_v27 = vpop.permute.xlu1 %3091 }
0x1318   :  { %v3094_v50 = vadd.f32 %v3092_v27, %v10959_v36 }
0x131a   :  { %v8224_v7 = vmul.f32 -1.442695, %v3094_v50 }
0x1320   :  { %v10079_v16 = vpop.eup %10078 }
0x1321   :  { %3117 = vrot.lane.b32.xlu1 %v10079_v16, %s10664_s6  ;;  %v10081_v21 = vpop.eup %10080 }
0x1322   :  { %v2869_v28 = vadd.f32 1.0, %v10081_v21 }
0x1324   :  { %10082 = vrcp.f32 %v2869_v28 }
0x1325   :  { %10084 = vpow2.f32 %v8224_v7 }
0x132e   :  { %v10083_v12 = vpop.eup %10082 }
0x132f   :  { %v10085_v43 = vpop.eup %10084 }
0x1330   :  { %v3098_v37 = vadd.f32 1.0, %v10085_v43 }
0x1332   :  { %10086 = vrcp.f32 %v3098_v37 }
0x133c   :  { %v10087_v2 = vpop.eup %10086 }
0x137f   :  { %v2889_v52 = vpop.permute.xlu0 %2888 }
0x1380   :  { %v11499_v49 = vmul.f32 %v10083_v12, %v2889_v52 }
0x1382   :  { %v3131_v22 = vpack.c.bf16 %v11499_v49, %v11499_v49 }
0x1384   :  { %v3133_v54 = vrot.slane %v3131_v22, 1 }
0x1386   :  { %3134 = vrot.lane.b32.xlu0 %v3133_v54, %s10672_s2 }
0x1393   :  { %v3118_v8 = vpop.permute.xlu1 %3117 }
0x1394   :  { %v11504_v56 = vmul.f32 %v10087_v2, %v3118_v8 }
0x1396   :  { %v3360_v63 = vpack.c.bf16 %v11504_v56, %v11504_v56 }
0x1398   :  { %v3362_v19 = vrot.slane %v3360_v63, 2 }
0x139a   :  { %3363 = vrot.lane.b32.xlu1 %v3362_v19, %s10672_s2 }
0x13f8   :  { %v3135_v58 = vpop.permute.xlu0 %3134 }
0x13f9   :  { %9169 = vmatmul.mubr.msk.bf16.vlgmr.msra.gmra.mrb[96].mxu1 %vm176_vm1, %v3135_v58  ;;  %9177 = vmatmul.mubr.msk.bf16.vlgmr.msra.gmra.mrb[100].mxu0 %vm176_vm1, %v3135_v58 }
0x13fa   :  { %9181 = vmatpush3.bf16.msra.mxu1 %v11511_v6  ;;  %9189 = vmatpush3.bf16.msra.mxu0 %v11514_v55 }
0x13fb   :  { %9182 = vmatprep.subr.bf16.mxu1 %v10669_v0  ;;  %9190 = vmatprep.subr.bf16.mxu0 %v10669_v0 }
0x13fc   :  { %9184 = vmatprep.mubr.msk.bf16.mxu1 %vm10670_vm0, %v10669_v0  ;;  %9192 = vmatprep.mubr.msk.bf16.mxu0 %vm10670_vm0, %v10669_v0 }
0x13fe   :  { %9183 = vmatpush3.bf16.msra.mxu1 %v11523_v33  ;;  %9191 = vmatpush3.bf16.msra.mxu0 %v11526_v40 }
0x13ff   :  { %9196 = vmatprep.subr.bf16.mxu1 %v10669_v0  ;;  %9204 = vmatprep.subr.bf16.mxu0 %v10669_v0 }
0x1401   :  { %9185 = vmatmul.mubr.msk.bf16.vlgmr.msra.gmra.mrb[100].mxu1 %vm176_vm1, %v3135_v58  ;;  %9193 = vmatmul.mubr.msk.bf16.vlgmr.msra.gmra.mrb[104].mxu0 %vm176_vm1, %v3135_v58 }
0x1402   :  { %9197 = vmatpush3.bf16.msra.mxu1 %v11533_v3  ;;  %9205 = vmatpush3.bf16.msra.mxu0 %v11536_v13 }
0x1403   :  { %9198 = vmatprep.subr.bf16.mxu1 %v10669_v0  ;;  %9206 = vmatprep.subr.bf16.mxu0 %v10669_v0 }
0x1404   :  { %9200 = vmatprep.mubr.msk.bf16.mxu1 %vm10670_vm0, %v10669_v0  ;;  %9208 = vmatprep.mubr.msk.bf16.mxu0 %vm10670_vm0, %v10669_v0 }
0x1406   :  { %9199 = vmatpush3.bf16.msra.mxu1 %v11545_v32  ;;  %9207 = vmatpush3.bf16.msra.mxu0 %v11548_v57 }
0x1407   :  { %9212 = vmatprep.subr.bf16.mxu1 %v10669_v0  ;;  %9220 = vmatprep.subr.bf16.mxu0 %v10669_v0 }
0x140c   :  { %v3364_v34 = vpop.permute.xlu1 %3363 }
0x140d   :  { %9201 = vmatmul.mubr.msk.bf16.vlgmr.msra.gmra.mrb[104].mxu1 %vm176_vm1, %v3364_v34  ;;  %9209 = vmatmul.mubr.msk.bf16.vlgmr.msra.gmra.mrb[108].mxu0 %vm176_vm1, %v3364_v34 }
0x140e   :  { %9213 = vmatpush3.bf16.msra.mxu1 %v11555_v41  ;;  %9221 = vmatpush3.bf16.msra.mxu0 %v11558_v31 }
0x140f   :  { %9214 = vmatprep.subr.bf16.mxu1 %v10669_v0  ;;  %9222 = vmatprep.subr.bf16.mxu0 %v10669_v0 }
0x1410   :  { %9216 = vmatprep.mubr.msk.bf16.mxu1 %vm10670_vm0, %v10669_v0  ;;  %9224 = vmatprep.mubr.msk.bf16.mxu0 %vm10670_vm0, %v10669_v0 }
0x1412   :  { %9215 = vmatpush3.bf16.msra.mxu1 %v11567_v9  ;;  %9223 = vmatpush3.bf16.msra.mxu0 %v11570_v14 }
0x1413   :  { %9228 = vmatprep.subr.bf16.mxu1 %v10669_v0  ;;  %9236 = vmatprep.subr.bf16.mxu0 %v10669_v0 }
0x1415   :  { %9217 = vmatmul.mubr.msk.bf16.vlgmr.msra.gmra.mrb[108].mxu1 %vm176_vm1, %v3364_v34  ;;  %9225 = vmatmul.mubr.msk.bf16.vlgmr.msra.gmra.mrb[112].mxu0 %vm176_vm1, %v3364_v34 }
0x1416   :  { %9229 = vmatpush3.bf16.msra.mxu1 %v11455_v11  ;;  %9237 = vmatpush3.bf16.msra.mxu0 %v10438_v5 }
0x1417   :  { %9230 = vmatprep.subr.bf16.mxu1 %v10669_v0  ;;  %9238 = vmatprep.subr.bf16.mxu0 %v10669_v0 }
0x1418   :  { %9232 = vmatprep.mubr.msk.bf16.mxu1 %vm10670_vm0, %v10669_v0  ;;  %9240 = vmatprep.mubr.msk.bf16.mxu0 %vm10670_vm0, %v10669_v0 }
0x141a   :  { %9231 = vmatpush3.bf16.msra.mxu1 %v11465_v47  ;;  %9239 = vmatpush3.bf16.msra.mxu0 %v10439_v62 }
0x141b   :  { %9244 = vmatprep.subr.bf16.mxu1 %v10669_v0  ;;  %9252 = vmatprep.subr.bf16.mxu0 %v10669_v0 }
0x14cc   :  { %v3173_v11 = vpop.f32.mrb[96].mxu1  ;;  %v3223_v60 = vpop.f32.mrb[100].mxu0 }
0x14cd   :  { %v9170_v45 = vpop.f32.mrb[97].mxu1  ;;  %v9178_v10 = vpop.f32.mrb[101].mxu0 }
0x14ce   :  { %v3176_v59 = vpop.f32.mrb[98].mxu1  ;;  %v3226_v15 = vpop.f32.mrb[102].mxu0 }
0x14cf   :  { %v9171_v18 = vpop.f32.mrb[99].mxu1  ;;  %v9179_v16 = vpop.f32.mrb[103].mxu0 }
0x14d4   :  { %v3275_v4 = vpop.f32.mrb[100].mxu1  ;;  %v3322_v53 = vpop.f32.mrb[104].mxu0 }
0x14d5   :  { %v3282_v61 = vrot.slane %v3275_v4, 4  ;;  %v9186_v27 = vpop.f32.mrb[101].mxu1  ;;  %v9194_v21 = vpop.f32.mrb[105].mxu0  ;;  %v3230_v4 = vrot.slane %v3223_v60, 4 }
0x14d6   :  { %v3278_v47 = vpop.f32.mrb[102].mxu1  ;;  %v3325_v50 = vpop.f32.mrb[106].mxu0 }
0x14d7   :  { %v9195_v28 = vpop.f32.mrb[107].mxu0  ;;  %3283 = vrot.lane.b32.xlu0 %v3282_v61, %s10664_s6  ;;  %v9187_v7 = vpop.f32.mrb[103].mxu1  ;;  %v3180_v50 = vrot.slane %v3173_v11, 4 }
0x14d9   :  { %v3182_v28 = vadd.f32 %v3180_v50, %v10961_v38 }
0x14db   :  { %v8226_v7 = vmul.f32 -1.442695, %v3182_v28 }
0x14e0   :  { %v3402_v12 = vpop.f32.mrb[104].mxu1  ;;  %v3452_v52 = vpop.f32.mrb[108].mxu0 }
0x14e1   :  { %v9202_v43 = vpop.f32.mrb[105].mxu1  ;;  %v9210_v22 = vpop.f32.mrb[109].mxu0  ;;  %v3459_v47 = vrot.slane %v3452_v52, 6  ;;  %v3329_v52 = vrot.slane %v3322_v53, 4 }
0x14e2   :  { %v3405_v54 = vpop.f32.mrb[106].mxu1  ;;  %v3455_v37 = vpop.f32.mrb[110].mxu0  ;;  %v3409_v43 = vrot.slane %v3402_v12, 6 }
0x14e3   :  { %v9203_v2 = vpop.f32.mrb[107].mxu1  ;;  %v9211_v8 = vpop.f32.mrb[111].mxu0 }
0x14e4   :  { %v3411_v60 = vadd.f32 %v3409_v43, %v10959_v36 }
0x14e6   :  { %v8233_v37 = vmul.f32 -1.442695, %v3411_v60 }
0x14e8   :  { %v3504_v63 = vpop.f32.mrb[108].mxu1  ;;  %v3551_v19 = vpop.f32.mrb[112].mxu0 }
0x14e9   :  { %v3511_v58 = vrot.slane %v3504_v63, 6  ;;  %v9218_v34 = vpop.f32.mrb[109].mxu1  ;;  %v9226_v5 = vpop.f32.mrb[113].mxu0 }
0x14ea   :  { %v3507_v62 = vpop.f32.mrb[110].mxu1  ;;  %v3554_v45 = vpop.f32.mrb[114].mxu0 }
0x14eb   :  { %v9227_v10 = vpop.f32.mrb[115].mxu0  ;;  %3512 = vrot.lane.b32.xlu1 %v3511_v58, %s10664_s6  ;;  %v9219_v59 = vpop.f32.mrb[111].mxu1  ;;  %v3558_v62 = vrot.slane %v3551_v19, 6 }
0x1549   :  { %v3284_v15 = vpop.permute.xlu0 %3283 }
0x154a   :  { %v3286_v18 = vadd.f32 %v3284_v15, %v10961_v38 }
0x154c   :  { %10088 = vtanh.f32 %v3286_v18 }
0x1556   :  { %v10089_v16 = vpop.eup %10088 }
0x1557   :  { %3345 = vrot.lane.b32.xlu0 %v10089_v16, %s10664_s6 }
0x155b   :  { %3231 = vrot.lane.b32.xlu0 %v3230_v4, %s10672_s2 }
0x155d   :  { %v3513_v61 = vpop.permute.xlu1 %3512 }
0x155e   :  { %v3515_v27 = vadd.f32 %v3513_v61, %v10959_v36 }
0x1560   :  { %10090 = vtanh.f32 %v3515_v27  ;;  %v3341_v27 = vrot.slane %v11488_v30, 6 }
0x1561   :  { %10092 = vpow2.f32 %v8226_v7 }
0x156a   :  { %v10091_v21 = vpop.eup %10090 }
0x156b   :  { %3574 = vrot.lane.b32.xlu1 %v10091_v21, %s10664_s6  ;;  %v10093_v22 = vpop.eup %10092 }
0x156c   :  { %v3186_v54 = vadd.f32 1.0, %v10093_v22  ;;  %v3570_v22 = vrot.slane %v11493_v20, 2 }
0x156e   :  { %10094 = vrcp.f32 %v3186_v54 }
0x156f   :  { %3460 = vrot.lane.b32.xlu1 %v3459_v47, %s10672_s2  ;;  %10096 = vpow2.f32 %v8233_v37 }
0x1578   :  { %v10095_v2 = vpop.eup %10094 }
0x1579   :  { %v10097_v58 = vpop.eup %10096 }
0x157a   :  { %v3415_v11 = vadd.f32 1.0, %v10097_v58 }
0x157c   :  { %10098 = vrcp.f32 %v3415_v11 }
0x1586   :  { %v10099_v34 = vpop.eup %10098 }
0x15c9   :  { %v3346_v8 = vpop.permute.xlu0 %3345 }
0x15ca   :  { %v3348_v63 = vmul.f32 %v10095_v2, %v3346_v8 }
0x15cc   :  { %3350 = vrot.lane.b32.xlu0 %v3348_v63, %s10672_s2 }
0x15cd   :  { %v3232_v45 = vpop.permute.xlu0 %3231 }
0x15ce   :  { %v3234_v10 = vadd.f32 %v3232_v45, %v10961_v38 }
0x15d0   :  { %3330 = vrot.lane.b32.xlu0 %v3329_v52, %s10673_s15  ;;  %v8228_v59 = vmul.f32 -1.442695, %v3234_v10 }
0x15d2   :  { %10100 = vpow2.f32 %v8228_v59 }
0x15dc   :  { %v10101_v18 = vpop.eup %10100 }
0x15dd   :  { %v3575_v12 = vpop.permute.xlu1 %3574  ;;  %v3238_v16 = vadd.f32 1.0, %v10101_v18 }
0x15de   :  { %v3577_v5 = vmul.f32 %v10099_v34, %v3575_v12 }
0x15df   :  { %10102 = vrcp.f32 %v3238_v16 }
0x15e0   :  { %3579 = vrot.lane.b32.xlu1 %v3577_v5, %s10672_s2 }
0x15e1   :  { %v3461_v15 = vpop.permute.xlu1 %3460 }
0x15e2   :  { %v3463_v53 = vadd.f32 %v3461_v15, %v10959_v36 }
0x15e4   :  { %3559 = vrot.lane.b32.xlu1 %v3558_v62, %s10673_s15  ;;  %v8235_v4 = vmul.f32 -1.442695, %v3463_v53 }
0x15e6   :  { %10104 = vpow2.f32 %v8235_v4 }
0x15e9   :  { %v10103_v61 = vpop.eup %10102 }
0x15ea   :  { %v3343_v19 = vmul.f32 %v10103_v61, %v3341_v27 }
0x15f0   :  { %v10105_v21 = vpop.eup %10104 }
0x15f1   :  { %v3467_v28 = vadd.f32 1.0, %v10105_v21 }
0x163e   :  { %v3351_v47 = vpop.permute.xlu0 %3350 }
0x163f   :  { %v11604_v50 = vadd.f32 %v3351_v47, %v3343_v19 }
0x1641   :  { %10106 = vtanh.f32 %v11604_v50 }
0x1642   :  { %10108 = vrcp.f32 %v3467_v28  ;;  %v3331_v2 = vpop.permute.xlu0 %3330 }
0x1643   :  { %v3333_v8 = vadd.f32 %v3331_v2, %v10961_v38 }
0x1645   :  { %v8231_v63 = vmul.f32 -1.442695, %v3333_v8 }
0x164b   :  { %v10107_v7 = vpop.eup %10106 }
0x164c   :  { %3356 = vrot.lane.b32.xlu0 %v10107_v7, %s10664_s6  ;;  %v10109_v43 = vpop.eup %10108 }
0x164d   :  { %v3572_v60 = vmul.f32 %v10109_v43, %v3570_v22 }
0x1652   :  { %v3580_v54 = vpop.permute.xlu1 %3579 }
0x1653   :  { %v11609_v37 = vadd.f32 %v3580_v54, %v3572_v60 }
0x1655   :  { %10110 = vtanh.f32 %v11609_v37 }
0x1656   :  { %10112 = vpow2.f32 %v8231_v63  ;;  %v3560_v58 = vpop.permute.xlu1 %3559 }
0x1657   :  { %v3562_v11 = vadd.f32 %v3560_v58, %v10959_v36 }
0x1659   :  { %v8238_v20 = vmul.f32 -1.442695, %v3562_v11 }
0x165f   :  { %v10111_v30 = vpop.eup %10110 }
0x1660   :  { %3585 = vrot.lane.b32.xlu1 %v10111_v30, %s10664_s6  ;;  %v10113_v52 = vpop.eup %10112 }
0x1661   :  { %v3337_v34 = vadd.f32 1.0, %v10113_v52 }
0x1663   :  { %10114 = vrcp.f32 %v3337_v34 }
0x1664   :  { %10116 = vpow2.f32 %v8238_v20 }
0x166d   :  { %v10115_v12 = vpop.eup %10114 }
0x166e   :  { %v10117_v45 = vpop.eup %10116 }
0x166f   :  { %v3566_v15 = vadd.f32 1.0, %v10117_v45 }
0x1671   :  { %10118 = vrcp.f32 %v3566_v15 }
0x167b   :  { %v10119_v18 = vpop.eup %10118 }
0x16be   :  { %v3357_v5 = vpop.permute.xlu0 %3356 }
0x16bf   :  { %v11615_v62 = vmul.f32 %v10115_v12, %v3357_v5 }
0x16c1   :  { %v3599_v10 = vpack.c.bf16 %v11615_v62, %v11615_v62 }
0x16c3   :  { %v3601_v59 = vrot.slane %v3599_v10, 2 }
0x16c5   :  { %3602 = vrot.lane.b32.xlu0 %v3601_v59, %s10672_s2 }
0x16d2   :  { %v3586_v53 = vpop.permute.xlu1 %3585 }
0x16d3   :  { %v11620_v16 = vmul.f32 %v10119_v18, %v3586_v53 }
0x16d5   :  { %v3828_v4 = vpack.c.bf16 %v11620_v16, %v11620_v16 }
0x16d7   :  { %v3830_v61 = vrot.slane %v3828_v4, 1 }
0x16d9   :  { %3831 = vrot.lane.b32.xlu1 %v3830_v61, %s10672_s2 }
0x1737   :  { %v3603_v27 = vpop.permute.xlu0 %3602 }
0x1738   :  { %9233 = vmatmul.mubr.msk.bf16.vlgmr.msra.gmra.mrb[112].mxu1 %vm176_vm1, %v3603_v27  ;;  %9241 = vmatmul.mubr.msk.bf16.vlgmr.msra.gmra.mrb[116].mxu0 %vm176_vm1, %v3603_v27 }
0x1739   :  { %9245 = vmatpush3.bf16.msra.mxu1 %v11511_v6  ;;  %9253 = vmatpush3.bf16.msra.mxu0 %v11514_v55 }
0x173a   :  { %9246 = vmatprep.subr.bf16.mxu1 %v10669_v0  ;;  %9254 = vmatprep.subr.bf16.mxu0 %v10669_v0 }
0x173b   :  { %9248 = vmatprep.mubr.msk.bf16.mxu1 %vm10670_vm0, %v10669_v0  ;;  %9256 = vmatprep.mubr.msk.bf16.mxu0 %vm10670_vm0, %v10669_v0 }
0x173d   :  { %9247 = vmatpush3.bf16.msra.mxu1 %v11523_v33  ;;  %9255 = vmatpush3.bf16.msra.mxu0 %v11526_v40 }
0x173e   :  { %9260 = vmatprep.subr.bf16.mxu1 %v10669_v0  ;;  %9268 = vmatprep.subr.bf16.mxu0 %v10669_v0 }
0x1740   :  { %9249 = vmatmul.mubr.msk.bf16.vlgmr.msra.gmra.mrb[116].mxu1 %vm176_vm1, %v3603_v27  ;;  %9257 = vmatmul.mubr.msk.bf16.vlgmr.msra.gmra.mrb[120].mxu0 %vm176_vm1, %v3603_v27 }
0x1741   :  { %9261 = vmatpush3.bf16.msra.mxu1 %v11533_v3  ;;  %9269 = vmatpush3.bf16.msra.mxu0 %v11536_v13 }
0x1742   :  { %9262 = vmatprep.subr.bf16.mxu1 %v10669_v0  ;;  %9270 = vmatprep.subr.bf16.mxu0 %v10669_v0 }
0x1743   :  { %9264 = vmatprep.mubr.msk.bf16.mxu1 %vm10670_vm0, %v10669_v0  ;;  %9272 = vmatprep.mubr.msk.bf16.mxu0 %vm10670_vm0, %v10669_v0 }
0x1745   :  { %9263 = vmatpush3.bf16.msra.mxu1 %v11545_v32  ;;  %9271 = vmatpush3.bf16.msra.mxu0 %v11548_v57 }
0x1746   :  { %9276 = vmatprep.subr.bf16.mxu1 %v10669_v0  ;;  %9284 = vmatprep.subr.bf16.mxu0 %v10669_v0 }
0x174b   :  { %v3832_v6 = vpop.permute.xlu1 %3831 }
0x174c   :  { %9265 = vmatmul.mubr.msk.bf16.vlgmr.msra.gmra.mrb[120].mxu1 %vm176_vm1, %v3832_v6  ;;  %9273 = vmatmul.mubr.msk.bf16.vlgmr.msra.gmra.mrb[124].mxu0 %vm176_vm1, %v3832_v6 }
0x174d   :  { %9277 = vmatpush3.bf16.msra.mxu1 %v11555_v41  ;;  %9285 = vmatpush3.bf16.msra.mxu0 %v11558_v31 }
0x174e   :  { %9278 = vmatprep.subr.bf16.mxu1 %v10669_v0  ;;  %9286 = vmatprep.subr.bf16.mxu0 %v10669_v0 }
0x174f   :  { %9280 = vmatprep.mubr.msk.bf16.mxu1 %vm10670_vm0, %v10669_v0  ;;  %9288 = vmatprep.mubr.msk.bf16.mxu0 %vm10670_vm0, %v10669_v0 }
0x1751   :  { %9279 = vmatpush3.bf16.msra.mxu1 %v11567_v9  ;;  %9287 = vmatpush3.bf16.msra.mxu0 %v11570_v14 }
0x1752   :  { %9292 = vmatprep.subr.bf16.mxu0 %v10669_v0 }
0x1754   :  { %9281 = vmatmul.mubr.msk.bf16.vlgmr.msra.gmra.mrb[124].mxu1 %vm176_vm1, %v3832_v6  ;;  %9289 = vmatmul.mubr.msk.bf16.vlgmr.msra.gmra.mrb[128].mxu0 %vm176_vm1, %v3832_v6 }
0x1755   :  { %4130 = vmatprep.mubr.bf16.mxu1 %v10671_v1  ;;  %9296 = vmatprep.mubr.msk.bf16.mxu0 %vm10670_vm0, %v10669_v0 }
0x180b   :  { %v3641_v55 = vpop.f32.mrb[112].mxu1  ;;  %v3691_v33 = vpop.f32.mrb[116].mxu0 }
0x180c   :  { %v9234_v40 = vpop.f32.mrb[113].mxu1  ;;  %v9242_v3 = vpop.f32.mrb[117].mxu0  ;;  %v3698_v53 = vrot.slane %v3691_v33, 2  ;;  %v3648_v6 = vrot.slane %v3641_v55, 2 }
0x180d   :  { %v3644_v13 = vpop.f32.mrb[114].mxu1  ;;  %v3694_v32 = vpop.f32.mrb[118].mxu0 }
0x180e   :  { %v9235_v57 = vpop.f32.mrb[115].mxu1  ;;  %v9243_v41 = vpop.f32.mrb[119].mxu0  ;;  %v3650_v40 = vadd.f32 %v3648_v6, %v10961_v38 }
0x1810   :  { %v8240_v3 = vmul.f32 -1.442695, %v3650_v40 }
0x1813   :  { %v3743_v31 = vpop.f32.mrb[116].mxu1  ;;  %v3790_v9 = vpop.f32.mrb[120].mxu0 }
0x1814   :  { %v3750_v14 = vrot.slane %v3743_v31, 2  ;;  %v9250_v21 = vpop.f32.mrb[117].mxu1  ;;  %v9258_v19 = vpop.f32.mrb[121].mxu0 }
0x1815   :  { %v3746_v47 = vpop.f32.mrb[118].mxu1  ;;  %v3793_v28 = vpop.f32.mrb[122].mxu0 }
0x1816   :  { %v9259_v7 = vpop.f32.mrb[123].mxu0  ;;  %3751 = vrot.lane.b32.xlu1 %v3750_v14, %s10664_s6  ;;  %v9251_v43 = vpop.f32.mrb[119].mxu1  ;;  %v3797_v47 = vrot.slane %v3790_v9, 2 }
0x181f   :  { %v3870_v22 = vpop.f32.mrb[120].mxu1  ;;  %v3917_v60 = vpop.f32.mrb[124].mxu0 }
0x1820   :  { %v9266_v54 = vpop.f32.mrb[121].mxu1  ;;  %v9274_v30 = vpop.f32.mrb[125].mxu0  ;;  %v3876_v32 = vadd.f32 %v3870_v22, %v10959_v36 }
0x1821   :  { %v3873_v2 = vpop.f32.mrb[122].mxu1  ;;  %v3920_v8 = vpop.f32.mrb[126].mxu0 }
0x1822   :  { %v9267_v63 = vpop.f32.mrb[123].mxu1  ;;  %v9275_v58 = vpop.f32.mrb[127].mxu0  ;;  %v8247_v57 = vmul.f32 -1.442695, %v3876_v32 }
0x1827   :  { %v3968_v52 = vpop.f32.mrb[124].mxu1  ;;  %v4014_v11 = vpop.f32.mrb[128].mxu0 }
0x1828   :  { %v9290_v34 = vpop.f32.mrb[129].mxu0  ;;  %3975 = vrot.lane.b32.xlu0 %v3968_v52, %s10664_s6  ;;  %v9282_v20 = vpop.f32.mrb[125].mxu1  ;;  %v3809_v52 = vrot.slane %v11604_v50, 6 }
0x1829   :  { %v3971_v12 = vpop.f32.mrb[126].mxu1  ;;  %v4017_v5 = vpop.f32.mrb[130].mxu0 }
0x182a   :  { %v9283_v45 = vpop.f32.mrb[127].mxu1  ;;  %v9291_v10 = vpop.f32.mrb[131].mxu0 }
0x182b   :  { %v4032_v10 = vrot.slane %v11609_v37, 2 }
0x1888   :  { %v3752_v59 = vpop.permute.xlu1 %3751 }
0x1889   :  { %v3754_v15 = vadd.f32 %v3752_v59, %v10961_v38 }
0x188b   :  { %10120 = vtanh.f32 %v3754_v15 }
0x1895   :  { %v10121_v18 = vpop.eup %10120 }
0x1896   :  { %3813 = vrot.lane.b32.xlu1 %v10121_v18, %s10664_s6 }
0x189a   :  { %3699 = vrot.lane.b32.xlu1 %v3698_v53, %s10672_s2  ;;  %v3976_v4 = vpop.permute.xlu0 %3975  ;;  %v9869_v53 = vld [vmem:[#allocation11 + $0x14] ss:$8 sps:$4 sm:$0xff]  }
0x189b   :  { %v3978_v61 = vadd.f32 %v3976_v4, %v10959_v36 }
0x189d   :  { %10122 = vtanh.f32 %v3978_v61 }
0x189e   :  { %10124 = vpow2.f32 %v8240_v3  ;;  %v9872_v3 = vld [vmem:[#allocation9 + $0x4] ss:$8 sps:$4 sm:$0xff]  }
0x18a7   :  { %v10123_v27 = vpop.eup %10122 }
0x18a8   :  { %4036 = vrot.lane.b32.xlu0 %v10123_v27, %s10664_s6  ;;  %v10125_v13 = vpop.eup %10124 }
0x18a9   :  { %v3654_v33 = vadd.f32 1.0, %v10125_v13 }
0x18ab   :  { %10126 = vrcp.f32 %v3654_v33  ;;  %v11723_v33 = vld [vmem:[#allocation14] sm:$0xff]  }
0x18ac   :  { %3924 = vrot.lane.b32.xlu0 %v3917_v60, %s10672_s2  ;;  %10128 = vpow2.f32 %v8247_v57  ;;  %9293 = vmatpush3.bf16.msra.mxu0 %v11723_v33  ;;  %v11728_v57 = vld [vmem:[#allocation14 + $0x8] sm:$0xff]  }
0x18ad   :  { %9294 = vmatprep.subr.bf16.mxu0 %v10669_v0 }
0x18b0   :  { %9295 = vmatpush3.bf16.msra.mxu0 %v11728_v57 }
0x18b1   :  { %9300 = vmatprep.subr.bf16.mxu0 %v10669_v0 }
0x18b3   :  { %9297 = vmatmul.mubr.bf16.vlgmr.msra.gmra.mrb[132].mxu0 %v10671_v1 }
0x18b4   :  { %9304 = vmatprep.mubr.msk.bf16.mxu0 %vm10670_vm0, %v10669_v0 }
0x18b5   :  { %v10127_v41 = vpop.eup %10126 }
0x18b6   :  { %v10129_v14 = vpop.eup %10128 }
0x18b7   :  { %v3880_v19 = vadd.f32 1.0, %v10129_v14 }
0x18b9   :  { %10130 = vrcp.f32 %v3880_v19 }
0x18c3   :  { %v10131_v55 = vpop.eup %10130 }
0x1908   :  { %v3814_v31 = vpop.permute.xlu1 %3813 }
0x1909   :  { %v3816_v21 = vmul.f32 %v10127_v41, %v3814_v31 }
0x190b   :  { %3818 = vrot.lane.b32.xlu1 %v3816_v21, %s10672_s2 }
0x190c   :  { %v3700_v43 = vpop.permute.xlu1 %3699 }
0x190d   :  { %v3702_v22 = vadd.f32 %v3700_v43, %v10961_v38  ;;  %v11753_v43 = vld [vmem:[#allocation14 + $0x30] sm:$0xff]  }
0x190f   :  { %3798 = vrot.lane.b32.xlu1 %v3797_v47, %s10673_s15  ;;  %v8242_v60 = vmul.f32 -1.442695, %v3702_v22  ;;  %v11758_v22 = vld [vmem:[#allocation14 + $0x38] sm:$0xff]  }
0x1911   :  { %10132 = vpow2.f32 %v8242_v60  ;;  %v11764_v60 = vld [vmem:[#allocation14 + $0x50] sm:$0xff]  }
0x191a   :  { %v4037_v28 = vpop.permute.xlu0 %4036 }
0x191b   :  { %v4039_v7 = vmul.f32 %v10131_v55, %v4037_v28  ;;  %v10133_v30 = vpop.eup %10132  ;;  %v11746_v28 = vld [vmem:[#allocation14 + $0x10] sm:$0xff]  }
0x191c   :  { %v3706_v9 = vadd.f32 1.0, %v10133_v30  ;;  %9301 = vmatpush3.bf16.msra.mxu0 %v11746_v28 }
0x191d   :  { %4041 = vrot.lane.b32.xlu0 %v4039_v7, %s10672_s2  ;;  %v11749_v7 = vld [vmem:[#allocation14 + $0x18] sm:$0xff]   ;;  %9302 = vmatprep.subr.bf16.mxu0 %v10669_v0 }
0x191e   :  { %v3925_v54 = vpop.permute.xlu0 %3924  ;;  %10134 = vrcp.f32 %v3706_v9 }
0x191f   :  { %v3927_v2 = vadd.f32 %v3925_v54, %v10959_v36  ;;  %v11769_v54 = vld [vmem:[#allocation14 + $0x58] sm:$0xff]  }
0x1920   :  { %9303 = vmatpush3.bf16.msra.mxu0 %v11749_v7 }
0x1921   :  { %4021 = vrot.lane.b32.xlu0 %v4014_v11, %s10673_s15  ;;  %v8249_v8 = vmul.f32 -1.442695, %v3927_v2  ;;  %9316 = vmatprep.subr.bf16.mxu0 %v10669_v0 }
0x1923   :  { %10136 = vpow2.f32 %v8249_v8  ;;  %9305 = vmatmul.mubr.bf16.vlgmr.msra.gmra.mrb[136].mxu0 %v10671_v1 }
0x1924   :  { %9317 = vmatpush3.bf16.msra.mxu0 %v11753_v43  ;;  %9320 = vmatprep.mubr.msk.bf16.mxu0 %vm10670_vm0, %v10669_v0 }
0x1925   :  { %9318 = vmatprep.subr.bf16.mxu0 %v10669_v0 }
0x1928   :  { %v10135_v63 = vpop.eup %10134  ;;  %9319 = vmatpush3.bf16.msra.mxu0 %v11758_v22 }
0x1929   :  { %v3811_v34 = vmul.f32 %v10135_v63, %v3809_v52  ;;  %9332 = vmatprep.subr.bf16.mxu0 %v10669_v0 }
0x192b   :  { %9321 = vmatmul.mubr.bf16.vlgmr.msra.gmra.mrb[140].mxu0 %v10671_v1 }
0x192c   :  { %9333 = vmatpush3.bf16.msra.mxu0 %v11764_v60  ;;  %9336 = vmatprep.mubr.msk.bf16.mxu0 %vm10670_vm0, %v10669_v0 }
0x192d   :  { %v10137_v58 = vpop.eup %10136  ;;  %9334 = vmatprep.subr.bf16.mxu0 %v10669_v0 }
0x192e   :  { %v3931_v20 = vadd.f32 1.0, %v10137_v58  ;;  %v9870_v58 = vld [vmem:[#allocation9] ss:$8 sps:$4 sm:$0xff]  }
0x1930   :  { %9335 = vmatpush3.bf16.msra.mxu0 %v11769_v54 }
0x1931   :  { %9348 = vmatprep.subr.bf16.mxu0 %v10669_v0 }
0x1933   :  { %9337 = vmatmul.mubr.bf16.vlgmr.msra.gmra.mrb[144].mxu0 %v10671_v1 }
0x1934   :  { %9352 = vmatprep.mubr.msk.bf16.mxu0 %vm10670_vm0, %v10669_v0 }
0x197d   :  { %v3819_v11 = vpop.permute.xlu1 %3818 }
0x197e   :  { %v3821_v12 = vadd.f32 %v3819_v11, %v3811_v34  ;;  %v9875_v34 = vld [vmem:[#allocation9 + $0x14] ss:$8 sps:$4 sm:$0xff]   ;;  %v9873_v11 = vld [vmem:[#allocation9 + $0x10] ss:$8 sps:$4 sm:$0xff]  }
0x1980   :  { %10138 = vtanh.f32 %v3821_v12 }
0x1981   :  { %10140 = vrcp.f32 %v3931_v20 }
0x198a   :  { %v10139_v5 = vpop.eup %10138 }
0x198b   :  { %v10141_v45 = vpop.eup %10140  ;;  %3824 = vrot.lane.b32.xlu1 %v10139_v5, %s10664_s6 }
0x198c   :  { %v4034_v59 = vmul.f32 %v10141_v45, %v4032_v10  ;;  %v11786_v45 = vld [vmem:[#allocation14 + $0x20] sm:$0xff]  }
0x198f   :  { %1268 = vrot.lane.b32.xlu1 %v11092_v39, %s10672_s2  ;;  %v4042_v15 = vpop.permute.xlu0 %4041 }
0x1990   :  { %v4044_v18 = vadd.f32 %v4042_v15, %v4034_v59  ;;  %v11790_v59 = vld [vmem:[#allocation14 + $0x28] sm:$0xff]   ;;  %v11796_v15 = vld [vmem:[#allocation14 + $0x40] sm:$0xff]  }
0x1992   :  { %10142 = vtanh.f32 %v4044_v18  ;;  %v11801_v18 = vld [vmem:[#allocation14 + $0x48] sm:$0xff]  }
0x1993   :  { %2199 = vrot.lane.b32.xlu1 %v11312_v23, %s10672_s2 }
0x1997   :  { %3127 = vrot.lane.b32.xlu1 %v11504_v56, %s10672_s2 }
0x199b   :  { %1262 = vrot.lane.b32.xlu1 %v11087_v29, %s10672_s2 }
0x199c   :  { %v10143_v50 = vpop.eup %10142 }
0x199d   :  { %4047 = vrot.lane.b32.xlu0 %v10143_v50, %s10664_s6  ;;  %v11807_v50 = vld [vmem:[#allocation14 + $0x60] sm:$0xff]  }
0x19a1   :  { %798 = vrot.lane.b32.xlu0 %v10998_v48, %s10672_s2  ;;  %v4022_v48 = vpop.permute.xlu0 %4021 }
0x19a2   :  { %v4024_v29 = vadd.f32 %v4022_v48, %v10959_v36  ;;  %v11812_v48 = vld [vmem:[#allocation14 + $0x68] sm:$0xff]  }
0x19a4   :  { %v8252_v39 = vmul.f32 -1.442695, %v4024_v29  ;;  %v11826_v29 = vpop.f32.mrb[132].mxu0 }
0x19a5   :  { %1737 = vrot.lane.b32.xlu0 %v11190_v17, %s10672_s2  ;;  %v3799_v17 = vpop.permute.xlu1 %3798 }
0x19a6   :  { %10144 = vpow2.f32 %v8252_v39  ;;  %v3801_v23 = vadd.f32 %v3799_v17, %v10961_v38  ;;  %v9867_v38 = vld [vmem:[#allocation11 + $0x10] ss:$8 sps:$4 sm:$0xff]   ;;  %v9298_v39 = vpop.f32.mrb[133].mxu0 }
0x19a7   :  { %v4311_v17 = vpop.f32.mrb[134].mxu0 }
0x19a9   :  { %2660 = vrot.lane.b32.xlu0 %v11406_v51, %s10672_s2  ;;  %v8245_v51 = vmul.f32 -1.442695, %v3801_v23  ;;  %v9299_v23 = vpop.f32.mrb[135].mxu0 }
0x19ab   :  { %10146 = vpow2.f32 %v8245_v51  ;;  %v11828_v51 = vld [vmem:[#allocation14 + $0x70] sm:$0xff]  }
0x19ac   :  { %9349 = vmatpush3.bf16.msra.mxu0 %v11828_v51 }
0x19ad   :  { %3595 = vrot.lane.b32.xlu0 %v11620_v16, %s10672_s2  ;;  %v9866_v16 = vld [vmem:[#allocation11 + $0x4] ss:$8 sps:$4 sm:$0xff]   ;;  %9350 = vmatprep.subr.bf16.mxu0 %v10669_v0 }
0x19ae   :  { %4098 = vmatprep.subr.bf16.mxu1 %v9866_v16 }
0x19b1   :  { %792 = vrot.lane.b32.xlu0 %v10993_v46, %s10672_s2  ;;  %v10145_v46 = vpop.eup %10144 }
0x19b5   :  { %1732 = vrot.lane.b32.xlu0 %v11185_v42, %s10672_s2  ;;  %v4028_v42 = vadd.f32 1.0, %v10145_v46  ;;  %v10147_v4 = vpop.eup %10146  ;;  %v4207_v46 = vld [vmem:[#allocation12] sm:$0x3] }
0x19b6   :  { %v3805_v61 = vadd.f32 1.0, %v10147_v4 }
0x19b7   :  { %10148 = vrcp.f32 %v4028_v42  ;;  %v4216_v42 = vrot.slane %v4207_v46, %v147_v25 }
0x19b8   :  { %10150 = vrcp.f32 %v3805_v61 }
0x19b9   :  { %2655 = vrot.lane.b32.xlu0 %v11401_v44, %s10672_s2 }
0x19bd   :  { %3590 = vrot.lane.b32.xlu0 %v11615_v62, %s10672_s2  ;;  %v9864_v62 = vld [vmem:[#allocation11] ss:$8 sps:$4 sm:$0xff]  }
0x19be   :  { %4099 = vmatpush1.bf16.msra.mxu1 %v9864_v62 }
0x19bf   :  { %4100 = vmatprep.subr.bf16.mxu1 %v9869_v53 }
0x19c1   :  { %v10149_v6 = vpop.eup %10148 }
0x19c2   :  { %4101 = vmatpush1.bf16.msra.mxu1 %v9867_v38  ;;  %v10151_v31 = vpop.eup %10150 }
0x19c3   :  { %4164 = vmatprep.subr.bf16.mxu1 %v9872_v3 }
0x19f6   :  { %v4367_v61 = vpop.f32.mrb[136].mxu0 }
0x19fd   :  { %v3825_v56 = vpop.permute.xlu1 %3824 }
0x19fe   :  { %v3827_v21 = vmul.f32 %v10151_v31, %v3825_v56  ;;  %v11831_v56 = vld [vmem:[#allocation14 + $0x78] sm:$0xff]  }
0x19ff   :  { %9351 = vmatpush3.bf16.msra.mxu0 %v11831_v56 }
0x1a00   :  { %9364 = vmatprep.subr.bf16.mxu0 %v10669_v0 }
0x1a01   :  { %v1269_v37 = vpop.permute.xlu1 %1268 }
0x1a02   :  { %1272 = vst.msk [vmem:[#allocation2 + $0x18] sm:$0x30] %vm1271_vm2, %v1269_v37  ;;  %9353 = vmatmul.mubr.bf16.vlgmr.msra.gmra.mrb[148].mxu0 %v10671_v1 }
0x1a03   :  { %9365 = vmatpush3.bf16.msra.mxu0 %v11746_v28  ;;  %9368 = vmatprep.mubr.msk.bf16.mxu0 %vm10670_vm0, %v10669_v0 }
0x1a04   :  { %9366 = vmatprep.subr.bf16.mxu0 %v10669_v0 }
0x1a05   :  { %v2200_v44 = vpop.permute.xlu1 %2199 }
0x1a06   :  { %2202 = vst.msk [vmem:[#allocation2 + $0x18] sm:$0x3] %vm795_vm3, %v2200_v44  ;;  %v4212_v44 = vrot.slane %v4207_v46, %v143_v26 }
0x1a07   :  { %9367 = vmatpush3.bf16.msra.mxu0 %v11749_v7 }
0x1a08   :  { %9380 = vmatprep.subr.bf16.mxu0 %v10669_v0 }
0x1a09   :  { %v3128_v36 = vpop.permute.xlu1 %3127 }
0x1a0a   :  { %3130 = vst.msk [vmem:[#allocation2 + $0x10] sm:$0x30] %vm1271_vm2, %v3128_v36 }
0x1a0d   :  { %v1263_v27 = vpop.permute.xlu1 %1262 }
0x1a0e   :  { %1266 = vst.msk [vmem:[#allocation2] sm:$0xc] %vm1265_vm4, %v1263_v27 }
0x1a0f   :  { %v4048_v40 = vpop.permute.xlu0 %4047 }
0x1a10   :  { %v4050_v13 = vmul.f32 %v10149_v6, %v4048_v40  ;;  %v9306_v6 = vpop.f32.mrb[137].mxu0 }
0x1a11   :  { %v4370_v25 = vpop.f32.mrb[138].mxu0 }
0x1a12   :  { %4057 = vrot.lane.b32.xlu1 %v4050_v13, %s10672_s2  ;;  %v9307_v3 = vpop.f32.mrb[139].mxu0 }
0x1a13   :  { %v799_v32 = vpop.permute.xlu0 %798  ;;  %v4488_v24 = vpop.f32.mrb[140].mxu0 }
0x1a14   :  { %803 = vst.msk [vmem:[#allocation2 + $0x18] sm:$0xc0] %vm802_vm5, %v799_v32  ;;  %v9322_v32 = vpop.f32.mrb[141].mxu0 }
0x1a15   :  { %v4491_v31 = vpop.f32.mrb[142].mxu0 }
0x1a16   :  { %2194 = vrot.lane.b32.xlu1 %v11307_v35, %s10672_s2 }
0x1a17   :  { %v1738_v41 = vpop.permute.xlu0 %1737 }
0x1a18   :  { %1740 = vst.msk [vmem:[#allocation2 + $0x18] sm:$0xc] %vm1265_vm4, %v1738_v41 }
0x1a1a   :  { %3122 = vrot.lane.b32.xlu1 %v11499_v49, %s10672_s2 }
0x1a1b   :  { %v2661_v14 = vpop.permute.xlu0 %2660 }
0x1a1c   :  { %2663 = vst.msk [vmem:[#allocation2 + $0x10] sm:$0xc0] %vm802_vm5, %v2661_v14 }
0x1a1e   :  { %4052 = vrot.lane.b32.xlu1 %v3827_v21, %s10672_s2  ;;  %v9323_v21 = vpop.f32.mrb[143].mxu0 }
0x1a1f   :  { %v3596_v35 = vpop.permute.xlu0 %3595  ;;  %v4065_v63 = vld [vmem:[#allocation2 + $0x18] sm:$0xff] }
0x1a20   :  { %3598 = vst.msk [vmem:[#allocation2 + $0x10] sm:$0xc] %vm1265_vm4, %v3596_v35 }
0x1a23   :  { %v793_v49 = vpop.permute.xlu0 %792 }
0x1a24   :  { %796 = vst.msk [vmem:[#allocation2] sm:$0x3] %vm795_vm3, %v793_v49 }
0x1a27   :  { %v1733_v19 = vpop.permute.xlu0 %1732 }
0x1a28   :  { %1735 = vst.msk [vmem:[#allocation2] sm:$0x30] %vm1271_vm2, %v1733_v19 }
0x1a2b   :  { %v2656_v47 = vpop.permute.xlu0 %2655 }
0x1a2c   :  { %2658 = vst.msk [vmem:[#allocation2 + $0x8] sm:$0x3] %vm795_vm3, %v2656_v47 }
0x1a2f   :  { %v3591_v55 = vpop.permute.xlu0 %3590 }
0x1a30   :  { %3593 = vst.msk [vmem:[#allocation2 + $0x8] sm:$0x30] %vm1271_vm2, %v3591_v55 }
0x1a84   :  { %v4058_v30 = vpop.permute.xlu1 %4057 }
0x1a85   :  { %4060 = vst.msk [vmem:[#allocation2 + $0x10] sm:$0x3] %vm795_vm3, %v4058_v30  ;;  %v4630_v30 = vpop.f32.mrb[144].mxu0 }
0x1a86   :  { %v4637_v46 = vrot.slane %v4630_v30, 2 }
0x1a88   :  { %v2195_v2 = vpop.permute.xlu1 %2194 }
0x1a89   :  { %2197 = vst.msk [vmem:[#allocation2] sm:$0xc0] %vm802_vm5, %v2195_v2  ;;  %v9338_v2 = vpop.f32.mrb[145].mxu0 }
0x1a8c   :  { %v3123_v9 = vpop.permute.xlu1 %3122  ;;  %v4064_v8 = vld [vmem:[#allocation2 + $0x10] sm:$0xff] }
0x1a8d   :  { %3125 = vst.msk [vmem:[#allocation2 + $0x8] sm:$0xc] %vm1265_vm4, %v3123_v9  ;;  %v4066_v52 = vpack.c.bf16 %v4065_v63, %v4064_v8  ;;  %v4633_v9 = vpop.f32.mrb[146].mxu0 }
0x1a8e   :  { %v9339_v8 = vpop.f32.mrb[147].mxu0 }
0x1a8f   :  { %8257 = vmatmul.mubr.msk.bf16.vlgmr.msra.gmra.mrb[128].mxu1 %vm176_vm1, %v4066_v52 }
0x1a90   :  { %v4053_v20 = vpop.permute.xlu1 %4052  ;;  %4165 = vmatpush1.bf16.msra.mxu1 %v9870_v58  ;;  %4196 = vmatprep.mubr.bf16.mxu1 %v10671_v1  ;;  %v4061_v12 = vld [vmem:[#allocation2] sm:$0xff] }
0x1a91   :  { %4055 = vst.msk [vmem:[#allocation2 + $0x8] sm:$0xc0] %vm802_vm5, %v4053_v20  ;;  %4166 = vmatprep.subr.bf16.mxu1 %v9875_v34 }
0x1a94   :  { %4167 = vmatpush1.bf16.msra.mxu1 %v9873_v11 }
0x1a95   :  { %9308 = vmatprep.subr.bf16.mxu1 %v10669_v0 }
0x1a98   :  { %v4062_v5 = vld [vmem:[#allocation2 + $0x8] sm:$0xff] }
0x1a99   :  { %v4063_v10 = vpack.c.bf16 %v4062_v5, %v4061_v12 }
0x1a9b   :  { %8262 = vmatmul.mubr.msk.bf16.vlgmr.msra.gmra.mrb[128].mxu1 %vm176_vm1, %v4063_v10 }
0x1a9c   :  { %9309 = vmatpush3.bf16.msra.mxu1 %v11786_v45  ;;  %9312 = vmatprep.mubr.msk.bf16.mxu1 %vm10670_vm0, %v10669_v0 }
0x1a9d   :  { %9310 = vmatprep.subr.bf16.mxu1 %v10669_v0 }
0x1aa0   :  { %9311 = vmatpush3.bf16.msra.mxu1 %v11790_v59 }
0x1aa1   :  { %9324 = vmatprep.subr.bf16.mxu1 %v10669_v0 }
0x1aa3   :  { %9313 = vmatmul.mubr.bf16.vlgmr.msra.gmra.mrb[132].mxu1 %v10671_v1 }
0x1aa4   :  { %9325 = vmatpush3.bf16.msra.mxu1 %v11796_v15  ;;  %9328 = vmatprep.mubr.msk.bf16.mxu1 %vm10670_vm0, %v10669_v0 }
0x1aa5   :  { %9326 = vmatprep.subr.bf16.mxu1 %v10669_v0 }
0x1aa8   :  { %9327 = vmatpush3.bf16.msra.mxu1 %v11801_v18 }
0x1aa9   :  { %9340 = vmatprep.subr.bf16.mxu1 %v10669_v0 }
0x1aab   :  { %9329 = vmatmul.mubr.bf16.vlgmr.msra.gmra.mrb[136].mxu1 %v10671_v1 }
0x1aac   :  { %9341 = vmatpush3.bf16.msra.mxu1 %v11807_v50  ;;  %9344 = vmatprep.mubr.msk.bf16.mxu1 %vm10670_vm0, %v10669_v0 }
0x1aad   :  { %9342 = vmatprep.subr.bf16.mxu1 %v10669_v0 }
0x1ab0   :  { %9343 = vmatpush3.bf16.msra.mxu1 %v11812_v48 }
0x1ab1   :  { %9356 = vmatprep.subr.bf16.mxu1 %v10669_v0 }
0x1ab3   :  { %9345 = vmatmul.mubr.bf16.vlgmr.msra.gmra.mrb[140].mxu1 %v10671_v1 }
0x1ab4   :  { %9357 = vmatpush3.bf16.msra.mxu1 %v11723_v33  ;;  %9360 = vmatprep.mubr.msk.bf16.mxu1 %vm10670_vm0, %v10669_v0 }
0x1ab5   :  { %9358 = vmatprep.subr.bf16.mxu1 %v10669_v0 }
0x1ab8   :  { %9359 = vmatpush3.bf16.msra.mxu1 %v11728_v57 }
0x1ab9   :  { %9372 = vmatprep.subr.bf16.mxu1 %v10669_v0 }
0x1ad5   :  { %v4753_v5 = vpop.f32.mrb[148].mxu0 }
0x1ad6   :  { %v9354_v10 = vpop.f32.mrb[149].mxu0 }
0x1ad7   :  { %v4756_v39 = vpop.f32.mrb[150].mxu0 }
0x1ad8   :  { %v9355_v17 = vpop.f32.mrb[151].mxu0 }
0x1b6e   :  { %v4198_v37 = vpop.f32.mrb[128].mxu1 }
0x1b6f   :  { %v4200_v1 = vpop.f32.mrb[129].mxu1  ;;  %v11853_v63 = vadd.f32 %v4212_v44, %v4198_v37 }
0x1b70   :  { %v11847_v62 = vadd.f32 %v4216_v42, %v4200_v1  ;;  %v4202_v16 = vpop.f32.mrb[130].mxu1 }
0x1b71   :  { %v11849_v36 = vadd.f32 %v4212_v44, %v4202_v16  ;;  %v4204_v38 = vpop.f32.mrb[131].mxu1 }
0x1b72   :  { %v11857_v20 = vadd.f32 %v4216_v42, %v4204_v38  ;;  %v4314_v42 = vadd.f32 %v11826_v29, %v11853_v63 }
0x1b74   :  { %v8265_v37 = vmul.f32 -1.442695, %v4314_v42 }
0x1b76   :  { %v4430_v53 = vpop.f32.mrb[132].mxu1 }
0x1b77   :  { %4437 = vrot.lane.b32.xlu0 %v4430_v53, %s10664_s6  ;;  %v9314_v4 = vpop.f32.mrb[133].mxu1 }
0x1b78   :  { %v4433_v27 = vpop.f32.mrb[134].mxu1 }
0x1b79   :  { %v9315_v40 = vpop.f32.mrb[135].mxu1 }
0x1b7e   :  { %v4568_v13 = vpop.f32.mrb[136].mxu1 }
0x1b7f   :  { %v9330_v26 = vpop.f32.mrb[137].mxu1  ;;  %v4575_v44 = vrot.slane %v4568_v13, 2  ;;  %v4760_v13 = vrot.slane %v4753_v5, 2 }
0x1b80   :  { %v4571_v41 = vpop.f32.mrb[138].mxu1 }
0x1b81   :  { %v9331_v14 = vpop.f32.mrb[139].mxu1  ;;  %v4577_v16 = vadd.f32 %v4575_v44, %v11857_v20 }
0x1b83   :  { %v8276_v53 = vmul.f32 -1.442695, %v4577_v16 }
0x1b86   :  { %v4694_v35 = vpop.f32.mrb[140].mxu1 }
0x1b87   :  { %v4701_v49 = vrot.slane %v4694_v35, 2  ;;  %v9346_v19 = vpop.f32.mrb[141].mxu1 }
0x1b88   :  { %v4697_v47 = vpop.f32.mrb[142].mxu1 }
0x1b89   :  { %4702 = vrot.lane.b32.xlu1 %v4701_v49, %s10664_s6  ;;  %v9347_v55 = vpop.f32.mrb[143].mxu1 }
0x1be9   :  { %v4438_v58 = vpop.permute.xlu0 %4437 }
0x1bea   :  { %v4440_v52 = vadd.f32 %v4438_v58, %v11853_v63 }
0x1bec   :  { %10152 = vtanh.f32 %v4440_v52 }
0x1bf6   :  { %v10153_v34 = vpop.eup %10152 }
0x1bf7   :  { %4507 = vrot.lane.b32.xlu0 %v10153_v34, %s10664_s6 }
0x1bfb   :  { %4374 = vrot.lane.b32.xlu0 %v4367_v61, %s10672_s2  ;;  %v4703_v11 = vpop.permute.xlu1 %4702 }
0x1bfc   :  { %v4705_v12 = vadd.f32 %v4703_v11, %v11857_v20 }
0x1bfe   :  { %10154 = vtanh.f32 %v4705_v12 }
0x1bff   :  { %10156 = vpow2.f32 %v8265_v37 }
0x1c08   :  { %v10155_v23 = vpop.eup %10154 }
0x1c09   :  { %4773 = vrot.lane.b32.xlu1 %v10155_v23, %s10664_s6  ;;  %v10157_v1 = vpop.eup %10156 }
0x1c0a   :  { %v4318_v38 = vadd.f32 1.0, %v10157_v1 }
0x1c0c   :  { %10158 = vrcp.f32 %v4318_v38 }
0x1c0d   :  { %4638 = vrot.lane.b32.xlu1 %v4637_v46, %s10672_s2  ;;  %10160 = vpow2.f32 %v8276_v53 }
0x1c16   :  { %v10159_v4 = vpop.eup %10158 }
0x1c17   :  { %v10161_v27 = vpop.eup %10160 }
0x1c18   :  { %v4581_v40 = vadd.f32 1.0, %v10161_v27 }
0x1c1a   :  { %10162 = vrcp.f32 %v4581_v40 }
0x1c24   :  { %v10163_v29 = vpop.eup %10162 }
0x1c69   :  { %v4508_v61 = vpop.permute.xlu0 %4507 }
0x1c6a   :  { %v4510_v6 = vmul.f32 %v10159_v4, %v4508_v61 }
0x1c6c   :  { %4512 = vrot.lane.b32.xlu0 %v4510_v6, %s10672_s2 }
0x1c6d   :  { %v4375_v26 = vpop.permute.xlu0 %4374 }
0x1c6e   :  { %v4377_v32 = vadd.f32 %v4375_v26, %v11853_v63 }
0x1c70   :  { %4495 = vrot.lane.b32.xlu0 %v4488_v24, %s10673_s15  ;;  %v8268_v41 = vmul.f32 -1.442695, %v4377_v32 }
0x1c72   :  { %10164 = vpow2.f32 %v8268_v41 }
0x1c7b   :  { %v4774_v25 = vpop.permute.xlu1 %4773 }
0x1c7c   :  { %v4776_v3 = vmul.f32 %v10163_v29, %v4774_v25  ;;  %v10165_v14 = vpop.eup %10164 }
0x1c7d   :  { %v4381_v35 = vadd.f32 1.0, %v10165_v14 }
0x1c7e   :  { %4778 = vrot.lane.b32.xlu1 %v4776_v3, %s10672_s2 }
0x1c7f   :  { %v4639_v31 = vpop.permute.xlu1 %4638  ;;  %10166 = vrcp.f32 %v4381_v35 }
0x1c80   :  { %v4641_v21 = vadd.f32 %v4639_v31, %v11857_v20 }
0x1c82   :  { %4761 = vrot.lane.b32.xlu1 %v4760_v13, %s10673_s15  ;;  %v8279_v24 = vmul.f32 -1.442695, %v4641_v21 }
0x1c84   :  { %10168 = vpow2.f32 %v8279_v24 }
0x1c89   :  { %v10167_v49 = vpop.eup %10166 }
0x1c8a   :  { %v4505_v47 = vmul.f32 0.0, %v10167_v49 }
0x1c8e   :  { %v10169_v19 = vpop.eup %10168 }
0x1c8f   :  { %v4645_v55 = vadd.f32 1.0, %v10169_v19 }
0x1cde   :  { %v4513_v30 = vpop.permute.xlu0 %4512 }
0x1cdf   :  { %v11872_v2 = vadd.f32 %v4513_v30, %v4505_v47 }
0x1ce1   :  { %10170 = vtanh.f32 %v11872_v2 }
0x1ce2   :  { %10172 = vrcp.f32 %v4645_v55  ;;  %v4496_v12 = vpop.permute.xlu0 %4495 }
0x1ce3   :  { %v4498_v5 = vadd.f32 %v4496_v12, %v11853_v63 }
0x1ce5   :  { %v8273_v10 = vmul.f32 -1.442695, %v4498_v5 }
0x1ceb   :  { %v10171_v9 = vpop.eup %10170 }
0x1cec   :  { %v10173_v8 = vpop.eup %10172  ;;  %4518 = vrot.lane.b32.xlu0 %v10171_v9, %s10664_s6 }
0x1ced   :  { %v4771_v58 = vmul.f32 0.0, %v10173_v8 }
0x1cf0   :  { %v4779_v52 = vpop.permute.xlu1 %4778 }
0x1cf1   :  { %v11876_v34 = vadd.f32 %v4779_v52, %v4771_v58 }
0x1cf3   :  { %10174 = vtanh.f32 %v11876_v34 }
0x1cf4   :  { %10176 = vpow2.f32 %v8273_v10  ;;  %v4762_v39 = vpop.permute.xlu1 %4761 }
0x1cf5   :  { %v4764_v23 = vadd.f32 %v4762_v39, %v11857_v20 }
0x1cf7   :  { %v8284_v42 = vmul.f32 -1.442695, %v4764_v23 }
0x1cfd   :  { %v10175_v11 = vpop.eup %10174 }
0x1cfe   :  { %4784 = vrot.lane.b32.xlu1 %v10175_v11, %s10664_s6  ;;  %v10177_v17 = vpop.eup %10176 }
0x1cff   :  { %v4502_v46 = vadd.f32 1.0, %v10177_v17 }
0x1d01   :  { %10178 = vrcp.f32 %v4502_v46 }
0x1d02   :  { %10180 = vpow2.f32 %v8284_v42 }
0x1d0b   :  { %v10179_v37 = vpop.eup %10178 }
0x1d0c   :  { %v10181_v1 = vpop.eup %10180 }
0x1d0d   :  { %v4768_v53 = vadd.f32 1.0, %v10181_v1 }
0x1d0f   :  { %10182 = vrcp.f32 %v4768_v53 }
0x1d19   :  { %v10183_v4 = vpop.eup %10182 }
0x1d5e   :  { %v4519_v44 = vpop.permute.xlu0 %4518 }
0x1d5f   :  { %v4521_v16 = vmul.f32 %v10179_v37, %v4519_v44 }
0x1d61   :  { %v4788_v38 = vpack.c.bf16 %v4521_v16, %v4521_v16 }
0x1d63   :  { %4790 = vrot.lane.b32.xlu0 %v4788_v38, %s10672_s2 }
0x1d70   :  { %v4785_v61 = vpop.permute.xlu1 %4784 }
0x1d71   :  { %v4787_v27 = vmul.f32 %v10183_v4, %v4785_v61 }
0x1d73   :  { %v5016_v6 = vpack.c.bf16 %v4787_v27, %v4787_v27 }
0x1d75   :  { %v5018_v40 = vrot.slane %v5016_v6, 3 }
0x1d77   :  { %5019 = vrot.lane.b32.xlu1 %v5018_v40, %s10672_s2 }
0x1dd5   :  { %v4791_v29 = vpop.permute.xlu0 %4790 }
0x1dd6   :  { %9361 = vmatmul.mubr.msk.bf16.vlgmr.msra.gmra.mrb[144].mxu1 %vm176_vm1, %v4791_v29  ;;  %9369 = vmatmul.mubr.msk.bf16.vlgmr.msra.gmra.mrb[152].mxu0 %vm176_vm1, %v4791_v29 }
0x1dd7   :  { %9373 = vmatpush3.bf16.msra.mxu1 %v11786_v45  ;;  %9381 = vmatpush3.bf16.msra.mxu0 %v11753_v43 }
0x1dd8   :  { %9374 = vmatprep.subr.bf16.mxu1 %v10669_v0  ;;  %9382 = vmatprep.subr.bf16.mxu0 %v10669_v0 }
0x1dd9   :  { %9376 = vmatprep.mubr.msk.bf16.mxu1 %vm10670_vm0, %v10669_v0  ;;  %9384 = vmatprep.mubr.msk.bf16.mxu0 %vm10670_vm0, %v10669_v0 }
0x1ddb   :  { %9375 = vmatpush3.bf16.msra.mxu1 %v11790_v59  ;;  %9383 = vmatpush3.bf16.msra.mxu0 %v11758_v22 }
0x1ddc   :  { %9388 = vmatprep.subr.bf16.mxu1 %v10669_v0  ;;  %9396 = vmatprep.subr.bf16.mxu0 %v10669_v0 }
0x1dde   :  { %9377 = vmatmul.mubr.msk.bf16.vlgmr.msra.gmra.mrb[148].mxu1 %vm176_vm1, %v4791_v29  ;;  %9385 = vmatmul.mubr.msk.bf16.vlgmr.msra.gmra.mrb[156].mxu0 %vm176_vm1, %v4791_v29 }
0x1ddf   :  { %9389 = vmatpush3.bf16.msra.mxu1 %v11796_v15  ;;  %9397 = vmatpush3.bf16.msra.mxu0 %v11764_v60 }
0x1de0   :  { %9390 = vmatprep.subr.bf16.mxu1 %v10669_v0  ;;  %9398 = vmatprep.subr.bf16.mxu0 %v10669_v0 }
0x1de1   :  { %9392 = vmatprep.mubr.msk.bf16.mxu1 %vm10670_vm0, %v10669_v0  ;;  %9400 = vmatprep.mubr.msk.bf16.mxu0 %vm10670_vm0, %v10669_v0 }
0x1de3   :  { %9391 = vmatpush3.bf16.msra.mxu1 %v11801_v18  ;;  %9399 = vmatpush3.bf16.msra.mxu0 %v11769_v54 }
0x1de4   :  { %9404 = vmatprep.subr.bf16.mxu1 %v10669_v0  ;;  %9412 = vmatprep.subr.bf16.mxu0 %v10669_v0 }
0x1de9   :  { %v5020_v25 = vpop.permute.xlu1 %5019 }
0x1dea   :  { %9393 = vmatmul.mubr.msk.bf16.vlgmr.msra.gmra.mrb[152].mxu1 %vm176_vm1, %v5020_v25  ;;  %9401 = vmatmul.mubr.msk.bf16.vlgmr.msra.gmra.mrb[160].mxu0 %vm176_vm1, %v5020_v25 }
0x1deb   :  { %9405 = vmatpush3.bf16.msra.mxu1 %v11807_v50  ;;  %9413 = vmatpush3.bf16.msra.mxu0 %v11828_v51 }
0x1dec   :  { %9406 = vmatprep.subr.bf16.mxu1 %v10669_v0  ;;  %9414 = vmatprep.subr.bf16.mxu0 %v10669_v0 }
0x1ded   :  { %9408 = vmatprep.mubr.msk.bf16.mxu1 %vm10670_vm0, %v10669_v0  ;;  %9416 = vmatprep.mubr.msk.bf16.mxu0 %vm10670_vm0, %v10669_v0 }
0x1def   :  { %9407 = vmatpush3.bf16.msra.mxu1 %v11812_v48  ;;  %9415 = vmatpush3.bf16.msra.mxu0 %v11831_v56 }
0x1df0   :  { %9420 = vmatprep.subr.bf16.mxu1 %v10669_v0  ;;  %9428 = vmatprep.subr.bf16.mxu0 %v10669_v0 }
0x1df2   :  { %9409 = vmatmul.mubr.msk.bf16.vlgmr.msra.gmra.mrb[156].mxu1 %vm176_vm1, %v5020_v25  ;;  %9417 = vmatmul.mubr.msk.bf16.vlgmr.msra.gmra.mrb[164].mxu0 %vm176_vm1, %v5020_v25 }
0x1df3   :  { %9421 = vmatpush3.bf16.msra.mxu1 %v11723_v33  ;;  %9429 = vmatpush3.bf16.msra.mxu0 %v11746_v28 }
0x1df4   :  { %9422 = vmatprep.subr.bf16.mxu1 %v10669_v0  ;;  %9430 = vmatprep.subr.bf16.mxu0 %v10669_v0 }
0x1df5   :  { %9424 = vmatprep.mubr.msk.bf16.mxu1 %vm10670_vm0, %v10669_v0  ;;  %9432 = vmatprep.mubr.msk.bf16.mxu0 %vm10670_vm0, %v10669_v0 }
0x1df7   :  { %9423 = vmatpush3.bf16.msra.mxu1 %v11728_v57  ;;  %9431 = vmatpush3.bf16.msra.mxu0 %v11749_v7 }
0x1df8   :  { %9436 = vmatprep.subr.bf16.mxu1 %v10669_v0  ;;  %9444 = vmatprep.subr.bf16.mxu0 %v10669_v0 }
0x1ea9   :  { %v4829_v3 = vpop.f32.mrb[144].mxu1  ;;  %v4879_v13 = vpop.f32.mrb[152].mxu0 }
0x1eaa   :  { %v9362_v26 = vpop.f32.mrb[145].mxu1  ;;  %v9370_v32 = vpop.f32.mrb[153].mxu0  ;;  %v4886_v6 = vrot.slane %v4879_v13, 6 }
0x1eab   :  { %v4832_v41 = vpop.f32.mrb[146].mxu1  ;;  %v4882_v31 = vpop.f32.mrb[154].mxu0  ;;  %v4836_v32 = vrot.slane %v4829_v3, 6 }
0x1eac   :  { %v9363_v14 = vpop.f32.mrb[147].mxu1  ;;  %v9371_v21 = vpop.f32.mrb[155].mxu0 }
0x1ead   :  { %v4838_v41 = vadd.f32 %v4836_v32, %v11853_v63 }
0x1eaf   :  { %v8286_v31 = vmul.f32 -1.442695, %v4838_v41 }
0x1eb1   :  { %v4931_v35 = vpop.f32.mrb[148].mxu1  ;;  %v4978_v24 = vpop.f32.mrb[156].mxu0 }
0x1eb2   :  { %v4938_v49 = vrot.slane %v4931_v35, 6  ;;  %v9378_v19 = vpop.f32.mrb[149].mxu1  ;;  %v9386_v47 = vpop.f32.mrb[157].mxu0 }
0x1eb3   :  { %v4934_v55 = vpop.f32.mrb[150].mxu1  ;;  %v4981_v30 = vpop.f32.mrb[158].mxu0 }
0x1eb4   :  { %v9387_v9 = vpop.f32.mrb[159].mxu0  ;;  %4939 = vrot.lane.b32.xlu0 %v4938_v49, %s10664_s6  ;;  %v9379_v8 = vpop.f32.mrb[151].mxu1 }
0x1eb5   :  { %v4985_v9 = vrot.slane %v4978_v24, 6 }
0x1ebd   :  { %v5058_v58 = vpop.f32.mrb[152].mxu1  ;;  %v5108_v52 = vpop.f32.mrb[160].mxu0 }
0x1ebe   :  { %v9394_v11 = vpop.f32.mrb[153].mxu1  ;;  %v9402_v12 = vpop.f32.mrb[161].mxu0  ;;  %v5115_v26 = vrot.slane %v5108_v52, 4  ;;  %v5065_v14 = vrot.slane %v5058_v58, 4 }
0x1ebf   :  { %v5061_v5 = vpop.f32.mrb[154].mxu1  ;;  %v5111_v10 = vpop.f32.mrb[162].mxu0 }
0x1ec0   :  { %v9395_v39 = vpop.f32.mrb[155].mxu1  ;;  %v9403_v17 = vpop.f32.mrb[163].mxu0  ;;  %v5067_v13 = vadd.f32 %v5065_v14, %v11857_v20 }
0x1ec2   :  { %v8293_v49 = vmul.f32 -1.442695, %v5067_v13 }
0x1ec5   :  { %v5160_v23 = vpop.f32.mrb[156].mxu1  ;;  %v5207_v46 = vpop.f32.mrb[164].mxu0 }
0x1ec6   :  { %v5167_v42 = vrot.slane %v5160_v23, 4  ;;  %v9410_v37 = vpop.f32.mrb[157].mxu1  ;;  %v9418_v44 = vpop.f32.mrb[165].mxu0  ;;  %v5214_v11 = vrot.slane %v5207_v46, 4 }
0x1ec7   :  { %v5163_v1 = vpop.f32.mrb[158].mxu1  ;;  %v5210_v16 = vpop.f32.mrb[166].mxu0  ;;  %v4997_v44 = vrot.slane %v11872_v2, 6 }
0x1ec8   :  { %v9419_v38 = vpop.f32.mrb[167].mxu0  ;;  %5168 = vrot.lane.b32.xlu1 %v5167_v42, %s10664_s6  ;;  %v9411_v53 = vpop.f32.mrb[159].mxu1 }
0x1f26   :  { %v4940_v4 = vpop.permute.xlu0 %4939 }
0x1f27   :  { %v4942_v61 = vadd.f32 %v4940_v4, %v11853_v63 }
0x1f29   :  { %10184 = vtanh.f32 %v4942_v61 }
0x1f33   :  { %v10185_v27 = vpop.eup %10184 }
0x1f34   :  { %5001 = vrot.lane.b32.xlu0 %v10185_v27, %s10664_s6  ;;  %v5226_v27 = vrot.slane %v11876_v34, 2 }
0x1f38   :  { %4887 = vrot.lane.b32.xlu0 %v4886_v6, %s10672_s2 }
0x1f3a   :  { %v5169_v40 = vpop.permute.xlu1 %5168 }
0x1f3b   :  { %v5171_v29 = vadd.f32 %v5169_v40, %v11857_v20 }
0x1f3d   :  { %10186 = vtanh.f32 %v5171_v29 }
0x1f3e   :  { %10188 = vpow2.f32 %v8286_v31 }
0x1f47   :  { %v10187_v25 = vpop.eup %10186 }
0x1f48   :  { %5230 = vrot.lane.b32.xlu1 %v10187_v25, %s10664_s6  ;;  %v10189_v21 = vpop.eup %10188 }
0x1f49   :  { %v4842_v35 = vadd.f32 1.0, %v10189_v21 }
0x1f4b   :  { %10190 = vrcp.f32 %v4842_v35 }
0x1f4c   :  { %5116 = vrot.lane.b32.xlu1 %v5115_v26, %s10672_s2  ;;  %10192 = vpow2.f32 %v8293_v49 }
0x1f55   :  { %v10191_v19 = vpop.eup %10190 }
0x1f56   :  { %v10193_v30 = vpop.eup %10192 }
0x1f57   :  { %v5071_v3 = vadd.f32 1.0, %v10193_v30 }
0x1f59   :  { %10194 = vrcp.f32 %v5071_v3 }
0x1f63   :  { %v10195_v8 = vpop.eup %10194 }
0x1fa6   :  { %v5002_v47 = vpop.permute.xlu0 %5001 }
0x1fa7   :  { %v5004_v55 = vmul.f32 %v10191_v19, %v5002_v47 }
0x1fa9   :  { %5006 = vrot.lane.b32.xlu0 %v5004_v55, %s10672_s2 }
0x1faa   :  { %v4888_v12 = vpop.permute.xlu0 %4887 }
0x1fab   :  { %v4890_v5 = vadd.f32 %v4888_v12, %v11853_v63 }
0x1fad   :  { %4986 = vrot.lane.b32.xlu0 %v4985_v9, %s10673_s15  ;;  %v8288_v10 = vmul.f32 -1.442695, %v4890_v5 }
0x1faf   :  { %10196 = vpow2.f32 %v8288_v10 }
0x1fb9   :  { %v10197_v17 = vpop.eup %10196 }
0x1fba   :  { %v5231_v58 = vpop.permute.xlu1 %5230  ;;  %v4894_v23 = vadd.f32 1.0, %v10197_v17 }
0x1fbb   :  { %v5233_v52 = vmul.f32 %v10195_v8, %v5231_v58 }
0x1fbc   :  { %10198 = vrcp.f32 %v4894_v23 }
0x1fbd   :  { %5235 = vrot.lane.b32.xlu1 %v5233_v52, %s10672_s2 }
0x1fbe   :  { %v5117_v39 = vpop.permute.xlu1 %5116 }
0x1fbf   :  { %v5119_v24 = vadd.f32 %v5117_v39, %v11857_v20 }
0x1fc1   :  { %5215 = vrot.lane.b32.xlu1 %v5214_v11, %s10673_s15  ;;  %v8295_v42 = vmul.f32 -1.442695, %v5119_v24 }
0x1fc3   :  { %10200 = vpow2.f32 %v8295_v42 }
0x1fc6   :  { %v10199_v37 = vpop.eup %10198 }
0x1fc7   :  { %v4999_v46 = vmul.f32 %v10199_v37, %v4997_v44 }
0x1fcd   :  { %v10201_v1 = vpop.eup %10200 }
0x1fce   :  { %v5123_v53 = vadd.f32 1.0, %v10201_v1 }
0x201b   :  { %v5007_v16 = vpop.permute.xlu0 %5006 }
0x201c   :  { %v11957_v38 = vadd.f32 %v5007_v16, %v4999_v46 }
0x201e   :  { %10202 = vtanh.f32 %v11957_v38 }
0x201f   :  { %10204 = vrcp.f32 %v5123_v53  ;;  %v4987_v25 = vpop.permute.xlu0 %4986 }
0x2020   :  { %v4989_v26 = vadd.f32 %v4987_v25, %v11853_v63 }
0x2022   :  { %v8291_v32 = vmul.f32 -1.442695, %v4989_v26 }
0x2028   :  { %v10203_v4 = vpop.eup %10202 }
0x2029   :  { %5012 = vrot.lane.b32.xlu0 %v10203_v4, %s10664_s6  ;;  %v10205_v61 = vpop.eup %10204 }
0x202a   :  { %v5228_v6 = vmul.f32 %v10205_v61, %v5226_v27 }
0x202f   :  { %v5236_v40 = vpop.permute.xlu1 %5235 }
0x2030   :  { %v11962_v29 = vadd.f32 %v5236_v40, %v5228_v6 }
0x2032   :  { %10206 = vtanh.f32 %v11962_v29 }
0x2033   :  { %10208 = vpow2.f32 %v8291_v32  ;;  %v5216_v41 = vpop.permute.xlu1 %5215 }
0x2034   :  { %v5218_v14 = vadd.f32 %v5216_v41, %v11857_v20 }
0x2036   :  { %v8298_v34 = vmul.f32 -1.442695, %v5218_v14 }
0x203c   :  { %v10207_v2 = vpop.eup %10206 }
0x203d   :  { %5241 = vrot.lane.b32.xlu1 %v10207_v2, %s10664_s6  ;;  %v10209_v31 = vpop.eup %10208 }
0x203e   :  { %v4993_v21 = vadd.f32 1.0, %v10209_v31 }
0x2040   :  { %10210 = vrcp.f32 %v4993_v21 }
0x2041   :  { %10212 = vpow2.f32 %v8298_v34 }
0x204a   :  { %v10211_v13 = vpop.eup %10210 }
0x204b   :  { %v10213_v19 = vpop.eup %10212 }
0x204c   :  { %v5222_v30 = vadd.f32 1.0, %v10213_v19 }
0x204e   :  { %10214 = vrcp.f32 %v5222_v30 }
0x2058   :  { %v10215_v9 = vpop.eup %10214 }
0x209b   :  { %v5013_v35 = vpop.permute.xlu0 %5012 }
0x209c   :  { %v5015_v49 = vmul.f32 %v10211_v13, %v5013_v35 }
0x209e   :  { %v5245_v47 = vpack.c.bf16 %v5015_v49, %v5015_v49 }
0x20a0   :  { %v5247_v55 = vrot.slane %v5245_v47, 1 }
0x20a2   :  { %5248 = vrot.lane.b32.xlu0 %v5247_v55, %s10672_s2 }
0x20af   :  { %v5242_v3 = vpop.permute.xlu1 %5241 }
0x20b0   :  { %v5244_v8 = vmul.f32 %v10215_v9, %v5242_v3 }
0x20b2   :  { %v5474_v58 = vpack.c.bf16 %v5244_v8, %v5244_v8 }
0x20b4   :  { %v5476_v52 = vrot.slane %v5474_v58, 2 }
0x20b6   :  { %5477 = vrot.lane.b32.xlu1 %v5476_v52, %s10672_s2 }
0x2114   :  { %v5249_v11 = vpop.permute.xlu0 %5248 }
0x2115   :  { %9425 = vmatmul.mubr.msk.bf16.vlgmr.msra.gmra.mrb[160].mxu1 %vm176_vm1, %v5249_v11  ;;  %9433 = vmatmul.mubr.msk.bf16.vlgmr.msra.gmra.mrb[168].mxu0 %vm176_vm1, %v5249_v11 }
0x2116   :  { %9437 = vmatpush3.bf16.msra.mxu1 %v11786_v45  ;;  %9445 = vmatpush3.bf16.msra.mxu0 %v11753_v43 }
0x2117   :  { %9438 = vmatprep.subr.bf16.mxu1 %v10669_v0  ;;  %9446 = vmatprep.subr.bf16.mxu0 %v10669_v0 }
0x2118   :  { %9440 = vmatprep.mubr.msk.bf16.mxu1 %vm10670_vm0, %v10669_v0  ;;  %9448 = vmatprep.mubr.msk.bf16.mxu0 %vm10670_vm0, %v10669_v0 }
0x211a   :  { %9439 = vmatpush3.bf16.msra.mxu1 %v11790_v59  ;;  %9447 = vmatpush3.bf16.msra.mxu0 %v11758_v22 }
0x211b   :  { %9452 = vmatprep.subr.bf16.mxu1 %v10669_v0  ;;  %9460 = vmatprep.subr.bf16.mxu0 %v10669_v0 }
0x211d   :  { %9441 = vmatmul.mubr.msk.bf16.vlgmr.msra.gmra.mrb[164].mxu1 %vm176_vm1, %v5249_v11  ;;  %9449 = vmatmul.mubr.msk.bf16.vlgmr.msra.gmra.mrb[172].mxu0 %vm176_vm1, %v5249_v11 }
0x211e   :  { %9453 = vmatpush3.bf16.msra.mxu1 %v11796_v15  ;;  %9461 = vmatpush3.bf16.msra.mxu0 %v11764_v60 }
0x211f   :  { %9454 = vmatprep.subr.bf16.mxu1 %v10669_v0  ;;  %9462 = vmatprep.subr.bf16.mxu0 %v10669_v0 }
0x2120   :  { %9456 = vmatprep.mubr.msk.bf16.mxu1 %vm10670_vm0, %v10669_v0  ;;  %9464 = vmatprep.mubr.msk.bf16.mxu0 %vm10670_vm0, %v10669_v0 }
0x2122   :  { %9455 = vmatpush3.bf16.msra.mxu1 %v11801_v18  ;;  %9463 = vmatpush3.bf16.msra.mxu0 %v11769_v54 }
0x2123   :  { %9468 = vmatprep.subr.bf16.mxu1 %v10669_v0  ;;  %9476 = vmatprep.subr.bf16.mxu0 %v10669_v0 }
0x2128   :  { %v5478_v43 = vpop.permute.xlu1 %5477 }
0x2129   :  { %9457 = vmatmul.mubr.msk.bf16.vlgmr.msra.gmra.mrb[168].mxu1 %vm176_vm1, %v5478_v43  ;;  %9465 = vmatmul.mubr.msk.bf16.vlgmr.msra.gmra.mrb[176].mxu0 %vm176_vm1, %v5478_v43 }
0x212a   :  { %9469 = vmatpush3.bf16.msra.mxu1 %v11807_v50  ;;  %9477 = vmatpush3.bf16.msra.mxu0 %v11828_v51 }
0x212b   :  { %9470 = vmatprep.subr.bf16.mxu1 %v10669_v0  ;;  %9478 = vmatprep.subr.bf16.mxu0 %v10669_v0 }
0x212c   :  { %9472 = vmatprep.mubr.msk.bf16.mxu1 %vm10670_vm0, %v10669_v0  ;;  %9480 = vmatprep.mubr.msk.bf16.mxu0 %vm10670_vm0, %v10669_v0 }
0x212e   :  { %9471 = vmatpush3.bf16.msra.mxu1 %v11812_v48  ;;  %9479 = vmatpush3.bf16.msra.mxu0 %v11831_v56 }
0x212f   :  { %9484 = vmatprep.subr.bf16.mxu1 %v10669_v0  ;;  %9492 = vmatprep.subr.bf16.mxu0 %v10669_v0 }
0x2131   :  { %9473 = vmatmul.mubr.msk.bf16.vlgmr.msra.gmra.mrb[172].mxu1 %vm176_vm1, %v5478_v43  ;;  %9481 = vmatmul.mubr.msk.bf16.vlgmr.msra.gmra.mrb[180].mxu0 %vm176_vm1, %v5478_v43 }
0x2132   :  { %9485 = vmatpush3.bf16.msra.mxu1 %v11723_v33  ;;  %9493 = vmatpush3.bf16.msra.mxu0 %v11746_v28 }
0x2133   :  { %9486 = vmatprep.subr.bf16.mxu1 %v10669_v0  ;;  %9494 = vmatprep.subr.bf16.mxu0 %v10669_v0 }
0x2134   :  { %9488 = vmatprep.mubr.msk.bf16.mxu1 %vm10670_vm0, %v10669_v0  ;;  %9496 = vmatprep.mubr.msk.bf16.mxu0 %vm10670_vm0, %v10669_v0 }
0x2136   :  { %9487 = vmatpush3.bf16.msra.mxu1 %v11728_v57  ;;  %9495 = vmatpush3.bf16.msra.mxu0 %v11749_v7 }
0x2137   :  { %9500 = vmatprep.subr.bf16.mxu1 %v10669_v0  ;;  %9508 = vmatprep.subr.bf16.mxu0 %v10669_v0 }
0x21e8   :  { %v5287_v33 = vpop.f32.mrb[160].mxu1  ;;  %v5337_v28 = vpop.f32.mrb[168].mxu0 }
0x21e9   :  { %v9426_v22 = vpop.f32.mrb[161].mxu1  ;;  %v9434_v60 = vpop.f32.mrb[169].mxu0  ;;  %v5344_v32 = vrot.slane %v5337_v28, 4  ;;  %v5294_v34 = vrot.slane %v5287_v33, 4 }
0x21ea   :  { %v5290_v54 = vpop.f32.mrb[162].mxu1  ;;  %v5340_v45 = vpop.f32.mrb[170].mxu0 }
0x21eb   :  { %v9427_v59 = vpop.f32.mrb[163].mxu1  ;;  %v9435_v15 = vpop.f32.mrb[171].mxu0  ;;  %v5296_v13 = vadd.f32 %v5294_v34, %v11853_v63 }
0x21ed   :  { %v8300_v35 = vmul.f32 -1.442695, %v5296_v13 }
0x21f0   :  { %v5389_v18 = vpop.f32.mrb[164].mxu1  ;;  %v5436_v50 = vpop.f32.mrb[172].mxu0 }
0x21f1   :  { %v5396_v48 = vrot.slane %v5389_v18, 4  ;;  %v9442_v51 = vpop.f32.mrb[165].mxu1  ;;  %v9450_v56 = vpop.f32.mrb[173].mxu0  ;;  %v5443_v52 = vrot.slane %v5436_v50, 4 }
0x21f2   :  { %v5392_v57 = vpop.f32.mrb[166].mxu1  ;;  %v5439_v12 = vpop.f32.mrb[174].mxu0  ;;  %v5455_v56 = vrot.slane %v11957_v38, 6 }
0x21f3   :  { %v9451_v7 = vpop.f32.mrb[175].mxu0  ;;  %5397 = vrot.lane.b32.xlu0 %v5396_v48, %s10664_s6  ;;  %v9443_v5 = vpop.f32.mrb[167].mxu1 }
0x21fc   :  { %v5516_v10 = vpop.f32.mrb[168].mxu1  ;;  %v5566_v39 = vpop.f32.mrb[176].mxu0 }
0x21fd   :  { %v9458_v17 = vpop.f32.mrb[169].mxu1  ;;  %v9466_v24 = vpop.f32.mrb[177].mxu0  ;;  %v5573_v21 = vrot.slane %v5566_v39, 6  ;;  %v5523_v49 = vrot.slane %v5516_v10, 6 }
0x21fe   :  { %v5519_v23 = vpop.f32.mrb[170].mxu1  ;;  %v5569_v42 = vpop.f32.mrb[178].mxu0  ;;  %v5684_v24 = vrot.slane %v11962_v29, 2 }
0x21ff   :  { %v9459_v37 = vpop.f32.mrb[171].mxu1  ;;  %v9467_v44 = vpop.f32.mrb[179].mxu0  ;;  %v5525_v47 = vadd.f32 %v5523_v49, %v11857_v20  ;;  %v12061_v49 = vld [vmem:[#allocation14 + $0x30] sm:$0xff]  }
0x2201   :  { %v8307_v30 = vmul.f32 -1.442695, %v5525_v47  ;;  %v12073_v47 = vld [vmem:[#allocation14 + $0x38] sm:$0xff]  }
0x2204   :  { %v5618_v1 = vpop.f32.mrb[172].mxu1  ;;  %v5665_v46 = vpop.f32.mrb[180].mxu0 }
0x2205   :  { %v5625_v16 = vrot.slane %v5618_v1, 6  ;;  %v9474_v53 = vpop.f32.mrb[173].mxu1  ;;  %v9482_v4 = vpop.f32.mrb[181].mxu0  ;;  %v5672_v22 = vrot.slane %v5665_v46, 6 }
0x2206   :  { %v5621_v61 = vpop.f32.mrb[174].mxu1  ;;  %v5668_v27 = vpop.f32.mrb[182].mxu0 }
0x2207   :  { %v9483_v6 = vpop.f32.mrb[183].mxu0  ;;  %5626 = vrot.lane.b32.xlu1 %v5625_v16, %s10664_s6  ;;  %v9475_v40 = vpop.f32.mrb[175].mxu1 }
0x2265   :  { %v5398_v2 = vpop.permute.xlu0 %5397 }
0x2266   :  { %v5400_v25 = vadd.f32 %v5398_v2, %v11853_v63 }
0x2268   :  { %10216 = vtanh.f32 %v5400_v25 }
0x2272   :  { %v10217_v26 = vpop.eup %10216 }
0x2273   :  { %5459 = vrot.lane.b32.xlu0 %v10217_v26, %s10664_s6 }
0x2277   :  { %5345 = vrot.lane.b32.xlu0 %v5344_v32, %s10672_s2 }
0x2279   :  { %v5627_v41 = vpop.permute.xlu1 %5626 }
0x227a   :  { %v5629_v31 = vadd.f32 %v5627_v41, %v11857_v20 }
0x227c   :  { %10218 = vtanh.f32 %v5629_v31 }
0x227d   :  { %10220 = vpow2.f32 %v8300_v35  ;;  %v12058_v35 = vld [vmem:[#allocation14 + $0x20] sm:$0xff]  }
0x2286   :  { %v10219_v14 = vpop.eup %10218 }
0x2287   :  { %5688 = vrot.lane.b32.xlu1 %v10219_v14, %s10664_s6  ;;  %v10221_v19 = vpop.eup %10220 }
0x2288   :  { %v5300_v55 = vadd.f32 1.0, %v10221_v19  ;;  %v12070_v19 = vld [vmem:[#allocation14 + $0x28] sm:$0xff]  }
0x228a   :  { %10222 = vrcp.f32 %v5300_v55  ;;  %v12080_v55 = vld [vmem:[#allocation14 + $0x40] sm:$0xff]  }
0x228b   :  { %5574 = vrot.lane.b32.xlu1 %v5573_v21, %s10672_s2  ;;  %10224 = vpow2.f32 %v8307_v30  ;;  %v12083_v30 = vld [vmem:[#allocation14 + $0x50] sm:$0xff]  }
0x2294   :  { %v10223_v9 = vpop.eup %10222 }
0x2295   :  { %v10225_v58 = vpop.eup %10224 }
0x2296   :  { %v5529_v11 = vadd.f32 1.0, %v10225_v58  ;;  %v12102_v58 = vld [vmem:[#allocation14 + $0x60] sm:$0xff]  }
0x2298   :  { %10226 = vrcp.f32 %v5529_v11  ;;  %v12114_v11 = vld [vmem:[#allocation14 + $0x68] sm:$0xff]  }
0x22a2   :  { %v10227_v43 = vpop.eup %10226 }
0x22e5   :  { %v5460_v3 = vpop.permute.xlu0 %5459 }
0x22e6   :  { %v5462_v8 = vmul.f32 %v10223_v9, %v5460_v3  ;;  %v12092_v9 = vld [vmem:[#allocation14 + $0x48] sm:$0xff]   ;;  %v12095_v3 = vld [vmem:[#allocation14 + $0x58] sm:$0xff]  }
0x22e8   :  { %5464 = vrot.lane.b32.xlu0 %v5462_v8, %s10672_s2 }
0x22e9   :  { %v5346_v60 = vpop.permute.xlu0 %5345 }
0x22ea   :  { %v5348_v54 = vadd.f32 %v5346_v60, %v11853_v63  ;;  %v12139_v60 = vld [vmem:[#allocation14 + $0x18] sm:$0xff]  }
0x22ec   :  { %5444 = vrot.lane.b32.xlu0 %v5443_v52, %s10673_s15  ;;  %v8302_v45 = vmul.f32 -1.442695, %v5348_v54  ;;  %v12105_v52 = vld [vmem:[#allocation14 + $0x70] sm:$0xff]  }
0x22ee   :  { %10228 = vpow2.f32 %v8302_v45 }
0x22f8   :  { %v10229_v15 = vpop.eup %10228 }
0x22f9   :  { %v5689_v33 = vpop.permute.xlu1 %5688  ;;  %v5352_v50 = vadd.f32 1.0, %v10229_v15 }
0x22fa   :  { %v5691_v28 = vmul.f32 %v10227_v43, %v5689_v33  ;;  %v12117_v43 = vld [vmem:[#allocation14 + $0x78] sm:$0xff]   ;;  %v12124_v33 = vld [vmem:[#allocation14] sm:$0xff]  }
0x22fb   :  { %10230 = vrcp.f32 %v5352_v50 }
0x22fc   :  { %5693 = vrot.lane.b32.xlu1 %v5691_v28, %s10672_s2  ;;  %v12127_v28 = vld [vmem:[#allocation14 + $0x10] sm:$0xff]  }
0x22fd   :  { %v5575_v59 = vpop.permute.xlu1 %5574 }
0x22fe   :  { %v5577_v18 = vadd.f32 %v5575_v59, %v11857_v20 }
0x2300   :  { %5673 = vrot.lane.b32.xlu1 %v5672_v22, %s10673_s15  ;;  %v8309_v48 = vmul.f32 -1.442695, %v5577_v18  ;;  %v12136_v22 = vld [vmem:[#allocation14 + $0x8] sm:$0xff]  }
0x2302   :  { %10232 = vpow2.f32 %v8309_v48 }
0x2305   :  { %v10231_v51 = vpop.eup %10230 }
0x2306   :  { %v5457_v12 = vmul.f32 %v10231_v51, %v5455_v56 }
0x230c   :  { %v10233_v57 = vpop.eup %10232 }
0x230d   :  { %v5581_v10 = vadd.f32 1.0, %v10233_v57 }
0x235a   :  { %v5465_v7 = vpop.permute.xlu0 %5464 }
0x235b   :  { %v12043_v5 = vadd.f32 %v5465_v7, %v5457_v12 }
0x235d   :  { %10234 = vtanh.f32 %v12043_v5 }
0x235e   :  { %10236 = vrcp.f32 %v5581_v10  ;;  %v5445_v44 = vpop.permute.xlu0 %5444 }
0x235f   :  { %v5447_v1 = vadd.f32 %v5445_v44, %v11853_v63 }
0x2361   :  { %v8305_v46 = vmul.f32 -1.442695, %v5447_v1 }
0x2367   :  { %v10235_v39 = vpop.eup %10234 }
0x2368   :  { %5470 = vrot.lane.b32.xlu0 %v10235_v39, %s10664_s6  ;;  %v10237_v17 = vpop.eup %10236 }
0x2369   :  { %v5686_v23 = vmul.f32 %v10237_v17, %v5684_v24 }
0x236e   :  { %v5694_v42 = vpop.permute.xlu1 %5693 }
0x236f   :  { %v12048_v37 = vadd.f32 %v5694_v42, %v5686_v23 }
0x2371   :  { %10238 = vtanh.f32 %v12048_v37 }
0x2372   :  { %10240 = vpow2.f32 %v8305_v46  ;;  %v5674_v16 = vpop.permute.xlu1 %5673 }
0x2373   :  { %v5676_v4 = vadd.f32 %v5674_v16, %v11857_v20 }
0x2375   :  { %v8312_v29 = vmul.f32 -1.442695, %v5676_v4 }
0x237b   :  { %v10239_v38 = vpop.eup %10238 }
0x237c   :  { %5699 = vrot.lane.b32.xlu1 %v10239_v38, %s10664_s6  ;;  %v10241_v53 = vpop.eup %10240 }
0x237d   :  { %v5451_v61 = vadd.f32 1.0, %v10241_v53 }
0x237f   :  { %10242 = vrcp.f32 %v5451_v61 }
0x2380   :  { %10244 = vpow2.f32 %v8312_v29 }
0x2389   :  { %v10243_v27 = vpop.eup %10242 }
0x238a   :  { %v10245_v2 = vpop.eup %10244 }
0x238b   :  { %v5680_v32 = vadd.f32 1.0, %v10245_v2 }
0x238d   :  { %10246 = vrcp.f32 %v5680_v32 }
0x2397   :  { %v10247_v41 = vpop.eup %10246 }
0x23da   :  { %v5471_v6 = vpop.permute.xlu0 %5470 }
0x23db   :  { %v5473_v40 = vmul.f32 %v10243_v27, %v5471_v6 }
0x23dd   :  { %v5703_v25 = vpack.c.bf16 %v5473_v40, %v5473_v40 }
0x23df   :  { %v5705_v26 = vrot.slane %v5703_v25, 2 }
0x23e1   :  { %5706 = vrot.lane.b32.xlu0 %v5705_v26, %s10672_s2 }
0x23ee   :  { %v5700_v31 = vpop.permute.xlu1 %5699 }
0x23ef   :  { %v5702_v14 = vmul.f32 %v10247_v41, %v5700_v31 }
0x23f1   :  { %v5932_v21 = vpack.c.bf16 %v5702_v14, %v5702_v14 }
0x23f3   :  { %v5934_v34 = vrot.slane %v5932_v21, 1 }
0x23f5   :  { %5935 = vrot.lane.b32.xlu1 %v5934_v34, %s10672_s2 }
0x2453   :  { %v5707_v13 = vpop.permute.xlu0 %5706 }
0x2454   :  { %9489 = vmatmul.mubr.msk.bf16.vlgmr.msra.gmra.mrb[176].mxu1 %vm176_vm1, %v5707_v13  ;;  %9497 = vmatmul.mubr.msk.bf16.vlgmr.msra.gmra.mrb[184].mxu0 %vm176_vm1, %v5707_v13 }
0x2455   :  { %9501 = vmatpush3.bf16.msra.mxu1 %v12058_v35  ;;  %9509 = vmatpush3.bf16.msra.mxu0 %v12061_v49 }
0x2456   :  { %9502 = vmatprep.subr.bf16.mxu1 %v10669_v0  ;;  %9510 = vmatprep.subr.bf16.mxu0 %v10669_v0 }
0x2457   :  { %9504 = vmatprep.mubr.msk.bf16.mxu1 %vm10670_vm0, %v10669_v0  ;;  %9512 = vmatprep.mubr.msk.bf16.mxu0 %vm10670_vm0, %v10669_v0 }
0x2459   :  { %9503 = vmatpush3.bf16.msra.mxu1 %v12070_v19  ;;  %9511 = vmatpush3.bf16.msra.mxu0 %v12073_v47 }
0x245a   :  { %9516 = vmatprep.subr.bf16.mxu1 %v10669_v0  ;;  %9524 = vmatprep.subr.bf16.mxu0 %v10669_v0 }
0x245c   :  { %9505 = vmatmul.mubr.msk.bf16.vlgmr.msra.gmra.mrb[180].mxu1 %vm176_vm1, %v5707_v13  ;;  %9513 = vmatmul.mubr.msk.bf16.vlgmr.msra.gmra.mrb[188].mxu0 %vm176_vm1, %v5707_v13 }
0x245d   :  { %9517 = vmatpush3.bf16.msra.mxu1 %v12080_v55  ;;  %9525 = vmatpush3.bf16.msra.mxu0 %v12083_v30 }
0x245e   :  { %9518 = vmatprep.subr.bf16.mxu1 %v10669_v0  ;;  %9526 = vmatprep.subr.bf16.mxu0 %v10669_v0 }
0x245f   :  { %9520 = vmatprep.mubr.msk.bf16.mxu1 %vm10670_vm0, %v10669_v0  ;;  %9528 = vmatprep.mubr.msk.bf16.mxu0 %vm10670_vm0, %v10669_v0 }
0x2461   :  { %9519 = vmatpush3.bf16.msra.mxu1 %v12092_v9  ;;  %9527 = vmatpush3.bf16.msra.mxu0 %v12095_v3 }
0x2462   :  { %9532 = vmatprep.subr.bf16.mxu1 %v10669_v0  ;;  %9540 = vmatprep.subr.bf16.mxu0 %v10669_v0 }
0x2467   :  { %v5936_v8 = vpop.permute.xlu1 %5935 }
0x2468   :  { %9521 = vmatmul.mubr.msk.bf16.vlgmr.msra.gmra.mrb[184].mxu1 %vm176_vm1, %v5936_v8  ;;  %9529 = vmatmul.mubr.msk.bf16.vlgmr.msra.gmra.mrb[192].mxu0 %vm176_vm1, %v5936_v8 }
0x2469   :  { %9533 = vmatpush3.bf16.msra.mxu1 %v12102_v58  ;;  %9541 = vmatpush3.bf16.msra.mxu0 %v12105_v52 }
0x246a   :  { %9534 = vmatprep.subr.bf16.mxu1 %v10669_v0  ;;  %9542 = vmatprep.subr.bf16.mxu0 %v10669_v0 }
0x246b   :  { %9536 = vmatprep.mubr.msk.bf16.mxu1 %vm10670_vm0, %v10669_v0  ;;  %9544 = vmatprep.mubr.msk.bf16.mxu0 %vm10670_vm0, %v10669_v0 }
0x246d   :  { %9535 = vmatpush3.bf16.msra.mxu1 %v12114_v11  ;;  %9543 = vmatpush3.bf16.msra.mxu0 %v12117_v43 }
0x246e   :  { %9548 = vmatprep.subr.bf16.mxu1 %v10669_v0  ;;  %9556 = vmatprep.subr.bf16.mxu0 %v10669_v0 }
0x2470   :  { %9537 = vmatmul.mubr.msk.bf16.vlgmr.msra.gmra.mrb[188].mxu1 %vm176_vm1, %v5936_v8  ;;  %9545 = vmatmul.mubr.msk.bf16.vlgmr.msra.gmra.mrb[196].mxu0 %vm176_vm1, %v5936_v8 }
0x2471   :  { %9549 = vmatpush3.bf16.msra.mxu1 %v12124_v33  ;;  %9557 = vmatpush3.bf16.msra.mxu0 %v12127_v28 }
0x2472   :  { %9550 = vmatprep.subr.bf16.mxu1 %v10669_v0  ;;  %9558 = vmatprep.subr.bf16.mxu0 %v10669_v0 }
0x2473   :  { %9552 = vmatprep.mubr.msk.bf16.mxu1 %vm10670_vm0, %v10669_v0  ;;  %9560 = vmatprep.mubr.msk.bf16.mxu0 %vm10670_vm0, %v10669_v0 }
0x2475   :  { %9551 = vmatpush3.bf16.msra.mxu1 %v12136_v22  ;;  %9559 = vmatpush3.bf16.msra.mxu0 %v12139_v60 }
0x2476   :  { %9564 = vmatprep.subr.bf16.mxu1 %v10669_v0  ;;  %9572 = vmatprep.subr.bf16.mxu0 %v10669_v0 }
0x2527   :  { %v5745_v54 = vpop.f32.mrb[176].mxu1  ;;  %v5795_v45 = vpop.f32.mrb[184].mxu0 }
0x2528   :  { %v9490_v59 = vpop.f32.mrb[177].mxu1  ;;  %v9498_v15 = vpop.f32.mrb[185].mxu0  ;;  %v5802_v14 = vrot.slane %v5795_v45, 2  ;;  %v5752_v8 = vrot.slane %v5745_v54, 2 }
0x2529   :  { %v5748_v18 = vpop.f32.mrb[178].mxu1  ;;  %v5798_v50 = vpop.f32.mrb[186].mxu0 }
0x252a   :  { %v9491_v48 = vpop.f32.mrb[179].mxu1  ;;  %v9499_v51 = vpop.f32.mrb[187].mxu0  ;;  %v5754_v59 = vadd.f32 %v5752_v8, %v11853_v63 }
0x252c   :  { %v8314_v15 = vmul.f32 -1.442695, %v5754_v59 }
0x252f   :  { %v5847_v56 = vpop.f32.mrb[180].mxu1  ;;  %v5894_v57 = vpop.f32.mrb[188].mxu0 }
0x2530   :  { %v5854_v12 = vrot.slane %v5847_v56, 2  ;;  %v9506_v7 = vpop.f32.mrb[181].mxu1  ;;  %v9514_v10 = vpop.f32.mrb[189].mxu0 }
0x2531   :  { %v5850_v39 = vpop.f32.mrb[182].mxu1  ;;  %v5897_v17 = vpop.f32.mrb[190].mxu0 }
0x2532   :  { %v9515_v24 = vpop.f32.mrb[191].mxu0  ;;  %5855 = vrot.lane.b32.xlu0 %v5854_v12, %s10664_s6  ;;  %v9507_v23 = vpop.f32.mrb[183].mxu1  ;;  %v5901_v39 = vrot.slane %v5894_v57, 2 }
0x253b   :  { %v5974_v42 = vpop.f32.mrb[184].mxu1  ;;  %v6021_v38 = vpop.f32.mrb[192].mxu0 }
0x253c   :  { %v9522_v44 = vpop.f32.mrb[185].mxu1  ;;  %v9530_v1 = vpop.f32.mrb[193].mxu0  ;;  %v5980_v50 = vadd.f32 %v5974_v42, %v11857_v20 }
0x253d   :  { %v5977_v46 = vpop.f32.mrb[186].mxu1  ;;  %v6024_v16 = vpop.f32.mrb[194].mxu0 }
0x253e   :  { %v9523_v53 = vpop.f32.mrb[187].mxu1  ;;  %v9531_v4 = vpop.f32.mrb[195].mxu0  ;;  %v8321_v48 = vmul.f32 -1.442695, %v5980_v50 }
0x2543   :  { %v6072_v61 = vpop.f32.mrb[188].mxu1  ;;  %v6118_v29 = vpop.f32.mrb[196].mxu0 }
0x2544   :  { %v9546_v27 = vpop.f32.mrb[197].mxu0  ;;  %6079 = vrot.lane.b32.xlu1 %v6072_v61, %s10664_s6  ;;  %v9538_v6 = vpop.f32.mrb[189].mxu1  ;;  %v5913_v61 = vrot.slane %v12043_v5, 6 }
0x2545   :  { %v6075_v40 = vpop.f32.mrb[190].mxu1  ;;  %v6121_v2 = vpop.f32.mrb[198].mxu0 }
0x2546   :  { %v9539_v25 = vpop.f32.mrb[191].mxu1  ;;  %v9547_v26 = vpop.f32.mrb[199].mxu0 }
0x2547   :  { %v6136_v26 = vrot.slane %v12048_v37, 2 }
0x25a4   :  { %v5856_v32 = vpop.permute.xlu0 %5855 }
0x25a5   :  { %v5858_v41 = vadd.f32 %v5856_v32, %v11853_v63 }
0x25a7   :  { %10248 = vtanh.f32 %v5858_v41 }
0x25b1   :  { %v10249_v31 = vpop.eup %10248 }
0x25b2   :  { %5917 = vrot.lane.b32.xlu0 %v10249_v31, %s10664_s6 }
0x25b6   :  { %5803 = vrot.lane.b32.xlu0 %v5802_v14, %s10672_s2  ;;  %v6080_v21 = vpop.permute.xlu1 %6079 }
0x25b7   :  { %v6082_v34 = vadd.f32 %v6080_v21, %v11857_v20 }
0x25b9   :  { %10250 = vtanh.f32 %v6082_v34 }
0x25ba   :  { %10252 = vpow2.f32 %v8314_v15 }
0x25c3   :  { %v10251_v13 = vpop.eup %10250 }
0x25c4   :  { %6140 = vrot.lane.b32.xlu1 %v10251_v13, %s10664_s6  ;;  %v10253_v18 = vpop.eup %10252 }
0x25c5   :  { %v5758_v45 = vadd.f32 1.0, %v10253_v18 }
0x25c7   :  { %10254 = vrcp.f32 %v5758_v45 }
0x25c8   :  { %6028 = vrot.lane.b32.xlu1 %v6021_v38, %s10672_s2  ;;  %10256 = vpow2.f32 %v8321_v48 }
0x25d1   :  { %v10255_v51 = vpop.eup %10254 }
0x25d2   :  { %v10257_v12 = vpop.eup %10256 }
0x25d3   :  { %v5984_v10 = vadd.f32 1.0, %v10257_v12 }
0x25d5   :  { %10258 = vrcp.f32 %v5984_v10 }
0x25df   :  { %v10259_v54 = vpop.eup %10258 }
0x2624   :  { %v5918_v56 = vpop.permute.xlu0 %5917 }
0x2625   :  { %v5920_v7 = vmul.f32 %v10255_v51, %v5918_v56 }
0x2627   :  { %5922 = vrot.lane.b32.xlu0 %v5920_v7, %s10672_s2 }
0x2628   :  { %v5804_v23 = vpop.permute.xlu0 %5803 }
0x2629   :  { %v5806_v42 = vadd.f32 %v5804_v23, %v11853_v63 }
0x262b   :  { %5902 = vrot.lane.b32.xlu0 %v5901_v39, %s10673_s15  ;;  %v8316_v38 = vmul.f32 -1.442695, %v5806_v42 }
0x262d   :  { %10260 = vpow2.f32 %v8316_v38 }
0x2636   :  { %v6141_v17 = vpop.permute.xlu1 %6140 }
0x2637   :  { %v6143_v24 = vmul.f32 %v10259_v54, %v6141_v17  ;;  %v10261_v1 = vpop.eup %10260 }
0x2638   :  { %v5810_v57 = vadd.f32 1.0, %v10261_v1 }
0x2639   :  { %6145 = vrot.lane.b32.xlu1 %v6143_v24, %s10672_s2 }
0x263a   :  { %v6029_v44 = vpop.permute.xlu1 %6028  ;;  %10262 = vrcp.f32 %v5810_v57 }
0x263b   :  { %v6031_v46 = vadd.f32 %v6029_v44, %v11857_v20 }
0x263d   :  { %6125 = vrot.lane.b32.xlu1 %v6118_v29, %s10673_s15  ;;  %v8323_v16 = vmul.f32 -1.442695, %v6031_v46 }
0x263f   :  { %10264 = vpow2.f32 %v8323_v16 }
0x2644   :  { %v10263_v53 = vpop.eup %10262 }
0x2645   :  { %v5915_v27 = vmul.f32 %v10263_v53, %v5913_v61 }
0x2649   :  { %v10265_v4 = vpop.eup %10264 }
0x264a   :  { %v6035_v6 = vadd.f32 1.0, %v10265_v4 }
0x2699   :  { %v5923_v29 = vpop.permute.xlu0 %5922 }
0x269a   :  { %v12161_v40 = vadd.f32 %v5923_v29, %v5915_v27 }
0x269c   :  { %10266 = vtanh.f32 %v12161_v40 }
0x269d   :  { %10268 = vrcp.f32 %v6035_v6  ;;  %v5903_v14 = vpop.permute.xlu0 %5902 }
0x269e   :  { %v5905_v21 = vadd.f32 %v5903_v14, %v11853_v63 }
0x26a0   :  { %v8319_v34 = vmul.f32 -1.442695, %v5905_v21 }
0x26a6   :  { %v10267_v2 = vpop.eup %10266 }
0x26a7   :  { %v10269_v25 = vpop.eup %10268  ;;  %5928 = vrot.lane.b32.xlu0 %v10267_v2, %s10664_s6 }
0x26a8   :  { %v6138_v32 = vmul.f32 %v10269_v25, %v6136_v26 }
0x26ab   :  { %v6146_v41 = vpop.permute.xlu1 %6145 }
0x26ac   :  { %v12166_v31 = vadd.f32 %v6146_v41, %v6138_v32 }
0x26ae   :  { %10270 = vtanh.f32 %v12166_v31 }
0x26af   :  { %10272 = vpow2.f32 %v8319_v34  ;;  %v6126_v13 = vpop.permute.xlu1 %6125 }
0x26b0   :  { %v6128_v59 = vadd.f32 %v6126_v13, %v11857_v20 }
0x26b2   :  { %v8326_v37 = vmul.f32 -1.442695, %v6128_v59 }
0x26b8   :  { %v10271_v5 = vpop.eup %10270 }
0x26b9   :  { %6151 = vrot.lane.b32.xlu1 %v10271_v5, %s10664_s6  ;;  %v10273_v8 = vpop.eup %10272 }
0x26ba   :  { %v5909_v15 = vadd.f32 1.0, %v10273_v8 }
0x26bc   :  { %10274 = vrcp.f32 %v5909_v15 }
0x26bd   :  { %10276 = vpow2.f32 %v8326_v37 }
0x26c6   :  { %v10275_v18 = vpop.eup %10274 }
0x26c7   :  { %v10277_v45 = vpop.eup %10276 }
0x26c8   :  { %v6132_v56 = vadd.f32 1.0, %v10277_v45 }
0x26ca   :  { %10278 = vrcp.f32 %v6132_v56 }
0x26d4   :  { %v10279_v63 = vpop.eup %10278 }
0x2719   :  { %v5929_v50 = vpop.permute.xlu0 %5928 }
0x271a   :  { %v5931_v48 = vmul.f32 %v10275_v18, %v5929_v50 }
0x271c   :  { %v6155_v51 = vpack.c.bf16 %v5931_v48, %v5931_v48 }
0x271e   :  { %v6157_v12 = vrot.slane %v6155_v51, 3 }
0x2720   :  { %6158 = vrot.lane.b32.xlu0 %v6157_v12, %s10672_s2 }
0x272b   :  { %v6152_v7 = vpop.permute.xlu1 %6151 }
0x272c   :  { %v6154_v10 = vmul.f32 %v10279_v63, %v6152_v7 }
0x272e   :  { %v6378_v39 = vpack.c.bf16 %v6154_v10, %v6154_v10 }
0x2730   :  { %6380 = vrot.lane.b32.xlu1 %v6378_v39, %s10672_s2 }
0x2792   :  { %v6159_v20 = vpop.permute.xlu0 %6158 }
0x2793   :  { %9553 = vmatmul.mubr.msk.bf16.vlgmr.msra.gmra.mrb[192].mxu1 %vm176_vm1, %v6159_v20  ;;  %9561 = vmatmul.mubr.msk.bf16.vlgmr.msra.gmra.mrb[200].mxu0 %vm176_vm1, %v6159_v20 }
0x2794   :  { %9565 = vmatpush3.bf16.msra.mxu1 %v12058_v35  ;;  %9573 = vmatpush3.bf16.msra.mxu0 %v12061_v49 }
0x2795   :  { %9566 = vmatprep.subr.bf16.mxu1 %v10669_v0  ;;  %9574 = vmatprep.subr.bf16.mxu0 %v10669_v0 }
0x2796   :  { %9568 = vmatprep.mubr.msk.bf16.mxu1 %vm10670_vm0, %v10669_v0  ;;  %9576 = vmatprep.mubr.msk.bf16.mxu0 %vm10670_vm0, %v10669_v0 }
0x2798   :  { %9567 = vmatpush3.bf16.msra.mxu1 %v12070_v19  ;;  %9575 = vmatpush3.bf16.msra.mxu0 %v12073_v47 }
0x2799   :  { %9580 = vmatprep.subr.bf16.mxu1 %v10669_v0  ;;  %9588 = vmatprep.subr.bf16.mxu0 %v10669_v0 }
0x279b   :  { %9569 = vmatmul.mubr.msk.bf16.vlgmr.msra.gmra.mrb[196].mxu1 %vm176_vm1, %v6159_v20  ;;  %9577 = vmatmul.mubr.msk.bf16.vlgmr.msra.gmra.mrb[204].mxu0 %vm176_vm1, %v6159_v20 }
0x279c   :  { %9581 = vmatpush3.bf16.msra.mxu1 %v12080_v55  ;;  %9589 = vmatpush3.bf16.msra.mxu0 %v12083_v30 }
0x279d   :  { %9582 = vmatprep.subr.bf16.mxu1 %v10669_v0  ;;  %9590 = vmatprep.subr.bf16.mxu0 %v10669_v0 }
0x279e   :  { %9584 = vmatprep.mubr.msk.bf16.mxu1 %vm10670_vm0, %v10669_v0  ;;  %9592 = vmatprep.mubr.msk.bf16.mxu0 %vm10670_vm0, %v10669_v0 }
0x27a0   :  { %9583 = vmatpush3.bf16.msra.mxu1 %v12092_v9  ;;  %9591 = vmatpush3.bf16.msra.mxu0 %v12095_v3 }
0x27a1   :  { %9596 = vmatprep.subr.bf16.mxu1 %v10669_v0  ;;  %9604 = vmatprep.subr.bf16.mxu0 %v10669_v0 }
0x27a2   :  { %v6381_v54 = vpop.permute.xlu1 %6380 }
0x27a3   :  { %9585 = vmatmul.mubr.msk.bf16.vlgmr.msra.gmra.mrb[200].mxu1 %vm176_vm1, %v6381_v54  ;;  %9593 = vmatmul.mubr.msk.bf16.vlgmr.msra.gmra.mrb[208].mxu0 %vm176_vm1, %v6381_v54 }
0x27a4   :  { %9597 = vmatpush3.bf16.msra.mxu1 %v12102_v58  ;;  %9605 = vmatpush3.bf16.msra.mxu0 %v12105_v52 }
0x27a5   :  { %9598 = vmatprep.subr.bf16.mxu1 %v10669_v0  ;;  %9606 = vmatprep.subr.bf16.mxu0 %v10669_v0 }
0x27a6   :  { %9600 = vmatprep.mubr.msk.bf16.mxu1 %vm10670_vm0, %v10669_v0  ;;  %9608 = vmatprep.mubr.msk.bf16.mxu0 %vm10670_vm0, %v10669_v0 }
0x27a8   :  { %9599 = vmatpush3.bf16.msra.mxu1 %v12114_v11  ;;  %9607 = vmatpush3.bf16.msra.mxu0 %v12117_v43 }
0x27a9   :  { %9612 = vmatprep.subr.bf16.mxu1 %v10669_v0  ;;  %9620 = vmatprep.subr.bf16.mxu0 %v10669_v0 }
0x27ab   :  { %9601 = vmatmul.mubr.msk.bf16.vlgmr.msra.gmra.mrb[204].mxu1 %vm176_vm1, %v6381_v54  ;;  %9609 = vmatmul.mubr.msk.bf16.vlgmr.msra.gmra.mrb[212].mxu0 %vm176_vm1, %v6381_v54 }
0x27ac   :  { %9613 = vmatpush3.bf16.msra.mxu1 %v12124_v33  ;;  %9621 = vmatpush3.bf16.msra.mxu0 %v12127_v28 }
0x27ad   :  { %9614 = vmatprep.subr.bf16.mxu1 %v10669_v0  ;;  %9622 = vmatprep.subr.bf16.mxu0 %v10669_v0 }
0x27ae   :  { %9616 = vmatprep.mubr.msk.bf16.mxu1 %vm10670_vm0, %v10669_v0  ;;  %9624 = vmatprep.mubr.msk.bf16.mxu0 %vm10670_vm0, %v10669_v0 }
0x27b0   :  { %9615 = vmatpush3.bf16.msra.mxu1 %v12136_v22  ;;  %9623 = vmatpush3.bf16.msra.mxu0 %v12139_v60 }
0x27b1   :  { %9628 = vmatprep.subr.bf16.mxu1 %v10669_v0  ;;  %9636 = vmatprep.subr.bf16.mxu0 %v10669_v0 }
0x2866   :  { %v6197_v17 = vpop.f32.mrb[192].mxu1  ;;  %v6244_v24 = vpop.f32.mrb[200].mxu0 }
0x2867   :  { %v9554_v23 = vpop.f32.mrb[193].mxu1  ;;  %v9562_v42 = vpop.f32.mrb[201].mxu0  ;;  %v6203_v39 = vadd.f32 %v6197_v17, %v11849_v36 }
0x2868   :  { %v6200_v38 = vpop.f32.mrb[194].mxu1  ;;  %v6247_v44 = vpop.f32.mrb[202].mxu0 }
0x2869   :  { %v9555_v1 = vpop.f32.mrb[195].mxu1  ;;  %v9563_v46 = vpop.f32.mrb[203].mxu0  ;;  %v8328_v20 = vmul.f32 -1.442695, %v6203_v39 }
0x286e   :  { %v6295_v57 = vpop.f32.mrb[196].mxu1  ;;  %v6341_v16 = vpop.f32.mrb[204].mxu0 }
0x286f   :  { %v9578_v53 = vpop.f32.mrb[205].mxu0  ;;  %6302 = vrot.lane.b32.xlu0 %v6295_v57, %s10664_s6  ;;  %v9570_v4 = vpop.f32.mrb[197].mxu1 }
0x2870   :  { %v6298_v61 = vpop.f32.mrb[198].mxu1  ;;  %v6344_v27 = vpop.f32.mrb[206].mxu0 }
0x2871   :  { %v9571_v6 = vpop.f32.mrb[199].mxu1  ;;  %v9579_v29 = vpop.f32.mrb[207].mxu0 }
0x2876   :  { %v6419_v2 = vpop.f32.mrb[200].mxu1  ;;  %v6469_v25 = vpop.f32.mrb[208].mxu0 }
0x2877   :  { %v9586_v26 = vpop.f32.mrb[201].mxu1  ;;  %v9594_v32 = vpop.f32.mrb[209].mxu0  ;;  %v6476_v10 = vrot.slane %v6469_v25, 2  ;;  %v6426_v54 = vrot.slane %v6419_v2, 2 }
0x2878   :  { %v6422_v41 = vpop.f32.mrb[202].mxu1  ;;  %v6472_v5 = vpop.f32.mrb[210].mxu0 }
0x2879   :  { %v9587_v14 = vpop.f32.mrb[203].mxu1  ;;  %v9595_v21 = vpop.f32.mrb[211].mxu0  ;;  %v6428_v42 = vadd.f32 %v6426_v54, %v11847_v62 }
0x287a   :  { %v6359_v21 = vrot.slane %v12161_v40, 6 }
0x287e   :  { %v6521_v34 = vpop.f32.mrb[204].mxu1  ;;  %v6568_v13 = vpop.f32.mrb[212].mxu0 }
0x287f   :  { %v6528_v8 = vrot.slane %v6521_v34, 2  ;;  %v9602_v59 = vpop.f32.mrb[205].mxu1  ;;  %v9610_v15 = vpop.f32.mrb[213].mxu0  ;;  %v6575_v27 = vrot.slane %v6568_v13, 2 }
0x2880   :  { %v6524_v37 = vpop.f32.mrb[206].mxu1  ;;  %v6571_v18 = vpop.f32.mrb[214].mxu0 }
0x2881   :  { %v9611_v50 = vpop.f32.mrb[215].mxu0  ;;  %6529 = vrot.lane.b32.xlu1 %v6528_v8, %s10664_s6  ;;  %v9603_v45 = vpop.f32.mrb[207].mxu1  ;;  %v6587_v18 = vrot.slane %v12166_v31, 2 }
0x28e1   :  { %v6303_v48 = vpop.permute.xlu0 %6302 }
0x28e2   :  { %v6305_v51 = vadd.f32 %v6303_v48, %v11849_v36 }
0x28e4   :  { %10280 = vtanh.f32 %v6305_v51 }
0x28ee   :  { %v10281_v56 = vpop.eup %10280 }
0x28ef   :  { %6363 = vrot.lane.b32.xlu0 %v10281_v56, %s10664_s6 }
0x28f3   :  { %6251 = vrot.lane.b32.xlu0 %v6244_v24, %s10672_s2  ;;  %v6530_v12 = vpop.permute.xlu1 %6529  ;;  %v8335_v24 = vmul.f32 -1.442695, %v6428_v42 }
0x28f4   :  { %v6532_v63 = vadd.f32 %v6530_v12, %v11847_v62 }
0x28f6   :  { %10282 = vtanh.f32 %v6532_v63 }
0x28f7   :  { %10284 = vpow2.f32 %v8328_v20 }
0x2900   :  { %v10283_v7 = vpop.eup %10282 }
0x2901   :  { %6591 = vrot.lane.b32.xlu1 %v10283_v7, %s10664_s6  ;;  %v10285_v23 = vpop.eup %10284 }
0x2902   :  { %v6207_v38 = vadd.f32 1.0, %v10285_v23 }
0x2904   :  { %10286 = vrcp.f32 %v6207_v38 }
0x2905   :  { %6477 = vrot.lane.b32.xlu1 %v6476_v10, %s10672_s2  ;;  %10288 = vpow2.f32 %v8335_v24 }
0x290e   :  { %v10287_v44 = vpop.eup %10286 }
0x290f   :  { %v10289_v46 = vpop.eup %10288 }
0x2910   :  { %v6432_v53 = vadd.f32 1.0, %v10289_v46 }
0x2912   :  { %10290 = vrcp.f32 %v6432_v53 }
0x291c   :  { %v10291_v17 = vpop.eup %10290 }
0x2961   :  { %v6364_v1 = vpop.permute.xlu0 %6363 }
0x2962   :  { %v6366_v57 = vmul.f32 %v10287_v44, %v6364_v1 }
0x2964   :  { %6368 = vrot.lane.b32.xlu0 %v6366_v57, %s10672_s2 }
0x2965   :  { %v6252_v6 = vpop.permute.xlu0 %6251 }
0x2966   :  { %v6254_v29 = vadd.f32 %v6252_v6, %v11849_v36 }
0x2968   :  { %6348 = vrot.lane.b32.xlu0 %v6341_v16, %s10673_s15  ;;  %v8330_v2 = vmul.f32 -1.442695, %v6254_v29 }
0x296a   :  { %10292 = vpow2.f32 %v8330_v2 }
0x2973   :  { %v6592_v4 = vpop.permute.xlu1 %6591 }
0x2974   :  { %v6594_v61 = vmul.f32 %v10291_v17, %v6592_v4  ;;  %v10293_v26 = vpop.eup %10292 }
0x2975   :  { %v6258_v41 = vadd.f32 1.0, %v10293_v26 }
0x2976   :  { %6596 = vrot.lane.b32.xlu1 %v6594_v61, %s10672_s2 }
0x2977   :  { %v6478_v25 = vpop.permute.xlu1 %6477  ;;  %10294 = vrcp.f32 %v6258_v41 }
0x2978   :  { %v6480_v32 = vadd.f32 %v6478_v25, %v11847_v62 }
0x297a   :  { %6576 = vrot.lane.b32.xlu1 %v6575_v27, %s10673_s15  ;;  %v8337_v16 = vmul.f32 -1.442695, %v6480_v32 }
0x297c   :  { %10296 = vpow2.f32 %v8337_v16 }
0x2981   :  { %v10295_v5 = vpop.eup %10294 }
0x2982   :  { %v6361_v34 = vmul.f32 %v10295_v5, %v6359_v21 }
0x2986   :  { %v10297_v14 = vpop.eup %10296 }
0x2987   :  { %v6484_v13 = vadd.f32 1.0, %v10297_v14 }
0x29d6   :  { %v6369_v8 = vpop.permute.xlu0 %6368 }
0x29d7   :  { %v12247_v59 = vadd.f32 %v6369_v8, %v6361_v34 }
0x29d9   :  { %10298 = vtanh.f32 %v12247_v59 }
0x29da   :  { %10300 = vrcp.f32 %v6484_v13  ;;  %v6349_v51 = vpop.permute.xlu0 %6348 }
0x29db   :  { %v6351_v56 = vadd.f32 %v6349_v51, %v11849_v36 }
0x29dd   :  { %v8333_v12 = vmul.f32 -1.442695, %v6351_v56 }
0x29e3   :  { %v10299_v15 = vpop.eup %10298 }
0x29e4   :  { %v10301_v37 = vpop.eup %10300  ;;  %6374 = vrot.lane.b32.xlu0 %v10299_v15, %s10664_s6 }
0x29e5   :  { %v6589_v50 = vmul.f32 %v10301_v37, %v6587_v18 }
0x29e8   :  { %v6597_v45 = vpop.permute.xlu1 %6596 }
0x29e9   :  { %v12252_v48 = vadd.f32 %v6597_v45, %v6589_v50 }
0x29eb   :  { %10302 = vtanh.f32 %v12252_v48 }
0x29ec   :  { %10304 = vpow2.f32 %v8333_v12  ;;  %v6577_v63 = vpop.permute.xlu1 %6576 }
0x29ed   :  { %v6579_v10 = vadd.f32 %v6577_v63, %v11847_v62 }
0x29ef   :  { %v8340_v31 = vmul.f32 -1.442695, %v6579_v10 }
0x29f5   :  { %v10303_v40 = vpop.eup %10302 }
0x29f6   :  { %6602 = vrot.lane.b32.xlu1 %v10303_v40, %s10664_s6  ;;  %v10305_v7 = vpop.eup %10304 }
0x29f7   :  { %v6355_v39 = vadd.f32 1.0, %v10305_v7 }
0x29f9   :  { %10306 = vrcp.f32 %v6355_v39 }
0x29fa   :  { %10308 = vpow2.f32 %v8340_v31 }
0x2a03   :  { %v10307_v20 = vpop.eup %10306 }
0x2a04   :  { %v10309_v23 = vpop.eup %10308 }
0x2a05   :  { %v6583_v24 = vadd.f32 1.0, %v10309_v23 }
0x2a07   :  { %10310 = vrcp.f32 %v6583_v24 }
0x2a11   :  { %v10311_v44 = vpop.eup %10310 }
0x2a56   :  { %v6375_v54 = vpop.permute.xlu0 %6374 }
0x2a57   :  { %v6377_v42 = vmul.f32 %v10307_v20, %v6375_v54 }
0x2a59   :  { %v6606_v38 = vpack.c.bf16 %v6377_v42, %v6377_v42 }
0x2a5b   :  { %6608 = vrot.lane.b32.xlu0 %v6606_v38, %s10672_s2 }
0x2a68   :  { %v6603_v1 = vpop.permute.xlu1 %6602 }
0x2a69   :  { %v6605_v46 = vmul.f32 %v10311_v44, %v6603_v1 }
0x2a6b   :  { %v6834_v57 = vpack.c.bf16 %v6605_v46, %v6605_v46 }
0x2a6d   :  { %v6836_v53 = vrot.slane %v6834_v57, 3 }
0x2a6f   :  { %6837 = vrot.lane.b32.xlu1 %v6836_v53, %s10672_s2 }
0x2acd   :  { %v6609_v17 = vpop.permute.xlu0 %6608 }
0x2ace   :  { %9617 = vmatmul.mubr.msk.bf16.vlgmr.msra.gmra.mrb[208].mxu1 %vm176_vm1, %v6609_v17  ;;  %9625 = vmatmul.mubr.msk.bf16.vlgmr.msra.gmra.mrb[216].mxu0 %vm176_vm1, %v6609_v17 }
0x2acf   :  { %9629 = vmatpush3.bf16.msra.mxu1 %v12058_v35  ;;  %9637 = vmatpush3.bf16.msra.mxu0 %v12061_v49 }
0x2ad0   :  { %9630 = vmatprep.subr.bf16.mxu1 %v10669_v0  ;;  %9638 = vmatprep.subr.bf16.mxu0 %v10669_v0 }
0x2ad1   :  { %9632 = vmatprep.mubr.msk.bf16.mxu1 %vm10670_vm0, %v10669_v0  ;;  %9640 = vmatprep.mubr.msk.bf16.mxu0 %vm10670_vm0, %v10669_v0 }
0x2ad3   :  { %9631 = vmatpush3.bf16.msra.mxu1 %v12070_v19  ;;  %9639 = vmatpush3.bf16.msra.mxu0 %v12073_v47 }
0x2ad4   :  { %9644 = vmatprep.subr.bf16.mxu1 %v10669_v0  ;;  %9652 = vmatprep.subr.bf16.mxu0 %v10669_v0 }
0x2ad6   :  { %9633 = vmatmul.mubr.msk.bf16.vlgmr.msra.gmra.mrb[212].mxu1 %vm176_vm1, %v6609_v17  ;;  %9641 = vmatmul.mubr.msk.bf16.vlgmr.msra.gmra.mrb[220].mxu0 %vm176_vm1, %v6609_v17 }
0x2ad7   :  { %9645 = vmatpush3.bf16.msra.mxu1 %v12080_v55  ;;  %9653 = vmatpush3.bf16.msra.mxu0 %v12083_v30 }
0x2ad8   :  { %9646 = vmatprep.subr.bf16.mxu1 %v10669_v0  ;;  %9654 = vmatprep.subr.bf16.mxu0 %v10669_v0 }
0x2ad9   :  { %9648 = vmatprep.mubr.msk.bf16.mxu1 %vm10670_vm0, %v10669_v0  ;;  %9656 = vmatprep.mubr.msk.bf16.mxu0 %vm10670_vm0, %v10669_v0 }
0x2adb   :  { %9647 = vmatpush3.bf16.msra.mxu1 %v12092_v9  ;;  %9655 = vmatpush3.bf16.msra.mxu0 %v12095_v3 }
0x2adc   :  { %9660 = vmatprep.subr.bf16.mxu1 %v10669_v0  ;;  %9668 = vmatprep.subr.bf16.mxu0 %v10669_v0 }
0x2ae1   :  { %v6838_v35 = vpop.permute.xlu1 %6837 }
0x2ae2   :  { %9649 = vmatmul.mubr.msk.bf16.vlgmr.msra.gmra.mrb[216].mxu1 %vm176_vm1, %v6838_v35  ;;  %9657 = vmatmul.mubr.msk.bf16.vlgmr.msra.gmra.mrb[224].mxu0 %vm176_vm1, %v6838_v35 }
0x2ae3   :  { %9661 = vmatpush3.bf16.msra.mxu1 %v12102_v58  ;;  %9669 = vmatpush3.bf16.msra.mxu0 %v12105_v52 }
0x2ae4   :  { %9662 = vmatprep.subr.bf16.mxu1 %v10669_v0  ;;  %9670 = vmatprep.subr.bf16.mxu0 %v10669_v0 }
0x2ae5   :  { %9664 = vmatprep.mubr.msk.bf16.mxu1 %vm10670_vm0, %v10669_v0  ;;  %9672 = vmatprep.mubr.msk.bf16.mxu0 %vm10670_vm0, %v10669_v0 }
0x2ae7   :  { %9663 = vmatpush3.bf16.msra.mxu1 %v12114_v11  ;;  %9671 = vmatpush3.bf16.msra.mxu0 %v12117_v43 }
0x2ae8   :  { %9676 = vmatprep.subr.bf16.mxu1 %v10669_v0  ;;  %9684 = vmatprep.subr.bf16.mxu0 %v10669_v0 }
0x2aea   :  { %9665 = vmatmul.mubr.msk.bf16.vlgmr.msra.gmra.mrb[220].mxu1 %vm176_vm1, %v6838_v35  ;;  %9673 = vmatmul.mubr.msk.bf16.vlgmr.msra.gmra.mrb[228].mxu0 %vm176_vm1, %v6838_v35 }
0x2aeb   :  { %9677 = vmatpush3.bf16.msra.mxu1 %v12124_v33  ;;  %9685 = vmatpush3.bf16.msra.mxu0 %v12127_v28 }
0x2aec   :  { %9678 = vmatprep.subr.bf16.mxu1 %v10669_v0  ;;  %9686 = vmatprep.subr.bf16.mxu0 %v10669_v0 }
0x2aed   :  { %9680 = vmatprep.mubr.msk.bf16.mxu1 %vm10670_vm0, %v10669_v0  ;;  %9688 = vmatprep.mubr.msk.bf16.mxu0 %vm10670_vm0, %v10669_v0 }
0x2aef   :  { %9679 = vmatpush3.bf16.msra.mxu1 %v12136_v22  ;;  %9687 = vmatpush3.bf16.msra.mxu0 %v12139_v60 }
0x2af0   :  { %9692 = vmatprep.subr.bf16.mxu1 %v10669_v0  ;;  %9700 = vmatprep.subr.bf16.mxu0 %v10669_v0 }
0x2ba1   :  { %v6647_v49 = vpop.f32.mrb[208].mxu1  ;;  %v6697_v19 = vpop.f32.mrb[216].mxu0 }
0x2ba2   :  { %v9618_v47 = vpop.f32.mrb[209].mxu1  ;;  %v9626_v55 = vpop.f32.mrb[217].mxu0  ;;  %v6704_v40 = vrot.slane %v6697_v19, 6  ;;  %v6654_v7 = vrot.slane %v6647_v49, 6 }
0x2ba3   :  { %v6650_v30 = vpop.f32.mrb[210].mxu1  ;;  %v6700_v9 = vpop.f32.mrb[218].mxu0 }
0x2ba4   :  { %v9619_v3 = vpop.f32.mrb[211].mxu1  ;;  %v9627_v58 = vpop.f32.mrb[219].mxu0  ;;  %v6656_v10 = vadd.f32 %v6654_v7, %v11849_v36  ;;  %v12348_v7 = vld [vmem:[#allocation14 + $0x20] sm:$0xff]  }
0x2ba6   :  { %v8342_v39 = vmul.f32 -1.442695, %v6656_v10  ;;  %v12351_v10 = vld [vmem:[#allocation14 + $0x30] sm:$0xff]  }
0x2ba9   :  { %v6749_v52 = vpop.f32.mrb[212].mxu1  ;;  %v6796_v11 = vpop.f32.mrb[220].mxu0 }
0x2baa   :  { %v6756_v43 = vrot.slane %v6749_v52, 6  ;;  %v9634_v33 = vpop.f32.mrb[213].mxu1  ;;  %v9642_v28 = vpop.f32.mrb[221].mxu0  ;;  %v6803_v46 = vrot.slane %v6796_v11, 6 }
0x2bab   :  { %v6752_v22 = vpop.f32.mrb[214].mxu1  ;;  %v6799_v4 = vpop.f32.mrb[222].mxu0 }
0x2bac   :  { %v9643_v60 = vpop.f32.mrb[223].mxu0  ;;  %6757 = vrot.lane.b32.xlu0 %v6756_v43, %s10664_s6  ;;  %v9635_v61 = vpop.f32.mrb[215].mxu1  ;;  %v6815_v43 = vrot.slane %v12247_v59, 6 }
0x2bb5   :  { %v6876_v27 = vpop.f32.mrb[216].mxu1  ;;  %v6926_v6 = vpop.f32.mrb[224].mxu0 }
0x2bb6   :  { %v9650_v29 = vpop.f32.mrb[217].mxu1  ;;  %v9658_v2 = vpop.f32.mrb[225].mxu0  ;;  %v6933_v63 = vrot.slane %v6926_v6, 4  ;;  %v6883_v31 = vrot.slane %v6876_v27, 4  ;;  %v7044_v6 = vrot.slane %v12252_v48, 2 }
0x2bb7   :  { %v6879_v25 = vpop.f32.mrb[218].mxu1  ;;  %v6929_v26 = vpop.f32.mrb[226].mxu0 }
0x2bb8   :  { %v9651_v32 = vpop.f32.mrb[219].mxu1  ;;  %v9659_v41 = vpop.f32.mrb[227].mxu0  ;;  %v6885_v54 = vadd.f32 %v6883_v31, %v11847_v62  ;;  %v12363_v31 = vld [vmem:[#allocation14 + $0x38] sm:$0xff]  }
0x2bba   :  { %v8349_v42 = vmul.f32 -1.442695, %v6885_v54  ;;  %v12373_v54 = vld [vmem:[#allocation14 + $0x50] sm:$0xff]  }
0x2bbd   :  { %v6978_v16 = vpop.f32.mrb[220].mxu1  ;;  %v7025_v5 = vpop.f32.mrb[228].mxu0 }
0x2bbe   :  { %v6985_v14 = vrot.slane %v6978_v16, 4  ;;  %v9666_v21 = vpop.f32.mrb[221].mxu1  ;;  %v9674_v34 = vpop.f32.mrb[229].mxu0  ;;  %v7032_v49 = vrot.slane %v7025_v5, 4 }
0x2bbf   :  { %v6981_v13 = vpop.f32.mrb[222].mxu1  ;;  %v7028_v8 = vpop.f32.mrb[230].mxu0 }
0x2bc0   :  { %v9675_v15 = vpop.f32.mrb[231].mxu0  ;;  %6986 = vrot.lane.b32.xlu1 %v6985_v14, %s10664_s6  ;;  %v9667_v37 = vpop.f32.mrb[223].mxu1 }
0x2c1e   :  { %v6758_v18 = vpop.permute.xlu0 %6757 }
0x2c1f   :  { %v6760_v50 = vadd.f32 %v6758_v18, %v11849_v36 }
0x2c21   :  { %10312 = vtanh.f32 %v6760_v50 }
0x2c2b   :  { %v10313_v45 = vpop.eup %10312 }
0x2c2c   :  { %6819 = vrot.lane.b32.xlu0 %v10313_v45, %s10664_s6 }
0x2c30   :  { %6705 = vrot.lane.b32.xlu0 %v6704_v40, %s10672_s2 }
0x2c32   :  { %v6987_v51 = vpop.permute.xlu1 %6986 }
0x2c33   :  { %v6989_v56 = vadd.f32 %v6987_v51, %v11847_v62 }
0x2c35   :  { %10314 = vtanh.f32 %v6989_v56 }
0x2c36   :  { %10316 = vpow2.f32 %v8342_v39  ;;  %v12360_v39 = vld [vmem:[#allocation14 + $0x28] sm:$0xff]  }
0x2c3f   :  { %v10315_v12 = vpop.eup %10314 }
0x2c40   :  { %7048 = vrot.lane.b32.xlu1 %v10315_v12, %s10664_s6  ;;  %v10317_v20 = vpop.eup %10316 }
0x2c41   :  { %v6660_v23 = vadd.f32 1.0, %v10317_v20  ;;  %v12370_v20 = vld [vmem:[#allocation14 + $0x40] sm:$0xff]  }
0x2c43   :  { %10318 = vrcp.f32 %v6660_v23  ;;  %v12382_v23 = vld [vmem:[#allocation14 + $0x48] sm:$0xff]  }
0x2c44   :  { %6934 = vrot.lane.b32.xlu1 %v6933_v63, %s10672_s2  ;;  %10320 = vpow2.f32 %v8349_v42  ;;  %v12385_v42 = vld [vmem:[#allocation14 + $0x58] sm:$0xff]  }
0x2c4d   :  { %v10319_v38 = vpop.eup %10318 }
0x2c4e   :  { %v10321_v1 = vpop.eup %10320 }
0x2c4f   :  { %v6889_v57 = vadd.f32 1.0, %v10321_v1  ;;  %v12404_v1 = vld [vmem:[#allocation14 + $0x68] sm:$0xff]  }
0x2c51   :  { %10322 = vrcp.f32 %v6889_v57  ;;  %v10468_v57 = vld [vmem:[#allocation14] sm:$0xff]  }
0x2c5b   :  { %v10323_v53 = vpop.eup %10322 }
0x2c9e   :  { %v6820_v24 = vpop.permute.xlu0 %6819 }
0x2c9f   :  { %v6822_v44 = vmul.f32 %v10319_v38, %v6820_v24  ;;  %v12392_v24 = vld [vmem:[#allocation14 + $0x60] sm:$0xff]  }
0x2ca1   :  { %6824 = vrot.lane.b32.xlu0 %v6822_v44, %s10672_s2  ;;  %v12395_v44 = vld [vmem:[#allocation14 + $0x70] sm:$0xff]  }
0x2ca2   :  { %v6706_v19 = vpop.permute.xlu0 %6705 }
0x2ca3   :  { %v6708_v47 = vadd.f32 %v6706_v19, %v11849_v36 }
0x2ca5   :  { %6804 = vrot.lane.b32.xlu0 %v6803_v46, %s10673_s15  ;;  %v8344_v55 = vmul.f32 -1.442695, %v6708_v47  ;;  %v12407_v46 = vld [vmem:[#allocation14 + $0x78] sm:$0xff]  }
0x2ca7   :  { %10324 = vpow2.f32 %v8344_v55 }
0x2cb1   :  { %v10325_v9 = vpop.eup %10324 }
0x2cb2   :  { %v7049_v17 = vpop.permute.xlu1 %7048  ;;  %v6712_v58 = vadd.f32 1.0, %v10325_v9 }
0x2cb3   :  { %v7051_v35 = vmul.f32 %v10323_v53, %v7049_v17  ;;  %v10469_v53 = vld [vmem:[#allocation14 + $0x10] sm:$0xff]   ;;  %v10470_v17 = vld [vmem:[#allocation14 + $0x8] sm:$0xff]  }
0x2cb4   :  { %10326 = vrcp.f32 %v6712_v58 }
0x2cb5   :  { %7053 = vrot.lane.b32.xlu1 %v7051_v35, %s10672_s2  ;;  %v10471_v35 = vld [vmem:[#allocation14 + $0x18] sm:$0xff]  }
0x2cb6   :  { %v6935_v30 = vpop.permute.xlu1 %6934 }
0x2cb7   :  { %v6937_v3 = vadd.f32 %v6935_v30, %v11847_v62 }
0x2cb9   :  { %7033 = vrot.lane.b32.xlu1 %v7032_v49, %s10673_s15  ;;  %v8351_v52 = vmul.f32 -1.442695, %v6937_v3 }
0x2cbb   :  { %10328 = vpow2.f32 %v8351_v52 }
0x2cbe   :  { %v10327_v11 = vpop.eup %10326 }
0x2cbf   :  { %v6817_v28 = vmul.f32 %v10327_v11, %v6815_v43 }
0x2cc5   :  { %v10329_v33 = vpop.eup %10328 }
0x2cc6   :  { %v6941_v60 = vadd.f32 1.0, %v10329_v33 }
0x2d13   :  { %v6825_v22 = vpop.permute.xlu0 %6824 }
0x2d14   :  { %v12333_v4 = vadd.f32 %v6825_v22, %v6817_v28 }
0x2d16   :  { %10330 = vtanh.f32 %v12333_v4 }
0x2d17   :  { %10332 = vrcp.f32 %v6941_v60  ;;  %v6805_v26 = vpop.permute.xlu0 %6804 }
0x2d18   :  { %v6807_v32 = vadd.f32 %v6805_v26, %v11849_v36 }
0x2d1a   :  { %v8347_v41 = vmul.f32 -1.442695, %v6807_v32 }
0x2d20   :  { %v10331_v61 = vpop.eup %10330 }
0x2d21   :  { %6830 = vrot.lane.b32.xlu0 %v10331_v61, %s10664_s6  ;;  %v10333_v27 = vpop.eup %10332 }
0x2d22   :  { %v7046_v29 = vmul.f32 %v10333_v27, %v7044_v6 }
0x2d27   :  { %v7054_v2 = vpop.permute.xlu1 %7053 }
0x2d28   :  { %v12338_v25 = vadd.f32 %v7054_v2, %v7046_v29 }
0x2d2a   :  { %10334 = vtanh.f32 %v12338_v25 }
0x2d2b   :  { %10336 = vpow2.f32 %v8347_v41  ;;  %v7034_v16 = vpop.permute.xlu1 %7033 }
0x2d2c   :  { %v7036_v14 = vadd.f32 %v7034_v16, %v11847_v62 }
0x2d2e   :  { %v8354_v48 = vmul.f32 -1.442695, %v7036_v14 }
0x2d34   :  { %v10335_v59 = vpop.eup %10334 }
0x2d35   :  { %7059 = vrot.lane.b32.xlu1 %v10335_v59, %s10664_s6  ;;  %v10337_v5 = vpop.eup %10336 }
0x2d36   :  { %v6811_v21 = vadd.f32 1.0, %v10337_v5 }
0x2d38   :  { %10338 = vrcp.f32 %v6811_v21 }
0x2d39   :  { %10340 = vpow2.f32 %v8354_v48 }
0x2d42   :  { %v10339_v34 = vpop.eup %10338 }
0x2d43   :  { %v10341_v15 = vpop.eup %10340 }
0x2d44   :  { %v7040_v50 = vadd.f32 1.0, %v10341_v15 }
0x2d46   :  { %10342 = vrcp.f32 %v7040_v50 }
0x2d50   :  { %v10343_v45 = vpop.eup %10342 }
0x2d93   :  { %v6831_v13 = vpop.permute.xlu0 %6830 }
0x2d94   :  { %v6833_v8 = vmul.f32 %v10339_v34, %v6831_v13 }
0x2d96   :  { %v7063_v37 = vpack.c.bf16 %v6833_v8, %v6833_v8 }
0x2d98   :  { %v7065_v18 = vrot.slane %v7063_v37, 1 }
0x2d9a   :  { %7066 = vrot.lane.b32.xlu0 %v7065_v18, %s10672_s2 }
0x2da7   :  { %v7060_v40 = vpop.permute.xlu1 %7059 }
0x2da8   :  { %v7062_v51 = vmul.f32 %v10343_v45, %v7060_v40 }
0x2daa   :  { %v7292_v56 = vpack.c.bf16 %v7062_v51, %v7062_v51 }
0x2dac   :  { %v7294_v12 = vrot.slane %v7292_v56, 2 }
0x2dae   :  { %7295 = vrot.lane.b32.xlu1 %v7294_v12, %s10672_s2 }
0x2e0c   :  { %v7067_v63 = vpop.permute.xlu0 %7066 }
0x2e0d   :  { %9681 = vmatmul.mubr.msk.bf16.vlgmr.msra.gmra.mrb[224].mxu1 %vm176_vm1, %v7067_v63  ;;  %9689 = vmatmul.mubr.msk.bf16.vlgmr.msra.gmra.mrb[232].mxu0 %vm176_vm1, %v7067_v63 }
0x2e0e   :  { %9693 = vmatpush3.bf16.msra.mxu1 %v12348_v7  ;;  %9701 = vmatpush3.bf16.msra.mxu0 %v12351_v10 }
0x2e0f   :  { %9694 = vmatprep.subr.bf16.mxu1 %v10669_v0  ;;  %9702 = vmatprep.subr.bf16.mxu0 %v10669_v0 }
0x2e10   :  { %9696 = vmatprep.mubr.msk.bf16.mxu1 %vm10670_vm0, %v10669_v0  ;;  %9704 = vmatprep.mubr.msk.bf16.mxu0 %vm10670_vm0, %v10669_v0 }
0x2e12   :  { %9695 = vmatpush3.bf16.msra.mxu1 %v12360_v39  ;;  %9703 = vmatpush3.bf16.msra.mxu0 %v12363_v31 }
0x2e13   :  { %9708 = vmatprep.subr.bf16.mxu1 %v10669_v0  ;;  %9716 = vmatprep.subr.bf16.mxu0 %v10669_v0 }
0x2e15   :  { %9697 = vmatmul.mubr.msk.bf16.vlgmr.msra.gmra.mrb[228].mxu1 %vm176_vm1, %v7067_v63  ;;  %9705 = vmatmul.mubr.msk.bf16.vlgmr.msra.gmra.mrb[236].mxu0 %vm176_vm1, %v7067_v63 }
0x2e16   :  { %9709 = vmatpush3.bf16.msra.mxu1 %v12370_v20  ;;  %9717 = vmatpush3.bf16.msra.mxu0 %v12373_v54 }
0x2e17   :  { %9710 = vmatprep.subr.bf16.mxu1 %v10669_v0  ;;  %9718 = vmatprep.subr.bf16.mxu0 %v10669_v0 }
0x2e18   :  { %9712 = vmatprep.mubr.msk.bf16.mxu1 %vm10670_vm0, %v10669_v0  ;;  %9720 = vmatprep.mubr.msk.bf16.mxu0 %vm10670_vm0, %v10669_v0 }
0x2e1a   :  { %9711 = vmatpush3.bf16.msra.mxu1 %v12382_v23  ;;  %9719 = vmatpush3.bf16.msra.mxu0 %v12385_v42 }
0x2e1b   :  { %9724 = vmatprep.subr.bf16.mxu1 %v10669_v0  ;;  %9732 = vmatprep.subr.bf16.mxu0 %v10669_v0 }
0x2e20   :  { %v7296_v38 = vpop.permute.xlu1 %7295 }
0x2e21   :  { %9713 = vmatmul.mubr.msk.bf16.vlgmr.msra.gmra.mrb[232].mxu1 %vm176_vm1, %v7296_v38  ;;  %9721 = vmatmul.mubr.msk.bf16.vlgmr.msra.gmra.mrb[240].mxu0 %vm176_vm1, %v7296_v38 }
0x2e22   :  { %9725 = vmatpush3.bf16.msra.mxu1 %v12392_v24  ;;  %9733 = vmatpush3.bf16.msra.mxu0 %v12395_v44 }
0x2e23   :  { %9726 = vmatprep.subr.bf16.mxu1 %v10669_v0  ;;  %9734 = vmatprep.subr.bf16.mxu0 %v10669_v0 }
0x2e24   :  { %9728 = vmatprep.mubr.msk.bf16.mxu1 %vm10670_vm0, %v10669_v0  ;;  %9736 = vmatprep.mubr.msk.bf16.mxu0 %vm10670_vm0, %v10669_v0 }
0x2e26   :  { %9727 = vmatpush3.bf16.msra.mxu1 %v12404_v1  ;;  %9735 = vmatpush3.bf16.msra.mxu0 %v12407_v46 }
0x2e27   :  { %9740 = vmatprep.subr.bf16.mxu1 %v10669_v0  ;;  %9748 = vmatprep.subr.bf16.mxu0 %v10669_v0 }
0x2e29   :  { %9729 = vmatmul.mubr.msk.bf16.vlgmr.msra.gmra.mrb[236].mxu1 %vm176_vm1, %v7296_v38  ;;  %9737 = vmatmul.mubr.msk.bf16.vlgmr.msra.gmra.mrb[244].mxu0 %vm176_vm1, %v7296_v38 }
0x2e2a   :  { %9741 = vmatpush3.bf16.msra.mxu1 %v10468_v57  ;;  %9749 = vmatpush3.bf16.msra.mxu0 %v10469_v53 }
0x2e2b   :  { %9742 = vmatprep.subr.bf16.mxu1 %v10669_v0  ;;  %9750 = vmatprep.subr.bf16.mxu0 %v10669_v0 }
0x2e2c   :  { %9744 = vmatprep.mubr.msk.bf16.mxu1 %vm10670_vm0, %v10669_v0  ;;  %9752 = vmatprep.mubr.msk.bf16.mxu0 %vm10670_vm0, %v10669_v0 }
0x2e2e   :  { %9743 = vmatpush3.bf16.msra.mxu1 %v10470_v17  ;;  %9751 = vmatpush3.bf16.msra.mxu0 %v10471_v35 }
0x2e2f   :  { %9756 = vmatprep.subr.bf16.mxu1 %v10669_v0  ;;  %9764 = vmatprep.subr.bf16.mxu0 %v10669_v0 }
0x2ee0   :  { %v7105_v49 = vpop.f32.mrb[224].mxu1  ;;  %v7155_v19 = vpop.f32.mrb[232].mxu0 }
0x2ee1   :  { %v9682_v47 = vpop.f32.mrb[225].mxu1  ;;  %v9690_v55 = vpop.f32.mrb[233].mxu0  ;;  %v7162_v40 = vrot.slane %v7155_v19, 4  ;;  %v7112_v38 = vrot.slane %v7105_v49, 4 }
0x2ee2   :  { %v7108_v30 = vpop.f32.mrb[226].mxu1  ;;  %v7158_v9 = vpop.f32.mrb[234].mxu0 }
0x2ee3   :  { %v9683_v3 = vpop.f32.mrb[227].mxu1  ;;  %v9691_v58 = vpop.f32.mrb[235].mxu0  ;;  %v7114_v57 = vadd.f32 %v7112_v38, %v11849_v36 }
0x2ee5   :  { %v8356_v53 = vmul.f32 -1.442695, %v7114_v57 }
0x2ee8   :  { %v7207_v52 = vpop.f32.mrb[228].mxu1  ;;  %v7254_v11 = vpop.f32.mrb[236].mxu0 }
0x2ee9   :  { %v7214_v43 = vrot.slane %v7207_v52, 4  ;;  %v9698_v33 = vpop.f32.mrb[229].mxu1  ;;  %v9706_v28 = vpop.f32.mrb[237].mxu0  ;;  %v7261_v52 = vrot.slane %v7254_v11, 4 }
0x2eea   :  { %v7210_v22 = vpop.f32.mrb[230].mxu1  ;;  %v7257_v60 = vpop.f32.mrb[238].mxu0 }
0x2eeb   :  { %v9707_v61 = vpop.f32.mrb[239].mxu0  ;;  %7215 = vrot.lane.b32.xlu0 %v7214_v43, %s10664_s6  ;;  %v9699_v27 = vpop.f32.mrb[231].mxu1 }
0x2ef4   :  { %v7334_v6 = vpop.f32.mrb[232].mxu1  ;;  %v7384_v29 = vpop.f32.mrb[240].mxu0 }
0x2ef5   :  { %v9714_v2 = vpop.f32.mrb[233].mxu1  ;;  %v9722_v59 = vpop.f32.mrb[241].mxu0  ;;  %v7391_v63 = vrot.slane %v7384_v29, 6  ;;  %v7341_v17 = vrot.slane %v7334_v6, 6 }
0x2ef6   :  { %v7337_v26 = vpop.f32.mrb[234].mxu1  ;;  %v7387_v32 = vpop.f32.mrb[242].mxu0 }
0x2ef7   :  { %v9715_v41 = vpop.f32.mrb[235].mxu1  ;;  %v9723_v16 = vpop.f32.mrb[243].mxu0  ;;  %v7343_v19 = vadd.f32 %v7341_v17, %v11847_v62  ;;  %v7273_v32 = vrot.slane %v12333_v4, 6 }
0x2ef9   :  { %v8363_v55 = vmul.f32 -1.442695, %v7343_v19 }
0x2efc   :  { %v7436_v5 = vpop.f32.mrb[236].mxu1  ;;  %v7483_v14 = vpop.f32.mrb[244].mxu0 }
0x2efd   :  { %v7443_v21 = vrot.slane %v7436_v5, 6  ;;  %v9730_v48 = vpop.f32.mrb[237].mxu1  ;;  %v9738_v34 = vpop.f32.mrb[245].mxu0  ;;  %v7490_v22 = vrot.slane %v7483_v14, 6 }
0x2efe   :  { %v7439_v13 = vpop.f32.mrb[238].mxu1  ;;  %v7486_v8 = vpop.f32.mrb[246].mxu0 }
0x2eff   :  { %v9739_v15 = vpop.f32.mrb[247].mxu0  ;;  %7444 = vrot.lane.b32.xlu1 %v7443_v21, %s10664_s6  ;;  %v9731_v37 = vpop.f32.mrb[239].mxu1  ;;  %v7502_v13 = vrot.slane %v12338_v25, 2 }
0x2f5d   :  { %v7216_v18 = vpop.permute.xlu0 %7215 }
0x2f5e   :  { %v7218_v50 = vadd.f32 %v7216_v18, %v11849_v36 }
0x2f60   :  { %10344 = vtanh.f32 %v7218_v50 }
0x2f6a   :  { %v10345_v45 = vpop.eup %10344 }
0x2f6b   :  { %7277 = vrot.lane.b32.xlu0 %v10345_v45, %s10664_s6 }
0x2f6f   :  { %7163 = vrot.lane.b32.xlu0 %v7162_v40, %s10672_s2 }
0x2f71   :  { %v7445_v51 = vpop.permute.xlu1 %7444 }
0x2f72   :  { %v7447_v56 = vadd.f32 %v7445_v51, %v11847_v62 }
0x2f74   :  { %10346 = vtanh.f32 %v7447_v56 }
0x2f75   :  { %10348 = vpow2.f32 %v8356_v53 }
0x2f7e   :  { %v10347_v12 = vpop.eup %10346 }
0x2f7f   :  { %7506 = vrot.lane.b32.xlu1 %v10347_v12, %s10664_s6  ;;  %v10349_v35 = vpop.eup %10348 }
0x2f80   :  { %v7118_v47 = vadd.f32 1.0, %v10349_v35 }
0x2f82   :  { %10350 = vrcp.f32 %v7118_v47 }
0x2f83   :  { %7392 = vrot.lane.b32.xlu1 %v7391_v63, %s10672_s2  ;;  %10352 = vpow2.f32 %v8363_v55 }
0x2f8c   :  { %v10351_v30 = vpop.eup %10350 }
0x2f8d   :  { %v10353_v58 = vpop.eup %10352 }
0x2f8e   :  { %v7347_v49 = vadd.f32 1.0, %v10353_v58 }
0x2f90   :  { %10354 = vrcp.f32 %v7347_v49 }
0x2f9a   :  { %v10355_v43 = vpop.eup %10354 }
0x2fdd   :  { %v7278_v9 = vpop.permute.xlu0 %7277 }
0x2fde   :  { %v7280_v3 = vmul.f32 %v10351_v30, %v7278_v9 }
0x2fe0   :  { %7282 = vrot.lane.b32.xlu0 %v7280_v3, %s10672_s2 }
0x2fe1   :  { %v7164_v60 = vpop.permute.xlu0 %7163 }
0x2fe2   :  { %v7166_v61 = vadd.f32 %v7164_v60, %v11849_v36 }
0x2fe4   :  { %7262 = vrot.lane.b32.xlu0 %v7261_v52, %s10673_s15  ;;  %v8358_v27 = vmul.f32 -1.442695, %v7166_v61 }
0x2fe6   :  { %10356 = vpow2.f32 %v8358_v27 }
0x2ff0   :  { %v10357_v29 = vpop.eup %10356 }
0x2ff1   :  { %v7507_v33 = vpop.permute.xlu1 %7506  ;;  %v7170_v2 = vadd.f32 1.0, %v10357_v29 }
0x2ff2   :  { %v7509_v28 = vmul.f32 %v10355_v43, %v7507_v33 }
0x2ff3   :  { %10358 = vrcp.f32 %v7170_v2 }
0x2ff4   :  { %7511 = vrot.lane.b32.xlu1 %v7509_v28, %s10672_s2 }
0x2ff5   :  { %v7393_v6 = vpop.permute.xlu1 %7392 }
0x2ff6   :  { %v7395_v11 = vadd.f32 %v7393_v6, %v11847_v62 }
0x2ff8   :  { %7491 = vrot.lane.b32.xlu1 %v7490_v22, %s10673_s15  ;;  %v8365_v59 = vmul.f32 -1.442695, %v7395_v11 }
0x2ffa   :  { %10360 = vpow2.f32 %v8365_v59 }
0x2ffd   :  { %v10359_v26 = vpop.eup %10358 }
0x2ffe   :  { %v7275_v16 = vmul.f32 %v10359_v26, %v7273_v32 }
0x3004   :  { %v10361_v41 = vpop.eup %10360 }
0x3005   :  { %v7399_v21 = vadd.f32 1.0, %v10361_v41 }
0x3052   :  { %v7283_v5 = vpop.permute.xlu0 %7282 }
0x3053   :  { %v12439_v14 = vadd.f32 %v7283_v5, %v7275_v16 }
0x3055   :  { %10362 = vtanh.f32 %v12439_v14 }
0x3056   :  { %10364 = vrcp.f32 %v7399_v21  ;;  %v7263_v18 = vpop.permute.xlu0 %7262 }
0x3057   :  { %v7265_v50 = vadd.f32 %v7263_v18, %v11849_v36 }
0x3059   :  { %v8361_v45 = vmul.f32 -1.442695, %v7265_v50 }
0x305f   :  { %v10363_v48 = vpop.eup %10362 }
0x3060   :  { %7288 = vrot.lane.b32.xlu0 %v10363_v48, %s10664_s6  ;;  %v10365_v34 = vpop.eup %10364 }
0x3061   :  { %v7504_v8 = vmul.f32 %v10365_v34, %v7502_v13 }
0x3066   :  { %v7512_v15 = vpop.permute.xlu1 %7511 }
0x3067   :  { %v12444_v37 = vadd.f32 %v7512_v15, %v7504_v8 }
0x3069   :  { %10366 = vtanh.f32 %v12444_v37 }
0x306a   :  { %10368 = vpow2.f32 %v8361_v45  ;;  %v7492_v40 = vpop.permute.xlu1 %7491 }
0x306b   :  { %v7494_v56 = vadd.f32 %v7492_v40, %v11847_v62 }
0x306d   :  { %v8368_v25 = vmul.f32 -1.442695, %v7494_v56 }
0x3073   :  { %v10367_v4 = vpop.eup %10366 }
0x3074   :  { %7517 = vrot.lane.b32.xlu1 %v10367_v4, %s10664_s6  ;;  %v10369_v51 = vpop.eup %10368 }
0x3075   :  { %v7269_v12 = vadd.f32 1.0, %v10369_v51 }
0x3077   :  { %10370 = vrcp.f32 %v7269_v12 }
0x3078   :  { %10372 = vpow2.f32 %v8368_v25 }
0x3081   :  { %v10371_v63 = vpop.eup %10370 }
0x3082   :  { %v10373_v53 = vpop.eup %10372 }
0x3083   :  { %v7498_v19 = vadd.f32 1.0, %v10373_v53 }
0x3085   :  { %10374 = vrcp.f32 %v7498_v19 }
0x308f   :  { %v10375_v47 = vpop.eup %10374 }
0x30d2   :  { %v7289_v38 = vpop.permute.xlu0 %7288 }
0x30d3   :  { %v7291_v57 = vmul.f32 %v10371_v63, %v7289_v38 }
0x30d5   :  { %v7521_v17 = vpack.c.bf16 %v7291_v57, %v7291_v57 }
0x30d7   :  { %v7523_v35 = vrot.slane %v7521_v17, 2 }
0x30d9   :  { %7524 = vrot.lane.b32.xlu0 %v7523_v35, %s10672_s2 }
0x30e6   :  { %v7518_v55 = vpop.permute.xlu1 %7517 }
0x30e7   :  { %v7520_v30 = vmul.f32 %v10375_v47, %v7518_v55 }
0x30e9   :  { %v7750_v9 = vpack.c.bf16 %v7520_v30, %v7520_v30 }
0x30eb   :  { %v7752_v3 = vrot.slane %v7750_v9, 1 }
0x30ed   :  { %7753 = vrot.lane.b32.xlu1 %v7752_v3, %s10672_s2 }
0x314b   :  { %v7525_v58 = vpop.permute.xlu0 %7524 }
0x314c   :  { %9745 = vmatmul.mubr.msk.bf16.vlgmr.msra.gmra.mrb[240].mxu1 %vm176_vm1, %v7525_v58  ;;  %9753 = vmatmul.mubr.msk.bf16.vlgmr.msra.gmra.mrb[248].mxu0 %vm176_vm1, %v7525_v58 }
0x314d   :  { %9757 = vmatpush3.bf16.msra.mxu1 %v12348_v7  ;;  %9765 = vmatpush3.bf16.msra.mxu0 %v12351_v10 }
0x314e   :  { %9758 = vmatprep.subr.bf16.mxu1 %v10669_v0  ;;  %9766 = vmatprep.subr.bf16.mxu0 %v10669_v0 }
0x314f   :  { %9760 = vmatprep.mubr.msk.bf16.mxu1 %vm10670_vm0, %v10669_v0  ;;  %9768 = vmatprep.mubr.msk.bf16.mxu0 %vm10670_vm0, %v10669_v0 }
0x3151   :  { %9759 = vmatpush3.bf16.msra.mxu1 %v12360_v39  ;;  %9767 = vmatpush3.bf16.msra.mxu0 %v12363_v31 }
0x3152   :  { %9772 = vmatprep.subr.bf16.mxu1 %v10669_v0  ;;  %9780 = vmatprep.subr.bf16.mxu0 %v10669_v0 }
0x3154   :  { %9761 = vmatmul.mubr.msk.bf16.vlgmr.msra.gmra.mrb[244].mxu1 %vm176_vm1, %v7525_v58  ;;  %9769 = vmatmul.mubr.msk.bf16.vlgmr.msra.gmra.mrb[252].mxu0 %vm176_vm1, %v7525_v58 }
0x3155   :  { %9773 = vmatpush3.bf16.msra.mxu1 %v12370_v20  ;;  %9781 = vmatpush3.bf16.msra.mxu0 %v12373_v54 }
0x3156   :  { %9774 = vmatprep.subr.bf16.mxu1 %v10669_v0  ;;  %9782 = vmatprep.subr.bf16.mxu0 %v10669_v0 }
0x3157   :  { %9776 = vmatprep.mubr.msk.bf16.mxu1 %vm10670_vm0, %v10669_v0  ;;  %9784 = vmatprep.mubr.msk.bf16.mxu0 %vm10670_vm0, %v10669_v0 }
0x3159   :  { %9775 = vmatpush3.bf16.msra.mxu1 %v12382_v23  ;;  %9783 = vmatpush3.bf16.msra.mxu0 %v12385_v42 }
0x315a   :  { %9788 = vmatprep.subr.bf16.mxu1 %v10669_v0  ;;  %9796 = vmatprep.subr.bf16.mxu0 %v10669_v0 }
0x315f   :  { %v7754_v7 = vpop.permute.xlu1 %7753 }
0x3160   :  { %9777 = vmatmul.mubr.msk.bf16.vlgmr.msra.gmra.mrb[248].mxu1 %vm176_vm1, %v7754_v7  ;;  %9785 = vmatmul.mubr.msk.bf16.vlgmr.msra.gmra.mrb[0].mxu0 %vm176_vm1, %v7754_v7 }
0x3161   :  { %9789 = vmatpush3.bf16.msra.mxu1 %v12392_v24  ;;  %9797 = vmatpush3.bf16.msra.mxu0 %v12395_v44 }
0x3162   :  { %9790 = vmatprep.subr.bf16.mxu1 %v10669_v0  ;;  %9798 = vmatprep.subr.bf16.mxu0 %v10669_v0 }
0x3163   :  { %9792 = vmatprep.mubr.msk.bf16.mxu1 %vm10670_vm0, %v10669_v0  ;;  %9800 = vmatprep.mubr.msk.bf16.mxu0 %vm10670_vm0, %v10669_v0 }
0x3165   :  { %9791 = vmatpush3.bf16.msra.mxu1 %v12404_v1  ;;  %9799 = vmatpush3.bf16.msra.mxu0 %v12407_v46 }
0x3166   :  { %9804 = vmatprep.subr.bf16.mxu1 %v10669_v0  ;;  %9812 = vmatprep.subr.bf16.mxu0 %v10669_v0 }
0x3168   :  { %9793 = vmatmul.mubr.msk.bf16.vlgmr.msra.gmra.mrb[252].mxu1 %vm176_vm1, %v7754_v7  ;;  %9801 = vmatmul.mubr.msk.bf16.vlgmr.msra.gmra.mrb[4].mxu0 %vm176_vm1, %v7754_v7 }
0x3169   :  { %9808 = vmatprep.mubr.msk.bf16.mxu1 %vm10670_vm0, %v10669_v0  ;;  %9816 = vmatprep.mubr.msk.bf16.mxu0 %vm10670_vm0, %v10669_v0 }
0x321f   :  { %v7563_v10 = vpop.f32.mrb[240].mxu1  ;;  %v7613_v39 = vpop.f32.mrb[248].mxu0 }
0x3220   :  { %v9746_v31 = vpop.f32.mrb[241].mxu1  ;;  %v9754_v20 = vpop.f32.mrb[249].mxu0  ;;  %v7620_v4 = vrot.slane %v7613_v39, 2  ;;  %v7570_v40 = vrot.slane %v7563_v10, 2 }
0x3221   :  { %v7566_v54 = vpop.f32.mrb[242].mxu1  ;;  %v7616_v23 = vpop.f32.mrb[250].mxu0 }
0x3222   :  { %v9747_v42 = vpop.f32.mrb[243].mxu1  ;;  %v9755_v24 = vpop.f32.mrb[251].mxu0  ;;  %v7572_v51 = vadd.f32 %v7570_v40, %v11849_v36 }
0x3223   :  { %v7731_v24 = vrot.slane %v12439_v14, 6  ;;  %v9892_v14 = vld [vmem:[%s12564_s9] sm:$0xff]  }
0x3224   :  { %v8370_v56 = vmul.f32 -1.442695, %v7572_v51  ;;  %9805 = vmatpush3.bf16.msra.mxu1 %v9892_v14 }
0x3225   :  { %9806 = vmatprep.subr.bf16.mxu1 %v10669_v0 }
0x3227   :  { %v7665_v44 = vpop.f32.mrb[244].mxu1  ;;  %v7712_v1 = vpop.f32.mrb[252].mxu0 }
0x3228   :  { %v7672_v46 = vrot.slane %v7665_v44, 2  ;;  %v9762_v52 = vpop.f32.mrb[245].mxu1  ;;  %v9770_v49 = vpop.f32.mrb[253].mxu0  ;;  %v7719_v47 = vrot.slane %v7712_v1, 2 }
0x3229   :  { %v7668_v43 = vpop.f32.mrb[246].mxu1  ;;  %v7715_v33 = vpop.f32.mrb[254].mxu0 }
0x322a   :  { %v9771_v28 = vpop.f32.mrb[255].mxu0  ;;  %7673 = vrot.lane.b32.xlu0 %v7672_v46, %s10664_s6  ;;  %v9763_v22 = vpop.f32.mrb[247].mxu1  ;;  %v7954_v33 = vrot.slane %v12444_v37, 2 }
0x3233   :  { %v7792_v60 = vpop.f32.mrb[248].mxu1  ;;  %v7839_v61 = vpop.f32.mrb[0].mxu0 }
0x3234   :  { %v9778_v27 = vpop.f32.mrb[249].mxu1  ;;  %v9786_v6 = vpop.f32.mrb[1].mxu0  ;;  %v7798_v25 = vadd.f32 %v7792_v60, %v11847_v62 }
0x3235   :  { %v7795_v29 = vpop.f32.mrb[250].mxu1  ;;  %v7842_v11 = vpop.f32.mrb[2].mxu0 }
0x3236   :  { %v9779_v2 = vpop.f32.mrb[251].mxu1  ;;  %v9787_v59 = vpop.f32.mrb[3].mxu0  ;;  %v8377_v38 = vmul.f32 -1.442695, %v7798_v25  ;;  %v8389_v25 = vld [vmem:[%s12565_s10] ss:$0 sm:$0xff] }
0x323b   :  { %v7890_v26 = vpop.f32.mrb[252].mxu1  ;;  %v7936_v32 = vpop.f32.mrb[4].mxu0 }
0x323c   :  { %v9802_v41 = vpop.f32.mrb[5].mxu0  ;;  %7897 = vrot.lane.b32.xlu1 %v7890_v26, %s10664_s6  ;;  %v9794_v16 = vpop.f32.mrb[253].mxu1 }
0x323d   :  { %v7893_v5 = vpop.f32.mrb[254].mxu1  ;;  %v7939_v21 = vpop.f32.mrb[6].mxu0  ;;  %v9894_v41 = vld [vmem:[%s12563_s8] sm:$0xff]   ;;  %v9895_v16 = vld [vmem:[%s12563_s8 + $0x8] sm:$0xff]  }
0x323e   :  { %v9795_v48 = vpop.f32.mrb[255].mxu1  ;;  %v9803_v34 = vpop.f32.mrb[7].mxu0  ;;  %9813 = vmatpush3.bf16.msra.mxu0 %v9894_v41 }
0x323f   :  { %9814 = vmatprep.subr.bf16.mxu0 %v10669_v0 }
0x3242   :  { %9815 = vmatpush3.bf16.msra.mxu0 %v9895_v16 }
0x329c   :  { %v7674_v13 = vpop.permute.xlu0 %7673 }
0x329d   :  { %v7676_v8 = vadd.f32 %v7674_v13, %v11849_v36 }
0x329f   :  { %10376 = vtanh.f32 %v7676_v8 }
0x32a9   :  { %v10377_v15 = vpop.eup %10376 }
0x32aa   :  { %7735 = vrot.lane.b32.xlu0 %v10377_v15, %s10664_s6 }
0x32ae   :  { %7621 = vrot.lane.b32.xlu0 %v7620_v4, %s10672_s2  ;;  %v7898_v18 = vpop.permute.xlu1 %7897 }
0x32af   :  { %v7900_v50 = vadd.f32 %v7898_v18, %v11847_v62 }
0x32b1   :  { %10378 = vtanh.f32 %v7900_v50 }
0x32b2   :  { %10380 = vpow2.f32 %v8370_v56 }
0x32bb   :  { %v10379_v45 = vpop.eup %10378 }
0x32bc   :  { %7958 = vrot.lane.b32.xlu1 %v10379_v45, %s10664_s6  ;;  %v10381_v12 = vpop.eup %10380 }
0x32bd   :  { %v7576_v63 = vadd.f32 1.0, %v10381_v12 }
0x32bf   :  { %10382 = vrcp.f32 %v7576_v63 }
0x32c0   :  { %7846 = vrot.lane.b32.xlu1 %v7839_v61, %s10672_s2  ;;  %10384 = vpow2.f32 %v8377_v38  ;;  %v9893_v61 = vld [vmem:[%s12564_s9 + $0x8] sm:$0xff]  }
0x32c1   :  { %9807 = vmatpush3.bf16.msra.mxu1 %v9893_v61 }
0x32c9   :  { %v10383_v57 = vpop.eup %10382 }
0x32ca   :  { %v10385_v17 = vpop.eup %10384 }
0x32cb   :  { %v7802_v19 = vadd.f32 1.0, %v10385_v17 }
0x32cd   :  { %10386 = vrcp.f32 %v7802_v19 }
0x32d7   :  { %v10387_v55 = vpop.eup %10386 }
0x331c   :  { %v7736_v53 = vpop.permute.xlu0 %7735 }
0x331d   :  { %v7738_v35 = vmul.f32 %v10383_v57, %v7736_v53 }
0x331f   :  { %7740 = vrot.lane.b32.xlu0 %v7738_v35, %s10672_s2 }
0x3320   :  { %v7622_v3 = vpop.permute.xlu0 %7621 }
0x3321   :  { %v7624_v58 = vadd.f32 %v7622_v3, %v11849_v36 }
0x3323   :  { %7720 = vrot.lane.b32.xlu0 %v7719_v47, %s10673_s15  ;;  %v8372_v7 = vmul.f32 -1.442695, %v7624_v58 }
0x3325   :  { %10388 = vpow2.f32 %v8372_v7 }
0x332e   :  { %v7959_v30 = vpop.permute.xlu1 %7958 }
0x332f   :  { %v7961_v9 = vmul.f32 %v10387_v55, %v7959_v30  ;;  %v10389_v39 = vpop.eup %10388 }
0x3330   :  { %v7628_v20 = vadd.f32 1.0, %v10389_v39 }
0x3331   :  { %7963 = vrot.lane.b32.xlu1 %v7961_v9, %s10672_s2 }
0x3332   :  { %v7847_v10 = vpop.permute.xlu1 %7846  ;;  %10390 = vrcp.f32 %v7628_v20 }
0x3333   :  { %v7849_v31 = vadd.f32 %v7847_v10, %v11847_v62 }
0x3335   :  { %7943 = vrot.lane.b32.xlu1 %v7936_v32, %s10673_s15  ;;  %v8379_v54 = vmul.f32 -1.442695, %v7849_v31 }
0x3337   :  { %10392 = vpow2.f32 %v8379_v54 }
0x333c   :  { %v10391_v23 = vpop.eup %10390 }
0x333d   :  { %v7733_v44 = vmul.f32 %v10391_v23, %v7731_v24 }
0x3341   :  { %v10393_v42 = vpop.eup %10392 }
0x3342   :  { %v7853_v1 = vadd.f32 1.0, %v10393_v42 }
0x3391   :  { %v7741_v46 = vpop.permute.xlu0 %7740 }
0x3392   :  { %v7743_v52 = vadd.f32 %v7741_v46, %v7733_v44 }
0x3394   :  { %10394 = vtanh.f32 %v7743_v52 }
0x3395   :  { %10396 = vrcp.f32 %v7853_v1  ;;  %v7721_v37 = vpop.permute.xlu0 %7720 }
0x3396   :  { %v7723_v6 = vadd.f32 %v7721_v37, %v11849_v36 }
0x3398   :  { %v8375_v29 = vmul.f32 -1.442695, %v7723_v6 }
0x339e   :  { %v10395_v49 = vpop.eup %10394 }
0x339f   :  { %v10397_v43 = vpop.eup %10396  ;;  %7746 = vrot.lane.b32.xlu0 %v10395_v49, %s10664_s6 }
0x33a0   :  { %v7956_v28 = vmul.f32 %v10397_v43, %v7954_v33 }
0x33a3   :  { %v7964_v22 = vpop.permute.xlu1 %7963 }
0x33a4   :  { %v7966_v60 = vadd.f32 %v7964_v22, %v7956_v28 }
0x33a6   :  { %10398 = vtanh.f32 %v7966_v60 }
0x33a7   :  { %10400 = vpow2.f32 %v8375_v29  ;;  %v7944_v11 = vpop.permute.xlu1 %7943 }
0x33a8   :  { %v7946_v59 = vadd.f32 %v7944_v11, %v11847_v62 }
0x33aa   :  { %v8382_v32 = vmul.f32 -1.442695, %v7946_v59 }
0x33b0   :  { %v10399_v27 = vpop.eup %10398 }
0x33b1   :  { %7969 = vrot.lane.b32.xlu1 %v10399_v27, %s10664_s6  ;;  %v10401_v2 = vpop.eup %10400 }
0x33b2   :  { %v7727_v26 = vadd.f32 1.0, %v10401_v2 }
0x33b4   :  { %10402 = vrcp.f32 %v7727_v26 }
0x33b5   :  { %10404 = vpow2.f32 %v8382_v32 }
0x33be   :  { %v10403_v36 = vpop.eup %10402 }
0x33bf   :  { %v10405_v21 = vpop.eup %10404 }
0x33c0   :  { %v7950_v34 = vadd.f32 1.0, %v10405_v21 }
0x33c2   :  { %10406 = vrcp.f32 %v7950_v34 }
0x33cc   :  { %v10407_v8 = vpop.eup %10406 }
0x3411   :  { %v7747_v5 = vpop.permute.xlu0 %7746 }
0x3412   :  { %v7749_v62 = vmul.f32 %v10403_v36, %v7747_v5 }
0x3414   :  { %v7978_v48 = vpack.c.bf16 %v7749_v62, %v7749_v62 }
0x3416   :  { %v7984_v13 = vrot.slane %v7978_v48, 3 }
0x3418   :  { %7985 = vrot.lane.b32.xlu0 %v7984_v13, %s10672_s2 }
0x3423   :  { %v7970_v15 = vpop.permute.xlu1 %7969 }
0x3424   :  { %v7972_v4 = vmul.f32 %v10407_v8, %v7970_v15 }
0x3426   :  { %v7973_v18 = vpack.c.bf16 %v7972_v4, %v7972_v4 }
0x3428   :  { %8043 = vrot.lane.b32.xlu1 %v7973_v18, %s10672_s2 }
0x348a   :  { %v7986_v50 = vpop.permute.xlu0 %7985 }
0x348b   :  { %9809 = vmatmul.mubr.msk.bf16.vlgmr.msra.gmra.mrb[0].mxu1 %vm176_vm1, %v7986_v50 }
0x349a   :  { %v8044_v0 = vpop.permute.xlu1 %8043 }
0x349b   :  { %9817 = vmatmul.mubr.msk.bf16.vlgmr.msra.gmra.mrb[8].mxu0 %vm176_vm1, %v8044_v0 }
0x355e   :  { %v8036_v45 = vpop.f32.mrb[0].mxu1 }
0x355f   :  { %v9810_v40 = vpop.f32.mrb[1].mxu1 }
0x3560   :  { %v8039_v51 = vpop.f32.mrb[2].mxu1 }
0x3561   :  { %v9811_v56 = vpop.f32.mrb[3].mxu1 }
0x356e   :  { %v8094_v12 = vpop.f32.mrb[8].mxu0 }
0x356f   :  { %v8095_v63 = vadd.f32 %v8094_v12, %v8036_v45  ;;  %v9818_v38 = vpop.f32.mrb[9].mxu0 }
0x3570   :  { %v8097_v57 = vpop.f32.mrb[10].mxu0 }
0x3571   :  { %v8107_v53 = vadd.f32 %v8389_v25, %v8095_v63  ;;  %v9819_v17 = vpop.f32.mrb[11].mxu0 }
0x3573   :  { %8108 = vst [vmem:[#allocation15] sm:$0x3] %v8107_v53 }
0x3574   :  { %10637 = shalt.err (!%p10634_p4)
}
0x3575   :  { %s10638_s10 = scalar_lea.hbm %s12566_s11, 32 }
0x3576   :  { %p10639_p5 = scmp.ne.s32.totalorder %s12566_s11, %s10638_s10  ;;  %p10642_p6 = scmp.lt.u32.totalorder %s10638_s10, %s12566_s11 }
0x3578   :  { %p10644_p7 = pnand %p10642_p6, %p10639_p5 }
0x357a   :  { %10647 = shalt.err (!%p10644_p7)
}
0x357b   :  { %8118 = dma.vmem_to_hbm [thread:$0]  %s8116_s3, 32, %s12566_s11, [#allocation5]  }
0x357c   :  { %10656 = dma.done.wait [#allocation5], 32  }
0x357d   :  { %10657 = vsyncadd [#allocation5], 4294967264 }
0x357e   :  { %8122 = vsyncpa [#allocation4], 1 }
0x357f   :  { %8123 = vsyncpa [#allocation7], 1 }
0x3580   :  { %8124 = vsyncpa [#allocation10], 1 }
0x3581   :  { %8125 = vsyncpa [#allocation13], 1 }
0x3582   :  { %8126 = vsyncpa [#allocation5], 1 }

</bundles_post_ra>
